<compile_context>
chip_gen: v5e
topology: v5e:2x2
jax: 0.10.0
libtpu: 0.0.40
codegen_flags: <defaults>
</compile_context>

<pallas_src>
import functools

import numpy as np

import jax
import jax.numpy as jnp
from jax.experimental import pallas as pl
from jax.experimental.pallas import tpu as pltpu


# ----------------------------------------------------------------------------
# In-kernel helper
# ----------------------------------------------------------------------------
def _dot(a, b):
    return jnp.dot(a, b, preferred_element_type=jnp.float32)


# ----------------------------------------------------------------------------
# Fused LeNet5 kernel (one grid step == B images)
# ----------------------------------------------------------------------------
def _lenet5_kernel(x_ref, w1_ref, b1_ref, rs1e_ref, rs1o_ref, cs1_ref,
                   w2_ref, b2_ref, rs2e_ref, rs2o_ref, cs2_ref,
                   fc1w_ref, fc1b_ref, fc2w_ref, fc2b_ref,
                   fc3w_ref, fc3b_ref, out_ref):
    r1 = x_ref.shape[0]            # B * 32 stacked input rows
    bsz = r1 // 32                 # images per grid step
    r2 = bsz * 14                  # stacked pool1 rows

    # Pad 8 zero rows so the 4 vertical conv taps of the last image stay
    # in range (the extra output rows are garbage and never selected).
    xp = jnp.concatenate(
        [x_ref[...], jnp.zeros((8, 32), jnp.float32)], axis=0)      # (B*32+8, 32)

    # --- conv1 + ReLU: 5 banded-weight matmuls (one per vertical tap) -------
    # Output lane layout is width-major: lane = w*6 + c_out  (168 lanes).
    o1 = _dot(xp[0:r1, :], w1_ref[0])
    for i in range(1, 5):
        o1 = o1 + _dot(xp[i:i + r1, :], w1_ref[i])
    o1 = jnp.maximum(o1 + b1_ref[...], 0.0)                         # (B*32, 168)

    # --- pool1 (2x2/2): lane pair-max (stride 6) + hoisted selection matmuls
    a1 = _dot(jnp.maximum(o1[:, :162], o1[:, 6:]), cs1_ref[...])    # (B*32, 84)
    p1 = jnp.maximum(_dot(rs1e_ref[...], a1), _dot(rs1o_ref[...], a1))
    # p1: (B*14 + 8, 84); rows b*14+hp are valid, last 8 rows are zero pad.

    # --- conv2 + ReLU: 5 banded-weight matmuls ------------------------------
    # Output lane layout: lane = w*16 + c_out  (160 lanes).
    o2 = _dot(p1[0:r2, :], w2_ref[0])
    for i in range(1, 5):
        o2 = o2 + _dot(p1[i:i + r2, :], w2_ref[i])
    o2 = jnp.maximum(o2 + b2_ref[...], 0.0)                         # (B*14, 160)

    # --- pool2 + flatten + fc1 (K-split over the 5 pooled rows per image) ---
    a2 = _dot(jnp.maximum(o2[:, :144], o2[:, 16:]), cs2_ref[...])   # (B*14, 80)
    acc = jnp.zeros((bsz, 120), jnp.float32)
    for hp in range(5):
        z = jnp.maximum(_dot(rs2e_ref[hp], a2), _dot(rs2o_ref[hp], a2))  # (B, 80)
        acc = acc + _dot(z, fc1w_ref[hp])
    h1 = jnp.maximum(acc + fc1b_ref[...], 0.0)                      # (B, 120)

    # --- classifier tail, lane-dense logits ---------------------------------
    h2 = jnp.maximum(_dot(h1, fc2w_ref[...]) + fc2b_ref[...], 0.0)  # (B, 84)
    out_ref[...] = _dot(h2, fc3w_ref[...]) + fc3b_ref[...]          # (B, 128)


# ----------------------------------------------------------------------------
# Parameters (PyTorch layout) + one-time repack into kernel layout
# ----------------------------------------------------------------------------
def init_params(key, num_classes):
    ks = jax.random.split(key, 10)
    s = 0.1
    return {
        "conv1_w": s * jax.random.normal(ks[0], (6, 1, 5, 5), jnp.float32),
        "conv1_b": s * jax.random.normal(ks[1], (6,), jnp.float32),
        "conv2_w": s * jax.random.normal(ks[2], (16, 6, 5, 5), jnp.float32),
        "conv2_b": s * jax.random.normal(ks[3], (16,), jnp.float32),
        "fc1_w": s * jax.random.normal(ks[4], (120, 16 * 5 * 5), jnp.float32),
        "fc1_b": s * jax.random.normal(ks[5], (120,), jnp.float32),
        "fc2_w": s * jax.random.normal(ks[6], (84, 120), jnp.float32),
        "fc2_b": s * jax.random.normal(ks[7], (84,), jnp.float32),
        "fc3_w": s * jax.random.normal(ks[8], (num_classes, 84), jnp.float32),
        "fc3_b": s * jax.random.normal(ks[9], (num_classes,), jnp.float32),
    }


def prepare_params(params, block_b=8):
    """One-time repack of PyTorch-layout params into the kernel's layout.

    Also builds the (batch-block-dependent) pooling / flatten selection
    matrices so no iota/where work happens inside the kernel.
    """
    f32 = np.float32
    B = int(block_b)

    c1w = np.asarray(params["conv1_w"], f32)     # (6, 1, 5, 5)
    c1b = np.asarray(params["conv1_b"], f32)
    c2w = np.asarray(params["conv2_w"], f32)     # (16, 6, 5, 5)
    c2b = np.asarray(params["conv2_b"], f32)
    f1w = np.asarray(params["fc1_w"], f32)       # (120, 400)
    f1b = np.asarray(params["fc1_b"], f32)
    f2w = np.asarray(params["fc2_w"], f32)       # (84, 120)
    f2b = np.asarray(params["fc2_b"], f32)
    f3w = np.asarray(params["fc3_w"], f32)       # (nc, 84)
    f3b = np.asarray(params["fc3_b"], f32)
    nc = f3w.shape[0]

    # conv1 banded weights: w1[i, w_in, wo*6 + co] = c1w[co, 0, i, w_in - wo].
    w1 = np.zeros((5, 32, 28 * 6), f32)
    for i in range(5):
        for j in range(5):
            for wo in range(28):
                w1[i, wo + j, wo * 6: wo * 6 + 6] = c1w[:, 0, i, j]
    b1 = np.tile(c1b, 28)[None, :]                               # (1, 168)

    # conv2 banded weights: w2[i, w_in*6+ci, wo*16+co] = c2w[co, ci, i, w_in-wo].
    w2 = np.zeros((5, 14 * 6, 10 * 16), f32)
    for i in range(5):
        for j in range(5):
            for ci in range(6):
                for wo in range(10):
                    w2[i, (wo + j) * 6 + ci, wo * 16: wo * 16 + 16] = c2w[:, ci, i, j]
    b2 = np.tile(c2b, 10)[None, :]                               # (1, 160)

    # pool1 selection constants (hoisted out of the kernel).
    cs1 = np.zeros((162, 84), f32)                               # column downsample
    for wp in range(14):
        for c in range(6):
            cs1[2 * wp * 6 + c, wp * 6 + c] = 1.0
    rs1e = np.zeros((B * 14 + 8, B * 32), f32)                   # even rows (+pad)
    rs1o = np.zeros((B * 14 + 8, B * 32), f32)                   # odd rows (+pad)
    for b in range(B):
        for hp in range(14):
            rs1e[b * 14 + hp, b * 32 + 2 * hp] = 1.0
            rs1o[b * 14 + hp, b * 32 + 2 * hp + 1] = 1.0

    # pool2 selection constants.
    cs2 = np.zeros((144, 80), f32)
    for wp in range(5):
        for c in range(16):
            cs2[2 * wp * 16 + c, wp * 16 + c] = 1.0
    rs2e = np.zeros((5, B, B * 14), f32)
    rs2o = np.zeros((5, B, B * 14), f32)
    for hp in range(5):
        for b in range(B):
            rs2e[hp, b, b * 14 + 2 * hp] = 1.0
            rs2o[hp, b, b * 14 + 2 * hp + 1] = 1.0

    # fc1 split into 5 row-gathered pieces; piece hp row order = (wp, co).
    f1w_r = f1w.reshape(120, 16, 5, 5)                           # (n, c, h, w)
    fc1w = np.zeros((5, 80, 120), f32)
    for hp in range(5):
        fc1w[hp] = np.transpose(f1w_r[:, :, hp, :], (2, 1, 0)).reshape(80, 120)
    fc1b = f1b[None, :]

    fc2w = np.ascontiguousarray(f2w.T)                           # (120, 84)
    fc2b = f2b[None, :]

    nc_pad = 128                                                 # lane-dense logits
    fc3w = np.zeros((84, nc_pad), f32)
    fc3w[:, :nc] = f3w.T
    fc3b = np.zeros((1, nc_pad), f32)
    fc3b[0, :nc] = f3b

    prep = dict(w1=w1, b1=b1, rs1e=rs1e, rs1o=rs1o, cs1=cs1,
                w2=w2, b2=b2, rs2e=rs2e, rs2o=rs2o, cs2=cs2,
                fc1w=fc1w, fc1b=fc1b, fc2w=fc2w, fc2b=fc2b,
                fc3w=fc3w, fc3b=fc3b)
    return {k: jnp.asarray(v) for k, v in prep.items()}


# ----------------------------------------------------------------------------
# Forward pass wrapper: one pallas_call, grid over batch blocks of B images
# ----------------------------------------------------------------------------
def lenet5_forward(prep, x, num_classes):
    B = prep["rs1e"].shape[1] // 32            # images per grid step (static)
    n = x.shape[0]
    assert x.shape[1:] == (1, 32, 32), x.shape

    n_pad = -(-n // B) * B
    xf = x.astype(jnp.float32)
    if n_pad != n:
        xf = jnp.concatenate(
            [xf, jnp.zeros((n_pad - n, 1, 32, 32), jnp.float32)], axis=0)
    x2 = xf.reshape(n_pad * 32, 32)            # stacked image rows

    weights = (prep["w1"], prep["b1"], prep["rs1e"], prep["rs1o"], prep["cs1"],
               prep["w2"], prep["b2"], prep["rs2e"], prep["rs2o"], prep["cs2"],
               prep["fc1w"], prep["fc1b"], prep["fc2w"], prep["fc2b"],
               prep["fc3w"], prep["fc3b"])

    def const_spec(a):
        nd = a.ndim
        return pl.BlockSpec(a.shape, lambda i, _nd=nd: (0,) * _nd)

    out = pl.pallas_call(
        _lenet5_kernel,
        grid=(n_pad // B,),
        in_specs=[pl.BlockSpec((B * 32, 32), lambda i: (i, 0))]
                 + [const_spec(w) for w in weights],
        out_specs=pl.BlockSpec((B, 128), lambda i: (i, 0)),
        out_shape=jax.ShapeDtypeStruct((n_pad, 128), jnp.float32),
        compiler_params=pltpu.CompilerParams(
            dimension_semantics=("parallel",)),
    )(x2, *weights)
    return out[:n, :num_classes]


# ----------------------------------------------------------------------------
# Pure-JAX reference (PyTorch semantics) for a correctness cross-check
# ----------------------------------------------------------------------------
def lenet5_reference(params, x):
    hi = jax.lax.Precision.HIGHEST
    y = jax.lax.conv_general_dilated(
        x, params["conv1_w"], (1, 1), "VALID",
        dimension_numbers=("NCHW", "OIHW", "NCHW"), precision=hi)
    y = jnp.maximum(y + params["conv1_b"][None, :, None, None], 0.0)
    y = jax.lax.reduce_window(y, -jnp.inf, jax.lax.max,
                              (1, 1, 2, 2), (1, 1, 2, 2), "VALID")
    y = jax.lax.conv_general_dilated(
        y, params["conv2_w"], (1, 1), "VALID",
        dimension_numbers=("NCHW", "OIHW", "NCHW"), precision=hi)
    y = jnp.maximum(y + params["conv2_b"][None, :, None, None], 0.0)
    y = jax.lax.reduce_window(y, -jnp.inf, jax.lax.max,
                              (1, 1, 2, 2), (1, 1, 2, 2), "VALID")
    y = y.reshape(y.shape[0], -1)
    y = jnp.maximum(jnp.dot(y, params["fc1_w"].T, precision=hi) + params["fc1_b"], 0.0)
    y = jnp.maximum(jnp.dot(y, params["fc2_w"].T, precision=hi) + params["fc2_b"], 0.0)
    return jnp.dot(y, params["fc3_w"].T, precision=hi) + params["fc3_b"]


if __name__ == "__main__":
    num_classes = 10
    key = jax.random.PRNGKey(0)
    k_param, k_x = jax.random.split(key)

    params = init_params(k_param, num_classes)
    prep = prepare_params(params, block_b=8)   # one-time repack, not per forward
    # 16 images / 8 per grid step -> 2 grid steps (keeps both v7x TCs busy).
    x = jax.random.normal(k_x, (16, 1, 32, 32), jnp.float32)

    fwd = jax.jit(functools.partial(lenet5_forward, num_classes=num_classes))
    out = jax.block_until_ready(fwd(prep, x))

    assert out.shape == (16, num_classes), out.shape
    assert out.dtype == jnp.float32

    ref = lenet5_reference(params, x)
    max_err = float(jnp.max(jnp.abs(out - ref)))
    assert jnp.allclose(out, ref, rtol=3e-2, atol=3e-2), max_err
    print("KERNEL_OK")
</pallas_src>

<mosaic_0001>
module attributes {stable_mosaic.version = 11 : i64} {
  func.func @_lenet5_kernel(%arg0: i32, %arg1: memref<256x32xf32, #tpu.memory_space<vmem>>, %arg2: memref<5x32x168xf32, #tpu.memory_space<vmem>>, %arg3: memref<1x168xf32, #tpu.memory_space<vmem>>, %arg4: memref<120x256xf32, #tpu.memory_space<vmem>>, %arg5: memref<120x256xf32, #tpu.memory_space<vmem>>, %arg6: memref<162x84xf32, #tpu.memory_space<vmem>>, %arg7: memref<5x84x160xf32, #tpu.memory_space<vmem>>, %arg8: memref<1x160xf32, #tpu.memory_space<vmem>>, %arg9: memref<5x8x112xf32, #tpu.memory_space<vmem>>, %arg10: memref<5x8x112xf32, #tpu.memory_space<vmem>>, %arg11: memref<144x80xf32, #tpu.memory_space<vmem>>, %arg12: memref<5x80x120xf32, #tpu.memory_space<vmem>>, %arg13: memref<1x120xf32, #tpu.memory_space<vmem>>, %arg14: memref<120x84xf32, #tpu.memory_space<vmem>>, %arg15: memref<1x84xf32, #tpu.memory_space<vmem>>, %arg16: memref<84x128xf32, #tpu.memory_space<vmem>>, %arg17: memref<1x128xf32, #tpu.memory_space<vmem>>, %arg18: memref<8x128xf32, #tpu.memory_space<vmem>>) attributes {dimension_semantics = [#tpu.dimension_semantics<parallel>], iteration_bounds = array<i64: 2>, scalar_prefetch = 0 : i64, scratch_operands = 0 : i64, tpu.core_type = #tpu.core_type<tc>, window_params = [{transform_indices = @transform_0, window_bounds = array<i64: 256, 32>}, {pipeline_mode = #tpu.pipeline_mode<synchronous>, transform_indices = @transform_1, window_bounds = array<i64: 5, 32, 168>}, {pipeline_mode = #tpu.pipeline_mode<synchronous>, transform_indices = @transform_2, window_bounds = array<i64: 1, 168>}, {pipeline_mode = #tpu.pipeline_mode<synchronous>, transform_indices = @transform_3, window_bounds = array<i64: 120, 256>}, {pipeline_mode = #tpu.pipeline_mode<synchronous>, transform_indices = @transform_4, window_bounds = array<i64: 120, 256>}, {pipeline_mode = #tpu.pipeline_mode<synchronous>, transform_indices = @transform_5, window_bounds = array<i64: 162, 84>}, {pipeline_mode = #tpu.pipeline_mode<synchronous>, transform_indices = @transform_6, window_bounds = array<i64: 5, 84, 160>}, {pipeline_mode = #tpu.pipeline_mode<synchronous>, transform_indices = @transform_7, window_bounds = array<i64: 1, 160>}, {pipeline_mode = #tpu.pipeline_mode<synchronous>, transform_indices = @transform_8, window_bounds = array<i64: 5, 8, 112>}, {pipeline_mode = #tpu.pipeline_mode<synchronous>, transform_indices = @transform_9, window_bounds = array<i64: 5, 8, 112>}, {pipeline_mode = #tpu.pipeline_mode<synchronous>, transform_indices = @transform_10, window_bounds = array<i64: 144, 80>}, {pipeline_mode = #tpu.pipeline_mode<synchronous>, transform_indices = @transform_11, window_bounds = array<i64: 5, 80, 120>}, {pipeline_mode = #tpu.pipeline_mode<synchronous>, transform_indices = @transform_12, window_bounds = array<i64: 1, 120>}, {pipeline_mode = #tpu.pipeline_mode<synchronous>, transform_indices = @transform_13, window_bounds = array<i64: 120, 84>}, {pipeline_mode = #tpu.pipeline_mode<synchronous>, transform_indices = @transform_14, window_bounds = array<i64: 1, 84>}, {pipeline_mode = #tpu.pipeline_mode<synchronous>, transform_indices = @transform_15, window_bounds = array<i64: 84, 128>}, {pipeline_mode = #tpu.pipeline_mode<synchronous>, transform_indices = @transform_16, window_bounds = array<i64: 1, 128>}, {transform_indices = @transform_17, window_bounds = array<i64: 8, 128>}]} {
    %c0 = arith.constant 0 : index
    %c0_0 = arith.constant 0 : index
    %0 = vector.load %arg1[%c0, %c0_0] : memref<256x32xf32, #tpu.memory_space<vmem>>, vector<256x32xf32>
    %cst = arith.constant 0.000000e+00 : f32
    %1 = vector.broadcast %cst : f32 to vector<8x32xf32>
    %2 = tpu.concatenate %0, %1 in 0 : vector<256x32xf32>, vector<8x32xf32> -> vector<264x32xf32>
    %3 = vector.extract_strided_slice %2 {offsets = [0, 0], sizes = [256, 32], strides = [1, 1]} : vector<264x32xf32> to vector<256x32xf32>
    %c0_1 = arith.constant 0 : index
    %c0_2 = arith.constant 0 : index
    %c0_3 = arith.constant 0 : index
    %4 = vector.load %arg2[%c0_1, %c0_2, %c0_3] : memref<5x32x168xf32, #tpu.memory_space<vmem>>, vector<1x32x168xf32>
    %5 = vector.shape_cast %4 : vector<1x32x168xf32> to vector<32x168xf32>
    %cst_4 = arith.constant dense<0.000000e+00> : vector<256x168xf32>
    %6 = tpu.matmul %3, %5, %cst_4 {dimension_numbers = #tpu.dot_dimension_numbers<[1], [0], [0], [1], [0, 0, 1, 1], [], []>} : vector<256x32xf32>, vector<32x168xf32>, vector<256x168xf32> -> vector<256x168xf32>
    %7 = vector.extract_strided_slice %2 {offsets = [1, 0], sizes = [256, 32], strides = [1, 1]} : vector<264x32xf32> to vector<256x32xf32>
    %c1 = arith.constant 1 : index
    %c0_5 = arith.constant 0 : index
    %c0_6 = arith.constant 0 : index
    %8 = vector.load %arg2[%c1, %c0_5, %c0_6] : memref<5x32x168xf32, #tpu.memory_space<vmem>>, vector<1x32x168xf32>
    %9 = vector.shape_cast %8 : vector<1x32x168xf32> to vector<32x168xf32>
    %cst_7 = arith.constant dense<0.000000e+00> : vector<256x168xf32>
    %10 = tpu.matmul %7, %9, %cst_7 {dimension_numbers = #tpu.dot_dimension_numbers<[1], [0], [0], [1], [0, 0, 1, 1], [], []>} : vector<256x32xf32>, vector<32x168xf32>, vector<256x168xf32> -> vector<256x168xf32>
    %11 = arith.addf %6, %10 : vector<256x168xf32>
    %12 = vector.extract_strided_slice %2 {offsets = [2, 0], sizes = [256, 32], strides = [1, 1]} : vector<264x32xf32> to vector<256x32xf32>
    %c2 = arith.constant 2 : index
    %c0_8 = arith.constant 0 : index
    %c0_9 = arith.constant 0 : index
    %13 = vector.load %arg2[%c2, %c0_8, %c0_9] : memref<5x32x168xf32, #tpu.memory_space<vmem>>, vector<1x32x168xf32>
    %14 = vector.shape_cast %13 : vector<1x32x168xf32> to vector<32x168xf32>
    %cst_10 = arith.constant dense<0.000000e+00> : vector<256x168xf32>
    %15 = tpu.matmul %12, %14, %cst_10 {dimension_numbers = #tpu.dot_dimension_numbers<[1], [0], [0], [1], [0, 0, 1, 1], [], []>} : vector<256x32xf32>, vector<32x168xf32>, vector<256x168xf32> -> vector<256x168xf32>
    %16 = arith.addf %11, %15 : vector<256x168xf32>
    %17 = vector.extract_strided_slice %2 {offsets = [3, 0], sizes = [256, 32], strides = [1, 1]} : vector<264x32xf32> to vector<256x32xf32>
    %c3 = arith.constant 3 : index
    %c0_11 = arith.constant 0 : index
    %c0_12 = arith.constant 0 : index
    %18 = vector.load %arg2[%c3, %c0_11, %c0_12] : memref<5x32x168xf32, #tpu.memory_space<vmem>>, vector<1x32x168xf32>
    %19 = vector.shape_cast %18 : vector<1x32x168xf32> to vector<32x168xf32>
    %cst_13 = arith.constant dense<0.000000e+00> : vector<256x168xf32>
    %20 = tpu.matmul %17, %19, %cst_13 {dimension_numbers = #tpu.dot_dimension_numbers<[1], [0], [0], [1], [0, 0, 1, 1], [], []>} : vector<256x32xf32>, vector<32x168xf32>, vector<256x168xf32> -> vector<256x168xf32>
    %21 = arith.addf %16, %20 : vector<256x168xf32>
    %22 = vector.extract_strided_slice %2 {offsets = [4, 0], sizes = [256, 32], strides = [1, 1]} : vector<264x32xf32> to vector<256x32xf32>
    %c4 = arith.constant 4 : index
    %c0_14 = arith.constant 0 : index
    %c0_15 = arith.constant 0 : index
    %23 = vector.load %arg2[%c4, %c0_14, %c0_15] : memref<5x32x168xf32, #tpu.memory_space<vmem>>, vector<1x32x168xf32>
    %24 = vector.shape_cast %23 : vector<1x32x168xf32> to vector<32x168xf32>
    %cst_16 = arith.constant dense<0.000000e+00> : vector<256x168xf32>
    %25 = tpu.matmul %22, %24, %cst_16 {dimension_numbers = #tpu.dot_dimension_numbers<[1], [0], [0], [1], [0, 0, 1, 1], [], []>} : vector<256x32xf32>, vector<32x168xf32>, vector<256x168xf32> -> vector<256x168xf32>
    %26 = arith.addf %21, %25 : vector<256x168xf32>
    %c0_17 = arith.constant 0 : index
    %c0_18 = arith.constant 0 : index
    %27 = vector.load %arg3[%c0_17, %c0_18] : memref<1x168xf32, #tpu.memory_space<vmem>>, vector<1x168xf32>
    %28 = vector.broadcast %27 : vector<1x168xf32> to vector<256x168xf32>
    %29 = arith.addf %26, %28 : vector<256x168xf32>
    %cst_19 = arith.constant 0.000000e+00 : f32
    %30 = vector.broadcast %cst_19 : f32 to vector<256x168xf32>
    %31 = arith.maximumf %29, %30 : vector<256x168xf32>
    %32 = vector.extract_strided_slice %31 {offsets = [0, 0], sizes = [256, 162], strides = [1, 1]} : vector<256x168xf32> to vector<256x162xf32>
    %33 = vector.extract_strided_slice %31 {offsets = [0, 6], sizes = [256, 162], strides = [1, 1]} : vector<256x168xf32> to vector<256x162xf32>
    %34 = arith.maximumf %32, %33 : vector<256x162xf32>
    %c0_20 = arith.constant 0 : index
    %c0_21 = arith.constant 0 : index
    %35 = vector.load %arg6[%c0_20, %c0_21] : memref<162x84xf32, #tpu.memory_space<vmem>>, vector<162x84xf32>
    %cst_22 = arith.constant dense<0.000000e+00> : vector<256x84xf32>
    %36 = tpu.matmul %34, %35, %cst_22 {dimension_numbers = #tpu.dot_dimension_numbers<[1], [0], [0], [1], [0, 0, 1, 1], [], []>} : vector<256x162xf32>, vector<162x84xf32>, vector<256x84xf32> -> vector<256x84xf32>
    %c0_23 = arith.constant 0 : index
    %c0_24 = arith.constant 0 : index
    %37 = vector.load %arg4[%c0_23, %c0_24] : memref<120x256xf32, #tpu.memory_space<vmem>>, vector<120x256xf32>
    %cst_25 = arith.constant dense<0.000000e+00> : vector<120x84xf32>
    %38 = tpu.matmul %37, %36, %cst_25 {dimension_numbers = #tpu.dot_dimension_numbers<[1], [0], [0], [1], [0, 0, 1, 1], [], []>} : vector<120x256xf32>, vector<256x84xf32>, vector<120x84xf32> -> vector<120x84xf32>
    %c0_26 = arith.constant 0 : index
    %c0_27 = arith.constant 0 : index
    %39 = vector.load %arg5[%c0_26, %c0_27] : memref<120x256xf32, #tpu.memory_space<vmem>>, vector<120x256xf32>
    %cst_28 = arith.constant dense<0.000000e+00> : vector<120x84xf32>
    %40 = tpu.matmul %39, %36, %cst_28 {dimension_numbers = #tpu.dot_dimension_numbers<[1], [0], [0], [1], [0, 0, 1, 1], [], []>} : vector<120x256xf32>, vector<256x84xf32>, vector<120x84xf32> -> vector<120x84xf32>
    %41 = arith.maximumf %38, %40 : vector<120x84xf32>
    %42 = vector.extract_strided_slice %41 {offsets = [0, 0], sizes = [112, 84], strides = [1, 1]} : vector<120x84xf32> to vector<112x84xf32>
    %c0_29 = arith.constant 0 : index
    %c0_30 = arith.constant 0 : index
    %c0_31 = arith.constant 0 : index
    %43 = vector.load %arg7[%c0_29, %c0_30, %c0_31] : memref<5x84x160xf32, #tpu.memory_space<vmem>>, vector<1x84x160xf32>
    %44 = vector.shape_cast %43 : vector<1x84x160xf32> to vector<84x160xf32>
    %cst_32 = arith.constant dense<0.000000e+00> : vector<112x160xf32>
    %45 = tpu.matmul %42, %44, %cst_32 {dimension_numbers = #tpu.dot_dimension_numbers<[1], [0], [0], [1], [0, 0, 1, 1], [], []>} : vector<112x84xf32>, vector<84x160xf32>, vector<112x160xf32> -> vector<112x160xf32>
    %46 = vector.extract_strided_slice %41 {offsets = [1, 0], sizes = [112, 84], strides = [1, 1]} : vector<120x84xf32> to vector<112x84xf32>
    %c1_33 = arith.constant 1 : index
    %c0_34 = arith.constant 0 : index
    %c0_35 = arith.constant 0 : index
    %47 = vector.load %arg7[%c1_33, %c0_34, %c0_35] : memref<5x84x160xf32, #tpu.memory_space<vmem>>, vector<1x84x160xf32>
    %48 = vector.shape_cast %47 : vector<1x84x160xf32> to vector<84x160xf32>
    %cst_36 = arith.constant dense<0.000000e+00> : vector<112x160xf32>
    %49 = tpu.matmul %46, %48, %cst_36 {dimension_numbers = #tpu.dot_dimension_numbers<[1], [0], [0], [1], [0, 0, 1, 1], [], []>} : vector<112x84xf32>, vector<84x160xf32>, vector<112x160xf32> -> vector<112x160xf32>
    %50 = arith.addf %45, %49 : vector<112x160xf32>
    %51 = vector.extract_strided_slice %41 {offsets = [2, 0], sizes = [112, 84], strides = [1, 1]} : vector<120x84xf32> to vector<112x84xf32>
    %c2_37 = arith.constant 2 : index
    %c0_38 = arith.constant 0 : index
    %c0_39 = arith.constant 0 : index
    %52 = vector.load %arg7[%c2_37, %c0_38, %c0_39] : memref<5x84x160xf32, #tpu.memory_space<vmem>>, vector<1x84x160xf32>
    %53 = vector.shape_cast %52 : vector<1x84x160xf32> to vector<84x160xf32>
    %cst_40 = arith.constant dense<0.000000e+00> : vector<112x160xf32>
    %54 = tpu.matmul %51, %53, %cst_40 {dimension_numbers = #tpu.dot_dimension_numbers<[1], [0], [0], [1], [0, 0, 1, 1], [], []>} : vector<112x84xf32>, vector<84x160xf32>, vector<112x160xf32> -> vector<112x160xf32>
    %55 = arith.addf %50, %54 : vector<112x160xf32>
    %56 = vector.extract_strided_slice %41 {offsets = [3, 0], sizes = [112, 84], strides = [1, 1]} : vector<120x84xf32> to vector<112x84xf32>
    %c3_41 = arith.constant 3 : index
    %c0_42 = arith.constant 0 : index
    %c0_43 = arith.constant 0 : index
    %57 = vector.load %arg7[%c3_41, %c0_42, %c0_43] : memref<5x84x160xf32, #tpu.memory_space<vmem>>, vector<1x84x160xf32>
    %58 = vector.shape_cast %57 : vector<1x84x160xf32> to vector<84x160xf32>
    %cst_44 = arith.constant dense<0.000000e+00> : vector<112x160xf32>
    %59 = tpu.matmul %56, %58, %cst_44 {dimension_numbers = #tpu.dot_dimension_numbers<[1], [0], [0], [1], [0, 0, 1, 1], [], []>} : vector<112x84xf32>, vector<84x160xf32>, vector<112x160xf32> -> vector<112x160xf32>
    %60 = arith.addf %55, %59 : vector<112x160xf32>
    %61 = vector.extract_strided_slice %41 {offsets = [4, 0], sizes = [112, 84], strides = [1, 1]} : vector<120x84xf32> to vector<112x84xf32>
    %c4_45 = arith.constant 4 : index
    %c0_46 = arith.constant 0 : index
    %c0_47 = arith.constant 0 : index
    %62 = vector.load %arg7[%c4_45, %c0_46, %c0_47] : memref<5x84x160xf32, #tpu.memory_space<vmem>>, vector<1x84x160xf32>
    %63 = vector.shape_cast %62 : vector<1x84x160xf32> to vector<84x160xf32>
    %cst_48 = arith.constant dense<0.000000e+00> : vector<112x160xf32>
    %64 = tpu.matmul %61, %63, %cst_48 {dimension_numbers = #tpu.dot_dimension_numbers<[1], [0], [0], [1], [0, 0, 1, 1], [], []>} : vector<112x84xf32>, vector<84x160xf32>, vector<112x160xf32> -> vector<112x160xf32>
    %65 = arith.addf %60, %64 : vector<112x160xf32>
    %c0_49 = arith.constant 0 : index
    %c0_50 = arith.constant 0 : index
    %66 = vector.load %arg8[%c0_49, %c0_50] : memref<1x160xf32, #tpu.memory_space<vmem>>, vector<1x160xf32>
    %67 = vector.broadcast %66 : vector<1x160xf32> to vector<112x160xf32>
    %68 = arith.addf %65, %67 : vector<112x160xf32>
    %cst_51 = arith.constant 0.000000e+00 : f32
    %69 = vector.broadcast %cst_51 : f32 to vector<112x160xf32>
    %70 = arith.maximumf %68, %69 : vector<112x160xf32>
    %71 = vector.extract_strided_slice %70 {offsets = [0, 0], sizes = [112, 144], strides = [1, 1]} : vector<112x160xf32> to vector<112x144xf32>
    %72 = vector.extract_strided_slice %70 {offsets = [0, 16], sizes = [112, 144], strides = [1, 1]} : vector<112x160xf32> to vector<112x144xf32>
    %73 = arith.maximumf %71, %72 : vector<112x144xf32>
    %c0_52 = arith.constant 0 : index
    %c0_53 = arith.constant 0 : index
    %74 = vector.load %arg11[%c0_52, %c0_53] : memref<144x80xf32, #tpu.memory_space<vmem>>, vector<144x80xf32>
    %cst_54 = arith.constant dense<0.000000e+00> : vector<112x80xf32>
    %75 = tpu.matmul %73, %74, %cst_54 {dimension_numbers = #tpu.dot_dimension_numbers<[1], [0], [0], [1], [0, 0, 1, 1], [], []>} : vector<112x144xf32>, vector<144x80xf32>, vector<112x80xf32> -> vector<112x80xf32>
    %cst_55 = arith.constant 0.000000e+00 : f32
    %76 = vector.broadcast %cst_55 : f32 to vector<8x120xf32>
    %c0_56 = arith.constant 0 : index
    %c0_57 = arith.constant 0 : index
    %c0_58 = arith.constant 0 : index
    %77 = vector.load %arg9[%c0_56, %c0_57, %c0_58] : memref<5x8x112xf32, #tpu.memory_space<vmem>>, vector<1x8x112xf32>
    %78 = vector.shape_cast %77 : vector<1x8x112xf32> to vector<8x112xf32>
    %cst_59 = arith.constant dense<0.000000e+00> : vector<8x80xf32>
    %79 = tpu.matmul %78, %75, %cst_59 {dimension_numbers = #tpu.dot_dimension_numbers<[1], [0], [0], [1], [0, 0, 1, 1], [], []>} : vector<8x112xf32>, vector<112x80xf32>, vector<8x80xf32> -> vector<8x80xf32>
    %c0_60 = arith.constant 0 : index
    %c0_61 = arith.constant 0 : index
    %c0_62 = arith.constant 0 : index
    %80 = vector.load %arg10[%c0_60, %c0_61, %c0_62] : memref<5x8x112xf32, #tpu.memory_space<vmem>>, vector<1x8x112xf32>
    %81 = vector.shape_cast %80 : vector<1x8x112xf32> to vector<8x112xf32>
    %cst_63 = arith.constant dense<0.000000e+00> : vector<8x80xf32>
    %82 = tpu.matmul %81, %75, %cst_63 {dimension_numbers = #tpu.dot_dimension_numbers<[1], [0], [0], [1], [0, 0, 1, 1], [], []>} : vector<8x112xf32>, vector<112x80xf32>, vector<8x80xf32> -> vector<8x80xf32>
    %83 = arith.maximumf %79, %82 : vector<8x80xf32>
    %c0_64 = arith.constant 0 : index
    %c0_65 = arith.constant 0 : index
    %c0_66 = arith.constant 0 : index
    %84 = vector.load %arg12[%c0_64, %c0_65, %c0_66] : memref<5x80x120xf32, #tpu.memory_space<vmem>>, vector<1x80x120xf32>
    %85 = vector.shape_cast %84 : vector<1x80x120xf32> to vector<80x120xf32>
    %cst_67 = arith.constant dense<0.000000e+00> : vector<8x120xf32>
    %86 = tpu.matmul %83, %85, %cst_67 {dimension_numbers = #tpu.dot_dimension_numbers<[1], [0], [0], [1], [0, 0, 1, 1], [], []>} : vector<8x80xf32>, vector<80x120xf32>, vector<8x120xf32> -> vector<8x120xf32>
    %87 = arith.addf %76, %86 : vector<8x120xf32>
    %c1_68 = arith.constant 1 : index
    %c0_69 = arith.constant 0 : index
    %c0_70 = arith.constant 0 : index
    %88 = vector.load %arg9[%c1_68, %c0_69, %c0_70] : memref<5x8x112xf32, #tpu.memory_space<vmem>>, vector<1x8x112xf32>
    %89 = vector.shape_cast %88 : vector<1x8x112xf32> to vector<8x112xf32>
    %cst_71 = arith.constant dense<0.000000e+00> : vector<8x80xf32>
    %90 = tpu.matmul %89, %75, %cst_71 {dimension_numbers = #tpu.dot_dimension_numbers<[1], [0], [0], [1], [0, 0, 1, 1], [], []>} : vector<8x112xf32>, vector<112x80xf32>, vector<8x80xf32> -> vector<8x80xf32>
    %c1_72 = arith.constant 1 : index
    %c0_73 = arith.constant 0 : index
    %c0_74 = arith.constant 0 : index
    %91 = vector.load %arg10[%c1_72, %c0_73, %c0_74] : memref<5x8x112xf32, #tpu.memory_space<vmem>>, vector<1x8x112xf32>
    %92 = vector.shape_cast %91 : vector<1x8x112xf32> to vector<8x112xf32>
    %cst_75 = arith.constant dense<0.000000e+00> : vector<8x80xf32>
    %93 = tpu.matmul %92, %75, %cst_75 {dimension_numbers = #tpu.dot_dimension_numbers<[1], [0], [0], [1], [0, 0, 1, 1], [], []>} : vector<8x112xf32>, vector<112x80xf32>, vector<8x80xf32> -> vector<8x80xf32>
    %94 = arith.maximumf %90, %93 : vector<8x80xf32>
    %c1_76 = arith.constant 1 : index
    %c0_77 = arith.constant 0 : index
    %c0_78 = arith.constant 0 : index
    %95 = vector.load %arg12[%c1_76, %c0_77, %c0_78] : memref<5x80x120xf32, #tpu.memory_space<vmem>>, vector<1x80x120xf32>
    %96 = vector.shape_cast %95 : vector<1x80x120xf32> to vector<80x120xf32>
    %cst_79 = arith.constant dense<0.000000e+00> : vector<8x120xf32>
    %97 = tpu.matmul %94, %96, %cst_79 {dimension_numbers = #tpu.dot_dimension_numbers<[1], [0], [0], [1], [0, 0, 1, 1], [], []>} : vector<8x80xf32>, vector<80x120xf32>, vector<8x120xf32> -> vector<8x120xf32>
    %98 = arith.addf %87, %97 : vector<8x120xf32>
    %c2_80 = arith.constant 2 : index
    %c0_81 = arith.constant 0 : index
    %c0_82 = arith.constant 0 : index
    %99 = vector.load %arg9[%c2_80, %c0_81, %c0_82] : memref<5x8x112xf32, #tpu.memory_space<vmem>>, vector<1x8x112xf32>
    %100 = vector.shape_cast %99 : vector<1x8x112xf32> to vector<8x112xf32>
    %cst_83 = arith.constant dense<0.000000e+00> : vector<8x80xf32>
    %101 = tpu.matmul %100, %75, %cst_83 {dimension_numbers = #tpu.dot_dimension_numbers<[1], [0], [0], [1], [0, 0, 1, 1], [], []>} : vector<8x112xf32>, vector<112x80xf32>, vector<8x80xf32> -> vector<8x80xf32>
    %c2_84 = arith.constant 2 : index
    %c0_85 = arith.constant 0 : index
    %c0_86 = arith.constant 0 : index
    %102 = vector.load %arg10[%c2_84, %c0_85, %c0_86] : memref<5x8x112xf32, #tpu.memory_space<vmem>>, vector<1x8x112xf32>
    %103 = vector.shape_cast %102 : vector<1x8x112xf32> to vector<8x112xf32>
    %cst_87 = arith.constant dense<0.000000e+00> : vector<8x80xf32>
    %104 = tpu.matmul %103, %75, %cst_87 {dimension_numbers = #tpu.dot_dimension_numbers<[1], [0], [0], [1], [0, 0, 1, 1], [], []>} : vector<8x112xf32>, vector<112x80xf32>, vector<8x80xf32> -> vector<8x80xf32>
    %105 = arith.maximumf %101, %104 : vector<8x80xf32>
    %c2_88 = arith.constant 2 : index
    %c0_89 = arith.constant 0 : index
    %c0_90 = arith.constant 0 : index
    %106 = vector.load %arg12[%c2_88, %c0_89, %c0_90] : memref<5x80x120xf32, #tpu.memory_space<vmem>>, vector<1x80x120xf32>
    %107 = vector.shape_cast %106 : vector<1x80x120xf32> to vector<80x120xf32>
    %cst_91 = arith.constant dense<0.000000e+00> : vector<8x120xf32>
    %108 = tpu.matmul %105, %107, %cst_91 {dimension_numbers = #tpu.dot_dimension_numbers<[1], [0], [0], [1], [0, 0, 1, 1], [], []>} : vector<8x80xf32>, vector<80x120xf32>, vector<8x120xf32> -> vector<8x120xf32>
    %109 = arith.addf %98, %108 : vector<8x120xf32>
    %c3_92 = arith.constant 3 : index
    %c0_93 = arith.constant 0 : index
    %c0_94 = arith.constant 0 : index
    %110 = vector.load %arg9[%c3_92, %c0_93, %c0_94] : memref<5x8x112xf32, #tpu.memory_space<vmem>>, vector<1x8x112xf32>
    %111 = vector.shape_cast %110 : vector<1x8x112xf32> to vector<8x112xf32>
    %cst_95 = arith.constant dense<0.000000e+00> : vector<8x80xf32>
    %112 = tpu.matmul %111, %75, %cst_95 {dimension_numbers = #tpu.dot_dimension_numbers<[1], [0], [0], [1], [0, 0, 1, 1], [], []>} : vector<8x112xf32>, vector<112x80xf32>, vector<8x80xf32> -> vector<8x80xf32>
    %c3_96 = arith.constant 3 : index
    %c0_97 = arith.constant 0 : index
    %c0_98 = arith.constant 0 : index
    %113 = vector.load %arg10[%c3_96, %c0_97, %c0_98] : memref<5x8x112xf32, #tpu.memory_space<vmem>>, vector<1x8x112xf32>
    %114 = vector.shape_cast %113 : vector<1x8x112xf32> to vector<8x112xf32>
    %cst_99 = arith.constant dense<0.000000e+00> : vector<8x80xf32>
    %115 = tpu.matmul %114, %75, %cst_99 {dimension_numbers = #tpu.dot_dimension_numbers<[1], [0], [0], [1], [0, 0, 1, 1], [], []>} : vector<8x112xf32>, vector<112x80xf32>, vector<8x80xf32> -> vector<8x80xf32>
    %116 = arith.maximumf %112, %115 : vector<8x80xf32>
    %c3_100 = arith.constant 3 : index
    %c0_101 = arith.constant 0 : index
    %c0_102 = arith.constant 0 : index
    %117 = vector.load %arg12[%c3_100, %c0_101, %c0_102] : memref<5x80x120xf32, #tpu.memory_space<vmem>>, vector<1x80x120xf32>
    %118 = vector.shape_cast %117 : vector<1x80x120xf32> to vector<80x120xf32>
    %cst_103 = arith.constant dense<0.000000e+00> : vector<8x120xf32>
    %119 = tpu.matmul %116, %118, %cst_103 {dimension_numbers = #tpu.dot_dimension_numbers<[1], [0], [0], [1], [0, 0, 1, 1], [], []>} : vector<8x80xf32>, vector<80x120xf32>, vector<8x120xf32> -> vector<8x120xf32>
    %120 = arith.addf %109, %119 : vector<8x120xf32>
    %c4_104 = arith.constant 4 : index
    %c0_105 = arith.constant 0 : index
    %c0_106 = arith.constant 0 : index
    %121 = vector.load %arg9[%c4_104, %c0_105, %c0_106] : memref<5x8x112xf32, #tpu.memory_space<vmem>>, vector<1x8x112xf32>
    %122 = vector.shape_cast %121 : vector<1x8x112xf32> to vector<8x112xf32>
    %cst_107 = arith.constant dense<0.000000e+00> : vector<8x80xf32>
    %123 = tpu.matmul %122, %75, %cst_107 {dimension_numbers = #tpu.dot_dimension_numbers<[1], [0], [0], [1], [0, 0, 1, 1], [], []>} : vector<8x112xf32>, vector<112x80xf32>, vector<8x80xf32> -> vector<8x80xf32>
    %c4_108 = arith.constant 4 : index
    %c0_109 = arith.constant 0 : index
    %c0_110 = arith.constant 0 : index
    %124 = vector.load %arg10[%c4_108, %c0_109, %c0_110] : memref<5x8x112xf32, #tpu.memory_space<vmem>>, vector<1x8x112xf32>
    %125 = vector.shape_cast %124 : vector<1x8x112xf32> to vector<8x112xf32>
    %cst_111 = arith.constant dense<0.000000e+00> : vector<8x80xf32>
    %126 = tpu.matmul %125, %75, %cst_111 {dimension_numbers = #tpu.dot_dimension_numbers<[1], [0], [0], [1], [0, 0, 1, 1], [], []>} : vector<8x112xf32>, vector<112x80xf32>, vector<8x80xf32> -> vector<8x80xf32>
    %127 = arith.maximumf %123, %126 : vector<8x80xf32>
    %c4_112 = arith.constant 4 : index
    %c0_113 = arith.constant 0 : index
    %c0_114 = arith.constant 0 : index
    %128 = vector.load %arg12[%c4_112, %c0_113, %c0_114] : memref<5x80x120xf32, #tpu.memory_space<vmem>>, vector<1x80x120xf32>
    %129 = vector.shape_cast %128 : vector<1x80x120xf32> to vector<80x120xf32>
    %cst_115 = arith.constant dense<0.000000e+00> : vector<8x120xf32>
    %130 = tpu.matmul %127, %129, %cst_115 {dimension_numbers = #tpu.dot_dimension_numbers<[1], [0], [0], [1], [0, 0, 1, 1], [], []>} : vector<8x80xf32>, vector<80x120xf32>, vector<8x120xf32> -> vector<8x120xf32>
    %131 = arith.addf %120, %130 : vector<8x120xf32>
    %c0_116 = arith.constant 0 : index
    %c0_117 = arith.constant 0 : index
    %132 = vector.load %arg13[%c0_116, %c0_117] : memref<1x120xf32, #tpu.memory_space<vmem>>, vector<1x120xf32>
    %133 = vector.broadcast %132 : vector<1x120xf32> to vector<8x120xf32>
    %134 = arith.addf %131, %133 : vector<8x120xf32>
    %cst_118 = arith.constant 0.000000e+00 : f32
    %135 = vector.broadcast %cst_118 : f32 to vector<8x120xf32>
    %136 = arith.maximumf %134, %135 : vector<8x120xf32>
    %c0_119 = arith.constant 0 : index
    %c0_120 = arith.constant 0 : index
    %137 = vector.load %arg14[%c0_119, %c0_120] : memref<120x84xf32, #tpu.memory_space<vmem>>, vector<120x84xf32>
    %cst_121 = arith.constant dense<0.000000e+00> : vector<8x84xf32>
    %138 = tpu.matmul %136, %137, %cst_121 {dimension_numbers = #tpu.dot_dimension_numbers<[1], [0], [0], [1], [0, 0, 1, 1], [], []>} : vector<8x120xf32>, vector<120x84xf32>, vector<8x84xf32> -> vector<8x84xf32>
    %c0_122 = arith.constant 0 : index
    %c0_123 = arith.constant 0 : index
    %139 = vector.load %arg15[%c0_122, %c0_123] : memref<1x84xf32, #tpu.memory_space<vmem>>, vector<1x84xf32>
    %140 = vector.broadcast %139 : vector<1x84xf32> to vector<8x84xf32>
    %141 = arith.addf %138, %140 : vector<8x84xf32>
    %cst_124 = arith.constant 0.000000e+00 : f32
    %142 = vector.broadcast %cst_124 : f32 to vector<8x84xf32>
    %143 = arith.maximumf %141, %142 : vector<8x84xf32>
    %c0_125 = arith.constant 0 : index
    %c0_126 = arith.constant 0 : index
    %144 = vector.load %arg16[%c0_125, %c0_126] : memref<84x128xf32, #tpu.memory_space<vmem>>, vector<84x128xf32>
    %cst_127 = arith.constant dense<0.000000e+00> : vector<8x128xf32>
    %145 = tpu.matmul %143, %144, %cst_127 {dimension_numbers = #tpu.dot_dimension_numbers<[1], [0], [0], [1], [0, 0, 1, 1], [], []>} : vector<8x84xf32>, vector<84x128xf32>, vector<8x128xf32> -> vector<8x128xf32>
    %c0_128 = arith.constant 0 : index
    %c0_129 = arith.constant 0 : index
    %146 = vector.load %arg17[%c0_128, %c0_129] : memref<1x128xf32, #tpu.memory_space<vmem>>, vector<1x128xf32>
    %147 = vector.broadcast %146 : vector<1x128xf32> to vector<8x128xf32>
    %148 = arith.addf %145, %147 : vector<8x128xf32>
    %c0_130 = arith.constant 0 : index
    %c0_131 = arith.constant 0 : index
    %149 = vector.load %arg18[%c0_130, %c0_131] : memref<8x128xf32, #tpu.memory_space<vmem>>, vector<8x128xf32>
    tpu.vector_store %arg18[%c0_130, %c0_131], %148 {strides = array<i32>} : memref<8x128xf32, #tpu.memory_space<vmem>>, vector<8x128xf32>,
    return
  }
  func.func @transform_0(%arg0: i32) -> (i32, i32) {
    %c0_i32 = arith.constant 0 : i32
    %c0_i32_0 = arith.constant 0 : i32
    return %arg0, %c0_i32 : i32, i32
  }
  func.func @transform_1(%arg0: i32) -> (i32, i32, i32) {
    %c0_i32 = arith.constant 0 : i32
    %c0_i32_0 = arith.constant 0 : i32
    %c0_i32_1 = arith.constant 0 : i32
    %c0_i32_2 = arith.constant 0 : i32
    return %c0_i32, %c0_i32_0, %c0_i32_1 : i32, i32, i32
  }
  func.func @transform_2(%arg0: i32) -> (i32, i32) {
    %c0_i32 = arith.constant 0 : i32
    %c0_i32_0 = arith.constant 0 : i32
    %c0_i32_1 = arith.constant 0 : i32
    return %c0_i32, %c0_i32_0 : i32, i32
  }
  func.func @transform_3(%arg0: i32) -> (i32, i32) {
    %c0_i32 = arith.constant 0 : i32
    %c0_i32_0 = arith.constant 0 : i32
    %c0_i32_1 = arith.constant 0 : i32
    return %c0_i32, %c0_i32_0 : i32, i32
  }
  func.func @transform_4(%arg0: i32) -> (i32, i32) {
    %c0_i32 = arith.constant 0 : i32
    %c0_i32_0 = arith.constant 0 : i32
    %c0_i32_1 = arith.constant 0 : i32
    return %c0_i32, %c0_i32_0 : i32, i32
  }
  func.func @transform_5(%arg0: i32) -> (i32, i32) {
    %c0_i32 = arith.constant 0 : i32
    %c0_i32_0 = arith.constant 0 : i32
    %c0_i32_1 = arith.constant 0 : i32
    return %c0_i32, %c0_i32_0 : i32, i32
  }
  func.func @transform_6(%arg0: i32) -> (i32, i32, i32) {
    %c0_i32 = arith.constant 0 : i32
    %c0_i32_0 = arith.constant 0 : i32
    %c0_i32_1 = arith.constant 0 : i32
    %c0_i32_2 = arith.constant 0 : i32
    return %c0_i32, %c0_i32_0, %c0_i32_1 : i32, i32, i32
  }
  func.func @transform_7(%arg0: i32) -> (i32, i32) {
    %c0_i32 = arith.constant 0 : i32
    %c0_i32_0 = arith.constant 0 : i32
    %c0_i32_1 = arith.constant 0 : i32
    return %c0_i32, %c0_i32_0 : i32, i32
  }
  func.func @transform_8(%arg0: i32) -> (i32, i32, i32) {
    %c0_i32 = arith.constant 0 : i32
    %c0_i32_0 = arith.constant 0 : i32
    %c0_i32_1 = arith.constant 0 : i32
    %c0_i32_2 = arith.constant 0 : i32
    return %c0_i32, %c0_i32_0, %c0_i32_1 : i32, i32, i32
  }
  func.func @transform_9(%arg0: i32) -> (i32, i32, i32) {
    %c0_i32 = arith.constant 0 : i32
    %c0_i32_0 = arith.constant 0 : i32
    %c0_i32_1 = arith.constant 0 : i32
    %c0_i32_2 = arith.constant 0 : i32
    return %c0_i32, %c0_i32_0, %c0_i32_1 : i32, i32, i32
  }
  func.func @transform_10(%arg0: i32) -> (i32, i32) {
    %c0_i32 = arith.constant 0 : i32
    %c0_i32_0 = arith.constant 0 : i32
    %c0_i32_1 = arith.constant 0 : i32
    return %c0_i32, %c0_i32_0 : i32, i32
  }
  func.func @transform_11(%arg0: i32) -> (i32, i32, i32) {
    %c0_i32 = arith.constant 0 : i32
    %c0_i32_0 = arith.constant 0 : i32
    %c0_i32_1 = arith.constant 0 : i32
    %c0_i32_2 = arith.constant 0 : i32
    return %c0_i32, %c0_i32_0, %c0_i32_1 : i32, i32, i32
  }
  func.func @transform_12(%arg0: i32) -> (i32, i32) {
    %c0_i32 = arith.constant 0 : i32
    %c0_i32_0 = arith.constant 0 : i32
    %c0_i32_1 = arith.constant 0 : i32
    return %c0_i32, %c0_i32_0 : i32, i32
  }
  func.func @transform_13(%arg0: i32) -> (i32, i32) {
    %c0_i32 = arith.constant 0 : i32
    %c0_i32_0 = arith.constant 0 : i32
    %c0_i32_1 = arith.constant 0 : i32
    return %c0_i32, %c0_i32_0 : i32, i32
  }
  func.func @transform_14(%arg0: i32) -> (i32, i32) {
    %c0_i32 = arith.constant 0 : i32
    %c0_i32_0 = arith.constant 0 : i32
    %c0_i32_1 = arith.constant 0 : i32
    return %c0_i32, %c0_i32_0 : i32, i32
  }
  func.func @transform_15(%arg0: i32) -> (i32, i32) {
    %c0_i32 = arith.constant 0 : i32
    %c0_i32_0 = arith.constant 0 : i32
    %c0_i32_1 = arith.constant 0 : i32
    return %c0_i32, %c0_i32_0 : i32, i32
  }
  func.func @transform_16(%arg0: i32) -> (i32, i32) {
    %c0_i32 = arith.constant 0 : i32
    %c0_i32_0 = arith.constant 0 : i32
    %c0_i32_1 = arith.constant 0 : i32
    return %c0_i32, %c0_i32_0 : i32, i32
  }
  func.func @transform_17(%arg0: i32) -> (i32, i32) {
    %c0_i32 = arith.constant 0 : i32
    %c0_i32_0 = arith.constant 0 : i32
    return %arg0, %c0_i32 : i32, i32
  }
}

</mosaic_0001>

<bundles_post_ra>
// kernel: lenet5_forward.1
= control target key start
LH: loop header
LB: loop body
LE: loop exit
PB: predicated region body
PF: predicated region fallthrough
CT: control target
= control target key end

     0   :  { %s11141_s0 = inlined_call_operand.vmem [shape: f32[512,32], index: 0, kind: input, shape index: {}]   ;;  %s11142_s1 = inlined_call_operand.vmem [shape: f32[5,32,168], index: 1, kind: input, shape index: {}]   ;;  %s11143_s2 = inlined_call_operand.vmem [shape: f32[1,168], index: 2, kind: input, shape index: {}]   ;;  %s11144_s3 = inlined_call_operand.vmem [shape: f32[120,256], index: 3, kind: input, shape index: {}]   ;;  %s11145_s4 = inlined_call_operand.vmem [shape: f32[120,256], index: 4, kind: input, shape index: {}]   ;;  %s11146_s5 = inlined_call_operand.vmem [shape: f32[162,84], index: 5, kind: input, shape index: {}]   ;;  %s11147_s6 = inlined_call_operand.vmem [shape: f32[5,84,160], index: 6, kind: input, shape index: {}]   ;;  %s11148_s7 = inlined_call_operand.vmem [shape: f32[1,160], index: 7, kind: input, shape index: {}]   ;;  %s11149_s8 = inlined_call_operand.hbm [shape: f32[5,8,112], index: 8, kind: input, shape index: {}]   ;;  %s11150_s9 = inlined_call_operand.hbm [shape: f32[5,8,112], index: 9, kind: input, shape index: {}]   ;;  %s11151_s10 = inlined_call_operand.hbm [shape: f32[144,80], index: 10, kind: input, shape index: {}]   ;;  %s11152_s11 = inlined_call_operand.vmem [shape: f32[5,80,120], index: 11, kind: input, shape index: {}]   ;;  %s11153_s12 = inlined_call_operand.vmem [shape: f32[1,120], index: 12, kind: input, shape index: {}]   ;;  %s11154_s13 = inlined_call_operand.vmem [shape: f32[120,84], index: 13, kind: input, shape index: {}]   ;;  %s11155_s14 = inlined_call_operand.vmem [shape: f32[1,84], index: 14, kind: input, shape index: {}]   ;;  %s11156_s15 = inlined_call_operand.hbm [shape: f32[84,128], index: 15, kind: input, shape index: {}]   ;;  %s11157_s16 = inlined_call_operand.vmem [shape: f32[1,128], index: 16, kind: input, shape index: {}]   ;;  %s11158_s17 = inlined_call_operand.hbm [shape: f32[16,128], index: 17, kind: output, shape index: {}]  }
   0x1   :  { %11225 = sst [smem:[#allocation99_spill]] %s11141_s0 }
   0x2   :  { %11226 = sst [smem:[#allocation100_spill]] %s11142_s1 }
   0x3   :  { %11227 = sst [smem:[#allocation101_spill]] %s11149_s8 }
   0x4   :  { %11228 = sst [smem:[#allocation102_spill]] %s11150_s9 }
   0x5   :  { %11229 = sst [smem:[#allocation103_spill]] %s11157_s16 }
   0x6   :  { %11230 = sst [smem:[#allocation104_spill]] %s11158_s17 }
   0x7   :  { %22 = vsyncpa [#allocation3], 0 }
   0x8   :  { %23 = vsyncpa [#allocation6], 0 }
   0x9   :  { %24 = vsyncpa [#allocation9], 0 }
   0xa   :  { %25 = vsyncpa [#allocation4], 0 }
   0xb   :  { %27 = vsyncpa [#allocation4 + $0x1], 0  ;;  %s7043_s24 = smov 0   ;;  %s7045_s25 = smov 0  }
   0xc   :  { %s7047_s26 = smov 0   ;;  %s7049_s27 = smov 0  }
   0xd LB: > { %11231 = sst [smem:[#allocation15_spill]] %s6930_s24  ;;  %s7064_s28 = sadd.s32 4294967295, %s6942_s27   ;;  %s6942_s27 = sphi %s7049_s27, %s11529_s27   ;;  %s6938_s26 = sphi %s7047_s26, %s11531_s26   ;;  %s6934_s25 = sphi %s7045_s25, %s11533_s25   ;;  %s6930_s24 = sphi %s7043_s24, %s11532_s24  }
   0xe   : > { %11232 = sst [smem:[#allocation16_spill]] %s6938_s26  ;;  %s5910_s29 = sadd.s32 4294967294, %s6942_s27  }
   0xf   : > { %11233 = sst [smem:[#allocation17_spill]] %s6942_s27  ;;  %s7068_s0 = sadd.s32 1, %s6942_s27  }
  0x10   : > { %11234 = sst [smem:[#allocation18_spill]] %s7068_s0  ;;  %s402_s30 = sadd.s32 1, %s6938_s26 }
  0x11   : > { %s399_s18 = ssub.s32 %s6942_s27, %s7068_s0  ;;  %p412_p0 = scmp.ne.s32.totalorder %s6938_s26, %s6934_s25 }
  0x12   : > { %p400_p1 = scmp.eq.s32.totalorder %s399_s18, 0  ;;  %p413_p2 = scmp.eq.s32.totalorder %s7064_s28, 1 }
  0x13   : > { %p418_p3 = scmp.ne.s32.totalorder %s6934_s25, %s6930_s24  ;;  %p419_p4 = scmp.eq.s32.totalorder %s5910_s29, 1 }
  0x14   : > { %s7079_s19 = scalar_select %p400_p1, %s6938_s26, %s402_s30  }
  0x15   : > { %p7081_p5 = por %p413_p2, %p412_p0  ;;  %p7085_p6 = por %p419_p4, %p418_p3 }
  0x16   : > { %11235 = sst [smem:[#allocation19_spill]] %s7079_s19  ;;  %p5911_p7 = scmp.ge.s32.totalorder %s6942_s27, 1 }
  0x17   : > { %s11236_s1 = scalar_select %p7081_p5, 1, 0 }
  0x18   : > { %s11238_s20 = scalar_select %p7085_p6, 1, 0 }
  0x19   : > { %11237 = sst [smem:[#allocation20_spill]] %s11236_s1  ;;  %p426_p8 = scmp.lt.s32.totalorder %s6942_s27, 3 }
  0x1a   : > { %11239 = sst [smem:[#allocation21_spill]] %s11238_s20  ;;  %p6663_p9 = scmp.eq.s32.totalorder %s7064_s28, 0 }
  0x1b   : > { %p7092_p10 = pnand %p5911_p7, %p426_p8  ;;  %s11241_s9 = sld [smem:[#allocation102_spill]] }
  0x1c   : > { %s11242_s8 = sld [smem:[#allocation101_spill]]  ;;  %s6944_s0 = smov [#allocation5]  }
  0x1d   : > { %p6646_p11 = pneg %p7092_p10  ;;  %s474_s20 = sshll.u32 %s6944_s0, 4  ;;  %s475_s20 = int_to_ptr.vmem [resolvable:$true] %s474_s20 }
  0x1e   : > { %s6945_s22 = smov 128   ;;  %s6946_s23 = smov 8  }
  0x1f   : > { %p7106_p12 = pnand %p6663_p9, %p6646_p11  ;;  %s486_s24 = sshll.u32 %s11151_s10, 4  ;;  %s487_s24 = int_to_ptr.hbm [resolvable:$true] %s486_s24 }
  0x20   : > { %s512_s16 = sshll.u32 %s11156_s15, 4  ;;  %s6948_s1 = smov [#allocation7]   ;;  %s513_s16 = int_to_ptr.hbm [resolvable:$true] %s512_s16 }
  0x21   : > { %s472_s29 = sshll.u32 %s11241_s9, 4  ;;  %s6947_s9 = smov [#allocation2]   ;;  %s473_s29 = int_to_ptr.hbm [resolvable:$true] %s472_s29 }
  0x22   : > { %s458_s19 = sshll.u32 %s11242_s8, 4  ;;  %s460_s30 = sshll.u32 %s6947_s9, 4  ;;  %s459_s19 = int_to_ptr.hbm [resolvable:$true] %s458_s19  ;;  %s461_s30 = int_to_ptr.vmem [resolvable:$true] %s460_s30 }
  0x23   : > { %6652 = dma.hbm_to_vmem [thread:$0]  (!%p7106_p12), %s473_s29, 640, %s475_s20, [#allocation6], %s6945_s22, %s6945_s22, %s6946_s23  }
  0x24   : > { %6649 = dma.hbm_to_vmem [thread:$0]  (!%p7106_p12), %s459_s19, 640, %s461_s30, [#allocation3], %s6945_s22, %s6945_s22, %s6946_s23  }
  0x25   : > { %s488_s17 = sshll.u32 %s6948_s1, 4  ;;  %s6949_s20 = smov [#allocation8]   ;;  %s489_s17 = int_to_ptr.vmem [resolvable:$true] %s488_s17 }
  0x26   : > { %6655 = dma.hbm_to_vmem [thread:$0]  (!%p7106_p12), %s487_s24, 2304, %s489_s17, [#allocation6], %s6945_s22, %s6945_s22, %s6946_s23  }
  0x27   : > { %s514_s9 = sshll.u32 %s6949_s20, 4  ;;  %542 = sbr.rel (%p7092_p10) target bundleno = 2833 (0xb11), region = 88  ;;  %s515_s9 = int_to_ptr.vmem [resolvable:$true] %s514_s9 }
  0x28   : > { %6658 = dma.hbm_to_vmem [thread:$0]  (!%p7106_p12), %s513_s16, 1408, %s515_s9, [#allocation9], %s6945_s22, %s6945_s22, %s6946_s23  }
  0x2c   : > { %6913 = dma.done.wait (%p6663_p9), [#allocation3], 640  }
  0x2d   : > { %6915 = vsyncadd (%p6663_p9), [#allocation3], 4294966656 }
  0x2e   : > { %6917 = dma.done.wait (%p6663_p9), [#allocation6], 2944  }
  0x2f   : > { %6919 = vsyncadd (%p6663_p9), [#allocation6], 4294964352 }
  0x30   : > { %6921 = dma.done.wait (%p6663_p9), [#allocation9], 1408  }
  0x31   : > { %6923 = vsyncadd (%p6663_p9), [#allocation9], 4294965888  ;;  %s5923_s8 = sshll.u32 %s7064_s28, 5  ;;  %s11244_s26 = sld [smem:[#allocation100_spill]]  ;;  %v11169_v10 = vmov 0.0   ;;  %vm698_vm0 = vcmask 1046528  }
  0x32   : > { %p611_p13 = scmp.lt.s32.totalorder %s5923_s8, 63  ;;  %s11246_s17 = sld [smem:[#allocation99_spill]]  ;;  %v762_v11 = vrot.slane %v11169_v10, 1  ;;  %vm764_vm1 = vcmask 261120   ;;  %vm1354_vm2 = vcmask 1045504   ;;  %vm1783_vm3 = vcmask 1044480  }
  0x33   : > { %vm2212_vm4 = vcmask 1043456   ;;  %s6951_s0 = smov 122   ;;  %vm3237_vm5 = vcmask 1041408   ;;  %vm2958_vm6 = vcmask 998400   ;;  %vm3140_vm7 = vcmask 277504   ;;  %s607_s23 = sand.u32 1, %s6934_s25  }
  0x34   : > { %s11535_s8 = smov (!%p611_p13, %s5923_s8), 63  ;;  %vm3879_vm8 = vcmask 687104   ;;  %vm5115_vm9 = vcmask 130048   ;;  %vm5026_vm10 = vcmask 916480   ;;  %vm5397_vm11 = vcmask 654336   ;;  %s5922_s30 = sshll.u32 %s607_s23, 3 }
  0x35   : > { %s5924_s16 = sshll.u32 %s11535_s8, 3  ;;  %vm5727_vm12 = vcmask 982016   ;;  %s6621_s18 = sshll.u32 %s7064_s28, 3 }
  0x36   : > { %s11523_s20 = sld [smem:[#allocation104_spill]]  ;;  %s609_s1 = scalar_lea.vmem [#allocation10], %s5922_s30 }
  0x37   : > { %s11245_s19 = smov %s11244_s26  ;;  %v5931_v0 = vld [vmem:[%s11244_s26 + $0x70] sm:$0xff]  ;;  %s6952_s26 = smov 112  }
  0x38   : > { %v5932_v1 = vld [vmem:[%s11245_s19 + $0x78] sm:$0xff]  ;;  %v654_v2 = vld [vmem:[%s11245_s19 + $0x30] sm:$0xff]  ;;  %841 = vmatpush.msra.mxu0 %v5931_v0  ;;  %6624 = vmatpush.msra.mxu3 %v5931_v0  ;;  %v5929_v3 = vld [vmem:[%s11245_s19 + $0x60] sm:$0xff]  ;;  %s7160_s24 = scalar_lea.vmem %s11246_s17, %s5924_s16  ;;  %s11525_s27 = sld [smem:[#allocation103_spill]] }
  0x39   : > { %v5930_v4 = vld [vmem:[%s11245_s19 + $0x68] sm:$0xff]  ;;  %v652_v5 = vld [vmem:[%s11245_s19 + $0x20] sm:$0xff]  ;;  %954 = vmatpush.msra.mxu1 %v5932_v1  ;;  %1131 = vmatpush.msra.mxu2 %v654_v2  ;;  %v5927_v6 = vld [vmem:[%s11245_s19 + $0x50] sm:$0xff]  ;;  %s5807_s21 = sshll.u32 %s609_s1, 4  ;;  %s5795_s22 = scalar_lea.sflag [#allocation4], %s607_s23  ;;  %s5808_s21 = int_to_ptr.vmem [resolvable:$true] %s5807_s21 }
  0x3a   : > { %842 = vmatpush.msra.mxu0 %v5929_v3  ;;  %6625 = vmatpush.msra.mxu3 %v5929_v3  ;;  %v5928_v7 = vld [vmem:[%s11245_s19 + $0x58] sm:$0xff]  ;;  %v650_v8 = vld [vmem:[%s11245_s19 + $0x10] sm:$0xff]  ;;  %v5925_v9 = vld [vmem:[%s11245_s19 + $0x40] sm:$0xff] }
  0x3b   : > { %955 = vmatpush.msra.mxu1 %v5930_v4  ;;  %1132 = vmatpush.msra.mxu2 %v652_v5  ;;  %v7176_v12 = vld [vmem:[%s7160_s24] sm:$0xff]  ;;  %v7179_v13 = vld [vmem:[%s7160_s24 + $0x8] sm:$0xff]  ;;  %v7182_v14 = vld [vmem:[%s7160_s24 + $0xf8] sm:$0xff] }
  0x3c   : > { %843 = vmatpush.msra.mxu0 %v5927_v6  ;;  %6626 = vmatpush.msra.mxu3 %v5927_v6  ;;  %v5926_v15 = vld [vmem:[%s11245_s19 + $0x48] sm:$0xff]  ;;  %v648_v16 = vld [vmem:[%s11245_s19] sm:$0xff]  ;;  %v699_v17 = vrot.slane %v7176_v12, 1  ;;  %v700_v18 = vrot.slane %v7179_v13, 1  ;;  %v11171_v19 = vrot.slane %v7182_v14, 1  ;;  %v7200_v22 = vld [vmem:[%s7160_s24 + $0x10] sm:$0xff]  ;;  %s5805_s8 = scalar_lea.hbm %s11523_s20, %s6621_s18 }
  0x3d   : > { %956 = vmatpush.msra.mxu1 %v5928_v7  ;;  %1133 = vmatpush.msra.mxu2 %v650_v8  ;;  %v655_v23 = vld [vmem:[%s11245_s19 + $0x38] sm:$0xff]  ;;  %v653_v24 = vld [vmem:[%s11245_s19 + $0x28] sm:$0xff]  ;;  %v702_v25 = vrot.slane %v7200_v22, 1  ;;  %v7234_v32 = vld [vmem:[%s7160_s24 + $0x20] sm:$0xff]  ;;  %s5809_s29 = sshll.u32 %s5805_s8, 4  ;;  %s5810_s29 = int_to_ptr.hbm [resolvable:$true] %s5809_s29 }
  0x3e   : > { %844 = vmatpush.msra.mxu0 %v5925_v9  ;;  %6627 = vmatpush.msra.mxu3 %v5925_v9  ;;  %v701_v20 = vsel %vm698_vm0, %v699_v17, %v700_v18  ;;  %v7197_v21 = vsel %vm698_vm0, %v11171_v19, %v762_v11  ;;  %v651_v26 = vld [vmem:[%s11245_s19 + $0x18] sm:$0xff]  ;;  %v649_v27 = vld [vmem:[%s11245_s19 + $0x8] sm:$0xff]  ;;  %v706_v33 = vrot.slane %v7234_v32, 1  ;;  %v7256_v38 = vld [vmem:[%s7160_s24 + $0x30] sm:$0xff]  ;;  %s6882_s16 = sshra.s32 %s5810_s29, 4  ;;  %s6883_s16 = int_to_ptr.hbm [resolvable:$true] %s6882_s16 }
  0x3f   : > { %957 = vmatpush.msra.mxu1 %v5926_v15  ;;  %1134 = vmatpush.msra.mxu2 %v648_v16  ;;  %v703_v28 = vsel %vm698_vm0, %v700_v18, %v702_v25  ;;  %v7223_v29 = vld [vmem:[%s7160_s24 + $0x18] sm:$0xff]  ;;  %v7245_v35 = vld [vmem:[%s7160_s24 + $0x28] sm:$0xff]  ;;  %v710_v39 = vrot.slane %v7256_v38, 1  ;;  %v7278_v44 = vld [vmem:[%s7160_s24 + $0x40] sm:$0xff]  ;;  %s6884_s28 = scalar_lea.hbm %s6883_s16, 8  ;;  %p6889_p3 = scmp.lt.s32.totalorder %s6883_s16, %s11523_s20 }
  0x40   : > { %5933 = vmatmul.msk.f32.vlgmr.msra.gmra.mxu0 %vm764_vm1, %v701_v20  ;;  %5964 = vmatmul.msk.f32.vlgmr.msra.gmra.mxu3 %vm764_vm1, %v7197_v21  ;;  %v704_v30 = vrot.slane %v7223_v29, 1  ;;  %v708_v36 = vrot.slane %v7245_v35, 1  ;;  %v7267_v41 = vld [vmem:[%s7160_s24 + $0x38] sm:$0xff]  ;;  %v714_v45 = vrot.slane %v7278_v44, 1  ;;  %v7289_v47 = vld [vmem:[%s7160_s24 + $0x48] sm:$0xff]  ;;  %v7300_v50 = vld [vmem:[%s7160_s24 + $0x50] sm:$0xff]  ;;  %p6885_p0 = scmp.ne.s32.totalorder %s6883_s16, %s6884_s28 }
  0x41   : > { %5965 = vmatmul.msk.f32.vlgmr.msra.gmra.mxu1 %vm764_vm1, %v701_v20  ;;  %5997 = vmatmul.msk.f32.vlgmr.msra.gmra.mxu2 %vm764_vm1, %v7176_v12  ;;  %v712_v42 = vrot.slane %v7267_v41, 1  ;;  %v716_v48 = vrot.slane %v7289_v47, 1  ;;  %v718_v51 = vrot.slane %v7300_v50, 1  ;;  %v7311_v53 = vld [vmem:[%s7160_s24 + $0x58] sm:$0xff]  ;;  %v7322_v56 = vld [vmem:[%s7160_s24 + $0x60] sm:$0xff]  ;;  %v7333_v59 = vld [vmem:[%s7160_s24 + $0x68] sm:$0xff] }
  0x42   : > { %1244 = vmatpush.msrb.mxu3 %v655_v23  ;;  %v705_v31 = vsel %vm698_vm0, %v702_v25, %v704_v30  ;;  %v707_v34 = vsel %vm698_vm0, %v704_v30, %v706_v33  ;;  %v709_v37 = vsel %vm698_vm0, %v706_v33, %v708_v36  ;;  %v711_v40 = vsel %vm698_vm0, %v708_v36, %v710_v39  ;;  %v7344_v62 = vld [vmem:[%s7160_s24 + $0x70] sm:$0xff]  ;;  %v7355_v1 = vld [vmem:[%s7160_s24 + $0x78] sm:$0xff]  ;;  %v7366_v4 = vld [vmem:[%s7160_s24 + $0x80] sm:$0xff]  ;;  %p6886_p1 = pnand %p6885_p0, %p7081_p5 }
  0x43   : > { %v713_v43 = vsel %vm698_vm0, %v710_v39, %v712_v42  ;;  %v715_v46 = vsel %vm698_vm0, %v712_v42, %v714_v45  ;;  %v717_v49 = vsel %vm698_vm0, %v714_v45, %v716_v48  ;;  %v719_v52 = vsel %vm698_vm0, %v716_v48, %v718_v51  ;;  %v7377_v7 = vld [vmem:[%s7160_s24 + $0x88] sm:$0xff]  ;;  %v7388_v16 = vld [vmem:[%s7160_s24 + $0x90] sm:$0xff] }
  0x44   : > { %1245 = vmatpush.msrb.mxu3 %v653_v24  ;;  %v720_v54 = vrot.slane %v7311_v53, 1  ;;  %v722_v57 = vrot.slane %v7322_v56, 1  ;;  %v724_v60 = vrot.slane %v7333_v59, 1  ;;  %v726_v63 = vrot.slane %v7344_v62, 1  ;;  %p6887_p2 = pneg %p6886_p1 }
  0x45   : > { %v728_v2 = vrot.slane %v7355_v1, 1  ;;  %v730_v5 = vrot.slane %v7366_v4, 1  ;;  %v732_v8 = vrot.slane %v7377_v7, 1  ;;  %v734_v17 = vrot.slane %v7388_v16, 1 }
  0x46   : > { %1246 = vmatpush.msrb.mxu3 %v651_v26  ;;  %v721_v55 = vsel %vm698_vm0, %v718_v51, %v720_v54  ;;  %v723_v58 = vsel %vm698_vm0, %v720_v54, %v722_v57  ;;  %v725_v61 = vsel %vm698_vm0, %v722_v57, %v724_v60  ;;  %v727_v0 = vsel %vm698_vm0, %v724_v60, %v726_v63  ;;  %v7433_v54 = vld [vmem:[%s7160_s24 + $0xa8] sm:$0xff] }
  0x47   : > { %v729_v3 = vsel %vm698_vm0, %v726_v63, %v728_v2  ;;  %v731_v6 = vsel %vm698_vm0, %v728_v2, %v730_v5  ;;  %v733_v11 = vsel %vm698_vm0, %v730_v5, %v732_v8  ;;  %v735_v25 = vsel %vm698_vm0, %v732_v8, %v734_v17 }
  0x48   : > { %1247 = vmatpush.msrb.mxu3 %v649_v27  ;;  %5934 = vmatmul.msk.f32.gmra.mxu0 %vm764_vm1, %v703_v28  ;;  %v7403_v27 = vld [vmem:[%s7160_s24 + $0x98] sm:$0xff] }
  0x49   : > { %5966 = vmatmul.msk.f32.gmra.mxu1 %vm764_vm1, %v703_v28  ;;  %5998 = vmatmul.msk.f32.gmra.mxu2 %vm764_vm1, %v7179_v13  ;;  %v736_v28 = vrot.slane %v7403_v27, 1 }
  0x4a   : > { %6029 = vmatmul.msk.f32.vlgmr.msrb.gmra.mxu3 %vm764_vm1, %v7176_v12 }
  0x4b   : > { %v737_v36 = vsel %vm698_vm0, %v734_v17, %v736_v28 }
  0x50   : > { %5935 = vmatmul.msk.f32.gmra.mxu0 %vm764_vm1, %v705_v31 }
  0x51   : > { %5967 = vmatmul.msk.f32.gmra.mxu1 %vm764_vm1, %v705_v31  ;;  %5999 = vmatmul.msk.f32.gmra.mxu2 %vm764_vm1, %v7200_v22 }
  0x52   : > { %6030 = vmatmul.msk.f32.gmra.mxu3 %vm764_vm1, %v7179_v13 }
  0x58   : > { %5936 = vmatmul.msk.f32.gmra.mxu0 %vm764_vm1, %v707_v34 }
  0x59   : > { %5968 = vmatmul.msk.f32.gmra.mxu1 %vm764_vm1, %v707_v34  ;;  %6000 = vmatmul.msk.f32.gmra.mxu2 %vm764_vm1, %v7223_v29 }
  0x5a   : > { %6031 = vmatmul.msk.f32.gmra.mxu3 %vm764_vm1, %v7200_v22 }
  0x60   : > { %5937 = vmatmul.msk.f32.gmra.mxu0 %vm764_vm1, %v709_v37 }
  0x61   : > { %5969 = vmatmul.msk.f32.gmra.mxu1 %vm764_vm1, %v709_v37  ;;  %6001 = vmatmul.msk.f32.gmra.mxu2 %vm764_vm1, %v7234_v32 }
  0x62   : > { %6032 = vmatmul.msk.f32.gmra.mxu3 %vm764_vm1, %v7223_v29 }
  0x68   : > { %5938 = vmatmul.msk.f32.gmra.mxu0 %vm764_vm1, %v711_v40 }
  0x69   : > { %5970 = vmatmul.msk.f32.gmra.mxu1 %vm764_vm1, %v711_v40  ;;  %6002 = vmatmul.msk.f32.gmra.mxu2 %vm764_vm1, %v7245_v35  ;;  %v7418_v40 = vld [vmem:[%s7160_s24 + $0xa0] sm:$0xff] }
  0x6a   : > { %6033 = vmatmul.msk.f32.gmra.mxu3 %vm764_vm1, %v7234_v32  ;;  %v738_v42 = vrot.slane %v7418_v40, 1 }
  0x70   : > { %5939 = vmatmul.msk.f32.gmra.mxu0 %vm764_vm1, %v713_v43 }
  0x71   : > { %5971 = vmatmul.msk.f32.gmra.mxu1 %vm764_vm1, %v713_v43  ;;  %6003 = vmatmul.msk.f32.gmra.mxu2 %vm764_vm1, %v7256_v38 }
  0x72   : > { %6034 = vmatmul.msk.f32.gmra.mxu3 %vm764_vm1, %v7245_v35 }
  0x78   : > { %5940 = vmatmul.msk.f32.gmra.mxu0 %vm764_vm1, %v715_v46 }
  0x79   : > { %5972 = vmatmul.msk.f32.gmra.mxu1 %vm764_vm1, %v715_v46  ;;  %6004 = vmatmul.msk.f32.gmra.mxu2 %vm764_vm1, %v7267_v41 }
  0x7a   : > { %6035 = vmatmul.msk.f32.gmra.mxu3 %vm764_vm1, %v7256_v38 }
  0x80   : > { %5941 = vmatmul.msk.f32.gmra.mxu0 %vm764_vm1, %v717_v49 }
  0x81   : > { %5973 = vmatmul.msk.f32.gmra.mxu1 %vm764_vm1, %v717_v49  ;;  %6005 = vmatmul.msk.f32.gmra.mxu2 %vm764_vm1, %v7278_v44  ;;  %v739_v49 = vsel %vm698_vm0, %v736_v28, %v738_v42 }
  0x82   : > { %6036 = vmatmul.msk.f32.gmra.mxu3 %vm764_vm1, %v7267_v41 }
  0x88   : > { %5942 = vmatmul.msk.f32.gmra.mxu0 %vm764_vm1, %v719_v52 }
  0x89   : > { %5974 = vmatmul.msk.f32.gmra.mxu1 %vm764_vm1, %v719_v52  ;;  %6006 = vmatmul.msk.f32.gmra.mxu2 %vm764_vm1, %v7289_v47 }
  0x8a   : > { %6037 = vmatmul.msk.f32.gmra.mxu3 %vm764_vm1, %v7278_v44 }
  0x90   : > { %5943 = vmatmul.msk.f32.gmra.mxu0 %vm764_vm1, %v721_v55 }
  0x91   : > { %5975 = vmatmul.msk.f32.gmra.mxu1 %vm764_vm1, %v721_v55  ;;  %6007 = vmatmul.msk.f32.gmra.mxu2 %vm764_vm1, %v7300_v50  ;;  %v740_v55 = vrot.slane %v7433_v54, 1 }
  0x92   : > { %6038 = vmatmul.msk.f32.gmra.mxu3 %vm764_vm1, %v7289_v47 }
  0x93   : > { %v741_v63 = vsel %vm698_vm0, %v738_v42, %v740_v55  ;;  %v7478_v42 = vld [vmem:[%s7160_s24 + $0xc0] sm:$0xff] }
  0x98   : > { %5944 = vmatmul.msk.f32.gmra.mxu0 %vm764_vm1, %v723_v58 }
  0x99   : > { %5976 = vmatmul.msk.f32.gmra.mxu1 %vm764_vm1, %v723_v58  ;;  %6008 = vmatmul.msk.f32.gmra.mxu2 %vm764_vm1, %v7311_v53 }
  0x9a   : > { %6039 = vmatmul.msk.f32.gmra.mxu3 %vm764_vm1, %v7300_v50 }
  0xa0   : > { %5945 = vmatmul.msk.f32.gmra.mxu0 %vm764_vm1, %v725_v61 }
  0xa1   : > { %5977 = vmatmul.msk.f32.gmra.mxu1 %vm764_vm1, %v725_v61  ;;  %6009 = vmatmul.msk.f32.gmra.mxu2 %vm764_vm1, %v7322_v56 }
  0xa2   : > { %6040 = vmatmul.msk.f32.gmra.mxu3 %vm764_vm1, %v7311_v53 }
  0xa8   : > { %5946 = vmatmul.msk.f32.gmra.mxu0 %vm764_vm1, %v727_v0 }
  0xa9   : > { %5978 = vmatmul.msk.f32.gmra.mxu1 %vm764_vm1, %v727_v0  ;;  %6010 = vmatmul.msk.f32.gmra.mxu2 %vm764_vm1, %v7333_v59 }
  0xaa   : > { %6041 = vmatmul.msk.f32.gmra.mxu3 %vm764_vm1, %v7322_v56 }
  0xb0   : > { %5947 = vmatmul.msk.f32.gmra.mxu0 %vm764_vm1, %v729_v3 }
  0xb1   : > { %5979 = vmatmul.msk.f32.gmra.mxu1 %vm764_vm1, %v729_v3  ;;  %6011 = vmatmul.msk.f32.gmra.mxu2 %vm764_vm1, %v7344_v62  ;;  %v7448_v3 = vld [vmem:[%s7160_s24 + $0xb0] sm:$0xff] }
  0xb2   : > { %6042 = vmatmul.msk.f32.gmra.mxu3 %vm764_vm1, %v7333_v59  ;;  %v742_v5 = vrot.slane %v7448_v3, 1 }
  0xb8   : > { %5948 = vmatmul.msk.f32.gmra.mxu0 %vm764_vm1, %v731_v6 }
  0xb9   : > { %5980 = vmatmul.msk.f32.gmra.mxu1 %vm764_vm1, %v731_v6  ;;  %6012 = vmatmul.msk.f32.gmra.mxu2 %vm764_vm1, %v7355_v1 }
  0xba   : > { %6043 = vmatmul.msk.f32.gmra.mxu3 %vm764_vm1, %v7344_v62 }
  0xbd   : > { %v846_v9 = vpop.f32.mrf.mxu0 }
  0xbe   : > { %v959_v15 = vpop.f32.mrf.mxu1 }
  0xc0   : > { %5949 = vmatmul.msk.f32.gmra.mxu0 %vm764_vm1, %v733_v11 }
  0xc1   : > { %5981 = vmatmul.msk.f32.gmra.mxu1 %vm764_vm1, %v733_v11  ;;  %6013 = vmatmul.msk.f32.gmra.mxu2 %vm764_vm1, %v7366_v4 }
  0xc2   : > { %6044 = vmatmul.msk.f32.gmra.mxu3 %vm764_vm1, %v7355_v1 }
  0xc3   : > { %v7397_v18 = vpop.f32.mrf.mxu3 }
  0xc4   : > { %11247 = vst [vmem:[#allocation22_spill] sm:$0xff] %v7397_v18  ;;  %v1136_v20 = vpop.f32.mrf.mxu2  ;;  %v7562_v18 = vld [vmem:[%s7160_s24 + $0xe8] sm:$0xff] }
  0xc5   : > { %v7399_v23 = vadd.f32 %v1136_v20, %v846_v9  ;;  %v849_v24 = vpop.f32.mrf.mxu0 }
  0xc6   : > { %v962_v26 = vpop.f32.mrf.mxu1 }
  0xc8   : > { %5950 = vmatmul.msk.f32.gmra.mxu0 %vm764_vm1, %v735_v25 }
  0xc9   : > { %5982 = vmatmul.msk.f32.gmra.mxu1 %vm764_vm1, %v735_v25  ;;  %6014 = vmatmul.msk.f32.gmra.mxu2 %vm764_vm1, %v7377_v7 }
  0xca   : > { %6045 = vmatmul.msk.f32.gmra.mxu3 %vm764_vm1, %v7366_v4 }
  0xcc   : > { %v1139_v30 = vpop.f32.mrf.mxu2 }
  0xcd   : > { %v7412_v31 = vadd.f32 %v1139_v30, %v849_v24  ;;  %v1249_v33 = vpop.f32.mrf.mxu3  ;;  %v852_v34 = vpop.f32.mrf.mxu0  ;;  %v7463_v24 = vld [vmem:[%s7160_s24 + $0xb8] sm:$0xff] }
  0xce   : > { %v7415_v37 = vadd.f32 %v1249_v33, %v959_v15  ;;  %v965_v39 = vpop.f32.mrf.mxu1  ;;  %v743_v15 = vsel %vm698_vm0, %v740_v55, %v742_v5  ;;  %v744_v25 = vrot.slane %v7463_v24, 1 }
  0xd0   : > { %5951 = vmatmul.msk.f32.gmra.mxu0 %vm764_vm1, %v737_v36 }
  0xd1   : > { %5983 = vmatmul.msk.f32.gmra.mxu1 %vm764_vm1, %v737_v36  ;;  %6015 = vmatmul.msk.f32.gmra.mxu2 %vm764_vm1, %v7388_v16 }
  0xd2   : > { %6046 = vmatmul.msk.f32.gmra.mxu3 %vm764_vm1, %v7377_v7 }
  0xd4   : > { %v1142_v43 = vpop.f32.mrf.mxu2 }
  0xd5   : > { %v7427_v45 = vadd.f32 %v1142_v43, %v852_v34  ;;  %v1252_v46 = vpop.f32.mrf.mxu3  ;;  %v855_v48 = vpop.f32.mrf.mxu0  ;;  %v745_v34 = vsel %vm698_vm0, %v742_v5, %v744_v25  ;;  %v746_v43 = vrot.slane %v7478_v42, 1 }
  0xd6   : > { %v7430_v51 = vadd.f32 %v1252_v46, %v962_v26  ;;  %v968_v52 = vpop.f32.mrf.mxu1 }
  0xd7   : > { %v747_v55 = vsel %vm698_vm0, %v744_v25, %v746_v43  ;;  %v7508_v25 = vld [vmem:[%s7160_s24 + $0xd0] sm:$0xff] }
  0xd8   : > { %5952 = vmatmul.msk.f32.gmra.mxu0 %vm764_vm1, %v739_v49 }
  0xd9   : > { %5984 = vmatmul.msk.f32.gmra.mxu1 %vm764_vm1, %v739_v49  ;;  %6016 = vmatmul.msk.f32.gmra.mxu2 %vm764_vm1, %v7403_v27 }
  0xda   : > { %6047 = vmatmul.msk.f32.gmra.mxu3 %vm764_vm1, %v7388_v16 }
  0xdc   : > { %v1145_v57 = vpop.f32.mrf.mxu2 }
  0xdd   : > { %v7442_v58 = vadd.f32 %v1145_v57, %v855_v48  ;;  %v1255_v60 = vpop.f32.mrf.mxu3  ;;  %v858_v61 = vpop.f32.mrf.mxu0 }
  0xde   : > { %v7445_v0 = vadd.f32 %v1255_v60, %v965_v39  ;;  %v971_v2 = vpop.f32.mrf.mxu1 }
  0xe0   : > { %5953 = vmatmul.msk.f32.gmra.mxu0 %vm764_vm1, %v741_v63 }
  0xe1   : > { %5985 = vmatmul.msk.f32.gmra.mxu1 %vm764_vm1, %v741_v63  ;;  %6017 = vmatmul.msk.f32.gmra.mxu2 %vm764_vm1, %v7418_v40 }
  0xe2   : > { %6048 = vmatmul.msk.f32.gmra.mxu3 %vm764_vm1, %v7403_v27 }
  0xe4   : > { %v1148_v6 = vpop.f32.mrf.mxu2 }
  0xe5   : > { %v7457_v8 = vadd.f32 %v1148_v6, %v858_v61  ;;  %v1258_v9 = vpop.f32.mrf.mxu3  ;;  %v861_v11 = vpop.f32.mrf.mxu0  ;;  %v7493_v61 = vld [vmem:[%s7160_s24 + $0xc8] sm:$0xff] }
  0xe6   : > { %v7460_v17 = vadd.f32 %v1258_v9, %v968_v52  ;;  %v974_v20 = vpop.f32.mrf.mxu1  ;;  %v748_v63 = vrot.slane %v7493_v61, 1 }
  0xe8   : > { %5954 = vmatmul.msk.f32.gmra.mxu0 %vm764_vm1, %v743_v15 }
  0xe9   : > { %5986 = vmatmul.msk.f32.gmra.mxu1 %vm764_vm1, %v743_v15  ;;  %6018 = vmatmul.msk.f32.gmra.mxu2 %vm764_vm1, %v7433_v54 }
  0xea   : > { %6049 = vmatmul.msk.f32.gmra.mxu3 %vm764_vm1, %v7418_v40 }
  0xec   : > { %v1151_v26 = vpop.f32.mrf.mxu2 }
  0xed   : > { %v7472_v28 = vadd.f32 %v1151_v26, %v861_v11  ;;  %v1261_v30 = vpop.f32.mrf.mxu3  ;;  %v864_v33 = vpop.f32.mrf.mxu0  ;;  %v749_v11 = vsel %vm698_vm0, %v746_v43, %v748_v63  ;;  %v750_v26 = vrot.slane %v7508_v25, 1 }
  0xee   : > { %v7475_v36 = vadd.f32 %v1261_v30, %v971_v2  ;;  %v977_v39 = vpop.f32.mrf.mxu1  ;;  %v6067_v30 = vld [vmem:[%s11245_s19 + $0xb0] sm:$0xff] }
  0xef   : > { %1496 = vmatpush.msrb.mxu0 %v6067_v30 }
  0xf0   : > { %5955 = vmatmul.msk.f32.gmra.mxu0 %vm764_vm1, %v745_v34 }
  0xf1   : > { %5987 = vmatmul.msk.f32.gmra.mxu1 %vm764_vm1, %v745_v34  ;;  %6019 = vmatmul.msk.f32.gmra.mxu2 %vm764_vm1, %v7448_v3 }
  0xf2   : > { %6050 = vmatmul.msk.f32.gmra.mxu3 %vm764_vm1, %v7433_v54 }
  0xf4   : > { %v1154_v46 = vpop.f32.mrf.mxu2 }
  0xf5   : > { %v7487_v48 = vadd.f32 %v1154_v46, %v864_v33  ;;  %v1264_v49 = vpop.f32.mrf.mxu3  ;;  %v867_v52 = vpop.f32.mrf.mxu0  ;;  %v6068_v33 = vld [vmem:[%s11245_s19 + $0xb8] sm:$0xff] }
  0xf6   : > { %v7490_v57 = vadd.f32 %v1264_v49, %v974_v20  ;;  %v980_v60 = vpop.f32.mrf.mxu1  ;;  %1609 = vmatpush.msrb.mxu1 %v6068_v33  ;;  %v751_v49 = vsel %vm698_vm0, %v748_v63, %v750_v26 }
  0xf8   : > { %5956 = vmatmul.msk.f32.gmra.mxu0 %vm764_vm1, %v747_v55 }
  0xf9   : > { %5988 = vmatmul.msk.f32.gmra.mxu1 %vm764_vm1, %v747_v55  ;;  %6020 = vmatmul.msk.f32.gmra.mxu2 %vm764_vm1, %v7463_v24 }
  0xfa   : > { %6051 = vmatmul.msk.f32.gmra.mxu3 %vm764_vm1, %v7448_v3 }
  0xfc   : > { %v1157_v2 = vpop.f32.mrf.mxu2 }
  0xfd   : > { %v7502_v5 = vadd.f32 %v1157_v2, %v867_v52  ;;  %v1267_v6 = vpop.f32.mrf.mxu3  ;;  %v870_v9 = vpop.f32.mrf.mxu0  ;;  %v7529_v2 = vld [vmem:[%s7160_s24 + $0xd8] sm:$0xff] }
  0xfe   : > { %v7505_v15 = vadd.f32 %v1267_v6, %v977_v39  ;;  %v983_v20 = vpop.f32.mrf.mxu1  ;;  %v752_v6 = vrot.slane %v7529_v2, 1 }
 0x100   : > { %5957 = vmatmul.msk.f32.gmra.mxu0 %vm764_vm1, %v749_v11  ;;  %v753_v30 = vsel %vm698_vm0, %v750_v26, %v752_v6 }
 0x101   : > { %5989 = vmatmul.msk.f32.gmra.mxu1 %vm764_vm1, %v749_v11  ;;  %6021 = vmatmul.msk.f32.gmra.mxu2 %vm764_vm1, %v7478_v42 }
 0x102   : > { %6052 = vmatmul.msk.f32.gmra.mxu3 %vm764_vm1, %v7463_v24 }
 0x104   : > { %v1160_v34 = vpop.f32.mrf.mxu2 }
 0x105   : > { %v7523_v39 = vadd.f32 %v1160_v34, %v870_v9  ;;  %v1270_v43 = vpop.f32.mrf.mxu3  ;;  %v873_v46 = vpop.f32.mrf.mxu0 }
 0x106   : > { %v7526_v52 = vadd.f32 %v1270_v43, %v980_v60  ;;  %v986_v55 = vpop.f32.mrf.mxu1  ;;  %v7544_v43 = vld [vmem:[%s7160_s24 + $0xe0] sm:$0xff] }
 0x107   : > { %11248 = vst [vmem:[#allocation23_spill] sm:$0xff] %v7523_v39  ;;  %v6064_v39 = vld [vmem:[%s11245_s19 + $0x98] sm:$0xff] }
 0x108   : > { %5958 = vmatmul.msk.f32.gmra.mxu0 %vm764_vm1, %v751_v49 }
 0x109   : > { %5990 = vmatmul.msk.f32.gmra.mxu1 %vm764_vm1, %v751_v49  ;;  %6022 = vmatmul.msk.f32.gmra.mxu2 %vm764_vm1, %v7493_v61 }
 0x10a   : > { %6053 = vmatmul.msk.f32.gmra.mxu3 %vm764_vm1, %v7478_v42 }
 0x10c   : > { %v1163_v9 = vpop.f32.mrf.mxu2 }
 0x10d   : > { %v7538_v63 = vadd.f32 %v1163_v9, %v873_v46  ;;  %v1273_v60 = vpop.f32.mrf.mxu3  ;;  %v876_v11 = vpop.f32.mrf.mxu0  ;;  %v754_v46 = vrot.slane %v7544_v43, 1 }
 0x10e   : > { %v7541_v33 = vadd.f32 %v1273_v60, %v983_v20  ;;  %v989_v34 = vpop.f32.mrf.mxu1  ;;  %v6065_v20 = vld [vmem:[%s11245_s19 + $0xa0] sm:$0xff] }
 0x10f   : > { %11249 = vst [vmem:[#allocation24_spill] sm:$0xff] %v7538_v63  ;;  %v755_v10 = vsel %vm698_vm0, %v752_v6, %v754_v46  ;;  %1497 = vmatpush.msrb.mxu0 %v6065_v20  ;;  %v6139_v6 = vld [vmem:[%s11245_s19 + $0xf0] sm:$0xff] }
 0x110   : > { %11250 = vst [vmem:[#allocation25_spill] sm:$0xff] %v7541_v33  ;;  %5959 = vmatmul.msk.f32.gmra.mxu0 %vm764_vm1, %v753_v30  ;;  %v6063_v33 = vld [vmem:[%s11245_s19 + $0x90] sm:$0xff]  ;;  %1925 = vmatpush.msrb.mxu2 %v6139_v6 }
 0x111   : > { %5991 = vmatmul.msk.f32.gmra.mxu1 %vm764_vm1, %v753_v30  ;;  %6023 = vmatmul.msk.f32.gmra.mxu2 %vm764_vm1, %v7508_v25  ;;  %v7592_v63 = vld [vmem:[%s7160_s24 + $0xf0] sm:$0xff] }
 0x112   : > { %6054 = vmatmul.msk.f32.gmra.mxu3 %vm764_vm1, %v7493_v61  ;;  %1498 = vmatpush.msrb.mxu0 %v6063_v33 }
 0x114   : > { %v1166_v49 = vpop.f32.mrf.mxu2 }
 0x115   : > { %v7556_v26 = vadd.f32 %v1166_v49, %v876_v11  ;;  %v1276_v9 = vpop.f32.mrf.mxu3  ;;  %v879_v60 = vpop.f32.mrf.mxu0  ;;  %v6061_v11 = vld [vmem:[%s11245_s19 + $0x80] sm:$0xff] }
 0x116   : > { %v7559_v30 = vadd.f32 %v1276_v9, %v986_v55  ;;  %v992_v19 = vpop.f32.mrf.mxu1  ;;  %v756_v55 = vrot.slane %v7562_v18, 1  ;;  %1499 = vmatpush.msrb.mxu0 %v6061_v11  ;;  %v6137_v49 = vld [vmem:[%s11245_s19 + $0xe0] sm:$0xff] }
 0x117   : > { %11251 = vst [vmem:[#allocation26_spill] sm:$0xff] %v7556_v26  ;;  %1926 = vmatpush.msrb.mxu2 %v6137_v49  ;;  %v6138_v49 = vld [vmem:[%s11245_s19 + $0xe8] sm:$0xff] }
 0x118   : > { %11252 = vst [vmem:[#allocation27_spill] sm:$0xff] %v7559_v30  ;;  %5960 = vmatmul.msk.f32.gmra.mxu0 %vm764_vm1, %v755_v10  ;;  %v757_v11 = vsel %vm698_vm0, %v754_v46, %v756_v55  ;;  %v6062_v46 = vld [vmem:[%s11245_s19 + $0x88] sm:$0xff] }
 0x119   : > { %5992 = vmatmul.msk.f32.gmra.mxu1 %vm764_vm1, %v755_v10  ;;  %6024 = vmatmul.msk.f32.gmra.mxu2 %vm764_vm1, %v7529_v2  ;;  %v6066_v10 = vld [vmem:[%s11245_s19 + $0xa8] sm:$0xff] }
 0x11a   : > { %6055 = vmatmul.msk.f32.gmra.mxu3 %vm764_vm1, %v7508_v25  ;;  %1610 = vmatpush.msrb.mxu1 %v6066_v10 }
 0x11c   : > { %v1169_v33 = vpop.f32.mrf.mxu2  ;;  %1611 = vmatpush.msrb.mxu1 %v6064_v39  ;;  %v6140_v39 = vld [vmem:[%s11245_s19 + $0xf8] sm:$0xff] }
 0x11d   : > { %v7586_v20 = vadd.f32 %v1169_v33, %v879_v60  ;;  %v1279_v9 = vpop.f32.mrf.mxu3  ;;  %v882_v30 = vpop.f32.mrf.mxu0  ;;  %v6135_v60 = vld [vmem:[%s11245_s19 + $0xd0] sm:$0xff]  ;;  %v758_v33 = vrot.slane %v7592_v63, 1  ;;  %2038 = vmatpush.msra.mxu3 %v6140_v39 }
 0x11e   : > { %v7589_v26 = vadd.f32 %v1279_v9, %v989_v34  ;;  %v995_v6 = vpop.f32.mrf.mxu1  ;;  %1927 = vmatpush.msrb.mxu2 %v6135_v60  ;;  %v6133_v34 = vld [vmem:[%s11245_s19 + $0xc0] sm:$0xff]  ;;  %1612 = vmatpush.msrb.mxu1 %v6062_v46 }
 0x11f   : > { %11253 = vst [vmem:[#allocation28_spill] sm:$0xff] %v7586_v20  ;;  %2039 = vmatpush.msra.mxu3 %v6138_v49  ;;  %v11258_v49 = vrot.slane %v7182_v14, 1 }
 0x120   : > { %11254 = vst [vmem:[#allocation29_spill] sm:$0xff] %v7589_v26  ;;  %5961 = vmatmul.msk.f32.gmra.mxu0 %vm764_vm1, %v757_v11  ;;  %1928 = vmatpush.msrb.mxu2 %v6133_v34  ;;  %v759_v26 = vsel %vm698_vm0, %v756_v55, %v758_v33  ;;  %v6136_v34 = vld [vmem:[%s11245_s19 + $0xd8] sm:$0xff] }
 0x121   : > { %5993 = vmatmul.msk.f32.gmra.mxu1 %vm764_vm1, %v757_v11  ;;  %6025 = vmatmul.msk.f32.gmra.mxu2 %vm764_vm1, %v7544_v43 }
 0x122   : > { %6056 = vmatmul.msk.f32.gmra.mxu3 %vm764_vm1, %v7529_v2 }
 0x123   : > { %2040 = vmatpush.msra.mxu3 %v6136_v34 }
 0x124   : > { %v1172_v10 = vpop.f32.mrf.mxu2 }
 0x125   : > { %v7619_v9 = vadd.f32 %v1172_v10, %v882_v30  ;;  %v1282_v11 = vpop.f32.mrf.mxu3  ;;  %v885_v60 = vpop.f32.mrf.mxu0  ;;  %v6134_v30 = vld [vmem:[%s11245_s19 + $0xc8] sm:$0xff] }
 0x126   : > { %v7622_v20 = vadd.f32 %v1282_v11, %v992_v19  ;;  %v998_v46 = vpop.f32.mrf.mxu1  ;;  %2041 = vmatpush.msra.mxu3 %v6134_v30  ;;  %v761_v11 = vsel %vm698_vm0, %v758_v33, %v11258_v49 }
 0x127   : > { %11255 = vst [vmem:[#allocation30_spill] sm:$0xff] %v7619_v9 }
 0x128   : > { %11256 = vst [vmem:[#allocation31_spill] sm:$0xff] %v7622_v20  ;;  %5962 = vmatmul.msk.f32.gmra.mxu0 %vm764_vm1, %v759_v26 }
 0x129   : > { %5994 = vmatmul.msk.f32.gmra.mxu1 %vm764_vm1, %v759_v26  ;;  %6026 = vmatmul.msk.f32.gmra.mxu2 %vm764_vm1, %v7562_v18  ;;  %v1355_v26 = vrot.slane %v7176_v12, 2 }
 0x12a   : > { %6057 = vmatmul.msk.f32.gmra.mxu3 %vm764_vm1, %v7544_v43 }
 0x12c   : > { %v1175_v19 = vpop.f32.mrf.mxu2 }
 0x12d   : > { %v7636_v55 = vadd.f32 %v1175_v19, %v885_v60  ;;  %v1285_v39 = vpop.f32.mrf.mxu3  ;;  %v888_v10 = vpop.f32.mrf.mxu0  ;;  %v1356_v60 = vrot.slane %v7179_v13, 2 }
 0x12e   : > { %v7641_v34 = vadd.f32 %v1285_v39, %v995_v6  ;;  %v1001_v20 = vpop.f32.mrf.mxu1 }
 0x12f   : > { %11257 = vst [vmem:[#allocation32_spill] sm:$0xff] %v7636_v55  ;;  %v1357_v39 = vsel %vm1354_vm2, %v1355_v26, %v1356_v60  ;;  %v1785_v26 = vrot.slane %v7179_v13, 3  ;;  %v1787_v13 = vrot.slane %v7200_v22, 3 }
 0x130   : > { %11259 = vst [vmem:[#allocation33_spill] sm:$0xff] %v7641_v34  ;;  %5963 = vmatmul.msk.f32.gmra.mxu0 %vm764_vm1, %v761_v11  ;;  %v1358_v34 = vrot.slane %v7200_v22, 2  ;;  %v1789_v22 = vrot.slane %v7223_v29, 3 }
 0x131   : > { %5995 = vmatmul.msk.f32.gmra.mxu1 %vm764_vm1, %v761_v11  ;;  %6027 = vmatmul.msk.f32.gmra.mxu2 %vm764_vm1, %v7592_v63 }
 0x132   : > { %6058 = vmatmul.msk.f32.gmra.mxu3 %vm764_vm1, %v7562_v18 }
 0x134   : > { %v1178_v30 = vpop.f32.mrf.mxu2 }
 0x135   : > { %v7651_v33 = vadd.f32 %v1178_v30, %v888_v10  ;;  %v1288_v6 = vpop.f32.mrf.mxu3  ;;  %v891_v19 = vpop.f32.mrf.mxu0  ;;  %v1784_v10 = vrot.slane %v7176_v12, 3  ;;  %v1360_v12 = vrot.slane %v7223_v29, 2  ;;  %v1364_v29 = vrot.slane %v7245_v35, 2 }
 0x136   : > { %v7654_v49 = vadd.f32 %v1288_v6, %v998_v46  ;;  %v1004_v11 = vpop.f32.mrf.mxu1 }
 0x137   : > { %11260 = vst [vmem:[#allocation34_spill] sm:$0xff] %v7651_v33  ;;  %v1786_v9 = vsel %vm1783_vm3, %v1784_v10, %v1785_v26  ;;  %v1361_v10 = vsel %vm1354_vm2, %v1358_v34, %v1360_v12 }
 0x138   : > { %11261 = vst [vmem:[#allocation35_spill] sm:$0xff] %v7654_v49  ;;  %6069 = vmatmul.msk.f32.vlgmr.msrb.gmra.mxu0 %vm764_vm1, %v1357_v39 }
 0x139   : > { %5996 = vmatmul.msk.f32.gmra.mxu1 %vm764_vm1, %v7197_v21  ;;  %6028 = vmatmul.msk.f32.gmra.mxu2 %vm764_vm1, %v7182_v14  ;;  %v1359_v21 = vsel %vm1354_vm2, %v1356_v60, %v1358_v34 }
 0x13a   : > { %6059 = vmatmul.msk.f32.gmra.mxu3 %vm764_vm1, %v7592_v63 }
 0x13c   : > { %v1181_v46 = vpop.f32.mrf.mxu2 }
 0x13d   : > { %v7666_v30 = vadd.f32 %v1181_v46, %v891_v19  ;;  %v1291_v6 = vpop.f32.mrf.mxu3  ;;  %v894_v49 = vpop.f32.mrf.mxu0 }
 0x13e   : > { %v7669_v33 = vadd.f32 %v1291_v6, %v1001_v20  ;;  %v1007_v55 = vpop.f32.mrf.mxu1 }
 0x140   : > { %11262 = vst [vmem:[#allocation36_spill] sm:$0xff] %v7669_v33  ;;  %6070 = vmatmul.msk.f32.gmra.mxu0 %vm764_vm1, %v1359_v21 }
 0x141   : > { %6101 = vmatmul.msk.f32.vlgmr.msrb.gmra.mxu1 %vm764_vm1, %v1357_v39  ;;  %6141 = vmatmul.msk.f32.vlgmr.msrb.gmra.mxu2 %vm764_vm1, %v1786_v9  ;;  %v1788_v39 = vsel %vm1783_vm3, %v1785_v26, %v1787_v13 }
 0x142   : > { %6060 = vmatmul.msk.f32.gmra.mxu3 %vm764_vm1, %v7182_v14  ;;  %v1362_v14 = vrot.slane %v7234_v32, 2 }
 0x144   : > { %v1184_v19 = vpop.f32.mrf.mxu2 }
 0x145   : > { %v7679_v60 = vadd.f32 %v1184_v19, %v894_v49  ;;  %v1294_v20 = vpop.f32.mrf.mxu3  ;;  %v897_v46 = vpop.f32.mrf.mxu0 }
 0x146   : > { %v7682_v6 = vadd.f32 %v1294_v20, %v1004_v11  ;;  %v1010_v33 = vpop.f32.mrf.mxu1  ;;  %v1363_v20 = vsel %vm1354_vm2, %v1360_v12, %v1362_v14 }
 0x148   : > { %11263 = vst [vmem:[#allocation37_spill] sm:$0xff] %v7682_v6  ;;  %6071 = vmatmul.msk.f32.gmra.mxu0 %vm764_vm1, %v1361_v10 }
 0x149   : > { %6102 = vmatmul.msk.f32.gmra.mxu1 %vm764_vm1, %v1359_v21  ;;  %6142 = vmatmul.msk.f32.gmra.mxu2 %vm764_vm1, %v1788_v39  ;;  %v1790_v21 = vsel %vm1783_vm3, %v1787_v13, %v1789_v22 }
 0x14a   : > { %6173 = vmatmul.msk.f32.vlgmr.msra.gmra.mxu3 %vm764_vm1, %v1786_v9  ;;  %v1791_v9 = vrot.slane %v7234_v32, 3  ;;  %v1366_v32 = vrot.slane %v7256_v38, 2 }
 0x14c   : > { %v1187_v49 = vpop.f32.mrf.mxu2 }
 0x14d   : > { %v7691_v19 = vadd.f32 %v1187_v49, %v897_v46  ;;  %v1297_v34 = vpop.f32.mrf.mxu3  ;;  %v900_v11 = vpop.f32.mrf.mxu0 }
 0x14e   : > { %v7694_v26 = vadd.f32 %v1297_v34, %v1007_v55  ;;  %v1013_v6 = vpop.f32.mrf.mxu1  ;;  %v1365_v34 = vsel %vm1354_vm2, %v1362_v14, %v1364_v29 }
 0x150   : > { %11264 = vst [vmem:[#allocation38_spill] sm:$0xff] %v7694_v26  ;;  %6072 = vmatmul.msk.f32.gmra.mxu0 %vm764_vm1, %v1363_v20 }
 0x151   : > { %6103 = vmatmul.msk.f32.gmra.mxu1 %vm764_vm1, %v1361_v10  ;;  %6143 = vmatmul.msk.f32.gmra.mxu2 %vm764_vm1, %v1790_v21  ;;  %v1792_v10 = vsel %vm1783_vm3, %v1789_v22, %v1791_v9 }
 0x152   : > { %6174 = vmatmul.msk.f32.gmra.mxu3 %vm764_vm1, %v1788_v39  ;;  %v1793_v39 = vrot.slane %v7245_v35, 3  ;;  %v1368_v35 = vrot.slane %v7267_v41, 2 }
 0x154   : > { %v1190_v46 = vpop.f32.mrf.mxu2 }
 0x155   : > { %v7703_v49 = vadd.f32 %v1190_v46, %v900_v11  ;;  %v1300_v55 = vpop.f32.mrf.mxu3  ;;  %v903_v12 = vpop.f32.mrf.mxu0 }
 0x156   : > { %v7706_v13 = vadd.f32 %v1300_v55, %v1010_v33  ;;  %v1016_v26 = vpop.f32.mrf.mxu1  ;;  %v1367_v55 = vsel %vm1354_vm2, %v1364_v29, %v1366_v32 }
 0x158   : > { %11265 = vst [vmem:[#allocation39_spill] sm:$0xff] %v7706_v13  ;;  %6073 = vmatmul.msk.f32.gmra.mxu0 %vm764_vm1, %v1365_v34 }
 0x159   : > { %6104 = vmatmul.msk.f32.gmra.mxu1 %vm764_vm1, %v1363_v20  ;;  %6144 = vmatmul.msk.f32.gmra.mxu2 %vm764_vm1, %v1792_v10  ;;  %v1794_v20 = vsel %vm1783_vm3, %v1791_v9, %v1793_v39 }
 0x15a   : > { %6175 = vmatmul.msk.f32.gmra.mxu3 %vm764_vm1, %v1790_v21  ;;  %v1795_v21 = vrot.slane %v7256_v38, 3  ;;  %v1370_v38 = vrot.slane %v7278_v44, 2 }
 0x15c   : > { %v1193_v11 = vpop.f32.mrf.mxu2 }
 0x15d   : > { %v7715_v46 = vadd.f32 %v1193_v11, %v903_v12  ;;  %v1303_v33 = vpop.f32.mrf.mxu3  ;;  %v906_v14 = vpop.f32.mrf.mxu0 }
 0x15e   : > { %v7718_v22 = vadd.f32 %v1303_v33, %v1013_v6  ;;  %v1019_v13 = vpop.f32.mrf.mxu1  ;;  %v1369_v33 = vsel %vm1354_vm2, %v1366_v32, %v1368_v35 }
 0x160   : > { %11266 = vst [vmem:[#allocation40_spill] sm:$0xff] %v7718_v22  ;;  %6074 = vmatmul.msk.f32.gmra.mxu0 %vm764_vm1, %v1367_v55 }
 0x161   : > { %6105 = vmatmul.msk.f32.gmra.mxu1 %vm764_vm1, %v1365_v34  ;;  %6145 = vmatmul.msk.f32.gmra.mxu2 %vm764_vm1, %v1794_v20  ;;  %v1796_v34 = vsel %vm1783_vm3, %v1793_v39, %v1795_v21 }
 0x162   : > { %6176 = vmatmul.msk.f32.gmra.mxu3 %vm764_vm1, %v1792_v10  ;;  %v1797_v10 = vrot.slane %v7267_v41, 3  ;;  %v1372_v41 = vrot.slane %v7289_v47, 2 }
 0x164   : > { %v1196_v12 = vpop.f32.mrf.mxu2 }
 0x165   : > { %v7727_v11 = vadd.f32 %v1196_v12, %v906_v14  ;;  %v1306_v6 = vpop.f32.mrf.mxu3  ;;  %v909_v29 = vpop.f32.mrf.mxu0 }
 0x166   : > { %v7730_v9 = vadd.f32 %v1306_v6, %v1016_v26  ;;  %v1022_v22 = vpop.f32.mrf.mxu1  ;;  %v1371_v6 = vsel %vm1354_vm2, %v1368_v35, %v1370_v38 }
 0x167   : > { %11267 = vst [vmem:[#allocation41_spill] sm:$0xff] %v7727_v11 }
 0x168   : > { %11268 = vst [vmem:[#allocation42_spill] sm:$0xff] %v7730_v9  ;;  %6075 = vmatmul.msk.f32.gmra.mxu0 %vm764_vm1, %v1369_v33 }
 0x169   : > { %6106 = vmatmul.msk.f32.gmra.mxu1 %vm764_vm1, %v1367_v55  ;;  %6146 = vmatmul.msk.f32.gmra.mxu2 %vm764_vm1, %v1796_v34  ;;  %v1798_v55 = vsel %vm1783_vm3, %v1795_v21, %v1797_v10 }
 0x16a   : > { %6177 = vmatmul.msk.f32.gmra.mxu3 %vm764_vm1, %v1794_v20  ;;  %v1799_v20 = vrot.slane %v7278_v44, 3  ;;  %v1374_v44 = vrot.slane %v7300_v50, 2 }
 0x16c   : > { %v1199_v14 = vpop.f32.mrf.mxu2 }
 0x16d   : > { %v7739_v12 = vadd.f32 %v1199_v14, %v909_v29  ;;  %v1309_v26 = vpop.f32.mrf.mxu3  ;;  %v912_v32 = vpop.f32.mrf.mxu0 }
 0x16e   : > { %v7742_v39 = vadd.f32 %v1309_v26, %v1019_v13  ;;  %v1025_v9 = vpop.f32.mrf.mxu1  ;;  %v1373_v26 = vsel %vm1354_vm2, %v1370_v38, %v1372_v41 }
 0x16f   : > { %11269 = vst [vmem:[#allocation43_spill] sm:$0xff] %v7739_v12 }
 0x170   : > { %11270 = vst [vmem:[#allocation44_spill] sm:$0xff] %v7742_v39  ;;  %6076 = vmatmul.msk.f32.gmra.mxu0 %vm764_vm1, %v1371_v6 }
 0x171   : > { %6107 = vmatmul.msk.f32.gmra.mxu1 %vm764_vm1, %v1369_v33  ;;  %6147 = vmatmul.msk.f32.gmra.mxu2 %vm764_vm1, %v1798_v55  ;;  %v1800_v33 = vsel %vm1783_vm3, %v1797_v10, %v1799_v20 }
 0x172   : > { %6178 = vmatmul.msk.f32.gmra.mxu3 %vm764_vm1, %v1796_v34  ;;  %v1801_v34 = vrot.slane %v7289_v47, 3  ;;  %v1376_v47 = vrot.slane %v7311_v53, 2 }
 0x174   : > { %v1202_v29 = vpop.f32.mrf.mxu2 }
 0x175   : > { %v7751_v14 = vadd.f32 %v1202_v29, %v912_v32  ;;  %v1312_v13 = vpop.f32.mrf.mxu3  ;;  %v915_v35 = vpop.f32.mrf.mxu0 }
 0x176   : > { %v7754_v21 = vadd.f32 %v1312_v13, %v1022_v22  ;;  %v1028_v39 = vpop.f32.mrf.mxu1  ;;  %v1375_v13 = vsel %vm1354_vm2, %v1372_v41, %v1374_v44 }
 0x177   : > { %11271 = vst [vmem:[#allocation45_spill] sm:$0xff] %v7751_v14 }
 0x178   : > { %11272 = vst [vmem:[#allocation46_spill] sm:$0xff] %v7754_v21  ;;  %6077 = vmatmul.msk.f32.gmra.mxu0 %vm764_vm1, %v1373_v26 }
 0x179   : > { %6108 = vmatmul.msk.f32.gmra.mxu1 %vm764_vm1, %v1371_v6  ;;  %6148 = vmatmul.msk.f32.gmra.mxu2 %vm764_vm1, %v1800_v33  ;;  %v1802_v6 = vsel %vm1783_vm3, %v1799_v20, %v1801_v34 }
 0x17a   : > { %6179 = vmatmul.msk.f32.gmra.mxu3 %vm764_vm1, %v1798_v55  ;;  %v1803_v55 = vrot.slane %v7300_v50, 3  ;;  %v1378_v50 = vrot.slane %v7322_v56, 2 }
 0x17c   : > { %v1205_v32 = vpop.f32.mrf.mxu2 }
 0x17d   : > { %v7763_v29 = vadd.f32 %v1205_v32, %v915_v35  ;;  %v1315_v22 = vpop.f32.mrf.mxu3  ;;  %v918_v38 = vpop.f32.mrf.mxu0 }
 0x17e   : > { %v7766_v10 = vadd.f32 %v1315_v22, %v1025_v9  ;;  %v1031_v21 = vpop.f32.mrf.mxu1  ;;  %v1377_v22 = vsel %vm1354_vm2, %v1374_v44, %v1376_v47 }
 0x17f   : > { %11273 = vst [vmem:[#allocation47_spill] sm:$0xff] %v7763_v29 }
 0x180   : > { %11274 = vst [vmem:[#allocation48_spill] sm:$0xff] %v7766_v10  ;;  %6078 = vmatmul.msk.f32.gmra.mxu0 %vm764_vm1, %v1375_v13 }
 0x181   : > { %6109 = vmatmul.msk.f32.gmra.mxu1 %vm764_vm1, %v1373_v26  ;;  %6149 = vmatmul.msk.f32.gmra.mxu2 %vm764_vm1, %v1802_v6  ;;  %v1804_v26 = vsel %vm1783_vm3, %v1801_v34, %v1803_v55 }
 0x182   : > { %6180 = vmatmul.msk.f32.gmra.mxu3 %vm764_vm1, %v1800_v33  ;;  %v1805_v33 = vrot.slane %v7311_v53, 3  ;;  %v1380_v53 = vrot.slane %v7333_v59, 2 }
 0x184   : > { %v1208_v35 = vpop.f32.mrf.mxu2 }
 0x185   : > { %v7775_v32 = vadd.f32 %v1208_v35, %v918_v38  ;;  %v1318_v9 = vpop.f32.mrf.mxu3  ;;  %v921_v41 = vpop.f32.mrf.mxu0 }
 0x186   : > { %v7778_v20 = vadd.f32 %v1318_v9, %v1028_v39  ;;  %v1034_v10 = vpop.f32.mrf.mxu1  ;;  %v1379_v9 = vsel %vm1354_vm2, %v1376_v47, %v1378_v50 }
 0x187   : > { %11275 = vst [vmem:[#allocation49_spill] sm:$0xff] %v7775_v32 }
 0x188   : > { %11276 = vst [vmem:[#allocation50_spill] sm:$0xff] %v7778_v20  ;;  %6079 = vmatmul.msk.f32.gmra.mxu0 %vm764_vm1, %v1377_v22 }
 0x189   : > { %6110 = vmatmul.msk.f32.gmra.mxu1 %vm764_vm1, %v1375_v13  ;;  %6150 = vmatmul.msk.f32.gmra.mxu2 %vm764_vm1, %v1804_v26  ;;  %v1806_v13 = vsel %vm1783_vm3, %v1803_v55, %v1805_v33 }
 0x18a   : > { %6181 = vmatmul.msk.f32.gmra.mxu3 %vm764_vm1, %v1802_v6  ;;  %v1807_v6 = vrot.slane %v7322_v56, 3  ;;  %v1382_v56 = vrot.slane %v7344_v62, 2 }
 0x18c   : > { %v1211_v38 = vpop.f32.mrf.mxu2 }
 0x18d   : > { %v7787_v35 = vadd.f32 %v1211_v38, %v921_v41  ;;  %v1321_v39 = vpop.f32.mrf.mxu3  ;;  %v924_v44 = vpop.f32.mrf.mxu0 }
 0x18e   : > { %v7790_v34 = vadd.f32 %v1321_v39, %v1031_v21  ;;  %v1037_v20 = vpop.f32.mrf.mxu1  ;;  %v1381_v39 = vsel %vm1354_vm2, %v1378_v50, %v1380_v53 }
 0x18f   : > { %11277 = vst [vmem:[#allocation51_spill] sm:$0xff] %v7787_v35 }
 0x190   : > { %11278 = vst [vmem:[#allocation52_spill] sm:$0xff] %v7790_v34  ;;  %6080 = vmatmul.msk.f32.gmra.mxu0 %vm764_vm1, %v1379_v9 }
 0x191   : > { %6111 = vmatmul.msk.f32.gmra.mxu1 %vm764_vm1, %v1377_v22  ;;  %6151 = vmatmul.msk.f32.gmra.mxu2 %vm764_vm1, %v1806_v13  ;;  %v1808_v22 = vsel %vm1783_vm3, %v1805_v33, %v1807_v6 }
 0x192   : > { %6182 = vmatmul.msk.f32.gmra.mxu3 %vm764_vm1, %v1804_v26  ;;  %v1809_v26 = vrot.slane %v7333_v59, 3  ;;  %v1384_v59 = vrot.slane %v7355_v1, 2 }
 0x194   : > { %v1214_v41 = vpop.f32.mrf.mxu2 }
 0x195   : > { %v7799_v38 = vadd.f32 %v1214_v41, %v924_v44  ;;  %v1324_v21 = vpop.f32.mrf.mxu3  ;;  %v927_v47 = vpop.f32.mrf.mxu0 }
 0x196   : > { %v7802_v55 = vadd.f32 %v1324_v21, %v1034_v10  ;;  %v1040_v34 = vpop.f32.mrf.mxu1  ;;  %v1383_v21 = vsel %vm1354_vm2, %v1380_v53, %v1382_v56 }
 0x197   : > { %11279 = vst [vmem:[#allocation53_spill] sm:$0xff] %v7799_v38 }
 0x198   : > { %11280 = vst [vmem:[#allocation54_spill] sm:$0xff] %v7802_v55  ;;  %6081 = vmatmul.msk.f32.gmra.mxu0 %vm764_vm1, %v1381_v39 }
 0x199   : > { %6112 = vmatmul.msk.f32.gmra.mxu1 %vm764_vm1, %v1379_v9  ;;  %6152 = vmatmul.msk.f32.gmra.mxu2 %vm764_vm1, %v1808_v22  ;;  %v1810_v9 = vsel %vm1783_vm3, %v1807_v6, %v1809_v26 }
 0x19a   : > { %6183 = vmatmul.msk.f32.gmra.mxu3 %vm764_vm1, %v1806_v13  ;;  %v1811_v13 = vrot.slane %v7344_v62, 3  ;;  %v1386_v62 = vrot.slane %v7366_v4, 2 }
 0x19c   : > { %v1217_v44 = vpop.f32.mrf.mxu2 }
 0x19d   : > { %v7811_v41 = vadd.f32 %v1217_v44, %v927_v47  ;;  %v1327_v10 = vpop.f32.mrf.mxu3  ;;  %v930_v50 = vpop.f32.mrf.mxu0 }
 0x19e   : > { %v7814_v33 = vadd.f32 %v1327_v10, %v1037_v20  ;;  %v1043_v55 = vpop.f32.mrf.mxu1  ;;  %v1385_v10 = vsel %vm1354_vm2, %v1382_v56, %v1384_v59 }
 0x19f   : > { %11281 = vst [vmem:[#allocation55_spill] sm:$0xff] %v7811_v41 }
 0x1a0   : > { %11282 = vst [vmem:[#allocation56_spill] sm:$0xff] %v7814_v33  ;;  %6082 = vmatmul.msk.f32.gmra.mxu0 %vm764_vm1, %v1383_v21 }
 0x1a1   : > { %6113 = vmatmul.msk.f32.gmra.mxu1 %vm764_vm1, %v1381_v39  ;;  %6153 = vmatmul.msk.f32.gmra.mxu2 %vm764_vm1, %v1810_v9  ;;  %v1812_v39 = vsel %vm1783_vm3, %v1809_v26, %v1811_v13 }
 0x1a2   : > { %6184 = vmatmul.msk.f32.gmra.mxu3 %vm764_vm1, %v1808_v22  ;;  %v1813_v22 = vrot.slane %v7355_v1, 3  ;;  %v1388_v1 = vrot.slane %v7377_v7, 2 }
 0x1a4   : > { %v1220_v47 = vpop.f32.mrf.mxu2 }
 0x1a5   : > { %v7823_v44 = vadd.f32 %v1220_v47, %v930_v50  ;;  %v1330_v20 = vpop.f32.mrf.mxu3  ;;  %v933_v53 = vpop.f32.mrf.mxu0 }
 0x1a6   : > { %v7826_v6 = vadd.f32 %v1330_v20, %v1040_v34  ;;  %v1046_v33 = vpop.f32.mrf.mxu1  ;;  %v1387_v20 = vsel %vm1354_vm2, %v1384_v59, %v1386_v62 }
 0x1a7   : > { %11283 = vst [vmem:[#allocation57_spill] sm:$0xff] %v7823_v44 }
 0x1a8   : > { %11284 = vst [vmem:[#allocation58_spill] sm:$0xff] %v7826_v6  ;;  %6083 = vmatmul.msk.f32.gmra.mxu0 %vm764_vm1, %v1385_v10 }
 0x1a9   : > { %6114 = vmatmul.msk.f32.gmra.mxu1 %vm764_vm1, %v1383_v21  ;;  %6154 = vmatmul.msk.f32.gmra.mxu2 %vm764_vm1, %v1812_v39  ;;  %v1814_v21 = vsel %vm1783_vm3, %v1811_v13, %v1813_v22 }
 0x1aa   : > { %6185 = vmatmul.msk.f32.gmra.mxu3 %vm764_vm1, %v1810_v9  ;;  %v1815_v9 = vrot.slane %v7366_v4, 3  ;;  %v1390_v4 = vrot.slane %v7388_v16, 2 }
 0x1ac   : > { %v1223_v50 = vpop.f32.mrf.mxu2 }
 0x1ad   : > { %v7835_v47 = vadd.f32 %v1223_v50, %v933_v53  ;;  %v1333_v34 = vpop.f32.mrf.mxu3  ;;  %v936_v56 = vpop.f32.mrf.mxu0 }
 0x1ae   : > { %v7838_v26 = vadd.f32 %v1333_v34, %v1043_v55  ;;  %v1049_v6 = vpop.f32.mrf.mxu1  ;;  %v1389_v34 = vsel %vm1354_vm2, %v1386_v62, %v1388_v1 }
 0x1af   : > { %11285 = vst [vmem:[#allocation59_spill] sm:$0xff] %v7835_v47 }
 0x1b0   : > { %11286 = vst [vmem:[#allocation60_spill] sm:$0xff] %v7838_v26  ;;  %6084 = vmatmul.msk.f32.gmra.mxu0 %vm764_vm1, %v1387_v20 }
 0x1b1   : > { %6115 = vmatmul.msk.f32.gmra.mxu1 %vm764_vm1, %v1385_v10  ;;  %6155 = vmatmul.msk.f32.gmra.mxu2 %vm764_vm1, %v1814_v21  ;;  %v1816_v10 = vsel %vm1783_vm3, %v1813_v22, %v1815_v9 }
 0x1b2   : > { %6186 = vmatmul.msk.f32.gmra.mxu3 %vm764_vm1, %v1812_v39  ;;  %v1817_v39 = vrot.slane %v7377_v7, 3  ;;  %v1819_v7 = vrot.slane %v7388_v16, 3  ;;  %v1394_v16 = vrot.slane %v7418_v40, 2 }
 0x1b4   : > { %v1226_v53 = vpop.f32.mrf.mxu2 }
 0x1b5   : > { %v7847_v50 = vadd.f32 %v1226_v53, %v936_v56  ;;  %v1336_v55 = vpop.f32.mrf.mxu3  ;;  %v1501_v59 = vpop.f32.mrf.mxu0  ;;  %v1391_v53 = vsel %vm1354_vm2, %v1388_v1, %v1390_v4 }
 0x1b6   : > { %v7850_v13 = vadd.f32 %v1336_v55, %v1046_v33  ;;  %v1052_v26 = vpop.f32.mrf.mxu1 }
 0x1b7   : > { %11287 = vst [vmem:[#allocation61_spill] sm:$0xff] %v7847_v50  ;;  %v1820_v50 = vsel %vm1783_vm3, %v1817_v39, %v1819_v7 }
 0x1b8   : > { %11288 = vst [vmem:[#allocation62_spill] sm:$0xff] %v7850_v13  ;;  %6085 = vmatmul.msk.f32.gmra.mxu0 %vm764_vm1, %v1389_v34  ;;  %v1818_v13 = vsel %vm1783_vm3, %v1815_v9, %v1817_v39 }
 0x1b9   : > { %6116 = vmatmul.msk.f32.gmra.mxu1 %vm764_vm1, %v1387_v20  ;;  %6156 = vmatmul.msk.f32.gmra.mxu2 %vm764_vm1, %v1816_v10  ;;  %v1392_v20 = vrot.slane %v7403_v27, 2 }
 0x1ba   : > { %6187 = vmatmul.msk.f32.gmra.mxu3 %vm764_vm1, %v1814_v21  ;;  %v1710_v21 = vadd.f32 %v1501_v59, %v7399_v23  ;;  %v1821_v23 = vrot.slane %v7403_v27, 3  ;;  %v1396_v27 = vrot.slane %v7433_v54, 2 }
 0x1bb   : > { %v1393_v9 = vsel %vm1354_vm2, %v1390_v4, %v1392_v20 }
 0x1bc   : > { %v7859_v56 = vpop.f32.mrf.mxu2 }
 0x1bd   : > { %11289 = vst [vmem:[#allocation63_spill] sm:$0xff] %v7859_v56  ;;  %v1339_v62 = vpop.f32.mrf.mxu3  ;;  %v1504_v33 = vpop.f32.mrf.mxu0 }
 0x1be   : > { %v7862_v55 = vadd.f32 %v1339_v62, %v1049_v6  ;;  %v1614_v22 = vpop.f32.mrf.mxu1  ;;  %v1712_v59 = vadd.f32 %v1504_v33, %v7412_v31  ;;  %v1823_v31 = vrot.slane %v7418_v40, 3  ;;  %v1398_v40 = vrot.slane %v7448_v3, 2 }
 0x1c0   : > { %11290 = vst [vmem:[#allocation64_spill] sm:$0xff] %v7862_v55  ;;  %6086 = vmatmul.msk.f32.gmra.mxu0 %vm764_vm1, %v1391_v53 }
 0x1c1   : > { %6117 = vmatmul.msk.f32.gmra.mxu1 %vm764_vm1, %v1389_v34  ;;  %6157 = vmatmul.msk.f32.gmra.mxu2 %vm764_vm1, %v1818_v13 }
 0x1c2   : > { %6188 = vmatmul.msk.f32.gmra.mxu3 %vm764_vm1, %v1816_v10 }
 0x1c4   : > { %v1930_v1 = vpop.f32.mrf.mxu2 }
 0x1c5   : > { %v1342_v6 = vpop.f32.mrf.mxu3  ;;  %v7872_v62 = vadd.f32 %v1930_v1, %v1710_v21  ;;  %v1507_v55 = vpop.f32.mrf.mxu0  ;;  %v1395_v1 = vsel %vm1354_vm2, %v1392_v20, %v1394_v16 }
 0x1c6   : > { %v7875_v56 = vadd.f32 %v1342_v6, %v1052_v26  ;;  %v1617_v34 = vpop.f32.mrf.mxu1  ;;  %v1711_v26 = vadd.f32 %v1614_v22, %v7415_v37  ;;  %v1714_v37 = vadd.f32 %v1507_v55, %v7427_v45  ;;  %v1825_v45 = vrot.slane %v7433_v54, 3 }
 0x1c7   : > { %v1400_v54 = vrot.slane %v7463_v24, 2 }
 0x1c8   : > { %11291 = vst [vmem:[#allocation65_spill] sm:$0xff] %v7875_v56  ;;  %6087 = vmatmul.msk.f32.gmra.mxu0 %vm764_vm1, %v1393_v9  ;;  %v1822_v56 = vsel %vm1783_vm3, %v1819_v7, %v1821_v23 }
 0x1c9   : > { %6118 = vmatmul.msk.f32.gmra.mxu1 %vm764_vm1, %v1391_v53  ;;  %6158 = vmatmul.msk.f32.gmra.mxu2 %vm764_vm1, %v1820_v50 }
 0x1ca   : > { %6189 = vmatmul.msk.f32.gmra.mxu3 %vm764_vm1, %v1818_v13  ;;  %v1713_v13 = vadd.f32 %v1617_v34, %v7430_v51 }
 0x1cc   : > { %v1933_v10 = vpop.f32.mrf.mxu2 }
 0x1cd   : > { %v7886_v4 = vadd.f32 %v1933_v10, %v1712_v59  ;;  %v2043_v39 = vpop.f32.mrf.mxu3  ;;  %v1510_v21 = vpop.f32.mrf.mxu0  ;;  %v1397_v59 = vsel %vm1354_vm2, %v1394_v16, %v1396_v27  ;;  %v1824_v10 = vsel %vm1783_vm3, %v1821_v23, %v1823_v31 }
 0x1ce   : > { %v7889_v53 = vadd.f32 %v2043_v39, %v1711_v26  ;;  %v1620_v6 = vpop.f32.mrf.mxu1  ;;  %v1716_v51 = vadd.f32 %v1510_v21, %v7442_v58  ;;  %v1399_v39 = vsel %vm1354_vm2, %v1396_v27, %v1398_v40  ;;  %v1827_v58 = vrot.slane %v7448_v3, 3 }
 0x1cf   : > { %v1402_v3 = vrot.slane %v7478_v42, 2 }
 0x1d0   : > { %6088 = vmatmul.msk.f32.gmra.mxu0 %vm764_vm1, %v1395_v1 }
 0x1d1   : > { %6119 = vmatmul.msk.f32.gmra.mxu1 %vm764_vm1, %v1393_v9  ;;  %6159 = vmatmul.msk.f32.gmra.mxu2 %vm764_vm1, %v1822_v56 }
 0x1d2   : > { %6190 = vmatmul.msk.f32.gmra.mxu3 %vm764_vm1, %v1820_v50  ;;  %v1715_v50 = vadd.f32 %v1620_v6, %v7445_v0 }
 0x1d4   : > { %v1936_v33 = vpop.f32.mrf.mxu2 }
 0x1d5   : > { %v7900_v22 = vadd.f32 %v1936_v33, %v1714_v37  ;;  %v2046_v20 = vpop.f32.mrf.mxu3  ;;  %v1513_v7 = vpop.f32.mrf.mxu0  ;;  %v1401_v33 = vsel %vm1354_vm2, %v1398_v40, %v1400_v54 }
 0x1d6   : > { %v7903_v9 = vadd.f32 %v2046_v20, %v1713_v13  ;;  %v1623_v26 = vpop.f32.mrf.mxu1  ;;  %v1826_v13 = vsel %vm1783_vm3, %v1823_v31, %v1825_v45  ;;  %v1718_v0 = vadd.f32 %v1513_v7, %v7457_v8  ;;  %v1829_v8 = vrot.slane %v7463_v24, 3 }
 0x1d7   : > { %v1404_v24 = vrot.slane %v7493_v61, 2 }
 0x1d8   : > { %6089 = vmatmul.msk.f32.gmra.mxu0 %vm764_vm1, %v1397_v59 }
 0x1d9   : > { %6120 = vmatmul.msk.f32.gmra.mxu1 %vm764_vm1, %v1395_v1  ;;  %6160 = vmatmul.msk.f32.gmra.mxu2 %vm764_vm1, %v1824_v10 }
 0x1da   : > { %6191 = vmatmul.msk.f32.gmra.mxu3 %vm764_vm1, %v1822_v56  ;;  %v1717_v56 = vadd.f32 %v1623_v26, %v7460_v17 }
 0x1dc   : > { %v1939_v55 = vpop.f32.mrf.mxu2 }
 0x1dd   : > { %v7914_v34 = vadd.f32 %v1939_v55, %v1716_v51  ;;  %v2049_v16 = vpop.f32.mrf.mxu3  ;;  %v1516_v23 = vpop.f32.mrf.mxu0  ;;  %v1828_v51 = vsel %vm1783_vm3, %v1825_v45, %v1827_v58 }
 0x1de   : > { %v7917_v1 = vadd.f32 %v2049_v16, %v1715_v50  ;;  %v1626_v37 = vpop.f32.mrf.mxu1  ;;  %v1720_v17 = vadd.f32 %v1516_v23, %v7472_v28  ;;  %v1403_v50 = vsel %vm1354_vm2, %v1400_v54, %v1402_v3  ;;  %v1831_v28 = vrot.slane %v7478_v42, 3 }
 0x1df   : > { %v1719_v7 = vadd.f32 %v1626_v37, %v7475_v36  ;;  %v1406_v42 = vrot.slane %v7508_v25, 2 }
 0x1e0   : > { %6090 = vmatmul.msk.f32.gmra.mxu0 %vm764_vm1, %v1399_v39 }
 0x1e1   : > { %6121 = vmatmul.msk.f32.gmra.mxu1 %vm764_vm1, %v1397_v59  ;;  %6161 = vmatmul.msk.f32.gmra.mxu2 %vm764_vm1, %v1826_v13 }
 0x1e2   : > { %6192 = vmatmul.msk.f32.gmra.mxu3 %vm764_vm1, %v1824_v10 }
 0x1e4   : > { %v1942_v21 = vpop.f32.mrf.mxu2 }
 0x1e5   : > { %v7928_v6 = vadd.f32 %v1942_v21, %v1718_v0  ;;  %v2052_v27 = vpop.f32.mrf.mxu3  ;;  %v1519_v31 = vpop.f32.mrf.mxu0  ;;  %v1405_v0 = vsel %vm1354_vm2, %v1402_v3, %v1404_v24 }
 0x1e6   : > { %v7931_v20 = vadd.f32 %v2052_v27, %v1717_v56  ;;  %v1629_v59 = vpop.f32.mrf.mxu1  ;;  %v1722_v36 = vadd.f32 %v1519_v31, %v7487_v48  ;;  %v1832_v27 = vsel %vm1783_vm3, %v1829_v8, %v1831_v28  ;;  %v1833_v48 = vrot.slane %v7493_v61, 3 }
 0x1e7   : > { %v1721_v23 = vadd.f32 %v1629_v59, %v7490_v57  ;;  %v6211_v57 = vld [vmem:[%s11245_s19 + $0x130] sm:$0xff] }
 0x1e8   : > { %6091 = vmatmul.msk.f32.gmra.mxu0 %vm764_vm1, %v1401_v33 }
 0x1e9   : > { %6122 = vmatmul.msk.f32.gmra.mxu1 %vm764_vm1, %v1399_v39  ;;  %6162 = vmatmul.msk.f32.gmra.mxu2 %vm764_vm1, %v1828_v51  ;;  %v1830_v39 = vsel %vm1783_vm3, %v1827_v58, %v1829_v8 }
 0x1ea   : > { %6193 = vmatmul.msk.f32.gmra.mxu3 %vm764_vm1, %v1826_v13  ;;  %2354 = vmatpush.msra.mxu0 %v6211_v57 }
 0x1ec   : > { %v1945_v26 = vpop.f32.mrf.mxu2 }
 0x1ed   : > { %v7942_v10 = vadd.f32 %v1945_v26, %v1720_v17  ;;  %v2055_v40 = vpop.f32.mrf.mxu3  ;;  %v1522_v45 = vpop.f32.mrf.mxu0  ;;  %v1407_v17 = vsel %vm1354_vm2, %v1404_v24, %v1406_v42  ;;  %v1834_v26 = vsel %vm1783_vm3, %v1831_v28, %v1833_v48 }
 0x1ee   : > { %v7945_v55 = vadd.f32 %v2055_v40, %v1719_v7  ;;  %v1632_v16 = vpop.f32.mrf.mxu1  ;;  %v1724_v31 = vadd.f32 %v1522_v45, %v7502_v5  ;;  %v1408_v5 = vrot.slane %v7529_v2, 2  ;;  %v6212_v40 = vld [vmem:[%s11245_s19 + $0x138] sm:$0xff] }
 0x1ef   : > { %2467 = vmatpush.msra.mxu1 %v6212_v40 }
 0x1f0   : > { %6092 = vmatmul.msk.f32.gmra.mxu0 %vm764_vm1, %v1403_v50 }
 0x1f1   : > { %6123 = vmatmul.msk.f32.gmra.mxu1 %vm764_vm1, %v1401_v33  ;;  %6163 = vmatmul.msk.f32.gmra.mxu2 %vm764_vm1, %v1830_v39  ;;  %v1723_v33 = vadd.f32 %v1632_v16, %v7505_v15  ;;  %v1835_v15 = vrot.slane %v7508_v25, 3  ;;  %v1410_v25 = vrot.slane %v7544_v43, 2 }
 0x1f2   : > { %6194 = vmatmul.msk.f32.gmra.mxu3 %vm764_vm1, %v1828_v51 }
 0x1f4   : > { %v1948_v37 = vpop.f32.mrf.mxu2 }
 0x1f5   : > { %v7956_v13 = vadd.f32 %v1948_v37, %v1722_v36  ;;  %v2058_v54 = vpop.f32.mrf.mxu3  ;;  %v7958_v58 = vpop.f32.mrf.mxu0  ;;  %v1836_v36 = vsel %vm1783_vm3, %v1833_v48, %v1835_v15  ;;  %v1411_v37 = vsel %vm1354_vm2, %v1408_v5, %v1410_v25 }
 0x1f6   : > { %v7961_v56 = vadd.f32 %v2058_v54, %v1721_v23  ;;  %v1635_v21 = vpop.f32.mrf.mxu1 }
 0x1f7   : > { %v1725_v45 = vadd.f32 %v1635_v21, %v7526_v52  ;;  %v1837_v52 = vrot.slane %v7529_v2, 3  ;;  %v1412_v21 = vrot.slane %v7562_v18, 2  ;;  %v1839_v2 = vrot.slane %v7544_v43, 3  ;;  %v6205_v43 = vld [vmem:[%s11245_s19 + $0x100] sm:$0xff] }
 0x1f8   : > { %6093 = vmatmul.msk.f32.gmra.mxu0 %vm764_vm1, %v1405_v0 }
 0x1f9   : > { %6124 = vmatmul.msk.f32.gmra.mxu1 %vm764_vm1, %v1403_v50  ;;  %6164 = vmatmul.msk.f32.gmra.mxu2 %vm764_vm1, %v1832_v27  ;;  %v1413_v48 = vsel %vm1354_vm2, %v1410_v25, %v1412_v21 }
 0x1fa   : > { %6195 = vmatmul.msk.f32.gmra.mxu3 %vm764_vm1, %v1830_v39  ;;  %v1409_v39 = vsel %vm1354_vm2, %v1406_v42, %v1408_v5 }
 0x1fc   : > { %v1951_v59 = vpop.f32.mrf.mxu2 }
 0x1fd   : > { %v7975_v51 = vadd.f32 %v1951_v59, %v1724_v31  ;;  %v2061_v3 = vpop.f32.mrf.mxu3  ;;  %v7977_v8 = vpop.f32.mrf.mxu0  ;;  %v1840_v31 = vsel %vm1783_vm3, %v1837_v52, %v1839_v2  ;;  %v1414_v59 = vrot.slane %v7592_v63, 2 }
 0x1fe   : > { %v7980_v7 = vadd.f32 %v2061_v3, %v1723_v33  ;;  %v7982_v61 = vpop.f32.mrf.mxu1  ;;  %v6207_v33 = vld [vmem:[%s11245_s19 + $0x110] sm:$0xff]  ;;  %v1841_v3 = vrot.slane %v7562_v18, 3  ;;  %v6206_v18 = vld [vmem:[%s11245_s19 + $0x108] sm:$0xff] }
 0x1ff   : > { %v1415_v5 = vsel %vm1354_vm2, %v1412_v21, %v1414_v59  ;;  %v11292_v21 = vmov 0.0  }
 0x200   : > { %6094 = vmatmul.msk.f32.gmra.mxu0 %vm764_vm1, %v1407_v17  ;;  %v1842_v40 = vsel %vm1783_vm3, %v1839_v2, %v1841_v3  ;;  %v1418_v2 = vrot.slane %v11292_v21, 2 }
 0x201   : > { %6125 = vmatmul.msk.f32.gmra.mxu1 %vm764_vm1, %v1405_v0  ;;  %6165 = vmatmul.msk.f32.gmra.mxu2 %vm764_vm1, %v1834_v26  ;;  %v1838_v0 = vsel %vm1783_vm3, %v1835_v15, %v1837_v52 }
 0x202   : > { %6196 = vmatmul.msk.f32.gmra.mxu3 %vm764_vm1, %v1832_v27  ;;  %v6209_v27 = vld [vmem:[%s11245_s19 + $0x120] sm:$0xff] }
 0x203   : > { %2355 = vmatpush.msra.mxu0 %v6209_v27 }
 0x205   : > { %v2064_v50 = vpop.f32.mrf.mxu3  ;;  %v7995_v16 = vpop.f32.mrf.mxu0  ;;  %2356 = vmatpush.msra.mxu0 %v6207_v33 }
 0x206   : > { %v7998_v24 = vadd.f32 %v2064_v50, %v1725_v45  ;;  %v8000_v28 = vpop.f32.mrf.mxu1  ;;  %v6208_v45 = vld [vmem:[%s11245_s19 + $0x118] sm:$0xff] }
 0x207   : > { %2357 = vmatpush.msra.mxu0 %v6205_v43  ;;  %v8061_v50 = vld [vmem:[%s7160_s24 + $0xf8] sm:$0xff]  ;;  %v6717_v43 = vld [vmem:[%s7160_s24] sm:$0xff] }
 0x208   : > { %6095 = vmatmul.msk.f32.gmra.mxu0 %vm764_vm1, %v1409_v39 }
 0x209   : > { %6126 = vmatmul.msk.f32.gmra.mxu1 %vm764_vm1, %v1407_v17  ;;  %6166 = vmatmul.msk.f32.gmra.mxu2 %vm764_vm1, %v1836_v36  ;;  %v6210_v17 = vld [vmem:[%s11245_s19 + $0x128] sm:$0xff] }
 0x20a   : > { %6197 = vmatmul.msk.f32.gmra.mxu3 %vm764_vm1, %v1834_v26  ;;  %2468 = vmatpush.msra.mxu1 %v6210_v17 }
 0x20c   : > { %2469 = vmatpush.msra.mxu1 %v6208_v45 }
 0x20d   : > { %v8009_v23 = vpop.f32.mrf.mxu0 }
 0x20e   : > { %v8012_v54 = vpop.f32.mrf.mxu1  ;;  %2470 = vmatpush.msra.mxu1 %v6206_v18 }
 0x210   : > { %6096 = vmatmul.msk.f32.gmra.mxu0 %vm764_vm1, %v1411_v37 }
 0x211   : > { %6127 = vmatmul.msk.f32.gmra.mxu1 %vm764_vm1, %v1409_v39  ;;  %6167 = vmatmul.msk.f32.gmra.mxu2 %vm764_vm1, %v1838_v0  ;;  %v1416_v39 = vrot.slane %v8061_v50, 2 }
 0x212   : > { %6198 = vmatmul.msk.f32.gmra.mxu3 %vm764_vm1, %v1836_v36  ;;  %v1843_v36 = vrot.slane %v7592_v63, 3  ;;  %v1845_v63 = vrot.slane %v8061_v50, 3 }
 0x213   : > { %v1417_v52 = vsel %vm1354_vm2, %v1414_v59, %v1416_v39  ;;  %v2213_v59 = vrot.slane %v6717_v43, 4 }
 0x214   : > { %v1846_v33 = vsel %vm1783_vm3, %v1843_v36, %v1845_v63 }
 0x215   : > { %v8024_v42 = vpop.f32.mrf.mxu0 }
 0x216   : > { %v8027_v57 = vpop.f32.mrf.mxu1 }
 0x218   : > { %6097 = vmatmul.msk.f32.gmra.mxu0 %vm764_vm1, %v1413_v48 }
 0x219   : > { %6128 = vmatmul.msk.f32.gmra.mxu1 %vm764_vm1, %v1411_v37  ;;  %6168 = vmatmul.msk.f32.gmra.mxu2 %vm764_vm1, %v1840_v31 }
 0x21a   : > { %6199 = vmatmul.msk.f32.gmra.mxu3 %vm764_vm1, %v1838_v0  ;;  %v1844_v0 = vsel %vm1783_vm3, %v1841_v3, %v1843_v36  ;;  %v6718_v3 = vld [vmem:[%s7160_s24 + $0x8] sm:$0xff]  ;;  %v6719_v36 = vld [vmem:[%s7160_s24 + $0x10] sm:$0xff] }
 0x21b   : > { %v2214_v17 = vrot.slane %v6718_v3, 4 }
 0x21d   : > { %v8045_v26 = vpop.f32.mrf.mxu0  ;;  %v2215_v45 = vsel %vm2212_vm4, %v2213_v59, %v2214_v17 }
 0x21e   : > { %v8048_v15 = vpop.f32.mrf.mxu1 }
 0x220   : > { %6098 = vmatmul.msk.f32.gmra.mxu0 %vm764_vm1, %v1415_v5 }
 0x221   : > { %6129 = vmatmul.msk.f32.gmra.mxu1 %vm764_vm1, %v1413_v48  ;;  %6169 = vmatmul.msk.f32.gmra.mxu2 %vm764_vm1, %v1842_v40  ;;  %v1419_v48 = vsel %vm1354_vm2, %v1416_v39, %v1418_v2 }
 0x222   : > { %6200 = vmatmul.msk.f32.gmra.mxu3 %vm764_vm1, %v1840_v31 }
 0x225   : > { %v8066_v25 = vpop.f32.mrf.mxu0 }
 0x226   : > { %v8069_v37 = vpop.f32.mrf.mxu1 }
 0x228   : > { %6099 = vmatmul.msk.f32.gmra.mxu0 %vm764_vm1, %v1417_v52 }
 0x229   : > { %6130 = vmatmul.msk.f32.gmra.mxu1 %vm764_vm1, %v1415_v5  ;;  %6170 = vmatmul.msk.f32.gmra.mxu2 %vm764_vm1, %v1844_v0  ;;  %v1847_v5 = vrot.slane %v11292_v21, 3 }
 0x22a   : > { %6201 = vmatmul.msk.f32.gmra.mxu3 %vm764_vm1, %v1842_v40 }
 0x22b   : > { %v1848_v39 = vsel %vm1783_vm3, %v1845_v63, %v1847_v5  ;;  %v6720_v63 = vld [vmem:[%s7160_s24 + $0x18] sm:$0xff] }
 0x22d   : > { %v8078_v27 = vpop.f32.mrf.mxu0 }
 0x22e   : > { %v8081_v31 = vpop.f32.mrf.mxu1 }
 0x230   : > { %6100 = vmatmul.msk.f32.gmra.mxu0 %vm764_vm1, %v1419_v48 }
 0x231   : > { %6131 = vmatmul.msk.f32.gmra.mxu1 %vm764_vm1, %v1417_v52  ;;  %6171 = vmatmul.msk.f32.gmra.mxu2 %vm764_vm1, %v1846_v33  ;;  %v2216_v52 = vrot.slane %v6719_v36, 4 }
 0x232   : > { %6202 = vmatmul.msk.f32.gmra.mxu3 %vm764_vm1, %v1844_v0 }
 0x233   : > { %v2217_v2 = vsel %vm2212_vm4, %v2214_v17, %v2216_v52  ;;  %v6721_v17 = vld [vmem:[%s7160_s24 + $0x20] sm:$0xff] }
 0x234   : > { %v2220_v5 = vrot.slane %v6721_v17, 4 }
 0x235   : > { %v8091_v40 = vpop.f32.mrf.mxu0 }
 0x236   : > { %v8094_v18 = vpop.f32.mrf.mxu1 }
 0x238   : > { %6213 = vmatmul.msk.f32.vlgmr.msra.gmra.mxu0 %vm764_vm1, %v2215_v45 }
 0x239   : > { %6132 = vmatmul.msk.f32.gmra.mxu1 %vm764_vm1, %v1419_v48  ;;  %6172 = vmatmul.msk.f32.gmra.mxu2 %vm764_vm1, %v1848_v39  ;;  %v2218_v48 = vrot.slane %v6720_v63, 4 }
 0x23a   : > { %6203 = vmatmul.msk.f32.gmra.mxu3 %vm764_vm1, %v1846_v33 }
 0x23b   : > { %v2219_v3 = vsel %vm2212_vm4, %v2216_v52, %v2218_v48 }
 0x23d   : > { %v8102_v0 = vpop.f32.mrf.mxu0 }
 0x23e   : > { %v8105_v43 = vpop.f32.mrf.mxu1 }
 0x240   : > { %6214 = vmatmul.msk.f32.gmra.mxu0 %vm764_vm1, %v2217_v2 }
 0x241   : > { %6245 = vmatmul.msk.f32.vlgmr.msra.gmra.mxu1 %vm764_vm1, %v2215_v45  ;;  %v2221_v45 = vsel %vm2212_vm4, %v2218_v48, %v2220_v5  ;;  %v6723_v48 = vld [vmem:[%s7160_s24 + $0x30] sm:$0xff] }
 0x242   : > { %6204 = vmatmul.msk.f32.gmra.mxu3 %vm764_vm1, %v1848_v39  ;;  %v6722_v39 = vld [vmem:[%s7160_s24 + $0x28] sm:$0xff]  ;;  %v2224_v17 = vrot.slane %v6723_v48, 4 }
 0x243   : > { %v2222_v52 = vrot.slane %v6722_v39, 4 }
 0x245   : > { %v8111_v59 = vpop.f32.mrf.mxu0  ;;  %v2223_v44 = vsel %vm2212_vm4, %v2220_v5, %v2222_v52  ;;  %v2225_v38 = vsel %vm2212_vm4, %v2222_v52, %v2224_v17  ;;  %v6724_v5 = vld [vmem:[%s7160_s24 + $0x38] sm:$0xff]  ;;  %v6725_v52 = vld [vmem:[%s7160_s24 + $0x40] sm:$0xff] }
 0x246   : > { %v8114_v33 = vpop.f32.mrf.mxu1  ;;  %v2226_v39 = vrot.slane %v6724_v5, 4  ;;  %v2228_v48 = vrot.slane %v6725_v52, 4 }
 0x248   : > { %6215 = vmatmul.msk.f32.gmra.mxu0 %vm764_vm1, %v2219_v3  ;;  %v2227_v32 = vsel %vm2212_vm4, %v2224_v17, %v2226_v39  ;;  %v2229_v14 = vsel %vm2212_vm4, %v2226_v39, %v2228_v48  ;;  %v6726_v17 = vld [vmem:[%s7160_s24 + $0x48] sm:$0xff]  ;;  %v6727_v39 = vld [vmem:[%s7160_s24 + $0x50] sm:$0xff] }
 0x249   : > { %6246 = vmatmul.msk.f32.gmra.mxu1 %vm764_vm1, %v2217_v2  ;;  %v2230_v5 = vrot.slane %v6726_v17, 4  ;;  %v2232_v52 = vrot.slane %v6727_v39, 4 }
 0x24d   : > { %v8119_v36 = vpop.f32.mrf.mxu0 }
 0x24e   : > { %v8122_v63 = vpop.f32.mrf.mxu1 }
 0x24f   : > { %11293 = vst [vmem:[#allocation66_spill] sm:$0xff] %v8122_v63 }
 0x250   : > { %6216 = vmatmul.msk.f32.gmra.mxu0 %vm764_vm1, %v2221_v45 }
 0x251   : > { %6247 = vmatmul.msk.f32.gmra.mxu1 %vm764_vm1, %v2219_v3 }
 0x255   : > { %v8127_v47 = vpop.f32.mrf.mxu0 }
 0x256   : > { %11294 = vst [vmem:[#allocation67_spill] sm:$0xff] %v8127_v47  ;;  %v8130_v2 = vpop.f32.mrf.mxu1 }
 0x257   : > { %11295 = vst [vmem:[#allocation68_spill] sm:$0xff] %v8130_v2 }
 0x258   : > { %6217 = vmatmul.msk.f32.gmra.mxu0 %vm764_vm1, %v2223_v44 }
 0x259   : > { %6248 = vmatmul.msk.f32.gmra.mxu1 %vm764_vm1, %v2221_v45 }
 0x25d   : > { %v8135_v41 = vpop.f32.mrf.mxu0 }
 0x25e   : > { %11296 = vst [vmem:[#allocation69_spill] sm:$0xff] %v8135_v41  ;;  %v8138_v3 = vpop.f32.mrf.mxu1  ;;  %v8251_v41 = vpop.f32.mrf.mxu2 }
 0x25f   : > { %11297 = vst [vmem:[#allocation70_spill] sm:$0xff] %v8138_v3 }
 0x260   : > { %6218 = vmatmul.msk.f32.gmra.mxu0 %vm764_vm1, %v2225_v38 }
 0x261   : > { %6249 = vmatmul.msk.f32.gmra.mxu1 %vm764_vm1, %v2223_v44 }
 0x265   : > { %v8143_v35 = vpop.f32.mrf.mxu0 }
 0x266   : > { %11298 = vst [vmem:[#allocation71_spill] sm:$0xff] %v8143_v35  ;;  %v8146_v45 = vpop.f32.mrf.mxu1  ;;  %v2231_v35 = vsel %vm2212_vm4, %v2228_v48, %v2230_v5  ;;  %v6728_v48 = vld [vmem:[%s7160_s24 + $0x58] sm:$0xff]  ;;  %v8279_v2 = vpop.f32.mrf.mxu2 }
 0x267   : > { %11299 = vst [vmem:[#allocation72_spill] sm:$0xff] %v8146_v45  ;;  %v2234_v17 = vrot.slane %v6728_v48, 4 }
 0x268   : > { %6219 = vmatmul.msk.f32.gmra.mxu0 %vm764_vm1, %v2227_v32 }
 0x269   : > { %6250 = vmatmul.msk.f32.gmra.mxu1 %vm764_vm1, %v2225_v38 }
 0x26d   : > { %v8151_v29 = vpop.f32.mrf.mxu0 }
 0x26e   : > { %11300 = vst [vmem:[#allocation73_spill] sm:$0xff] %v8151_v29  ;;  %v8154_v44 = vpop.f32.mrf.mxu1  ;;  %v2233_v29 = vsel %vm2212_vm4, %v2230_v5, %v2232_v52  ;;  %v6729_v5 = vld [vmem:[%s7160_s24 + $0x60] sm:$0xff] }
 0x26f   : > { %11301 = vst [vmem:[#allocation74_spill] sm:$0xff] %v8154_v44  ;;  %v2236_v39 = vrot.slane %v6729_v5, 4 }
 0x270   : > { %6220 = vmatmul.msk.f32.gmra.mxu0 %vm764_vm1, %v2229_v14 }
 0x271   : > { %6251 = vmatmul.msk.f32.gmra.mxu1 %vm764_vm1, %v2227_v32 }
 0x275   : > { %v8159_v45 = vpop.f32.mrf.mxu0 }
 0x276   : > { %11302 = vst [vmem:[#allocation75_spill] sm:$0xff] %v8159_v45  ;;  %v8162_v38 = vpop.f32.mrf.mxu1  ;;  %v2235_v45 = vsel %vm2212_vm4, %v2232_v52, %v2234_v17  ;;  %v6730_v52 = vld [vmem:[%s7160_s24 + $0x68] sm:$0xff] }
 0x277   : > { %11303 = vst [vmem:[#allocation76_spill] sm:$0xff] %v8162_v38  ;;  %v2238_v48 = vrot.slane %v6730_v52, 4 }
 0x278   : > { %6221 = vmatmul.msk.f32.gmra.mxu0 %vm764_vm1, %v2231_v35 }
 0x279   : > { %6252 = vmatmul.msk.f32.gmra.mxu1 %vm764_vm1, %v2229_v14 }
 0x27d   : > { %v8167_v44 = vpop.f32.mrf.mxu0 }
 0x27e   : > { %11304 = vst [vmem:[#allocation77_spill] sm:$0xff] %v8167_v44  ;;  %v8170_v32 = vpop.f32.mrf.mxu1  ;;  %v2237_v44 = vsel %vm2212_vm4, %v2234_v17, %v2236_v39  ;;  %v6731_v17 = vld [vmem:[%s7160_s24 + $0x70] sm:$0xff] }
 0x27f   : > { %11305 = vst [vmem:[#allocation78_spill] sm:$0xff] %v8170_v32  ;;  %v2240_v5 = vrot.slane %v6731_v17, 4 }
 0x280   : > { %6222 = vmatmul.msk.f32.gmra.mxu0 %vm764_vm1, %v2233_v29 }
 0x281   : > { %6253 = vmatmul.msk.f32.gmra.mxu1 %vm764_vm1, %v2231_v35 }
 0x285   : > { %v8175_v38 = vpop.f32.mrf.mxu0 }
 0x286   : > { %11306 = vst [vmem:[#allocation79_spill] sm:$0xff] %v8175_v38  ;;  %v8178_v14 = vpop.f32.mrf.mxu1  ;;  %v2239_v38 = vsel %vm2212_vm4, %v2236_v39, %v2238_v48  ;;  %v6732_v39 = vld [vmem:[%s7160_s24 + $0x78] sm:$0xff] }
 0x287   : > { %11307 = vst [vmem:[#allocation80_spill] sm:$0xff] %v8178_v14  ;;  %v2242_v52 = vrot.slane %v6732_v39, 4 }
 0x288   : > { %6223 = vmatmul.msk.f32.gmra.mxu0 %vm764_vm1, %v2235_v45 }
 0x289   : > { %6254 = vmatmul.msk.f32.gmra.mxu1 %vm764_vm1, %v2233_v29 }
 0x28d   : > { %v8183_v32 = vpop.f32.mrf.mxu0 }
 0x28e   : > { %11308 = vst [vmem:[#allocation81_spill] sm:$0xff] %v8183_v32  ;;  %v8186_v35 = vpop.f32.mrf.mxu1  ;;  %v2241_v32 = vsel %vm2212_vm4, %v2238_v48, %v2240_v5  ;;  %v6733_v48 = vld [vmem:[%s7160_s24 + $0x80] sm:$0xff] }
 0x28f   : > { %11309 = vst [vmem:[#allocation82_spill] sm:$0xff] %v8186_v35  ;;  %v2244_v17 = vrot.slane %v6733_v48, 4 }
 0x290   : > { %6224 = vmatmul.msk.f32.gmra.mxu0 %vm764_vm1, %v2237_v44 }
 0x291   : > { %6255 = vmatmul.msk.f32.gmra.mxu1 %vm764_vm1, %v2235_v45 }
 0x295   : > { %v8191_v14 = vpop.f32.mrf.mxu0 }
 0x296   : > { %11310 = vst [vmem:[#allocation83_spill] sm:$0xff] %v8191_v14  ;;  %v8194_v29 = vpop.f32.mrf.mxu1  ;;  %v2243_v14 = vsel %vm2212_vm4, %v2240_v5, %v2242_v52  ;;  %v6734_v5 = vld [vmem:[%s7160_s24 + $0x88] sm:$0xff] }
 0x297   : > { %11311 = vst [vmem:[#allocation84_spill] sm:$0xff] %v8194_v29  ;;  %v2246_v39 = vrot.slane %v6734_v5, 4 }
 0x298   : > { %6225 = vmatmul.msk.f32.gmra.mxu0 %vm764_vm1, %v2239_v38 }
 0x299   : > { %6256 = vmatmul.msk.f32.gmra.mxu1 %vm764_vm1, %v2237_v44 }
 0x29d   : > { %v8199_v35 = vpop.f32.mrf.mxu0 }
 0x29e   : > { %11312 = vst [vmem:[#allocation85_spill] sm:$0xff] %v8199_v35  ;;  %v8202_v45 = vpop.f32.mrf.mxu1  ;;  %v2245_v35 = vsel %vm2212_vm4, %v2242_v52, %v2244_v17 }
 0x29f   : > { %11313 = vst [vmem:[#allocation86_spill] sm:$0xff] %v8202_v45 }
 0x2a0   : > { %6226 = vmatmul.msk.f32.gmra.mxu0 %vm764_vm1, %v2241_v32 }
 0x2a1   : > { %6257 = vmatmul.msk.f32.gmra.mxu1 %vm764_vm1, %v2239_v38 }
 0x2a5   : > { %v8207_v29 = vpop.f32.mrf.mxu0 }
 0x2a6   : > { %11314 = vst [vmem:[#allocation87_spill] sm:$0xff] %v8207_v29  ;;  %v8210_v44 = vpop.f32.mrf.mxu1 }
 0x2a7   : > { %11315 = vst [vmem:[#allocation88_spill] sm:$0xff] %v8210_v44  ;;  %v2632_v44 = vld [vmem:[%s11143_s2] sm:$0x3] }
 0x2a8   : > { %6227 = vmatmul.msk.f32.gmra.mxu0 %vm764_vm1, %v2243_v14 }
 0x2a9   : > { %6258 = vmatmul.msk.f32.gmra.mxu1 %vm764_vm1, %v2241_v32  ;;  %v8226_v32 = vperm.slane %v2632_v44, 0 }
 0x2ad   : > { %v8215_v45 = vpop.f32.mrf.mxu0 }
 0x2ae   : > { %11316 = vst [vmem:[#allocation89_spill] sm:$0xff] %v8215_v45  ;;  %v8218_v38 = vpop.f32.mrf.mxu1  ;;  %v2247_v45 = vsel %vm2212_vm4, %v2244_v17, %v2246_v39 }
 0x2af   : > { %11317 = vst [vmem:[#allocation90_spill] sm:$0xff] %v8218_v38 }
 0x2b0   : > { %6228 = vmatmul.msk.f32.gmra.mxu0 %vm764_vm1, %v2245_v35 }
 0x2b1   : > { %6259 = vmatmul.msk.f32.gmra.mxu1 %vm764_vm1, %v2243_v14  ;;  %v6735_v14 = vld [vmem:[%s7160_s24 + $0x90] sm:$0xff] }
 0x2b2   : > { %v2248_v5 = vrot.slane %v6735_v14, 4 }
 0x2b5   : > { %v2359_v48 = vpop.f32.mrf.mxu0 }
 0x2b6   : > { %v8229_v29 = vpop.f32.mrf.mxu1  ;;  %v2568_v52 = vadd.f32 %v2359_v48, %v7872_v62  ;;  %v2249_v62 = vsel %vm2212_vm4, %v2246_v39, %v2248_v5 }
 0x2b7   : > { %11318 = vst [vmem:[#allocation91_spill] sm:$0xff] %v8229_v29  ;;  %v8242_v29 = vperm.slane %v2632_v44, 1  ;;  %v6736_v44 = vld [vmem:[%s7160_s24 + $0x98] sm:$0xff] }
 0x2b8   : > { %6229 = vmatmul.msk.f32.gmra.mxu0 %vm764_vm1, %v2247_v45  ;;  %v8234_v38 = vadd.f32 %v8226_v32, %v2568_v52  ;;  %v2250_v39 = vrot.slane %v6736_v44, 4 }
 0x2b9   : > { %6260 = vmatmul.msk.f32.gmra.mxu1 %vm764_vm1, %v2245_v35 }
 0x2ba   : > { %v11172_v3 = vmax.f32 %v8234_v38, 0.0 }
 0x2bc   : > { %2830 = vrot.lane.b32.xlu0 %v11172_v3, %s6951_s0 }
 0x2bd   : > { %v2362_v17 = vpop.f32.mrf.mxu0 }
 0x2be   : > { %v2570_v48 = vadd.f32 %v2362_v17, %v7886_v4  ;;  %v2472_v52 = vpop.f32.mrf.mxu1 }
 0x2bf   : > { %v2569_v35 = vadd.f32 %v2472_v52, %v7889_v53 }
 0x2c0   : > { %6230 = vmatmul.msk.f32.gmra.mxu0 %vm764_vm1, %v2249_v62  ;;  %v8249_v14 = vadd.f32 %v8226_v32, %v2570_v48  ;;  %v2251_v48 = vsel %vm2212_vm4, %v2248_v5, %v2250_v39 }
 0x2c1   : > { %v8254_v12 = vadd.f32 %v8242_v29, %v2569_v35  ;;  %6261 = vmatmul.msk.f32.gmra.mxu1 %vm764_vm1, %v2247_v45 }
 0x2c2   : > { %v11173_v4 = vmax.f32 %v8249_v14, 0.0 }
 0x2c3   : > { %v11174_v17 = vmax.f32 %v8254_v12, 0.0 }
 0x2c4   : > { %2834 = vrot.lane.b32.xlu1 %v11173_v4, %s6951_s0  ;;  %v6737_v4 = vld [vmem:[%s7160_s24 + $0xa0] sm:$0xff] }
 0x2c5   : > { %2832 = vrot.lane.b32.xlu0 %v11174_v17, %s6951_s0  ;;  %v2365_v53 = vpop.f32.mrf.mxu0  ;;  %v2252_v17 = vrot.slane %v6737_v4, 4 }
 0x2c6   : > { %v2572_v45 = vadd.f32 %v2365_v53, %v7900_v22  ;;  %v2475_v52 = vpop.f32.mrf.mxu1 }
 0x2c7   : > { %v2571_v35 = vadd.f32 %v2475_v52, %v7903_v9  ;;  %v8282_v9 = vpop.f32.mrf.mxu3  ;;  %v2253_v4 = vsel %vm2212_vm4, %v2250_v39, %v2252_v17 }
 0x2c8   : > { %6231 = vmatmul.msk.f32.gmra.mxu0 %vm764_vm1, %v2251_v48  ;;  %v8271_v44 = vadd.f32 %v8226_v32, %v2572_v45 }
 0x2c9   : > { %v8274_v3 = vadd.f32 %v8242_v29, %v2571_v35  ;;  %6262 = vmatmul.msk.f32.gmra.mxu1 %vm764_vm1, %v2249_v62 }
 0x2ca   : > { %v11175_v5 = vmax.f32 %v8271_v44, 0.0 }
 0x2cb   : > { %v11176_v22 = vmax.f32 %v8274_v3, 0.0 }
 0x2cc   : > { %2838 = vrot.lane.b32.xlu2 %v11175_v5, %s6951_s0  ;;  %v6738_v5 = vld [vmem:[%s7160_s24 + $0xa8] sm:$0xff] }
 0x2cd   : > { %2836 = vrot.lane.b32.xlu1 %v11176_v22, %s6951_s0  ;;  %v2368_v62 = vpop.f32.mrf.mxu0  ;;  %v2254_v22 = vrot.slane %v6738_v5, 4 }
 0x2ce   : > { %v2574_v53 = vadd.f32 %v2368_v62, %v7914_v34  ;;  %v2478_v45 = vpop.f32.mrf.mxu1 }
 0x2cf   : > { %v2573_v52 = vadd.f32 %v2478_v45, %v7917_v1  ;;  %v8307_v1 = vpop.f32.mrf.mxu2 }
 0x2d0   : > { %v8294_v35 = vadd.f32 %v8226_v32, %v2574_v53  ;;  %6232 = vmatmul.msk.f32.gmra.mxu0 %vm764_vm1, %v2253_v4  ;;  %v8313_v53 = vpop.f32.mrf.mxu3 }
 0x2d1   : > { %v8298_v47 = vadd.f32 %v8242_v29, %v2573_v52  ;;  %6263 = vmatmul.msk.f32.gmra.mxu1 %vm764_vm1, %v2251_v48  ;;  %v2255_v48 = vsel %vm2212_vm4, %v2252_v17, %v2254_v22 }
 0x2d2   : > { %11319 = vst [vmem:[#allocation92_spill] sm:$0xff] %v8294_v35  ;;  %v11177_v39 = vmax.f32 %v8294_v35, 0.0 }
 0x2d3   : > { %v11178_v34 = vmax.f32 %v8298_v47, 0.0 }
 0x2d4   : > { %2842 = vrot.lane.b32.xlu0 %v11177_v39, %s6951_s0 }
 0x2d5   : > { %2840 = vrot.lane.b32.xlu2 %v11178_v34, %s6951_s0  ;;  %v2371_v62 = vpop.f32.mrf.mxu0  ;;  %v6739_v34 = vld [vmem:[%s7160_s24 + $0xb0] sm:$0xff] }
 0x2d6   : > { %v2576_v5 = vadd.f32 %v2371_v62, %v7928_v6  ;;  %v2481_v45 = vpop.f32.mrf.mxu1  ;;  %v2256_v35 = vrot.slane %v6739_v34, 4 }
 0x2d7   : > { %v2575_v52 = vadd.f32 %v2481_v45, %v7931_v20  ;;  %v8336_v34 = vpop.f32.mrf.mxu2 }
 0x2d8   : > { %v8318_v11 = vadd.f32 %v8226_v32, %v2576_v5  ;;  %6233 = vmatmul.msk.f32.gmra.mxu0 %vm764_vm1, %v2255_v48  ;;  %v2257_v62 = vsel %vm2212_vm4, %v2254_v22, %v2256_v35  ;;  %v6740_v22 = vld [vmem:[%s7160_s24 + $0xb8] sm:$0xff] }
 0x2d9   : > { %v8322_v39 = vadd.f32 %v8242_v29, %v2575_v52  ;;  %6264 = vmatmul.msk.f32.gmra.mxu1 %vm764_vm1, %v2253_v4  ;;  %v8339_v52 = vpop.f32.mrf.mxu3 }
 0x2da   : > { %11320 = vst [vmem:[#allocation93_spill] sm:$0xff] %v8318_v11  ;;  %v11181_v17 = vmax.f32 %v8318_v11, 0.0 }
 0x2db   : > { %v11180_v6 = vmax.f32 %v8322_v39, 0.0 }
 0x2dd   : > { %2844 = vrot.lane.b32.xlu1 %v11180_v6, %s6951_s0  ;;  %2846 = vrot.lane.b32.xlu2 %v11181_v17, %s6951_s0  ;;  %v2374_v20 = vpop.f32.mrf.mxu0 }
 0x2de   : > { %v2578_v4 = vadd.f32 %v2374_v20, %v7942_v10  ;;  %v2484_v5 = vpop.f32.mrf.mxu1  ;;  %v2258_v10 = vrot.slane %v6740_v22, 4 }
 0x2df   : > { %v2577_v45 = vadd.f32 %v2484_v5, %v7945_v55  ;;  %v8365_v11 = vpop.f32.mrf.mxu2 }
 0x2e0   : > { %v8342_v63 = vadd.f32 %v8226_v32, %v2578_v4  ;;  %6234 = vmatmul.msk.f32.gmra.mxu0 %vm764_vm1, %v2257_v62  ;;  %v2259_v4 = vsel %vm2212_vm4, %v2256_v35, %v2258_v10 }
 0x2e1   : > { %v8346_v6 = vadd.f32 %v8242_v29, %v2577_v45  ;;  %6265 = vmatmul.msk.f32.gmra.mxu1 %vm764_vm1, %v2255_v48 }
 0x2e2   : > { %11321 = vst [vmem:[#allocation94_spill] sm:$0xff] %v8342_v63  ;;  %v11184_v20 = vmax.f32 %v8342_v63, 0.0  ;;  %v8372_v63 = vpop.f32.mrf.mxu3 }
 0x2e3   : > { %11322 = vst [vmem:[#allocation95_spill] sm:$0xff] %v8346_v6  ;;  %v11183_v17 = vmax.f32 %v8346_v6, 0.0 }
 0x2e5   : > { %2848 = vrot.lane.b32.xlu0 %v11183_v17, %s6951_s0  ;;  %2850 = vrot.lane.b32.xlu1 %v11184_v20, %s6951_s0  ;;  %v2377_v55 = vpop.f32.mrf.mxu0  ;;  %v6741_v20 = vld [vmem:[%s7160_s24 + $0xc0] sm:$0xff] }
 0x2e6   : > { %v2580_v48 = vadd.f32 %v2377_v55, %v7956_v13  ;;  %v2487_v5 = vpop.f32.mrf.mxu1  ;;  %v2260_v35 = vrot.slane %v6741_v20, 4 }
 0x2e7   : > { %v2579_v45 = vadd.f32 %v2487_v5, %v7961_v56 }
 0x2e8   : > { %v8362_v22 = vadd.f32 %v8226_v32, %v2580_v48  ;;  %6235 = vmatmul.msk.f32.gmra.mxu0 %vm764_vm1, %v2259_v4 }
 0x2e9   : > { %v8368_v17 = vadd.f32 %v8242_v29, %v2579_v45  ;;  %6266 = vmatmul.msk.f32.gmra.mxu1 %vm764_vm1, %v2257_v62  ;;  %v2261_v62 = vsel %vm2212_vm4, %v2258_v10, %v2260_v35 }
 0x2ea   : > { %11323 = vst [vmem:[#allocation96_spill] sm:$0xff] %v8362_v22  ;;  %v11188_v13 = vmax.f32 %v8362_v22, 0.0  ;;  %v11326_v22 = vld [vmem:[#allocation23_spill] sm:$0xff] }
 0x2eb   : > { %11324 = vst [vmem:[#allocation97_spill] sm:$0xff] %v8368_v17  ;;  %v11187_v56 = vmax.f32 %v8368_v17, 0.0  ;;  %v1726_v10 = vadd.f32 %v7958_v58, %v11326_v22 }
 0x2ed   : > { %2852 = vrot.lane.b32.xlu2 %v11187_v56, %s6951_s0  ;;  %2854 = vrot.lane.b32.xlu0 %v11188_v13, %s6951_s0  ;;  %v2380_v55 = vpop.f32.mrf.mxu0  ;;  %v6742_v56 = vld [vmem:[%s7160_s24 + $0xc8] sm:$0xff] }
 0x2ee   : > { %v2582_v48 = vadd.f32 %v2380_v55, %v7975_v51  ;;  %v2490_v20 = vpop.f32.mrf.mxu1  ;;  %v2262_v13 = vrot.slane %v6742_v56, 4  ;;  %v8397_v55 = vpop.f32.mrf.mxu2 }
 0x2ef   : > { %v2581_v5 = vadd.f32 %v2490_v20, %v7980_v7  ;;  %v8401_v20 = vpop.f32.mrf.mxu3 }
 0x2f0   : > { %v8386_v45 = vadd.f32 %v8226_v32, %v2582_v48  ;;  %6236 = vmatmul.msk.f32.gmra.mxu0 %vm764_vm1, %v2261_v62  ;;  %v2155_v48 = vadd.f32 %v8251_v41, %v1726_v10  ;;  %v6743_v10 = vld [vmem:[%s7160_s24 + $0xd0] sm:$0xff] }
 0x2f1   : > { %v8390_v17 = vadd.f32 %v8242_v29, %v2581_v5  ;;  %6267 = vmatmul.msk.f32.gmra.mxu1 %vm764_vm1, %v2259_v4  ;;  %v2263_v4 = vsel %vm2212_vm4, %v2260_v35, %v2262_v13  ;;  %v3134_v35 = vld [vmem:[%s11146_s5 + $0x78] sm:$0xff] }
 0x2f2   : > { %11325 = vst [vmem:[#allocation98_spill] sm:$0xff] %v8386_v45  ;;  %v11192_v51 = vmax.f32 %v8386_v45, 0.0  ;;  %3241 = vmatpush.msra.mxu2 %v3134_v35 }
 0x2f3   : > { %v11191_v7 = vmax.f32 %v8390_v17, 0.0 }
 0x2f5   : > { %2856 = vrot.lane.b32.xlu1 %v11191_v7, %s6951_s0  ;;  %2858 = vrot.lane.b32.xlu2 %v11192_v51, %s6951_s0  ;;  %v2383_v58 = vpop.f32.mrf.mxu0  ;;  %v2264_v7 = vrot.slane %v6743_v10, 4 }
 0x2f6   : > { %v2584_v22 = vadd.f32 %v2383_v58, %v2155_v48  ;;  %v2493_v56 = vpop.f32.mrf.mxu1  ;;  %v11327_v48 = vld [vmem:[#allocation24_spill] sm:$0xff]  ;;  %v8434_v45 = vpop.f32.mrf.mxu2 }
 0x2f7   : > { %v2583_v5 = vadd.f32 %v2493_v56, %v7998_v24  ;;  %v3139_v24 = vld [vmem:[%s11146_s5 + $0xa0] sm:$0x3]  ;;  %v1728_v58 = vadd.f32 %v7977_v8, %v11327_v48  ;;  %v8443_v35 = vpop.f32.mrf.mxu3 }
 0x2f8   : > { %v8412_v6 = vadd.f32 %v8226_v32, %v2584_v22  ;;  %6237 = vmatmul.msk.f32.gmra.mxu0 %vm764_vm1, %v2263_v4  ;;  %6277 = vmatpush.msk.msrb.mxu3 %vm3237_vm5, %v3139_v24  ;;  %v11328_v56 = vld [vmem:[#allocation25_spill] sm:$0xff] }
 0x2f9   : > { %v8416_v41 = vadd.f32 %v8242_v29, %v2583_v5  ;;  %6268 = vmatmul.msk.f32.gmra.mxu1 %vm764_vm1, %v2261_v62  ;;  %v1727_v62 = vadd.f32 %v7982_v61, %v11328_v56  ;;  %v2157_v10 = vadd.f32 %v8279_v2, %v1728_v58  ;;  %v2265_v61 = vsel %vm2212_vm4, %v2262_v13, %v2264_v7  ;;  %v3132_v56 = vld [vmem:[%s11146_s5 + $0x68] sm:$0xff] }
 0x2fa   : > { %v11194_v22 = vmax.f32 %v8412_v6, 0.0 }
 0x2fb   : > { %v11197_v5 = vmax.f32 %v8416_v41, 0.0  ;;  %v2156_v51 = vadd.f32 %v8282_v9, %v1727_v62  ;;  %v3133_v9 = vld [vmem:[%s11146_s5 + $0x70] sm:$0xff]  ;;  %v6744_v62 = vld [vmem:[%s7160_s24 + $0xd8] sm:$0xff] }
 0x2fc   : > { %3242 = vmatpush.msra.mxu2 %v3133_v9  ;;  %v11330_v9 = vld [vmem:[#allocation27_spill] sm:$0xff] }
 0x2fd   : > { %2860 = vrot.lane.b32.xlu0 %v11197_v5, %s6951_s0  ;;  %2862 = vrot.lane.b32.xlu1 %v11194_v22, %s6951_s0  ;;  %v2386_v8 = vpop.f32.mrf.mxu0  ;;  %v1729_v22 = vadd.f32 %v8000_v28, %v11330_v9 }
 0x2fe   : > { %v2586_v24 = vadd.f32 %v2386_v8, %v2157_v10  ;;  %v2496_v2 = vpop.f32.mrf.mxu1  ;;  %v2266_v10 = vrot.slane %v6744_v62, 4  ;;  %3243 = vmatpush.msra.mxu2 %v3132_v56  ;;  %v11329_v8 = vld [vmem:[#allocation26_spill] sm:$0xff] }
 0x2ff   : > { %v2585_v48 = vadd.f32 %v2496_v2, %v2156_v51  ;;  %v3131_v51 = vld [vmem:[%s11146_s5 + $0x60] sm:$0xff]  ;;  %v2158_v62 = vadd.f32 %v8313_v53, %v1729_v22  ;;  %v8484_v53 = vpop.f32.mrf.mxu2 }
 0x300   : > { %v8449_v58 = vadd.f32 %v8226_v32, %v2586_v24  ;;  %6238 = vmatmul.msk.f32.gmra.mxu0 %vm764_vm1, %v2265_v61  ;;  %v1730_v24 = vadd.f32 %v7995_v16, %v11329_v8  ;;  %3244 = vmatpush.msra.mxu2 %v3131_v51  ;;  %v2267_v28 = vsel %vm2212_vm4, %v2264_v7, %v2266_v10  ;;  %v3128_v7 = vld [vmem:[%s11146_s5 + $0x48] sm:$0xff] }
 0x301   : > { %v8456_v13 = vadd.f32 %v8242_v29, %v2585_v48  ;;  %6269 = vmatmul.msk.f32.gmra.mxu1 %vm764_vm1, %v2263_v4  ;;  %v3130_v4 = vld [vmem:[%s11146_s5 + $0x58] sm:$0xff] }
 0x302   : > { %v11195_v2 = vmax.f32 %v8449_v58, 0.0  ;;  %v2159_v56 = vadd.f32 %v8307_v1, %v1730_v24  ;;  %3245 = vmatpush.msra.mxu2 %v3130_v4  ;;  %v3129_v1 = vld [vmem:[%s11146_s5 + $0x50] sm:$0xff]  ;;  %v8486_v24 = vpop.f32.mrf.mxu3 }
 0x303   : > { %v11196_v48 = vmax.f32 %v8456_v13, 0.0 }
 0x304   : > { %3246 = vmatpush.msra.mxu2 %v3129_v1 }
 0x305   : > { %2864 = vrot.lane.b32.xlu2 %v11196_v48, %s6951_s0  ;;  %2866 = vrot.lane.b32.xlu0 %v11195_v2, %s6951_s0  ;;  %v2389_v16 = vpop.f32.mrf.mxu0  ;;  %v11332_v2 = vld [vmem:[#allocation29_spill] sm:$0xff] }
 0x306   : > { %v2588_v51 = vadd.f32 %v2389_v16, %v2159_v56  ;;  %v2499_v8 = vpop.f32.mrf.mxu1  ;;  %v6745_v56 = vld [vmem:[%s7160_s24 + $0xe0] sm:$0xff]  ;;  %3247 = vmatpush.msra.mxu2 %v3128_v7  ;;  %v1731_v48 = vadd.f32 %v8012_v54, %v11332_v2 }
 0x307   : > { %v2587_v22 = vadd.f32 %v2499_v8, %v2158_v62  ;;  %v2268_v16 = vrot.slane %v6745_v56, 4  ;;  %v3127_v62 = vld [vmem:[%s11146_s5 + $0x40] sm:$0xff] }
 0x308   : > { %v8489_v9 = vadd.f32 %v8226_v32, %v2588_v51  ;;  %6239 = vmatmul.msk.f32.gmra.mxu0 %vm764_vm1, %v2267_v28  ;;  %v11331_v51 = vld [vmem:[#allocation28_spill] sm:$0xff]  ;;  %3248 = vmatpush.msra.mxu2 %v3127_v62  ;;  %v2160_v5 = vadd.f32 %v8339_v52, %v1731_v48  ;;  %v3124_v62 = vld [vmem:[%s11146_s5 + $0x28] sm:$0xff] }
 0x309   : > { %v8496_v4 = vadd.f32 %v8242_v29, %v2587_v22  ;;  %6270 = vmatmul.msk.f32.gmra.mxu1 %vm764_vm1, %v2265_v61  ;;  %v1732_v8 = vadd.f32 %v8009_v23, %v11331_v51  ;;  %v3126_v61 = vld [vmem:[%s11146_s5 + $0x38] sm:$0xff]  ;;  %v2269_v54 = vsel %vm2212_vm4, %v2266_v10, %v2268_v16  ;;  %v8531_v51 = vpop.f32.mrf.mxu2 }
 0x30a   : > { %v11198_v1 = vmax.f32 %v8489_v9, 0.0  ;;  %3249 = vmatpush.msra.mxu2 %v3126_v61 }
 0x30b   : > { %v11199_v22 = vmax.f32 %v8496_v4, 0.0  ;;  %v2161_v56 = vadd.f32 %v8336_v34, %v1732_v8  ;;  %v3125_v34 = vld [vmem:[%s11146_s5 + $0x30] sm:$0xff]  ;;  %v6746_v8 = vld [vmem:[%s7160_s24 + $0xe8] sm:$0xff] }
 0x30c   : > { %3250 = vmatpush.msra.mxu2 %v3125_v34  ;;  %v2270_v61 = vrot.slane %v6746_v8, 4 }
 0x30d   : > { %2868 = vrot.lane.b32.xlu1 %v11199_v22, %s6951_s0  ;;  %2870 = vrot.lane.b32.xlu2 %v11198_v1, %s6951_s0  ;;  %v2392_v23 = vpop.f32.mrf.mxu0  ;;  %v3122_v22 = vld [vmem:[%s11146_s5 + $0x18] sm:$0xff] }
 0x30e   : > { %v2590_v2 = vadd.f32 %v2392_v23, %v2161_v56  ;;  %v2502_v7 = vpop.f32.mrf.mxu1  ;;  %v3138_v56 = vld [vmem:[%s11146_s5 + $0x98] sm:$0xff]  ;;  %v11333_v23 = vld [vmem:[#allocation30_spill] sm:$0xff]  ;;  %3251 = vmatpush.msra.mxu2 %v3124_v62 }
 0x30f   : > { %v2589_v52 = vadd.f32 %v2502_v7, %v2160_v5  ;;  %v3123_v5 = vld [vmem:[%s11146_s5 + $0x20] sm:$0xff]  ;;  %v8546_v7 = vpop.f32.mrf.mxu3  ;;  %3366 = vmatpush.msrb.mxu3 %v3138_v56  ;;  %v2271_v56 = vsel %vm2212_vm4, %v2268_v16, %v2270_v61  ;;  %v3120_v16 = vld [vmem:[%s11146_s5 + $0x8] sm:$0xff] }
 0x310   : > { %v8525_v48 = vadd.f32 %v8226_v32, %v2590_v2  ;;  %6240 = vmatmul.msk.f32.gmra.mxu0 %vm764_vm1, %v2269_v54  ;;  %v1734_v2 = vadd.f32 %v8024_v42, %v11333_v23  ;;  %3252 = vmatpush.msra.mxu2 %v3123_v5  ;;  %v3136_v5 = vld [vmem:[%s11146_s5 + $0x88] sm:$0xff] }
 0x311   : > { %v8534_v10 = vadd.f32 %v8242_v29, %v2589_v52  ;;  %6271 = vmatmul.msk.f32.gmra.mxu1 %vm764_vm1, %v2267_v28  ;;  %v3137_v28 = vld [vmem:[%s11146_s5 + $0x90] sm:$0xff] }
 0x312   : > { %v11200_v34 = vmax.f32 %v8525_v48, 0.0  ;;  %v11334_v52 = vld [vmem:[#allocation31_spill] sm:$0xff]  ;;  %v2163_v42 = vadd.f32 %v8365_v11, %v1734_v2  ;;  %3367 = vmatpush.msrb.mxu3 %v3137_v28  ;;  %3253 = vmatpush.msra.mxu2 %v3122_v22 }
 0x313   : > { %v1733_v8 = vadd.f32 %v8027_v57, %v11334_v52  ;;  %v11201_v1 = vmax.f32 %v8534_v10, 0.0  ;;  %v3121_v11 = vld [vmem:[%s11146_s5 + $0x10] sm:$0xff] }
 0x314   : > { %3254 = vmatpush.msra.mxu2 %v3121_v11  ;;  %v6747_v28 = vld [vmem:[%s7160_s24 + $0xf0] sm:$0xff]  ;;  %3368 = vmatpush.msrb.mxu3 %v3136_v5  ;;  %v11336_v11 = vld [vmem:[#allocation33_spill] sm:$0xff] }
 0x315   : > { %v2162_v62 = vadd.f32 %v8372_v63, %v1733_v8  ;;  %2872 = vrot.lane.b32.xlu0 %v11201_v1, %s6951_s0  ;;  %2874 = vrot.lane.b32.xlu1 %v11200_v34, %s6951_s0  ;;  %v2395_v57 = vpop.f32.mrf.mxu0  ;;  %v2272_v8 = vrot.slane %v6747_v28, 4 }
 0x316   : > { %v2592_v23 = vadd.f32 %v2395_v57, %v2163_v42  ;;  %v2505_v52 = vpop.f32.mrf.mxu1  ;;  %v3135_v42 = vld [vmem:[%s11146_s5 + $0x80] sm:$0xff]  ;;  %v11335_v57 = vld [vmem:[#allocation32_spill] sm:$0xff]  ;;  %3255 = vmatpush.msra.mxu2 %v3120_v16 }
 0x317   : > { %v2591_v63 = vadd.f32 %v2505_v52, %v2162_v62  ;;  %v3119_v62 = vld [vmem:[%s11146_s5] sm:$0xff]  ;;  %3369 = vmatpush.msrb.mxu3 %v3135_v42  ;;  %v8600_v34 = vpop.f32.mrf.mxu3 }
 0x318   : > { %v8574_v2 = vadd.f32 %v8226_v32, %v2592_v23  ;;  %6241 = vmatmul.msk.f32.gmra.mxu0 %vm764_vm1, %v2271_v56  ;;  %v1736_v23 = vadd.f32 %v8045_v26, %v11335_v57  ;;  %3256 = vmatpush.msra.mxu2 %v3119_v62  ;;  %v2274_v62 = vrot.slane %v8061_v50, 4 }
 0x319   : > { %v8581_v22 = vadd.f32 %v8242_v29, %v2591_v63  ;;  %6272 = vmatmul.msk.f32.gmra.mxu1 %vm764_vm1, %v2269_v54  ;;  %v1735_v54 = vadd.f32 %v8048_v15, %v11336_v11  ;;  %v8596_v63 = vpop.f32.mrf.mxu2  ;;  %v2273_v15 = vsel %vm2212_vm4, %v2270_v61, %v2272_v8 }
 0x31a   : > { %v2726_v52 = vmax.f32 %v8574_v2, 0.0  ;;  %v2165_v28 = vadd.f32 %v8397_v55, %v1736_v23  ;;  %v11337_v23 = vld [vmem:[#allocation34_spill] sm:$0xff] }
 0x31b   : > { %v2725_v5 = vmax.f32 %v8581_v22, 0.0  ;;  %v2164_v1 = vadd.f32 %v8401_v20, %v1735_v54  ;;  %v1738_v11 = vadd.f32 %v8066_v25, %v11337_v23  ;;  %v11338_v54 = vld [vmem:[#allocation35_spill] sm:$0xff]  ;;  %v2275_v25 = vsel %vm2212_vm4, %v2272_v8, %v2274_v62 }
 0x31c   : > { %v1740_v8 = vadd.f32 %v8078_v27, %v7666_v30 }
 0x31d   : > { %2876 = vrot.lane.b32.xlu2 %v2725_v5, %s6951_s0  ;;  %2878 = vrot.lane.b32.xlu0 %v2726_v52, %s6951_s0  ;;  %v2398_v26 = vpop.f32.mrf.mxu0 }
 0x31e   : > { %v2594_v16 = vadd.f32 %v2398_v26, %v2165_v28  ;;  %v2508_v42 = vpop.f32.mrf.mxu1  ;;  %v2167_v26 = vadd.f32 %v8434_v45, %v1738_v11  ;;  %v2276_v11 = vrot.slane %v11292_v21, 4 }
 0x31f   : > { %v2593_v57 = vadd.f32 %v2508_v42, %v2164_v1  ;;  %v1737_v1 = vadd.f32 %v8069_v37, %v11338_v54  ;;  %v8636_v37 = vpop.f32.mrf.mxu3 }
 0x320   : > { %v8611_v55 = vadd.f32 %v8226_v32, %v2594_v16  ;;  %6242 = vmatmul.msk.f32.gmra.mxu0 %vm764_vm1, %v2273_v15  ;;  %v2277_v21 = vsel %vm2212_vm4, %v2274_v62, %v2276_v11  ;;  %v1742_v62 = vadd.f32 %v8091_v40, %v7679_v60 }
 0x321   : > { %v8615_v20 = vadd.f32 %v8242_v29, %v2593_v57  ;;  %6273 = vmatmul.msk.f32.gmra.mxu1 %vm764_vm1, %v2271_v56  ;;  %v2166_v16 = vadd.f32 %v8443_v35, %v1737_v1  ;;  %v8627_v42 = vpop.f32.mrf.mxu2  ;;  %v11339_v1 = vld [vmem:[#allocation36_spill] sm:$0xff] }
 0x322   : > { %v2728_v61 = vmax.f32 %v8611_v55, 0.0 }
 0x323   : > { %v2727_v28 = vmax.f32 %v8615_v20, 0.0 }
 0x325   : > { %2880 = vrot.lane.b32.xlu1 %v2727_v28, %s6951_s0  ;;  %2882 = vrot.lane.b32.xlu2 %v2728_v61, %s6951_s0  ;;  %v2401_v50 = vpop.f32.mrf.mxu0 }
 0x326   : > { %v2596_v56 = vadd.f32 %v2401_v50, %v2167_v26  ;;  %v2511_v57 = vpop.f32.mrf.mxu1  ;;  %v1739_v26 = vadd.f32 %v8081_v31, %v11339_v1  ;;  %v2169_v50 = vadd.f32 %v8484_v53, %v1740_v8  ;;  %v11340_v1 = vld [vmem:[#allocation37_spill] sm:$0xff] }
 0x327   : > { %v2595_v45 = vadd.f32 %v2511_v57, %v2166_v16  ;;  %v8664_v53 = vpop.f32.mrf.mxu3 }
 0x328   : > { %v8639_v35 = vadd.f32 %v8226_v32, %v2596_v56  ;;  %6243 = vmatmul.msk.f32.gmra.mxu0 %vm764_vm1, %v2275_v25  ;;  %v2168_v56 = vadd.f32 %v8486_v24, %v1739_v26  ;;  %v1741_v26 = vadd.f32 %v8094_v18, %v11340_v1 }
 0x329   : > { %v8643_v23 = vadd.f32 %v8242_v29, %v2595_v45  ;;  %6274 = vmatmul.msk.f32.gmra.mxu1 %vm764_vm1, %v2273_v15  ;;  %v8662_v57 = vpop.f32.mrf.mxu2 }
 0x32a   : > { %v2730_v54 = vmax.f32 %v8639_v35, 0.0 }
 0x32b   : > { %v2729_v16 = vmax.f32 %v8643_v23, 0.0 }
 0x32d   : > { %2884 = vrot.lane.b32.xlu0 %v2729_v16, %s6951_s0  ;;  %2886 = vrot.lane.b32.xlu1 %v2730_v54, %s6951_s0  ;;  %v2404_v30 = vpop.f32.mrf.mxu0 }
 0x32e   : > { %v2598_v27 = vadd.f32 %v2404_v30, %v2169_v50  ;;  %v2514_v15 = vpop.f32.mrf.mxu1  ;;  %v2831_v31 = vpop.permute.xlu0 %2830  ;;  %v2170_v30 = vadd.f32 %v8546_v7, %v1741_v26 }
 0x32f   : > { %v2597_v45 = vadd.f32 %v2514_v15, %v2168_v56  ;;  %v2171_v56 = vadd.f32 %v8531_v51, %v1742_v62  ;;  %v2839_v26 = vpop.permute.xlu2 %2838 }
 0x330   : > { %v8667_v24 = vadd.f32 %v8226_v32, %v2598_v27  ;;  %6244 = vmatmul.msk.f32.gmra.mxu0 %vm764_vm1, %v2277_v21 }
 0x331   : > { %v8671_v8 = vadd.f32 %v8242_v29, %v2597_v45  ;;  %6275 = vmatmul.msk.f32.gmra.mxu1 %vm764_vm1, %v2275_v25  ;;  %v11341_v45 = vmax.f32 %v8254_v12, 0.0  ;;  %v8694_v1 = vpop.f32.mrf.mxu2 }
 0x332   : > { %v11202_v11 = vmax.f32 %v8667_v24, 0.0 }
 0x333   : > { %v2731_v50 = vmax.f32 %v8671_v8, 0.0 }
 0x335   : > { %2888 = vrot.lane.b32.xlu2 %v2731_v50, %s6951_s0  ;;  %2890 = vrot.lane.b32.xlu0 %v11202_v11, %s6951_s0  ;;  %v2407_v60 = vpop.f32.mrf.mxu0 }
 0x336   : > { %v2600_v40 = vadd.f32 %v2407_v60, %v2171_v56  ;;  %v2517_v25 = vpop.f32.mrf.mxu1  ;;  %v2835_v27 = vpop.permute.xlu1 %2834  ;;  %v11342_v56 = vmax.f32 %v8234_v38, 0.0 }
 0x337   : > { %v2599_v18 = vadd.f32 %v2517_v25, %v2170_v30  ;;  %v2833_v15 = vpop.permute.xlu0 %2832  ;;  %v1744_v30 = vadd.f32 %v8102_v0, %v7691_v19 }
 0x338   : > { %v8689_v51 = vadd.f32 %v8226_v32, %v2600_v40  ;;  %v2959_v7 = vsel %vm2958_vm6, %v2831_v31, %v2833_v15  ;;  %v3056_v62 = vmax.f32 %v11341_v45, %v2833_v15  ;;  %v8704_v40 = vpop.f32.mrf.mxu3  ;;  %v11343_v31 = vld [vmem:[#allocation38_spill] sm:$0xff] }
 0x339   : > { %v8697_v11 = vadd.f32 %v8242_v29, %v2599_v18  ;;  %v3055_v60 = vmax.f32 %v11342_v56, %v2959_v7  ;;  %6276 = vmatmul.msk.f32.gmra.mxu1 %vm764_vm1, %v2277_v21  ;;  %v1743_v25 = vadd.f32 %v8105_v43, %v11343_v31  ;;  %v2173_v38 = vadd.f32 %v8596_v63, %v1744_v30 }
 0x33a   : > { %6278 = vmatmul.msk.f32.vlgmr.msrb.gmra.mxu3 %vm3140_vm7, %v3056_v62  ;;  %v11216_v12 = vmax.f32 %v8689_v51, 0.0  ;;  %v1746_v31 = vadd.f32 %v8111_v59, %v7703_v49 }
 0x33b   : > { %3257 = vmatmul.f32.vlgmr.msra.gmra.mxu2 %v3055_v60  ;;  %v2733_v18 = vmax.f32 %v8697_v11, 0.0  ;;  %v2172_v15 = vadd.f32 %v8600_v34, %v1743_v25  ;;  %v11344_v34 = vmax.f32 %v8274_v3, 0.0  ;;  %v11345_v60 = vmax.f32 %v8249_v14, 0.0  ;;  %v2841_v3 = vpop.permute.xlu2 %2840 }
 0x33c   : > { %v2961_v59 = vsel %vm2958_vm6, %v2839_v26, %v2841_v3 }
 0x33d   : > { %2892 = vrot.lane.b32.xlu1 %v2733_v18, %s6951_s0  ;;  %2894 = vrot.lane.b32.xlu2 %v11216_v12, %s6951_s0  ;;  %v2410_v19 = vpop.f32.mrf.mxu0 }
 0x33e   : > { %v2602_v0 = vadd.f32 %v2410_v19, %v2173_v38  ;;  %v2520_v21 = vpop.f32.mrf.mxu1  ;;  %v11346_v38 = vld [vmem:[#allocation39_spill] sm:$0xff] }
 0x33f   : > { %v2601_v7 = vadd.f32 %v2520_v21, %v2172_v15  ;;  %v2837_v43 = vpop.permute.xlu1 %2836  ;;  %v1745_v15 = vadd.f32 %v8114_v33, %v11346_v38  ;;  %v11350_v38 = vld [vmem:[#allocation66_spill] sm:$0xff] }
 0x340   : > { %v8720_v45 = vadd.f32 %v8226_v32, %v2602_v0  ;;  %v2960_v63 = vsel %vm2958_vm6, %v2835_v27, %v2837_v43  ;;  %v3058_v62 = vmax.f32 %v11344_v34, %v2837_v43  ;;  %v8736_v27 = vpop.f32.mrf.mxu2  ;;  %v2175_v0 = vadd.f32 %v8627_v42, %v1746_v31  ;;  %v8740_v14 = vpop.f32.mrf.mxu3  ;;  %v11349_v31 = vld [vmem:[#allocation40_spill] sm:$0xff] }
 0x341   : > { %v8726_v56 = vadd.f32 %v8242_v29, %v2601_v7  ;;  %v3057_v30 = vmax.f32 %v11345_v60, %v2960_v63  ;;  %v2174_v21 = vadd.f32 %v8636_v37, %v1745_v15  ;;  %v11347_v42 = vmax.f32 %v8298_v47, 0.0 }
 0x342   : > { %6279 = vmatmul.msk.f32.gmra.mxu3 %vm3140_vm7, %v3058_v62  ;;  %v11208_v25 = vmax.f32 %v8720_v45, 0.0  ;;  %v11348_v37 = vmax.f32 %v8271_v44, 0.0  ;;  %v1747_v47 = vadd.f32 %v11350_v38, %v11349_v31  ;;  %v11354_v31 = vld [vmem:[#allocation41_spill] sm:$0xff]  ;;  %v11355_v38 = vld [vmem:[#allocation67_spill] sm:$0xff] }
 0x343   : > { %3260 = vmatmul.f32.gmra.mxu2 %v3057_v30  ;;  %v2735_v19 = vmax.f32 %v8726_v56, 0.0  ;;  %v3060_v63 = vmax.f32 %v11347_v42, %v2841_v3  ;;  %v1748_v30 = vadd.f32 %v8119_v36, %v7715_v46 }
 0x344   : > { %v3059_v62 = vmax.f32 %v11348_v37, %v2961_v59  ;;  %v2176_v44 = vadd.f32 %v8664_v53, %v1747_v47  ;;  %v11352_v37 = vld [vmem:[#allocation92_spill] sm:$0xff]  ;;  %v1750_v47 = vadd.f32 %v11355_v38, %v11354_v31  ;;  %v11358_v31 = vld [vmem:[#allocation95_spill] sm:$0xff] }
 0x345   : > { %2896 = vrot.lane.b32.xlu0 %v2735_v19, %s6951_s0  ;;  %2898 = vrot.lane.b32.xlu1 %v11208_v25, %s6951_s0  ;;  %v2413_v49 = vpop.f32.mrf.mxu0  ;;  %v2177_v3 = vadd.f32 %v8662_v57, %v1748_v30  ;;  %v11359_v38 = vmax.f32 %v11358_v31, 0.0 }
 0x346   : > { %v2604_v33 = vadd.f32 %v2413_v49, %v2175_v0  ;;  %v2523_v7 = vpop.f32.mrf.mxu1  ;;  %v2843_v59 = vpop.permute.xlu0 %2842 }
 0x347   : > { %v2603_v43 = vadd.f32 %v2523_v7, %v2174_v21 }
 0x348   : > { %v8753_v34 = vadd.f32 %v8226_v32, %v2604_v33  ;;  %v8769_v0 = vpop.f32.mrf.mxu2  ;;  %v8777_v36 = vpop.f32.mrf.mxu3 }
 0x349   : > { %v8758_v60 = vadd.f32 %v8242_v29, %v2603_v43  ;;  %v11351_v43 = vmax.f32 %v8322_v39, 0.0 }
 0x34a   : > { %6280 = vmatmul.msk.f32.gmra.mxu3 %vm3140_vm7, %v3060_v63  ;;  %v11204_v26 = vmax.f32 %v8753_v34, 0.0 }
 0x34b   : > { %3263 = vmatmul.f32.gmra.mxu2 %v3059_v62  ;;  %v11209_v15 = vmax.f32 %v8758_v60, 0.0  ;;  %v11353_v62 = vmax.f32 %v11352_v37, 0.0 }
 0x34d   : > { %2900 = vrot.lane.b32.xlu2 %v11209_v15, %s6951_s0  ;;  %2902 = vrot.lane.b32.xlu0 %v11204_v26, %s6951_s0  ;;  %v2416_v46 = vpop.f32.mrf.mxu0  ;;  %v11365_v26 = vld [vmem:[#allocation70_spill] sm:$0xff] }
 0x34e   : > { %v2606_v21 = vadd.f32 %v2416_v46, %v2177_v3  ;;  %v2526_v49 = vpop.f32.mrf.mxu1  ;;  %v11357_v46 = vld [vmem:[#allocation68_spill] sm:$0xff] }
 0x34f   : > { %v2605_v33 = vadd.f32 %v2526_v49, %v2176_v44  ;;  %v2845_v57 = vpop.permute.xlu1 %2844  ;;  %v11356_v44 = vld [vmem:[#allocation42_spill] sm:$0xff]  ;;  %v2179_v49 = vadd.f32 %v8694_v1, %v1750_v47 }
 0x350   : > { %v8780_v53 = vadd.f32 %v8226_v32, %v2606_v21  ;;  %v2962_v7 = vsel %vm2958_vm6, %v2843_v59, %v2845_v57  ;;  %v3062_v42 = vmax.f32 %v11351_v43, %v2845_v57  ;;  %v1749_v21 = vadd.f32 %v11357_v46, %v11356_v44  ;;  %v11360_v46 = vld [vmem:[#allocation93_spill] sm:$0xff] }
 0x351   : > { %v8786_v63 = vadd.f32 %v8242_v29, %v2605_v33  ;;  %v3061_v30 = vmax.f32 %v11353_v62, %v2962_v7  ;;  %v2847_v33 = vpop.permute.xlu2 %2846  ;;  %v1999_v62 = vpop.f32.mrf.mxu2 }
 0x352   : > { %6281 = vmatmul.msk.f32.gmra.mxu3 %vm3140_vm7, %v3062_v42  ;;  %v11203_v3 = vmax.f32 %v8780_v53, 0.0  ;;  %v2178_v59 = vadd.f32 %v8704_v40, %v1749_v21  ;;  %v11361_v21 = vmax.f32 %v11360_v46, 0.0 }
 0x353   : > { %3266 = vmatmul.f32.gmra.mxu2 %v3061_v30  ;;  %v11205_v39 = vmax.f32 %v8786_v63, 0.0  ;;  %v2109_v30 = vpop.f32.mrf.mxu3 }
 0x355   : > { %2904 = vrot.lane.b32.xlu1 %v11205_v39, %s6951_s0  ;;  %2906 = vrot.lane.b32.xlu2 %v11203_v3, %s6951_s0  ;;  %v2419_v57 = vpop.f32.mrf.mxu0 }
 0x356   : > { %v2608_v7 = vadd.f32 %v2419_v57, %v2179_v49  ;;  %v2529_v43 = vpop.f32.mrf.mxu1  ;;  %v11362_v49 = vld [vmem:[#allocation43_spill] sm:$0xff]  ;;  %v11363_v57 = vld [vmem:[#allocation69_spill] sm:$0xff] }
 0x357   : > { %v2607_v42 = vadd.f32 %v2529_v43, %v2178_v59  ;;  %v2849_v37 = vpop.permute.xlu0 %2848  ;;  %v1752_v59 = vadd.f32 %v11363_v57, %v11362_v49 }
 0x358   : > { %v8806_v1 = vadd.f32 %v8226_v32, %v2608_v7  ;;  %v2963_v40 = vsel %vm2958_vm6, %v2847_v33, %v2849_v37  ;;  %v3064_v47 = vmax.f32 %v11359_v38, %v2849_v37  ;;  %v11364_v7 = vld [vmem:[#allocation44_spill] sm:$0xff]  ;;  %v2851_v33 = vpop.permute.xlu1 %2850 }
 0x359   : > { %v8812_v44 = vadd.f32 %v8242_v29, %v2607_v42  ;;  %v3063_v3 = vmax.f32 %v11361_v21, %v2963_v40  ;;  %v1751_v39 = vadd.f32 %v11365_v26, %v11364_v7  ;;  %v2181_v42 = vadd.f32 %v8736_v27, %v1752_v59  ;;  %v2853_v38 = vpop.permute.xlu2 %2852  ;;  %v11366_v21 = vld [vmem:[#allocation97_spill] sm:$0xff]  ;;  %v2002_v15 = vpop.f32.mrf.mxu2 }
 0x35a   : > { %6282 = vmatmul.msk.f32.gmra.mxu3 %vm3140_vm7, %v3064_v47  ;;  %v11207_v43 = vmax.f32 %v8806_v1, 0.0  ;;  %v2964_v26 = vsel %vm2958_vm6, %v2851_v33, %v2853_v38  ;;  %v11367_v49 = vmax.f32 %v11366_v21, 0.0 }
 0x35b   : > { %3269 = vmatmul.f32.gmra.mxu2 %v3063_v3  ;;  %v11206_v37 = vmax.f32 %v8812_v44, 0.0  ;;  %v2180_v31 = vadd.f32 %v8740_v14, %v1751_v39  ;;  %v11368_v39 = vld [vmem:[#allocation94_spill] sm:$0xff]  ;;  %v2112_v33 = vpop.f32.mrf.mxu3 }
 0x35c   : > { %v3066_v27 = vmax.f32 %v11367_v49, %v2853_v38  ;;  %v11369_v57 = vmax.f32 %v11368_v39, 0.0  ;;  %v11373_v38 = vld [vmem:[#allocation72_spill] sm:$0xff] }
 0x35d   : > { %2908 = vrot.lane.b32.xlu0 %v11206_v37, %s6951_s0  ;;  %2910 = vrot.lane.b32.xlu1 %v11207_v43, %s6951_s0  ;;  %v2422_v40 = vpop.f32.mrf.mxu0  ;;  %v11370_v37 = vld [vmem:[#allocation45_spill] sm:$0xff]  ;;  %v11371_v43 = vld [vmem:[#allocation71_spill] sm:$0xff] }
 0x35e   : > { %v2610_v47 = vadd.f32 %v2422_v40, %v2181_v42  ;;  %v2532_v3 = vpop.f32.mrf.mxu1  ;;  %v3065_v59 = vmax.f32 %v11369_v57, %v2964_v26  ;;  %v1754_v25 = vadd.f32 %v11371_v43, %v11370_v37 }
 0x35f   : > { %v2609_v46 = vadd.f32 %v2532_v3, %v2180_v31  ;;  %v11372_v31 = vld [vmem:[#allocation46_spill] sm:$0xff]  ;;  %v2855_v21 = vpop.permute.xlu0 %2854 }
 0x360   : > { %v8835_v14 = vadd.f32 %v8226_v32, %v2610_v47  ;;  %v1753_v40 = vadd.f32 %v11373_v38, %v11372_v31  ;;  %v2183_v26 = vadd.f32 %v8769_v0, %v1754_v25  ;;  %v11374_v0 = vmax.f32 %v8390_v17, 0.0 }
 0x361   : > { %v8840_v7 = vadd.f32 %v8242_v29, %v2609_v46 }
 0x362   : > { %6283 = vmatmul.msk.f32.gmra.mxu3 %vm3140_vm7, %v3066_v27  ;;  %v11210_v42 = vmax.f32 %v8835_v14, 0.0  ;;  %v2182_v3 = vadd.f32 %v8777_v36, %v1753_v40  ;;  %v11377_v40 = vld [vmem:[#allocation47_spill] sm:$0xff] }
 0x363   : > { %3272 = vmatmul.f32.gmra.mxu2 %v3065_v59  ;;  %v11211_v47 = vmax.f32 %v8840_v7, 0.0  ;;  %v11375_v59 = vld [vmem:[#allocation96_spill] sm:$0xff] }
 0x364   : > { %v11376_v31 = vmax.f32 %v11375_v59, 0.0 }
 0x365   : > { %2912 = vrot.lane.b32.xlu2 %v11211_v47, %s6951_s0  ;;  %2914 = vrot.lane.b32.xlu0 %v11210_v42, %s6951_s0  ;;  %v2425_v43 = vpop.f32.mrf.mxu0  ;;  %v2859_v47 = vpop.permute.xlu2 %2858 }
 0x366   : > { %v2612_v37 = vadd.f32 %v2425_v43, %v2183_v26  ;;  %v2535_v46 = vpop.f32.mrf.mxu1  ;;  %v11378_v26 = vld [vmem:[#allocation73_spill] sm:$0xff] }
 0x367   : > { %v2611_v49 = vadd.f32 %v2535_v46, %v2182_v3  ;;  %v2857_v27 = vpop.permute.xlu1 %2856  ;;  %v1756_v43 = vadd.f32 %v11378_v26, %v11377_v40  ;;  %v11380_v46 = vld [vmem:[#allocation74_spill] sm:$0xff] }
 0x368   : > { %v8858_v39 = vadd.f32 %v8226_v32, %v2612_v37  ;;  %v2965_v25 = vsel %vm2958_vm6, %v2855_v21, %v2857_v27  ;;  %v3068_v36 = vmax.f32 %v11374_v0, %v2857_v27  ;;  %v11379_v37 = vld [vmem:[#allocation48_spill] sm:$0xff]  ;;  %v2005_v27 = vpop.f32.mrf.mxu2 }
 0x369   : > { %v8864_v57 = vadd.f32 %v8242_v29, %v2611_v49  ;;  %v3067_v38 = vmax.f32 %v11376_v31, %v2965_v25  ;;  %v1755_v42 = vadd.f32 %v11380_v46, %v11379_v37  ;;  %v2185_v21 = vadd.f32 %v1999_v62, %v1756_v43  ;;  %v2115_v49 = vpop.f32.mrf.mxu3  ;;  %v11382_v43 = vld [vmem:[#allocation98_spill] sm:$0xff] }
 0x36a   : > { %6284 = vmatmul.msk.f32.gmra.mxu3 %vm3140_vm7, %v3068_v36  ;;  %v11212_v3 = vmax.f32 %v8858_v39, 0.0  ;;  %v11383_v37 = vmax.f32 %v11382_v43, 0.0 }
 0x36b   : > { %3275 = vmatmul.f32.gmra.mxu2 %v3067_v38  ;;  %v11213_v17 = vmax.f32 %v8864_v57, 0.0  ;;  %v2184_v0 = vadd.f32 %v2109_v30, %v1755_v42  ;;  %v11381_v30 = vmax.f32 %v8416_v41, 0.0 }
 0x36d   : > { %2916 = vrot.lane.b32.xlu1 %v11213_v17, %s6951_s0  ;;  %2918 = vrot.lane.b32.xlu2 %v11212_v3, %s6951_s0  ;;  %v2428_v25 = vpop.f32.mrf.mxu0  ;;  %v11384_v3 = vld [vmem:[#allocation49_spill] sm:$0xff]  ;;  %v11385_v17 = vld [vmem:[#allocation75_spill] sm:$0xff] }
 0x36e   : > { %v2614_v36 = vadd.f32 %v2428_v25, %v2185_v21  ;;  %v2538_v59 = vpop.f32.mrf.mxu1  ;;  %v1758_v21 = vadd.f32 %v11385_v17, %v11384_v3  ;;  %v11386_v25 = vld [vmem:[#allocation50_spill] sm:$0xff] }
 0x36f   : > { %v2613_v31 = vadd.f32 %v2538_v59, %v2184_v0  ;;  %v2861_v38 = vpop.permute.xlu0 %2860 }
 0x370   : > { %v8882_v40 = vadd.f32 %v8226_v32, %v2614_v36  ;;  %v2966_v62 = vsel %vm2958_vm6, %v2859_v47, %v2861_v38  ;;  %v3070_v42 = vmax.f32 %v11381_v30, %v2861_v38  ;;  %v11387_v36 = vld [vmem:[#allocation76_spill] sm:$0xff]  ;;  %v2863_v47 = vpop.permute.xlu1 %2862  ;;  %v2187_v38 = vadd.f32 %v2002_v15, %v1758_v21  ;;  %v2865_v30 = vpop.permute.xlu2 %2864 }
 0x371   : > { %v8888_v26 = vadd.f32 %v8242_v29, %v2613_v31  ;;  %v3069_v46 = vmax.f32 %v11383_v37, %v2966_v62  ;;  %v1757_v59 = vadd.f32 %v11387_v36, %v11386_v25  ;;  %v2118_v17 = vpop.f32.mrf.mxu3  ;;  %v2967_v62 = vsel %vm2958_vm6, %v2863_v47, %v2865_v30  ;;  %v2008_v37 = vpop.f32.mrf.mxu2 }
 0x372   : > { %6285 = vmatmul.msk.f32.gmra.mxu3 %vm3140_vm7, %v3070_v42  ;;  %v11214_v0 = vmax.f32 %v8882_v40, 0.0  ;;  %v11388_v15 = vmax.f32 %v8456_v13, 0.0  ;;  %v11389_v25 = vmax.f32 %v8412_v6, 0.0 }
 0x373   : > { %3278 = vmatmul.f32.gmra.mxu2 %v3069_v46  ;;  %v11215_v41 = vmax.f32 %v8888_v26, 0.0  ;;  %v2186_v31 = vadd.f32 %v2112_v33, %v1757_v59 }
 0x374   : > { %v3072_v33 = vmax.f32 %v11388_v15, %v2865_v30  ;;  %v3071_v36 = vmax.f32 %v11389_v25, %v2967_v62 }
 0x375   : > { %2920 = vrot.lane.b32.xlu0 %v11215_v41, %s6951_s0  ;;  %2922 = vrot.lane.b32.xlu1 %v11214_v0, %s6951_s0  ;;  %v2431_v3 = vpop.f32.mrf.mxu0  ;;  %v11390_v0 = vld [vmem:[#allocation51_spill] sm:$0xff]  ;;  %v11391_v41 = vld [vmem:[#allocation77_spill] sm:$0xff] }
 0x376   : > { %v2616_v42 = vadd.f32 %v2431_v3, %v2187_v38  ;;  %v2541_v43 = vpop.f32.mrf.mxu1  ;;  %v1760_v12 = vadd.f32 %v11391_v41, %v11390_v0  ;;  %v11392_v38 = vld [vmem:[#allocation52_spill] sm:$0xff] }
 0x377   : > { %v2615_v46 = vadd.f32 %v2541_v43, %v2186_v31  ;;  %v11393_v31 = vld [vmem:[#allocation78_spill] sm:$0xff]  ;;  %v2867_v62 = vpop.permute.xlu0 %2866 }
 0x378   : > { %v8909_v21 = vadd.f32 %v8226_v32, %v2616_v42  ;;  %v1759_v13 = vadd.f32 %v11393_v31, %v11392_v38  ;;  %v2189_v3 = vadd.f32 %v2005_v27, %v1760_v12  ;;  %v11394_v27 = vmax.f32 %v8496_v4, 0.0 }
 0x379   : > { %v8914_v59 = vadd.f32 %v8242_v29, %v2615_v46  ;;  %v2121_v15 = vpop.f32.mrf.mxu3  ;;  %v2011_v25 = vpop.f32.mrf.mxu2  ;;  %v11395_v38 = vmax.f32 %v8449_v58, 0.0 }
 0x37a   : > { %6286 = vmatmul.msk.f32.gmra.mxu3 %vm3140_vm7, %v3072_v33  ;;  %v11218_v47 = vmax.f32 %v8909_v21, 0.0  ;;  %v2188_v42 = vadd.f32 %v2115_v49, %v1759_v13  ;;  %v11396_v13 = vld [vmem:[#allocation53_spill] sm:$0xff] }
 0x37b   : > { %3281 = vmatmul.f32.gmra.mxu2 %v3071_v36  ;;  %v2749_v30 = vmax.f32 %v8914_v59, 0.0  ;;  %v11441_v59 = vmax.f32 %v8909_v21, 0.0 }
 0x37d   : > { %2924 = vrot.lane.b32.xlu2 %v2749_v30, %s6951_s0  ;;  %2926 = vrot.lane.b32.xlu0 %v11218_v47, %s6951_s0  ;;  %v2434_v6 = vpop.f32.mrf.mxu0 }
 0x37e   : > { %v2618_v0 = vadd.f32 %v2434_v6, %v2189_v3  ;;  %v2544_v41 = vpop.f32.mrf.mxu1  ;;  %v11397_v3 = vld [vmem:[#allocation79_spill] sm:$0xff] }
 0x37f   : > { %v2617_v43 = vadd.f32 %v2544_v41, %v2188_v42  ;;  %v2869_v46 = vpop.permute.xlu1 %2868  ;;  %v1762_v42 = vadd.f32 %v11397_v3, %v11396_v13  ;;  %v11399_v41 = vld [vmem:[#allocation80_spill] sm:$0xff] }
 0x380   : > { %v8930_v33 = vadd.f32 %v8226_v32, %v2618_v0  ;;  %v2968_v12 = vsel %vm2958_vm6, %v2867_v62, %v2869_v46  ;;  %v3074_v49 = vmax.f32 %v11394_v27, %v2869_v46  ;;  %v11398_v0 = vld [vmem:[#allocation54_spill] sm:$0xff] }
 0x381   : > { %v8936_v36 = vadd.f32 %v8242_v29, %v2617_v43  ;;  %v3073_v31 = vmax.f32 %v11395_v38, %v2968_v12  ;;  %v1761_v62 = vadd.f32 %v11399_v41, %v11398_v0  ;;  %v2191_v46 = vadd.f32 %v2008_v37, %v1762_v42  ;;  %v2871_v43 = vpop.permute.xlu2 %2870  ;;  %v2014_v47 = vpop.f32.mrf.mxu2 }
 0x382   : > { %6287 = vmatmul.msk.f32.gmra.mxu3 %vm3140_vm7, %v3074_v49  ;;  %v11217_v6 = vmax.f32 %v8930_v33, 0.0  ;;  %v11401_v0 = vmax.f32 %v8489_v9, 0.0 }
 0x383   : > { %3284 = vmatmul.f32.gmra.mxu2 %v3073_v31  ;;  %v2751_v4 = vmax.f32 %v8936_v36, 0.0  ;;  %v2190_v27 = vadd.f32 %v2118_v17, %v1761_v62  ;;  %v11400_v17 = vmax.f32 %v8534_v10, 0.0  ;;  %v11402_v62 = vld [vmem:[#allocation55_spill] sm:$0xff]  ;;  %v11442_v36 = vmax.f32 %v8930_v33, 0.0 }
 0x385   : > { %2928 = vrot.lane.b32.xlu1 %v2751_v4, %s6951_s0  ;;  %2930 = vrot.lane.b32.xlu2 %v11217_v6, %s6951_s0  ;;  %v2437_v58 = vpop.f32.mrf.mxu0  ;;  %v11403_v6 = vld [vmem:[#allocation81_spill] sm:$0xff] }
 0x386   : > { %v2620_v12 = vadd.f32 %v2437_v58, %v2191_v46  ;;  %v2547_v49 = vpop.f32.mrf.mxu1  ;;  %v1764_v46 = vadd.f32 %v11403_v6, %v11402_v62  ;;  %v2124_v58 = vpop.f32.mrf.mxu3 }
 0x387   : > { %v2619_v38 = vadd.f32 %v2547_v49, %v2190_v27  ;;  %v2873_v13 = vpop.permute.xlu0 %2872  ;;  %v11405_v49 = vld [vmem:[#allocation82_spill] sm:$0xff]  ;;  %v2875_v10 = vpop.permute.xlu1 %2874 }
 0x388   : > { %v8954_v31 = vadd.f32 %v8226_v32, %v2620_v12  ;;  %v2969_v37 = vsel %vm2958_vm6, %v2871_v43, %v2873_v13  ;;  %v3076_v3 = vmax.f32 %v11400_v17, %v2873_v13  ;;  %v11404_v12 = vld [vmem:[#allocation56_spill] sm:$0xff]  ;;  %v2193_v13 = vadd.f32 %v2011_v25, %v1764_v46 }
 0x389   : > { %v8960_v42 = vadd.f32 %v8242_v29, %v2619_v38  ;;  %v3075_v41 = vmax.f32 %v11401_v0, %v2969_v37  ;;  %v1763_v43 = vadd.f32 %v11405_v49, %v11404_v12  ;;  %v2877_v9 = vpop.permute.xlu2 %2876  ;;  %v11406_v25 = vmax.f32 %v8525_v48, 0.0  ;;  %v11407_v49 = vld [vmem:[#allocation57_spill] sm:$0xff] }
 0x38a   : > { %6288 = vmatmul.msk.f32.gmra.mxu3 %vm3140_vm7, %v3076_v3  ;;  %v11219_v27 = vmax.f32 %v8954_v31, 0.0  ;;  %v2970_v37 = vsel %vm2958_vm6, %v2875_v10, %v2877_v9 }
 0x38b   : > { %3287 = vmatmul.f32.gmra.mxu2 %v3075_v41  ;;  %v2753_v38 = vmax.f32 %v8960_v42, 0.0  ;;  %v2192_v17 = vadd.f32 %v2121_v15, %v1763_v43  ;;  %v3078_v41 = vmax.f32 %v2725_v5, %v2877_v9  ;;  %v3077_v46 = vmax.f32 %v11406_v25, %v2970_v37  ;;  %v11408_v43 = vld [vmem:[#allocation83_spill] sm:$0xff]  ;;  %v2017_v37 = vpop.f32.mrf.mxu2 }
 0x38c   : > { %v11443_v42 = vmax.f32 %v8954_v31, 0.0 }
 0x38d   : > { %2932 = vrot.lane.b32.xlu0 %v2753_v38, %s6951_s0  ;;  %2934 = vrot.lane.b32.xlu1 %v11219_v27, %s6951_s0  ;;  %v2440_v6 = vpop.f32.mrf.mxu0  ;;  %v1766_v27 = vadd.f32 %v11408_v43, %v11407_v49 }
 0x38e   : > { %v2622_v3 = vadd.f32 %v2440_v6, %v2193_v13  ;;  %v2550_v0 = vpop.f32.mrf.mxu1  ;;  %v11409_v13 = vld [vmem:[#allocation58_spill] sm:$0xff]  ;;  %v2127_v6 = vpop.f32.mrf.mxu3 }
 0x38f   : > { %v2621_v62 = vadd.f32 %v2550_v0, %v2192_v17  ;;  %v11410_v17 = vld [vmem:[#allocation84_spill] sm:$0xff]  ;;  %v2195_v9 = vadd.f32 %v2014_v47, %v1766_v27 }
 0x390   : > { %v8981_v15 = vadd.f32 %v8226_v32, %v2622_v3  ;;  %v1765_v22 = vadd.f32 %v11410_v17, %v11409_v13  ;;  %v11411_v13 = vld [vmem:[#allocation59_spill] sm:$0xff]  ;;  %v11412_v17 = vld [vmem:[#allocation85_spill] sm:$0xff] }
 0x391   : > { %v8986_v12 = vadd.f32 %v8242_v29, %v2621_v62 }
 0x392   : > { %6289 = vmatmul.msk.f32.gmra.mxu3 %vm3140_vm7, %v3078_v41  ;;  %v2756_v10 = vmax.f32 %v8981_v15, 0.0  ;;  %v2194_v48 = vadd.f32 %v2124_v58, %v1765_v22  ;;  %v2879_v41 = vpop.permute.xlu0 %2878  ;;  %v1768_v22 = vadd.f32 %v11412_v17, %v11411_v13 }
 0x393   : > { %3290 = vmatmul.f32.gmra.mxu2 %v3077_v46  ;;  %v2755_v5 = vmax.f32 %v8986_v12, 0.0 }
 0x395   : > { %2936 = vrot.lane.b32.xlu2 %v2755_v5, %s6951_s0  ;;  %2938 = vrot.lane.b32.xlu0 %v2756_v10, %s6951_s0  ;;  %v2443_v3 = vpop.f32.mrf.mxu0 }
 0x396   : > { %v2624_v0 = vadd.f32 %v2443_v3, %v2195_v9  ;;  %v2553_v62 = vpop.f32.mrf.mxu1  ;;  %v11414_v3 = vld [vmem:[#allocation86_spill] sm:$0xff] }
 0x397   : > { %v2623_v25 = vadd.f32 %v2553_v62, %v2194_v48  ;;  %v2881_v46 = vpop.permute.xlu1 %2880  ;;  %v11413_v48 = vld [vmem:[#allocation60_spill] sm:$0xff] }
 0x398   : > { %v9002_v49 = vadd.f32 %v8226_v32, %v2624_v0  ;;  %v2971_v47 = vsel %vm2958_vm6, %v2879_v41, %v2881_v46  ;;  %v3080_v58 = vmax.f32 %v2727_v28, %v2881_v46  ;;  %v1767_v0 = vadd.f32 %v11414_v3, %v11413_v48  ;;  %v2883_v41 = vpop.permute.xlu2 %2882  ;;  %v11415_v48 = vld [vmem:[#allocation61_spill] sm:$0xff]  ;;  %v11416_v3 = vld [vmem:[#allocation87_spill] sm:$0xff] }
 0x399   : > { %v9008_v27 = vadd.f32 %v8242_v29, %v2623_v25  ;;  %v3079_v43 = vmax.f32 %v2726_v52, %v2971_v47  ;;  %v2197_v28 = vadd.f32 %v2017_v37, %v1768_v22  ;;  %v2130_v52 = vpop.f32.mrf.mxu3  ;;  %v2020_v47 = vpop.f32.mrf.mxu2 }
 0x39a   : > { %6290 = vmatmul.msk.f32.gmra.mxu3 %vm3140_vm7, %v3080_v58  ;;  %v2758_v9 = vmax.f32 %v9002_v49, 0.0  ;;  %v2196_v62 = vadd.f32 %v2127_v6, %v1767_v0  ;;  %v1770_v0 = vadd.f32 %v11416_v3, %v11415_v48  ;;  %v11420_v48 = vld [vmem:[#allocation63_spill] sm:$0xff] }
 0x39b   : > { %3293 = vmatmul.f32.gmra.mxu2 %v3079_v43  ;;  %v2757_v20 = vmax.f32 %v9008_v27, 0.0 }
 0x39d   : > { %2940 = vrot.lane.b32.xlu1 %v2757_v20, %s6951_s0  ;;  %2942 = vrot.lane.b32.xlu2 %v2758_v9, %s6951_s0  ;;  %v2446_v2 = vpop.f32.mrf.mxu0 }
 0x39e   : > { %v2626_v25 = vadd.f32 %v2446_v2, %v2197_v28  ;;  %v2556_v46 = vpop.f32.mrf.mxu1  ;;  %v11418_v2 = vld [vmem:[#allocation88_spill] sm:$0xff] }
 0x39f   : > { %v2625_v58 = vadd.f32 %v2556_v46, %v2196_v62  ;;  %v2885_v43 = vpop.permute.xlu0 %2884  ;;  %v11417_v62 = vld [vmem:[#allocation62_spill] sm:$0xff] }
 0x3a0   : > { %v9026_v13 = vadd.f32 %v8226_v32, %v2626_v25  ;;  %v2972_v6 = vsel %vm2958_vm6, %v2883_v41, %v2885_v43  ;;  %v3082_v37 = vmax.f32 %v2729_v16, %v2885_v43  ;;  %v1769_v25 = vadd.f32 %v11418_v2, %v11417_v62  ;;  %v2887_v41 = vpop.permute.xlu1 %2886 }
 0x3a1   : > { %v9032_v17 = vadd.f32 %v8242_v29, %v2625_v58  ;;  %v3081_v22 = vmax.f32 %v2728_v61, %v2972_v6  ;;  %v2199_v16 = vadd.f32 %v2020_v47, %v1770_v0  ;;  %v2889_v58 = vpop.permute.xlu2 %2888  ;;  %v2133_v47 = vpop.f32.mrf.mxu3 }
 0x3a2   : > { %6291 = vmatmul.msk.f32.gmra.mxu3 %vm3140_vm7, %v3082_v37  ;;  %v2760_v28 = vmax.f32 %v9026_v13, 0.0  ;;  %v2198_v46 = vadd.f32 %v2130_v52, %v1769_v25  ;;  %v2973_v61 = vsel %vm2958_vm6, %v2887_v41, %v2889_v58  ;;  %v3084_v52 = vmax.f32 %v2731_v50, %v2889_v58  ;;  %v2023_v62 = vpop.f32.mrf.mxu2  ;;  %v11421_v41 = vld [vmem:[#allocation89_spill] sm:$0xff] }
 0x3a3   : > { %3296 = vmatmul.f32.gmra.mxu2 %v3081_v22  ;;  %v2759_v23 = vmax.f32 %v9032_v17, 0.0  ;;  %v11419_v22 = vld [vmem:[#allocation22_spill] sm:$0xff]  ;;  %v3083_v2 = vmax.f32 %v2730_v54, %v2973_v61 }
 0x3a4   : > { %v1230_v3 = vadd.f32 %v11420_v48, %v11419_v22 }
 0x3a5   : > { %2944 = vrot.lane.b32.xlu0 %v2759_v23, %s6951_s0  ;;  %2946 = vrot.lane.b32.xlu1 %v2760_v28, %s6951_s0  ;;  %v2449_v55 = vpop.f32.mrf.mxu0 }
 0x3a6   : > { %v2628_v43 = vadd.f32 %v2449_v55, %v2199_v16  ;;  %v2559_v6 = vpop.f32.mrf.mxu1  ;;  %v1772_v16 = vadd.f32 %v11421_v41, %v1230_v3  ;;  %v11422_v55 = vld [vmem:[#allocation64_spill] sm:$0xff] }
 0x3a7   : > { %v2627_v37 = vadd.f32 %v2559_v6, %v2198_v46  ;;  %v11423_v6 = vld [vmem:[#allocation90_spill] sm:$0xff] }
 0x3a8   : > { %v9055_v0 = vadd.f32 %v8226_v32, %v2628_v43  ;;  %v1771_v8 = vadd.f32 %v11423_v6, %v11422_v55  ;;  %v2201_v58 = vadd.f32 %v2023_v62, %v1772_v16  ;;  %v11425_v6 = vld [vmem:[#allocation65_spill] sm:$0xff] }
 0x3a9   : > { %v9060_v25 = vadd.f32 %v8242_v29, %v2627_v37  ;;  %v2891_v37 = vpop.permute.xlu0 %2890  ;;  %v2136_v16 = vpop.f32.mrf.mxu3 }
 0x3aa   : > { %6292 = vmatmul.msk.f32.gmra.mxu3 %vm3140_vm7, %v3084_v52  ;;  %v2762_v46 = vmax.f32 %v9055_v0, 0.0  ;;  %v2200_v43 = vadd.f32 %v2133_v47, %v1771_v8  ;;  %v11426_v8 = vld [vmem:[#allocation91_spill] sm:$0xff]  ;;  %v2895_v11 = vpop.permute.xlu2 %2894 }
 0x3ab   : > { %3299 = vmatmul.f32.gmra.mxu2 %v3083_v2  ;;  %v2761_v50 = vmax.f32 %v9060_v25, 0.0  ;;  %v11424_v2 = vmax.f32 %v8667_v24, 0.0 }
 0x3ad   : > { %2948 = vrot.lane.b32.xlu2 %v2761_v50, %s6951_s0  ;;  %2950 = vrot.lane.b32.xlu0 %v2762_v46, %s6951_s0  ;;  %v2452_v35 = vpop.f32.mrf.mxu0 }
 0x3ae   : > { %v2630_v54 = vadd.f32 %v2452_v35, %v2201_v58  ;;  %v2562_v61 = vpop.f32.mrf.mxu1 }
 0x3af   : > { %v2629_v22 = vadd.f32 %v2562_v61, %v2200_v43  ;;  %v2893_v48 = vpop.permute.xlu1 %2892 }
 0x3b0   : > { %v9075_v3 = vadd.f32 %v8226_v32, %v2630_v54  ;;  %v2974_v52 = vsel %vm2958_vm6, %v2891_v37, %v2893_v48  ;;  %v3086_v47 = vmax.f32 %v2733_v18, %v2893_v48  ;;  %v1773_v32 = vadd.f32 %v11426_v8, %v11425_v6 }
 0x3b1   : > { %v9081_v62 = vadd.f32 %v8242_v29, %v2629_v22  ;;  %v3085_v41 = vmax.f32 %v11424_v2, %v2974_v52  ;;  %v11427_v22 = vmax.f32 %v8689_v51, 0.0  ;;  %v11428_v51 = vmax.f32 %v8758_v60, 0.0 }
 0x3b2   : > { %6293 = vmatmul.msk.f32.gmra.mxu3 %vm3140_vm7, %v3086_v47  ;;  %v2764_v55 = vmax.f32 %v9075_v3, 0.0  ;;  %v2202_v43 = vadd.f32 %v2136_v16, %v1773_v32  ;;  %v2901_v2 = vpop.permute.xlu2 %2900  ;;  %v11429_v6 = vmax.f32 %v8720_v45, 0.0  ;;  %v11431_v60 = vmax.f32 %v8753_v34, 0.0 }
 0x3b3   : > { %3302 = vmatmul.f32.gmra.mxu2 %v3085_v41  ;;  %v2763_v58 = vmax.f32 %v9081_v62, 0.0  ;;  %v3090_v16 = vmax.f32 %v11428_v51, %v2901_v2 }
 0x3b5   : > { %2952 = vrot.lane.b32.xlu1 %v2763_v58, %s6951_s0  ;;  %2954 = vrot.lane.b32.xlu2 %v2764_v55, %s6951_s0 }
 0x3b6   : > { %v2565_v24 = vpop.f32.mrf.mxu1 }
 0x3b7   : > { %v2631_v18 = vadd.f32 %v2565_v24, %v2202_v43  ;;  %v2897_v35 = vpop.permute.xlu0 %2896  ;;  %v2899_v52 = vpop.permute.xlu1 %2898 }
 0x3b8   : > { %v2975_v54 = vsel %vm2958_vm6, %v2895_v11, %v2897_v35  ;;  %v3088_v61 = vmax.f32 %v2735_v19, %v2897_v35  ;;  %v2976_v56 = vsel %vm2958_vm6, %v2899_v52, %v2901_v2 }
 0x3b9   : > { %v9100_v37 = vadd.f32 %v8242_v29, %v2631_v18  ;;  %v3087_v48 = vmax.f32 %v11427_v22, %v2975_v54  ;;  %v3089_v8 = vmax.f32 %v11429_v6, %v2976_v56  ;;  %v11430_v54 = vmax.f32 %v8786_v63, 0.0 }
 0x3ba   : > { %6294 = vmatmul.msk.f32.gmra.mxu3 %vm3140_vm7, %v3088_v61  ;;  %v2907_v45 = vpop.permute.xlu2 %2906  ;;  %v11433_v63 = vmax.f32 %v8780_v53, 0.0 }
 0x3bb   : > { %3305 = vmatmul.f32.gmra.mxu2 %v3087_v48  ;;  %v2765_v47 = vmax.f32 %v9100_v37, 0.0 }
 0x3bd   : > { %v3371_v41 = vpop.f32.mrf.mxu3  ;;  %2956 = vrot.lane.b32.xlu0 %v2765_v47, %s6951_s0  ;;  %s6888_s0 = scalar_lea.hbm %s11523_s20, 16 }
 0x3be   : > { %v3258_v19 = vpop.f32.mrf.mxu2  ;;  %p6890_p4 = scmp.lt.s32.totalorder %s6888_s0, %s6884_s28 }
 0x3bf   : > { %v9110_v29 = vadd.f32 %v3371_v41, %v3258_v19  ;;  %v2903_v11 = vpop.permute.xlu0 %2902  ;;  %v11432_v19 = vmax.f32 %v8812_v44, 0.0  ;;  %v11435_v44 = vmax.f32 %v8806_v1, 0.0 }
 0x3c0   : > { %p6891_p7 = por %p6890_p4, %p6889_p3 }
 0x3c2   : > { %6295 = vmatmul.msk.f32.gmra.mxu3 %vm3140_vm7, %v3090_v16  ;;  %v2913_v6 = vpop.permute.xlu2 %2912  ;;  %p6892_p8 = pnand %p6891_p7, %p6887_p2 }
 0x3c3   : > { %3308 = vmatmul.f32.gmra.mxu2 %v3089_v8 }
 0x3c5   : > { %v3374_v32 = vpop.f32.mrf.mxu3 }
 0x3c6   : > { %v3261_v43 = vpop.f32.mrf.mxu2 }
 0x3c7   : > { %v9117_v24 = vadd.f32 %v3374_v32, %v3261_v43  ;;  %v2905_v18 = vpop.permute.xlu1 %2904 }
 0x3c8   : > { %v2977_v35 = vsel %vm2958_vm6, %v2903_v11, %v2905_v18  ;;  %v3092_v61 = vmax.f32 %v11430_v54, %v2905_v18  ;;  %v11434_v18 = vmax.f32 %v8840_v7, 0.0  ;;  %v11437_v7 = vmax.f32 %v8835_v14, 0.0 }
 0x3c9   : > { %v3091_v22 = vmax.f32 %v11431_v60, %v2977_v35 }
 0x3ca   : > { %6296 = vmatmul.msk.f32.gmra.mxu3 %vm3140_vm7, %v3092_v61  ;;  %v3096_v35 = vmax.f32 %v11434_v18, %v2913_v6  ;;  %v2919_v1 = vpop.permute.xlu2 %2918 }
 0x3cb   : > { %3311 = vmatmul.f32.gmra.mxu2 %v3091_v22 }
 0x3cd   : > { %v3377_v48 = vpop.f32.mrf.mxu3 }
 0x3ce   : > { %v3264_v52 = vpop.f32.mrf.mxu2 }
 0x3cf   : > { %v9125_v2 = vadd.f32 %v3377_v48, %v3264_v52  ;;  %v2909_v41 = vpop.permute.xlu0 %2908  ;;  %v2911_v34 = vpop.permute.xlu1 %2910  ;;  %v11436_v52 = vmax.f32 %v8864_v57, 0.0  ;;  %v11439_v57 = vmax.f32 %v8858_v39, 0.0 }
 0x3d0   : > { %v2978_v56 = vsel %vm2958_vm6, %v2907_v45, %v2909_v41  ;;  %v3094_v51 = vmax.f32 %v11432_v19, %v2909_v41  ;;  %v2979_v32 = vsel %vm2958_vm6, %v2911_v34, %v2913_v6  ;;  %v11438_v6 = vmax.f32 %v8888_v26, 0.0 }
 0x3d1   : > { %v3093_v16 = vmax.f32 %v11433_v63, %v2978_v56  ;;  %v3095_v54 = vmax.f32 %v11435_v44, %v2979_v32  ;;  %v11440_v26 = vmax.f32 %v8882_v40, 0.0 }
 0x3d2   : > { %6297 = vmatmul.msk.f32.gmra.mxu3 %vm3140_vm7, %v3094_v51 }
 0x3d3   : > { %3314 = vmatmul.f32.gmra.mxu2 %v3093_v16 }
 0x3d5   : > { %v3380_v8 = vpop.f32.mrf.mxu3 }
 0x3d6   : > { %v3267_v43 = vpop.f32.mrf.mxu2 }
 0x3d7   : > { %v9134_v11 = vadd.f32 %v3380_v8, %v3267_v43  ;;  %v2915_v60 = vpop.permute.xlu0 %2914  ;;  %v2925_v43 = vpop.permute.xlu2 %2924 }
 0x3da   : > { %6298 = vmatmul.msk.f32.gmra.mxu3 %vm3140_vm7, %v3096_v35 }
 0x3db   : > { %3317 = vmatmul.f32.gmra.mxu2 %v3095_v54 }
 0x3dd   : > { %v3383_v53 = vpop.f32.mrf.mxu3 }
 0x3de   : > { %v3270_v61 = vpop.f32.mrf.mxu2 }
 0x3df   : > { %v9141_v22 = vadd.f32 %v3383_v53, %v3270_v61  ;;  %v2917_v45 = vpop.permute.xlu1 %2916  ;;  %v3102_v53 = vmax.f32 %v2749_v30, %v2925_v43  ;;  %v2931_v40 = vpop.permute.xlu2 %2930 }
 0x3e0   : > { %v2980_v48 = vsel %vm2958_vm6, %v2915_v60, %v2917_v45  ;;  %v3098_v41 = vmax.f32 %v11436_v52, %v2917_v45 }
 0x3e1   : > { %v3097_v56 = vmax.f32 %v11437_v7, %v2980_v48 }
 0x3e2   : > { %6299 = vmatmul.msk.f32.gmra.mxu3 %vm3140_vm7, %v3098_v41 }
 0x3e3   : > { %3320 = vmatmul.f32.gmra.mxu2 %v3097_v56 }
 0x3e5   : > { %v3386_v19 = vpop.f32.mrf.mxu3 }
 0x3e6   : > { %v3273_v51 = vpop.f32.mrf.mxu2 }
 0x3e7   : > { %v9149_v63 = vadd.f32 %v3386_v19, %v3273_v51  ;;  %v2921_v16 = vpop.permute.xlu0 %2920  ;;  %v2923_v14 = vpop.permute.xlu1 %2922 }
 0x3e8   : > { %v2981_v34 = vsel %vm2958_vm6, %v2919_v1, %v2921_v16  ;;  %v3100_v8 = vmax.f32 %v11438_v6, %v2921_v16  ;;  %v2982_v35 = vsel %vm2958_vm6, %v2923_v14, %v2925_v43 }
 0x3e9   : > { %v3099_v32 = vmax.f32 %v11439_v57, %v2981_v34  ;;  %v3101_v61 = vmax.f32 %v11440_v26, %v2982_v35 }
 0x3ea   : > { %6300 = vmatmul.msk.f32.gmra.mxu3 %vm3140_vm7, %v3100_v8 }
 0x3eb   : > { %3323 = vmatmul.f32.gmra.mxu2 %v3099_v32 }
 0x3ed   : > { %v3389_v18 = vpop.f32.mrf.mxu3 }
 0x3ee   : > { %v3276_v44 = vpop.f32.mrf.mxu2 }
 0x3ef   : > { %v9158_v54 = vadd.f32 %v3389_v18, %v3276_v44  ;;  %v2927_v45 = vpop.permute.xlu0 %2926  ;;  %v2937_v34 = vpop.permute.xlu2 %2936 }
 0x3f0   : > { %v3108_v32 = vmax.f32 %v2755_v5, %v2937_v34 }
 0x3f2   : > { %6301 = vmatmul.msk.f32.gmra.mxu3 %vm3140_vm7, %v3102_v53 }
 0x3f3   : > { %3326 = vmatmul.f32.gmra.mxu2 %v3101_v61 }
 0x3f5   : > { %v3392_v39 = vpop.f32.mrf.mxu3 }
 0x3f6   : > { %v3279_v60 = vpop.f32.mrf.mxu2 }
 0x3f7   : > { %v9165_v48 = vadd.f32 %v3392_v39, %v3279_v60  ;;  %v2929_v52 = vpop.permute.xlu1 %2928  ;;  %v2943_v31 = vpop.permute.xlu2 %2942 }
 0x3f8   : > { %v2983_v41 = vsel %vm2958_vm6, %v2927_v45, %v2929_v52  ;;  %v3104_v7 = vmax.f32 %v2751_v4, %v2929_v52 }
 0x3f9   : > { %v3103_v30 = vmax.f32 %v11441_v59, %v2983_v41 }
 0x3fa   : > { %6302 = vmatmul.msk.f32.gmra.mxu3 %vm3140_vm7, %v3104_v7 }
 0x3fb   : > { %3329 = vmatmul.f32.gmra.mxu2 %v3103_v30 }
 0x3fd   : > { %v9173_v56 = vpop.f32.mrf.mxu3 }
 0x3fe   : > { %v9175_v1 = vpop.f32.mrf.mxu2 }
 0x3ff   : > { %v2933_v19 = vpop.permute.xlu0 %2932  ;;  %v2935_v21 = vpop.permute.xlu1 %2934 }
 0x400   : > { %v2984_v51 = vsel %vm2958_vm6, %v2931_v40, %v2933_v19  ;;  %v3106_v16 = vmax.f32 %v2753_v38, %v2933_v19  ;;  %v2985_v8 = vsel %vm2958_vm6, %v2935_v21, %v2937_v34  ;;  %v3396_v21 = vadd.f32 %v9173_v56, %v9175_v1 }
 0x401   : > { %v3105_v4 = vmax.f32 %v11442_v36, %v2984_v51  ;;  %v3107_v38 = vmax.f32 %v11443_v42, %v2985_v8 }
 0x402   : > { %6303 = vmatmul.msk.f32.gmra.mxu3 %vm3140_vm7, %v3106_v16 }
 0x403   : > { %3332 = vmatmul.f32.gmra.mxu2 %v3105_v4 }
 0x405   : > { %v9183_v6 = vpop.f32.mrf.mxu3 }
 0x406   : > { %v9186_v57 = vpop.f32.mrf.mxu2 }
 0x407   : > { %v2939_v43 = vpop.permute.xlu0 %2938  ;;  %v2949_v15 = vpop.permute.xlu2 %2948 }
 0x408   : > { %v3114_v52 = vmax.f32 %v2761_v50, %v2949_v15 }
 0x40a   : > { %6304 = vmatmul.msk.f32.gmra.mxu3 %vm3140_vm7, %v3108_v32 }
 0x40b   : > { %3335 = vmatmul.f32.gmra.mxu2 %v3107_v38 }
 0x40d   : > { %v3401_v33 = vpop.f32.mrf.mxu3 }
 0x40e   : > { %v3288_v14 = vpop.f32.mrf.mxu2 }
 0x40f   : > { %v2941_v18 = vpop.permute.xlu1 %2940  ;;  %v2955_v25 = vpop.permute.xlu2 %2954 }
 0x410   : > { %v2986_v35 = vsel %vm2958_vm6, %v2939_v43, %v2941_v18  ;;  %v3110_v44 = vmax.f32 %v2757_v20, %v2941_v18 }
 0x411   : > { %v3109_v53 = vmax.f32 %v2756_v10, %v2986_v35 }
 0x412   : > { %6305 = vmatmul.msk.f32.gmra.mxu3 %vm3140_vm7, %v3110_v44 }
 0x413   : > { %3338 = vmatmul.f32.gmra.mxu2 %v3109_v53 }
 0x415   : > { %v3404_v12 = vpop.f32.mrf.mxu3 }
 0x416   : > { %v3291_v5 = vpop.f32.mrf.mxu2 }
 0x417   : > { %v2945_v26 = vpop.permute.xlu0 %2944  ;;  %v2947_v27 = vpop.permute.xlu1 %2946  ;;  %v3405_v3 = vadd.f32 %v3404_v12, %v3291_v5 }
 0x418   : > { %v2987_v61 = vsel %vm2958_vm6, %v2943_v31, %v2945_v26  ;;  %v3112_v39 = vmax.f32 %v2759_v23, %v2945_v26  ;;  %v2988_v20 = vsel %vm2958_vm6, %v2947_v27, %v2949_v15  ;;  %v3621_v27 = vld [vmem:[%s11145_s4] sm:$0xff] }
 0x419   : > { %v3111_v60 = vmax.f32 %v2758_v9, %v2987_v61  ;;  %v3113_v41 = vmax.f32 %v2760_v28, %v2988_v20  ;;  %v3467_v15 = vld [vmem:[%s11144_s3] sm:$0xff] }
 0x41a   : > { %6306 = vmatmul.msk.f32.gmra.mxu3 %vm3140_vm7, %v3112_v39 }
 0x41b   : > { %3341 = vmatmul.f32.gmra.mxu2 %v3111_v60 }
 0x41d   : > { %v3407_v10 = vpop.f32.mrf.mxu3 }
 0x41e   : > { %v3294_v45 = vpop.f32.mrf.mxu2 }
 0x41f   : > { %v2951_v17 = vpop.permute.xlu0 %2950  ;;  %v3408_v36 = vadd.f32 %v3407_v10, %v3294_v45 }
 0x422   : > { %6307 = vmatmul.msk.f32.gmra.mxu3 %vm3140_vm7, %v3114_v52  ;;  %v3623_v52 = vld [vmem:[%s11145_s4 + $0x10] sm:$0xff] }
 0x423   : > { %3344 = vmatmul.f32.gmra.mxu2 %v3113_v41 }
 0x425   : > { %v3410_v49 = vpop.f32.mrf.mxu3 }
 0x426   : > { %v3297_v9 = vpop.f32.mrf.mxu2 }
 0x427   : > { %v2953_v23 = vpop.permute.xlu1 %2952  ;;  %v3411_v16 = vadd.f32 %v3410_v49, %v3297_v9  ;;  %v3469_v49 = vld [vmem:[%s11144_s3 + $0x10] sm:$0xff] }
 0x428   : > { %v2989_v7 = vsel %vm2958_vm6, %v2951_v17, %v2953_v23  ;;  %v3116_v59 = vmax.f32 %v2763_v58, %v2953_v23 }
 0x429   : > { %v3115_v30 = vmax.f32 %v2762_v46, %v2989_v7  ;;  %v3625_v7 = vld [vmem:[%s11145_s4 + $0x20] sm:$0xff] }
 0x42a   : > { %6308 = vmatmul.msk.f32.gmra.mxu3 %vm3140_vm7, %v3116_v59 }
 0x42b   : > { %3347 = vmatmul.f32.gmra.mxu2 %v3115_v30  ;;  %v3471_v30 = vld [vmem:[%s11144_s3 + $0x20] sm:$0xff] }
 0x42d   : > { %v3413_v13 = vpop.f32.mrf.mxu3 }
 0x42e   : > { %v3300_v28 = vpop.f32.mrf.mxu2 }
 0x42f   : > { %v2957_v50 = vpop.permute.xlu0 %2956  ;;  %v3414_v58 = vadd.f32 %v3413_v13, %v3300_v28 }
 0x430   : > { %v2990_v40 = vsel %vm2958_vm6, %v2955_v25, %v2957_v50  ;;  %v3118_v19 = vmax.f32 %v2765_v47, %v2957_v50  ;;  %v3399_v47 = vadd.f32 %v9183_v6, %v9186_v57  ;;  %v3627_v50 = vld [vmem:[%s11145_s4 + $0x30] sm:$0xff] }
 0x431   : > { %v3117_v51 = vmax.f32 %v2764_v55, %v2990_v40  ;;  %v3402_v55 = vadd.f32 %v3401_v33, %v3288_v14 }
 0x432   : > { %6309 = vmatmul.msk.f32.gmra.mxu3 %vm3140_vm7, %v3118_v19  ;;  %v3473_v19 = vld [vmem:[%s11144_s3 + $0x30] sm:$0xff] }
 0x433   : > { %3350 = vmatmul.f32.gmra.mxu2 %v3117_v51 }
 0x435   : > { %v3416_v0 = vpop.f32.mrf.mxu3 }
 0x436   : > { %v3303_v46 = vpop.f32.mrf.mxu2 }
 0x437   : > { %v3417_v62 = vadd.f32 %v3416_v0, %v3303_v46 }
 0x439   : > { %3497 = vmatpush.msrb.mxu0 %v3417_v62  ;;  %3651 = vmatpush.msrb.mxu2 %v3417_v62  ;;  %v3622_v62 = vld [vmem:[%s11145_s4 + $0x8] sm:$0xff] }
 0x43b   : > { %3498 = vmatpush.msrb.mxu0 %v3414_v58  ;;  %3652 = vmatpush.msrb.mxu2 %v3414_v58  ;;  %v3468_v58 = vld [vmem:[%s11144_s3 + $0x8] sm:$0xff] }
 0x43d   : > { %v9223_v4 = vpop.f32.mrf.mxu3  ;;  %3499 = vmatpush.msrb.mxu0 %v3411_v16  ;;  %3653 = vmatpush.msrb.mxu2 %v3411_v16  ;;  %v3629_v16 = vld [vmem:[%s11145_s4 + $0x40] sm:$0xff] }
 0x43e   : > { %v9225_v37 = vpop.f32.mrf.mxu2 }
 0x43f   : > { %3500 = vmatpush.msrb.mxu0 %v3408_v36  ;;  %3654 = vmatpush.msrb.mxu2 %v3408_v36  ;;  %v3420_v46 = vadd.f32 %v9223_v4, %v9225_v37  ;;  %v3475_v36 = vld [vmem:[%s11144_s3 + $0x40] sm:$0xff]  ;;  %v3624_v4 = vld [vmem:[%s11145_s4 + $0x18] sm:$0xff] }
 0x440   : > { %v3470_v37 = vld [vmem:[%s11144_s3 + $0x18] sm:$0xff] }
 0x441   : > { %3501 = vmatpush.msrb.mxu0 %v3405_v3  ;;  %3655 = vmatpush.msrb.mxu2 %v3405_v3  ;;  %v3631_v3 = vld [vmem:[%s11145_s4 + $0x50] sm:$0xff] }
 0x443   : > { %3502 = vmatpush.msrb.mxu0 %v3402_v55  ;;  %3656 = vmatpush.msrb.mxu2 %v3402_v55  ;;  %v3477_v55 = vld [vmem:[%s11144_s3 + $0x50] sm:$0xff] }
 0x445   : > { %v9231_v34 = vpop.f32.mrf.mxu3  ;;  %3503 = vmatpush.msrb.mxu0 %v3399_v47  ;;  %3657 = vmatpush.msrb.mxu2 %v3399_v47  ;;  %v3626_v47 = vld [vmem:[%s11145_s4 + $0x28] sm:$0xff] }
 0x446   : > { %v9233_v8 = vpop.f32.mrf.mxu2 }
 0x447   : > { %3504 = vmatpush.msrb.mxu0 %v3396_v21  ;;  %3658 = vmatpush.msrb.mxu2 %v3396_v21  ;;  %v3423_v0 = vadd.f32 %v9231_v34, %v9233_v8  ;;  %v3472_v21 = vld [vmem:[%s11144_s3 + $0x28] sm:$0xff]  ;;  %v3633_v34 = vld [vmem:[%s11145_s4 + $0x60] sm:$0xff] }
 0x448   : > { %v3479_v8 = vld [vmem:[%s11144_s3 + $0x60] sm:$0xff] }
 0x449   : > { %3505 = vmatpush.msrb.mxu0 %v9165_v48  ;;  %3659 = vmatpush.msrb.mxu2 %v9165_v48 }
 0x44b   : > { %3506 = vmatpush.msrb.mxu0 %v9158_v54  ;;  %3660 = vmatpush.msrb.mxu2 %v9158_v54 }
 0x44d   : > { %v9239_v6 = vpop.f32.mrf.mxu3  ;;  %3507 = vmatpush.msrb.mxu0 %v9149_v63  ;;  %3661 = vmatpush.msrb.mxu2 %v9149_v63 }
 0x44e   : > { %v9243_v56 = vpop.f32.mrf.mxu2 }
 0x44f   : > { %3508 = vmatpush.msrb.mxu0 %v9141_v22  ;;  %3662 = vmatpush.msrb.mxu2 %v9141_v22  ;;  %v3426_v51 = vadd.f32 %v9239_v6, %v9243_v56  ;;  %v3628_v6 = vld [vmem:[%s11145_s4 + $0x38] sm:$0xff] }
 0x450   : > { %v3474_v56 = vld [vmem:[%s11144_s3 + $0x38] sm:$0xff] }
 0x451   : > { %3509 = vmatpush.msrb.mxu0 %v9134_v11  ;;  %3663 = vmatpush.msrb.mxu2 %v9134_v11 }
 0x453   : > { %3510 = vmatpush.msrb.mxu0 %v9125_v2  ;;  %3664 = vmatpush.msrb.mxu2 %v9125_v2 }
 0x455   : > { %v9251_v54 = vpop.f32.mrf.mxu3  ;;  %3511 = vmatpush.msrb.mxu0 %v9117_v24  ;;  %3665 = vmatpush.msrb.mxu2 %v9117_v24 }
 0x456   : > { %v9255_v63 = vpop.f32.mrf.mxu2 }
 0x457   : > { %3512 = vmatpush.msrb.mxu0 %v9110_v29  ;;  %3666 = vmatpush.msrb.mxu2 %v9110_v29  ;;  %v3429_v40 = vadd.f32 %v9251_v54, %v9255_v63  ;;  %v3635_v54 = vld [vmem:[%s11145_s4 + $0x70] sm:$0xff] }
 0x458   : > { %3667 = vmatmul.f32.vlgmr.msrb.gmra.mxu2 %v3621_v27  ;;  %3513 = vmatmul.f32.vlgmr.msrb.gmra.mxu0 %v3467_v15  ;;  %v3481_v63 = vld [vmem:[%s11144_s3 + $0x70] sm:$0xff]  ;;  %v3488_v27 = vld [vmem:[%s11144_s3 + $0xa8] sm:$0xff]  ;;  %v3649_v15 = vld [vmem:[%s11145_s4 + $0xe0] sm:$0xff] }
 0x45d   : > { %v9259_v22 = vpop.f32.mrf.mxu3 }
 0x45e   : > { %v9261_v48 = vpop.f32.mrf.mxu2 }
 0x45f   : > { %v3432_v25 = vadd.f32 %v9259_v22, %v9261_v48  ;;  %v3630_v22 = vld [vmem:[%s11145_s4 + $0x48] sm:$0xff] }
 0x460   : > { %3670 = vmatmul.f32.gmra.mxu2 %v3623_v52  ;;  %3516 = vmatmul.f32.gmra.mxu0 %v3469_v49  ;;  %v3476_v48 = vld [vmem:[%s11144_s3 + $0x48] sm:$0xff]  ;;  %v6328_v52 = vld [vmem:[%s11147_s6 + $0x140] sm:$0xff]  ;;  %v6326_v49 = vld [vmem:[%s11147_s6 + $0x130] sm:$0xff] }
 0x465   : > { %v3434_v11 = vpop.f32.mrf.mxu3 }
 0x466   : > { %v3321_v1 = vpop.f32.mrf.mxu2 }
 0x467   : > { %v3435_v28 = vadd.f32 %v3434_v11, %v3321_v1  ;;  %v3637_v11 = vld [vmem:[%s11145_s4 + $0x80] sm:$0xff] }
 0x468   : > { %3673 = vmatmul.f32.gmra.mxu2 %v3625_v7  ;;  %3519 = vmatmul.f32.gmra.mxu0 %v3471_v30  ;;  %v3483_v1 = vld [vmem:[%s11144_s3 + $0x80] sm:$0xff]  ;;  %v3644_v7 = vld [vmem:[%s11145_s4 + $0xb8] sm:$0xff]  ;;  %v3808_v30 = vld [vmem:[%s11147_s6 + $0x90] sm:$0xff] }
 0x46d   : > { %v3437_v57 = vpop.f32.mrf.mxu3 }
 0x46e   : > { %v3324_v2 = vpop.f32.mrf.mxu2 }
 0x46f   : > { %v3438_v13 = vadd.f32 %v3437_v57, %v3324_v2  ;;  %v3632_v57 = vld [vmem:[%s11145_s4 + $0x58] sm:$0xff] }
 0x470   : > { %3676 = vmatmul.f32.gmra.mxu2 %v3627_v50  ;;  %3522 = vmatmul.f32.gmra.mxu0 %v3473_v19  ;;  %v3478_v2 = vld [vmem:[%s11144_s3 + $0x58] sm:$0xff]  ;;  %v3804_v50 = vld [vmem:[%s11147_s6 + $0x70] sm:$0xff]  ;;  %v3802_v19 = vld [vmem:[%s11147_s6 + $0x60] sm:$0xff] }
 0x475   : > { %v3440_v32 = vpop.f32.mrf.mxu3 }
 0x476   : > { %v3327_v42 = vpop.f32.mrf.mxu2 }
 0x477   : > { %v3441_v59 = vadd.f32 %v3440_v32, %v3327_v42  ;;  %v3639_v32 = vld [vmem:[%s11145_s4 + $0x90] sm:$0xff] }
 0x478   : > { %3679 = vmatmul.f32.gmra.mxu2 %v3629_v16  ;;  %3525 = vmatmul.f32.gmra.mxu0 %v3475_v36  ;;  %v3485_v42 = vld [vmem:[%s11144_s3 + $0x90] sm:$0xff]  ;;  %v3798_v16 = vld [vmem:[%s11147_s6 + $0x40] sm:$0xff]  ;;  %v3799_v36 = vld [vmem:[%s11147_s6 + $0x48] sm:$0xff] }
 0x47d   : > { %v3443_v38 = vpop.f32.mrf.mxu3 }
 0x47e   : > { %v3330_v33 = vpop.f32.mrf.mxu2 }
 0x47f   : > { %v3444_v23 = vadd.f32 %v3443_v38, %v3330_v33  ;;  %v3634_v38 = vld [vmem:[%s11145_s4 + $0x68] sm:$0xff] }
 0x480   : > { %3682 = vmatmul.f32.gmra.mxu2 %v3631_v3  ;;  %3528 = vmatmul.f32.gmra.mxu0 %v3477_v55  ;;  %v3480_v33 = vld [vmem:[%s11144_s3 + $0x68] sm:$0xff]  ;;  %v3794_v55 = vld [vmem:[%s11147_s6 + $0x20] sm:$0xff] }
 0x485   : > { %v3446_v14 = vpop.f32.mrf.mxu3 }
 0x486   : > { %v3333_v24 = vpop.f32.mrf.mxu2 }
 0x487   : > { %v3447_v17 = vadd.f32 %v3446_v14, %v3333_v24  ;;  %v3641_v14 = vld [vmem:[%s11145_s4 + $0xa0] sm:$0xff] }
 0x488   : > { %3685 = vmatmul.f32.gmra.mxu2 %v3633_v34  ;;  %3531 = vmatmul.f32.gmra.mxu0 %v3479_v8  ;;  %v3487_v24 = vld [vmem:[%s11144_s3 + $0xa0] sm:$0xff]  ;;  %v6325_v34 = vld [vmem:[%s11147_s6 + $0x128] sm:$0xff]  ;;  %v3648_v8 = vld [vmem:[%s11145_s4 + $0xd8] sm:$0xff] }
 0x48d   : > { %v3449_v43 = vpop.f32.mrf.mxu3 }
 0x48e   : > { %v3336_v18 = vpop.f32.mrf.mxu2 }
 0x48f   : > { %v3450_v9 = vadd.f32 %v3449_v43, %v3336_v18  ;;  %v3636_v43 = vld [vmem:[%s11145_s4 + $0x78] sm:$0xff] }
 0x490   : > { %3688 = vmatmul.f32.gmra.mxu2 %v3635_v54  ;;  %3534 = vmatmul.f32.gmra.mxu0 %v3481_v63  ;;  %v3482_v18 = vld [vmem:[%s11144_s3 + $0x78] sm:$0xff]  ;;  %v6322_v54 = vld [vmem:[%s11147_s6 + $0x110] sm:$0xff] }
 0x491   : > { %v6323_v63 = vld [vmem:[%s11147_s6 + $0x118] sm:$0xff] }
 0x495   : > { %v3452_v35 = vpop.f32.mrf.mxu3 }
 0x496   : > { %v3339_v44 = vpop.f32.mrf.mxu2 }
 0x497   : > { %v3453_v41 = vadd.f32 %v3452_v35, %v3339_v44  ;;  %v3643_v35 = vld [vmem:[%s11145_s4 + $0xb0] sm:$0xff] }
 0x498   : > { %3691 = vmatmul.f32.gmra.mxu2 %v3637_v11  ;;  %3537 = vmatmul.f32.gmra.mxu0 %v3483_v1  ;;  %v3489_v44 = vld [vmem:[%s11144_s3 + $0xb0] sm:$0xff]  ;;  %v3793_v1 = vld [vmem:[%s11147_s6 + $0x18] sm:$0xff] }
 0x499   : > { %v3792_v11 = vld [vmem:[%s11147_s6 + $0x10] sm:$0xff] }
 0x49d   : > { %v3455_v53 = vpop.f32.mrf.mxu3 }
 0x49e   : > { %v3342_v29 = vpop.f32.mrf.mxu2 }
 0x49f   : > { %v3456_v45 = vadd.f32 %v3455_v53, %v3342_v29  ;;  %v3638_v53 = vld [vmem:[%s11145_s4 + $0x88] sm:$0xff] }
 0x4a0   : > { %3694 = vmatmul.f32.gmra.mxu2 %v3639_v32  ;;  %3540 = vmatmul.f32.gmra.mxu0 %v3485_v42  ;;  %v3484_v29 = vld [vmem:[%s11144_s3 + $0x88] sm:$0xff]  ;;  %v3790_v32 = vld [vmem:[%s11147_s6] sm:$0xff] }
 0x4a1   : > { %v3791_v42 = vld [vmem:[%s11147_s6 + $0x8] sm:$0xff] }
 0x4a5   : > { %v3458_v31 = vpop.f32.mrf.mxu3 }
 0x4a6   : > { %v3345_v12 = vpop.f32.mrf.mxu2 }
 0x4a7   : > { %v3459_v20 = vadd.f32 %v3458_v31, %v3345_v12  ;;  %v3645_v31 = vld [vmem:[%s11145_s4 + $0xc0] sm:$0xff] }
 0x4a8   : > { %3697 = vmatmul.f32.gmra.mxu2 %v3641_v14  ;;  %3543 = vmatmul.f32.gmra.mxu0 %v3487_v24  ;;  %v3491_v12 = vld [vmem:[%s11144_s3 + $0xc0] sm:$0xff]  ;;  %v6317_v14 = vld [vmem:[%s11147_s6 + $0xe8] sm:$0xff] }
 0x4a9   : > { %v3650_v24 = vld [vmem:[%s11145_s4 + $0xe8] sm:$0xff] }
 0x4ad   : > { %v3461_v5 = vpop.f32.mrf.mxu3 }
 0x4ae   : > { %v3348_v26 = vpop.f32.mrf.mxu2 }
 0x4af   : > { %v3462_v10 = vadd.f32 %v3461_v5, %v3348_v26  ;;  %v3640_v5 = vld [vmem:[%s11145_s4 + $0x98] sm:$0xff] }
 0x4b0   : > { %3700 = vmatmul.f32.gmra.mxu2 %v3643_v35  ;;  %3546 = vmatmul.f32.gmra.mxu0 %v3489_v44  ;;  %v3486_v26 = vld [vmem:[%s11144_s3 + $0x98] sm:$0xff]  ;;  %v6312_v44 = vld [vmem:[%s11147_s6 + $0xc0] sm:$0xff] }
 0x4b1   : > { %v6315_v35 = vld [vmem:[%s11147_s6 + $0xd8] sm:$0xff] }
 0x4b5   : > { %v3464_v61 = vpop.f32.mrf.mxu3 }
 0x4b6   : > { %v3351_v39 = vpop.f32.mrf.mxu2 }
 0x4b7   : > { %v3465_v60 = vadd.f32 %v3464_v61, %v3351_v39  ;;  %v3647_v61 = vld [vmem:[%s11145_s4 + $0xd0] sm:$0xff] }
 0x4b8   : > { %3703 = vmatmul.f32.gmra.mxu2 %v3645_v31  ;;  %3549 = vmatmul.f32.gmra.mxu0 %v3491_v12  ;;  %v3493_v39 = vld [vmem:[%s11144_s3 + $0xd0] sm:$0xff]  ;;  %v6311_v12 = vld [vmem:[%s11147_s6 + $0xb8] sm:$0xff] }
 0x4b9   : > { %3559 = vmatpush.msrb.mxu1 %v3465_v60  ;;  %3713 = vmatpush.msra.mxu3 %v3465_v60  ;;  %v3642_v60 = vld [vmem:[%s11145_s4 + $0xa8] sm:$0xff]  ;;  %v6310_v31 = vld [vmem:[%s11147_s6 + $0xb0] sm:$0xff] }
 0x4bb   : > { %3560 = vmatpush.msrb.mxu1 %v3462_v10  ;;  %3714 = vmatpush.msra.mxu3 %v3462_v10  ;;  %v3495_v10 = vld [vmem:[%s11144_s3 + $0xe0] sm:$0xff] }
 0x4bd   : > { %3561 = vmatpush.msrb.mxu1 %v3459_v20  ;;  %3715 = vmatpush.msra.mxu3 %v3459_v20  ;;  %v6330_v20 = vld [vmem:[%s11147_s6 + $0x150] sm:$0xf] }
 0x4be   : > { %6332 = vmatpush.msk.msra.mxu0 %vm2212_vm4, %v6330_v20 }
 0x4bf   : > { %3562 = vmatpush.msrb.mxu1 %v3456_v45  ;;  %3716 = vmatpush.msra.mxu3 %v3456_v45  ;;  %v6331_v45 = vld [vmem:[%s11147_s6 + $0x158] sm:$0xf] }
 0x4c0   : > { %3706 = vmatmul.f32.gmra.mxu2 %v3647_v61  ;;  %3552 = vmatmul.f32.gmra.mxu0 %v3493_v39 }
 0x4c1   : > { %3563 = vmatpush.msrb.mxu1 %v3453_v41  ;;  %3717 = vmatpush.msra.mxu3 %v3453_v41  ;;  %v6329_v41 = vld [vmem:[%s11147_s6 + $0x148] sm:$0xff] }
 0x4c2   : > { %3920 = vmatpush.msra.mxu0 %v6328_v52 }
 0x4c3   : > { %3564 = vmatpush.msrb.mxu1 %v3450_v9  ;;  %3718 = vmatpush.msra.mxu3 %v3450_v9  ;;  %v6327_v9 = vld [vmem:[%s11147_s6 + $0x138] sm:$0xff] }
 0x4c4   : > { %3921 = vmatpush.msra.mxu0 %v6326_v49 }
 0x4c5   : > { %3565 = vmatpush.msrb.mxu1 %v3447_v17  ;;  %3719 = vmatpush.msra.mxu3 %v3447_v17  ;;  %v3810_v17 = vld [vmem:[%s11147_s6 + $0xa0] sm:$0xf] }
 0x4c6   : > { %6362 = vmatpush.msk.msra.mxu2 %vm2212_vm4, %v3810_v17 }
 0x4c7   : > { %3566 = vmatpush.msrb.mxu1 %v3444_v23  ;;  %3720 = vmatpush.msra.mxu3 %v3444_v23  ;;  %v3811_v23 = vld [vmem:[%s11147_s6 + $0xa8] sm:$0xf] }
 0x4c8   : > { %3709 = vmatmul.f32.gmra.mxu2 %v3649_v15  ;;  %3555 = vmatmul.f32.gmra.mxu0 %v3495_v10 }
 0x4c9   : > { %3567 = vmatpush.msrb.mxu1 %v3441_v59  ;;  %3721 = vmatpush.msra.mxu3 %v3441_v59  ;;  %v3490_v59 = vld [vmem:[%s11144_s3 + $0xb8] sm:$0xff] }
 0x4ca   : > { %4072 = vmatpush.msra.mxu2 %v3808_v30 }
 0x4cb   : > { %3568 = vmatpush.msrb.mxu1 %v3438_v13  ;;  %3722 = vmatpush.msra.mxu3 %v3438_v13  ;;  %v3809_v13 = vld [vmem:[%s11147_s6 + $0x98] sm:$0xff] }
 0x4cd   : > { %3569 = vmatpush.msrb.mxu1 %v3435_v28  ;;  %3723 = vmatpush.msra.mxu3 %v3435_v28  ;;  %v3806_v28 = vld [vmem:[%s11147_s6 + $0x80] sm:$0xff] }
 0x4ce   : > { %4073 = vmatpush.msra.mxu2 %v3806_v28 }
 0x4cf   : > { %3570 = vmatpush.msrb.mxu1 %v3432_v25  ;;  %3724 = vmatpush.msra.mxu3 %v3432_v25  ;;  %v3807_v25 = vld [vmem:[%s11147_s6 + $0x88] sm:$0xff] }
 0x4d0   : > { %4074 = vmatpush.msra.mxu2 %v3804_v50 }
 0x4d1   : > { %3571 = vmatpush.msrb.mxu1 %v3429_v40  ;;  %3725 = vmatpush.msra.mxu3 %v3429_v40  ;;  %v3805_v40 = vld [vmem:[%s11147_s6 + $0x78] sm:$0xff] }
 0x4d2   : > { %4075 = vmatpush.msra.mxu2 %v3802_v19 }
 0x4d3   : > { %3572 = vmatpush.msrb.mxu1 %v3426_v51  ;;  %3726 = vmatpush.msra.mxu3 %v3426_v51  ;;  %v3803_v51 = vld [vmem:[%s11147_s6 + $0x68] sm:$0xff] }
 0x4d5   : > { %3573 = vmatpush.msrb.mxu1 %v3423_v0  ;;  %3727 = vmatpush.msra.mxu3 %v3423_v0  ;;  %v3646_v0 = vld [vmem:[%s11145_s4 + $0xc8] sm:$0xff]  ;;  %v3514_v3 = vpop.f32.mrf.mxu0 }
 0x4d7   : > { %3574 = vmatpush.msrb.mxu1 %v3420_v46  ;;  %3728 = vmatpush.msra.mxu3 %v3420_v46  ;;  %v3492_v46 = vld [vmem:[%s11144_s3 + $0xc8] sm:$0xff] }
 0x4d8   : > { %3729 = vmatmul.f32.vlgmr.msra.gmra.mxu3 %v3622_v62  ;;  %3575 = vmatmul.f32.vlgmr.msrb.gmra.mxu1 %v3468_v58  ;;  %v3800_v62 = vld [vmem:[%s11147_s6 + $0x50] sm:$0xff]  ;;  %v3801_v58 = vld [vmem:[%s11147_s6 + $0x58] sm:$0xff] }
 0x4d9   : > { %6347 = vmatpush.msk.msra.mxu1 %vm2212_vm4, %v6331_v45  ;;  %6377 = vmatpush.msk.msrb.mxu3 %vm2212_vm4, %v3811_v23 }
 0x4da   : > { %4076 = vmatpush.msra.mxu2 %v3800_v62 }
 0x4db   : > { %3979 = vmatpush.msra.mxu1 %v6329_v41  ;;  %4131 = vmatpush.msrb.mxu3 %v3809_v13 }
 0x4dc   : > { %4077 = vmatpush.msra.mxu2 %v3798_v16 }
 0x4dd   : > { %3980 = vmatpush.msra.mxu1 %v6327_v9  ;;  %4132 = vmatpush.msrb.mxu3 %v3807_v25 }
 0x4df   : > { %4133 = vmatpush.msrb.mxu3 %v3805_v40  ;;  %3981 = vmatpush.msra.mxu1 %v6325_v34 }
 0x4e0   : > { %3732 = vmatmul.f32.gmra.mxu3 %v3624_v4  ;;  %3578 = vmatmul.f32.gmra.mxu1 %v3470_v37  ;;  %v3796_v4 = vld [vmem:[%s11147_s6 + $0x30] sm:$0xff]  ;;  %v3797_v37 = vld [vmem:[%s11147_s6 + $0x38] sm:$0xff] }
 0x4e1   : > { %4134 = vmatpush.msrb.mxu3 %v3803_v51  ;;  %4078 = vmatpush.msra.mxu2 %v3796_v4 }
 0x4e2   : > { %3982 = vmatpush.msra.mxu1 %v6323_v63 }
 0x4e3   : > { %4135 = vmatpush.msrb.mxu3 %v3801_v58  ;;  %4079 = vmatpush.msra.mxu2 %v3794_v55 }
 0x4e5   : > { %4136 = vmatpush.msrb.mxu3 %v3799_v36  ;;  %4080 = vmatpush.msra.mxu2 %v3792_v11 }
 0x4e7   : > { %4137 = vmatpush.msrb.mxu3 %v3797_v37  ;;  %4081 = vmatpush.msra.mxu2 %v3790_v32 }
 0x4e8   : > { %3735 = vmatmul.f32.gmra.mxu3 %v3626_v47  ;;  %3581 = vmatmul.f32.gmra.mxu1 %v3472_v21  ;;  %v3795_v47 = vld [vmem:[%s11147_s6 + $0x28] sm:$0xff]  ;;  %v6324_v21 = vld [vmem:[%s11147_s6 + $0x120] sm:$0xff] }
 0x4e9   : > { %3922 = vmatpush.msra.mxu0 %v6324_v21  ;;  %4138 = vmatpush.msrb.mxu3 %v3795_v47 }
 0x4eb   : > { %3923 = vmatpush.msra.mxu0 %v6322_v54  ;;  %4139 = vmatpush.msrb.mxu3 %v3793_v1 }
 0x4ed   : > { %4140 = vmatpush.msrb.mxu3 %v3791_v42 }
 0x4f0   : > { %3738 = vmatmul.f32.gmra.mxu3 %v3628_v6  ;;  %3584 = vmatmul.f32.gmra.mxu1 %v3474_v56  ;;  %v3494_v6 = vld [vmem:[%s11144_s3 + $0xd8] sm:$0xff]  ;;  %v3668_v56 = vpop.f32.mrf.mxu2 }
 0x4f8   : > { %3741 = vmatmul.f32.gmra.mxu3 %v3630_v22  ;;  %3587 = vmatmul.f32.gmra.mxu1 %v3476_v48  ;;  %v6320_v22 = vld [vmem:[%s11147_s6 + $0x100] sm:$0xff]  ;;  %v6321_v48 = vld [vmem:[%s11147_s6 + $0x108] sm:$0xff] }
 0x4f9   : > { %3924 = vmatpush.msra.mxu0 %v6320_v22  ;;  %3983 = vmatpush.msra.mxu1 %v6321_v48 }
 0x500   : > { %3744 = vmatmul.f32.gmra.mxu3 %v3632_v57  ;;  %3590 = vmatmul.f32.gmra.mxu1 %v3478_v2  ;;  %v6318_v57 = vld [vmem:[%s11147_s6 + $0xf0] sm:$0xff]  ;;  %v6319_v2 = vld [vmem:[%s11147_s6 + $0xf8] sm:$0xff] }
 0x501   : > { %3925 = vmatpush.msra.mxu0 %v6318_v57  ;;  %3984 = vmatpush.msra.mxu1 %v6319_v2 }
 0x503   : > { %3985 = vmatpush.msra.mxu1 %v6317_v14 }
 0x505   : > { %3986 = vmatpush.msra.mxu1 %v6315_v35 }
 0x508   : > { %3747 = vmatmul.f32.gmra.mxu3 %v3634_v38  ;;  %3593 = vmatmul.f32.gmra.mxu1 %v3480_v33  ;;  %v3517_v38 = vpop.f32.mrf.mxu0  ;;  %v6316_v33 = vld [vmem:[%s11147_s6 + $0xe0] sm:$0xff] }
 0x509   : > { %3926 = vmatpush.msra.mxu0 %v6316_v33 }
 0x510   : > { %3750 = vmatmul.f32.gmra.mxu3 %v3636_v43  ;;  %3596 = vmatmul.f32.gmra.mxu1 %v3482_v18  ;;  %v3496_v43 = vld [vmem:[%s11144_s3 + $0xe8] sm:$0xff]  ;;  %v6314_v18 = vld [vmem:[%s11147_s6 + $0xd0] sm:$0xff] }
 0x511   : > { %3927 = vmatpush.msra.mxu0 %v6314_v18 }
 0x513   : > { %3928 = vmatpush.msra.mxu0 %v6312_v44 }
 0x515   : > { %3929 = vmatpush.msra.mxu0 %v6310_v31 }
 0x518   : > { %3753 = vmatmul.f32.gmra.mxu3 %v3638_v53  ;;  %3599 = vmatmul.f32.gmra.mxu1 %v3484_v29  ;;  %v3671_v53 = vpop.f32.mrf.mxu2  ;;  %v6313_v29 = vld [vmem:[%s11147_s6 + $0xc8] sm:$0xff] }
 0x519   : > { %3987 = vmatpush.msra.mxu1 %v6313_v29 }
 0x51b   : > { %3988 = vmatpush.msra.mxu1 %v6311_v12 }
 0x520   : > { %3756 = vmatmul.f32.gmra.mxu3 %v3640_v5  ;;  %3602 = vmatmul.f32.gmra.mxu1 %v3486_v26  ;;  %v3520_v5 = vpop.f32.mrf.mxu0  ;;  %v3674_v26 = vpop.f32.mrf.mxu2 }
 0x528   : > { %3759 = vmatmul.f32.gmra.mxu3 %v3642_v60  ;;  %3605 = vmatmul.f32.gmra.mxu1 %v3488_v27  ;;  %v3523_v39 = vpop.f32.mrf.mxu0  ;;  %v3677_v15 = vpop.f32.mrf.mxu2 }
 0x530   : > { %3762 = vmatmul.f32.gmra.mxu3 %v3644_v7  ;;  %3608 = vmatmul.f32.gmra.mxu1 %v3490_v59  ;;  %v3526_v41 = vpop.f32.mrf.mxu0  ;;  %v3680_v23 = vpop.f32.mrf.mxu2 }
 0x538   : > { %3765 = vmatmul.f32.gmra.mxu3 %v3646_v0  ;;  %3611 = vmatmul.f32.gmra.mxu1 %v3492_v46  ;;  %v3529_v4 = vpop.f32.mrf.mxu0  ;;  %v3683_v55 = vpop.f32.mrf.mxu2 }
 0x540   : > { %3768 = vmatmul.f32.gmra.mxu3 %v3648_v8  ;;  %3614 = vmatmul.f32.gmra.mxu1 %v3494_v6  ;;  %v3532_v2 = vpop.f32.mrf.mxu0 }
 0x548   : > { %3771 = vmatmul.f32.gmra.mxu3 %v3650_v24  ;;  %3617 = vmatmul.f32.gmra.mxu1 %v3496_v43  ;;  %v3686_v24 = vpop.f32.mrf.mxu2 }
 0x555   : > { %v3576_v61 = vpop.f32.mrf.mxu1 }
 0x556   : > { %v3577_v60 = vadd.f32 %v3576_v61, %v3514_v3 }
 0x55b   : > { %v3730_v27 = vpop.f32.mrf.mxu3 }
 0x55c   : > { %v3731_v10 = vadd.f32 %v3730_v27, %v3668_v56 }
 0x55d   : > { %v3579_v20 = vpop.f32.mrf.mxu1 }
 0x55e   : > { %v3775_v45 = vmax.f32 %v3577_v60, %v3731_v10  ;;  %v3580_v52 = vadd.f32 %v3579_v20, %v3517_v38 }
 0x560   : > { %6363 = vmatmul.msk.f32.vlgmr.msra.gmra.mxu2 %vm3879_vm8, %v3775_v45  ;;  %6378 = vmatmul.msk.f32.vlgmr.msrb.gmra.mxu3 %vm3879_vm8, %v3775_v45  ;;  %v3850_v59 = vrot.slane %v3775_v45, 1  ;;  %v4207_v30 = vrot.slane %v3775_v45, 2  ;;  %v4439_v13 = vrot.slane %v3775_v45, 3  ;;  %v4671_v28 = vrot.slane %v3775_v45, 4 }
 0x563   : > { %v3733_v49 = vpop.f32.mrf.mxu3 }
 0x564   : > { %v3734_v9 = vadd.f32 %v3733_v49, %v3671_v53 }
 0x565   : > { %v3582_v17 = vpop.f32.mrf.mxu1 }
 0x566   : > { %v3776_v7 = vmax.f32 %v3580_v52, %v3734_v9  ;;  %v3583_v51 = vadd.f32 %v3582_v17, %v3520_v5 }
 0x568   : > { %v3851_v25 = vrot.slane %v3776_v7, 1  ;;  %6364 = vmatmul.msk.f32.gmra.mxu2 %vm3879_vm8, %v3776_v7  ;;  %6379 = vmatmul.msk.f32.gmra.mxu3 %vm3879_vm8, %v3776_v7  ;;  %v4208_v50 = vrot.slane %v3776_v7, 2  ;;  %v4440_v40 = vrot.slane %v3776_v7, 3  ;;  %v4672_v19 = vrot.slane %v3776_v7, 4 }
 0x56a   : > { %v3852_v0 = vsel %vm698_vm0, %v3850_v59, %v3851_v25  ;;  %v9595_v46 = vsel %vm1354_vm2, %v4207_v30, %v4208_v50  ;;  %v9598_v62 = vsel %vm1783_vm3, %v4439_v13, %v4440_v40  ;;  %v9601_v58 = vsel %vm2212_vm4, %v4671_v28, %v4672_v19 }
 0x56b   : > { %v3736_v16 = vpop.f32.mrf.mxu3  ;;  %6333 = vmatmul.msk.f32.vlgmr.msra.gmra.mxu0 %vm3879_vm8, %v3852_v0  ;;  %6348 = vmatmul.msk.f32.vlgmr.msra.gmra.mxu1 %vm3879_vm8, %v3852_v0 }
 0x56c   : > { %v3737_v36 = vadd.f32 %v3736_v16, %v3674_v26  ;;  %v3535_v26 = vpop.f32.mrf.mxu0 }
 0x56d   : > { %v3585_v37 = vpop.f32.mrf.mxu1 }
 0x56e   : > { %v3777_v3 = vmax.f32 %v3583_v51, %v3737_v36  ;;  %v3586_v6 = vadd.f32 %v3585_v37, %v3523_v39 }
 0x570   : > { %v3853_v47 = vrot.slane %v3777_v3, 1  ;;  %6365 = vmatmul.msk.f32.gmra.mxu2 %vm3879_vm8, %v3777_v3  ;;  %6380 = vmatmul.msk.f32.gmra.mxu3 %vm3879_vm8, %v3777_v3  ;;  %v4210_v21 = vrot.slane %v3777_v3, 2  ;;  %v4442_v34 = vrot.slane %v3777_v3, 3  ;;  %v4674_v8 = vrot.slane %v3777_v3, 4 }
 0x572   : > { %v3854_v56 = vsel %vm698_vm0, %v3851_v25, %v3853_v47  ;;  %v9609_v54 = vsel %vm1354_vm2, %v4208_v50, %v4210_v21  ;;  %v9612_v63 = vsel %vm1783_vm3, %v4440_v40, %v4442_v34  ;;  %v9615_v22 = vsel %vm2212_vm4, %v4672_v19, %v4674_v8 }
 0x573   : > { %v3739_v48 = vpop.f32.mrf.mxu3  ;;  %6334 = vmatmul.msk.f32.gmra.mxu0 %vm3879_vm8, %v3854_v56  ;;  %6349 = vmatmul.msk.f32.gmra.mxu1 %vm3879_vm8, %v3854_v56 }
 0x574   : > { %v3740_v11 = vadd.f32 %v3739_v48, %v3677_v15  ;;  %v3538_v25 = vpop.f32.mrf.mxu0 }
 0x575   : > { %v3588_v1 = vpop.f32.mrf.mxu1 }
 0x576   : > { %v3778_v57 = vmax.f32 %v3586_v6, %v3740_v11  ;;  %v3589_v14 = vadd.f32 %v3588_v1, %v3526_v41  ;;  %v3689_v41 = vpop.f32.mrf.mxu2 }
 0x578   : > { %v3855_v32 = vrot.slane %v3778_v57, 1  ;;  %6366 = vmatmul.msk.f32.gmra.mxu2 %vm3879_vm8, %v3778_v57  ;;  %6381 = vmatmul.msk.f32.gmra.mxu3 %vm3879_vm8, %v3778_v57  ;;  %v4212_v42 = vrot.slane %v3778_v57, 2  ;;  %v4444_v38 = vrot.slane %v3778_v57, 3  ;;  %v4676_v33 = vrot.slane %v3778_v57, 4 }
 0x57a   : > { %v3856_v43 = vsel %vm698_vm0, %v3853_v47, %v3855_v32  ;;  %v9623_v18 = vsel %vm1354_vm2, %v4210_v21, %v4212_v42  ;;  %v9626_v35 = vsel %vm1783_vm3, %v4442_v34, %v4444_v38  ;;  %v9629_v44 = vsel %vm2212_vm4, %v4674_v8, %v4676_v33 }
 0x57b   : > { %v3742_v53 = vpop.f32.mrf.mxu3  ;;  %6335 = vmatmul.msk.f32.gmra.mxu0 %vm3879_vm8, %v3856_v43  ;;  %6350 = vmatmul.msk.f32.gmra.mxu1 %vm3879_vm8, %v3856_v43 }
 0x57c   : > { %v3743_v29 = vadd.f32 %v3742_v53, %v3680_v23  ;;  %v3541_v1 = vpop.f32.mrf.mxu0 }
 0x57d   : > { %v3591_v31 = vpop.f32.mrf.mxu1 }
 0x57e   : > { %v3779_v12 = vmax.f32 %v3589_v14, %v3743_v29  ;;  %v3592_v27 = vadd.f32 %v3591_v31, %v3529_v4  ;;  %v3692_v36 = vpop.f32.mrf.mxu2 }
 0x580   : > { %v3857_v5 = vrot.slane %v3779_v12, 1  ;;  %6367 = vmatmul.msk.f32.gmra.mxu2 %vm3879_vm8, %v3779_v12  ;;  %6382 = vmatmul.msk.f32.gmra.mxu3 %vm3879_vm8, %v3779_v12  ;;  %v4214_v61 = vrot.slane %v3779_v12, 2  ;;  %v4446_v39 = vrot.slane %v3779_v12, 3  ;;  %v4678_v60 = vrot.slane %v3779_v12, 4 }
 0x582   : > { %v3858_v15 = vsel %vm698_vm0, %v3855_v32, %v3857_v5  ;;  %v9637_v10 = vsel %vm1354_vm2, %v4212_v42, %v4214_v61  ;;  %v9640_v20 = vsel %vm1783_vm3, %v4444_v38, %v4446_v39  ;;  %v9643_v45 = vsel %vm2212_vm4, %v4676_v33, %v4678_v60 }
 0x583   : > { %v3745_v52 = vpop.f32.mrf.mxu3  ;;  %6336 = vmatmul.msk.f32.gmra.mxu0 %vm3879_vm8, %v3858_v15  ;;  %6351 = vmatmul.msk.f32.gmra.mxu1 %vm3879_vm8, %v3858_v15 }
 0x584   : > { %v3746_v49 = vadd.f32 %v3745_v52, %v3683_v55  ;;  %v3544_v52 = vpop.f32.mrf.mxu0 }
 0x585   : > { %v3594_v9 = vpop.f32.mrf.mxu1 }
 0x586   : > { %v3780_v17 = vmax.f32 %v3592_v27, %v3746_v49  ;;  %v3595_v13 = vadd.f32 %v3594_v9, %v3532_v2  ;;  %v3695_v32 = vpop.f32.mrf.mxu2  ;;  %v6463_v27 = vld [vmem:[%s11147_s6 + $0x2a8] sm:$0xff]  ;;  %v6461_v49 = vld [vmem:[%s11147_s6 + $0x298] sm:$0xff] }
 0x588   : > { %v3859_v23 = vrot.slane %v3780_v17, 1  ;;  %6368 = vmatmul.msk.f32.gmra.mxu2 %vm3879_vm8, %v3780_v17  ;;  %6383 = vmatmul.msk.f32.gmra.mxu3 %vm3879_vm8, %v3780_v17  ;;  %v4216_v7 = vrot.slane %v3780_v17, 2  ;;  %v4448_v59 = vrot.slane %v3780_v17, 3  ;;  %v4680_v30 = vrot.slane %v3780_v17, 4 }
 0x58a   : > { %v3860_v28 = vsel %vm698_vm0, %v3857_v5, %v3859_v23  ;;  %v9651_v50 = vsel %vm1354_vm2, %v4214_v61, %v4216_v7  ;;  %v9654_v40 = vsel %vm1783_vm3, %v4446_v39, %v4448_v59  ;;  %v9657_v19 = vsel %vm2212_vm4, %v4678_v60, %v4680_v30  ;;  %v6464_v5 = vld [vmem:[%s11147_s6 + $0x2b0] sm:$0xf]  ;;  %v6462_v60 = vld [vmem:[%s11147_s6 + $0x2a0] sm:$0xff] }
 0x58b   : > { %v3748_v51 = vpop.f32.mrf.mxu3  ;;  %6337 = vmatmul.msk.f32.gmra.mxu0 %vm3879_vm8, %v3860_v28  ;;  %6352 = vmatmul.msk.f32.gmra.mxu1 %vm3879_vm8, %v3860_v28  ;;  %v6459_v28 = vld [vmem:[%s11147_s6 + $0x288] sm:$0xff] }
 0x58c   : > { %v3749_v0 = vadd.f32 %v3748_v51, %v3686_v24  ;;  %6466 = vmatpush.msk.msrb.mxu2 %vm2212_vm4, %v6464_v5  ;;  %v6452_v5 = vld [vmem:[%s11147_s6 + $0x250] sm:$0xff] }
 0x58d   : > { %v3597_v16 = vpop.f32.mrf.mxu1 }
 0x58e   : > { %v3781_v4 = vmax.f32 %v3595_v13, %v3749_v0  ;;  %v3598_v21 = vadd.f32 %v3597_v16, %v3535_v26  ;;  %v6465_v26 = vld [vmem:[%s11147_s6 + $0x2b8] sm:$0xf]  ;;  %4508 = vmatpush.msrb.mxu2 %v6462_v60  ;;  %v6458_v13 = vld [vmem:[%s11147_s6 + $0x280] sm:$0xff] }
 0x58f   : > { %6481 = vmatpush.msk.msra.mxu3 %vm2212_vm4, %v6465_v26  ;;  %v6453_v26 = vld [vmem:[%s11147_s6 + $0x258] sm:$0xff] }
 0x590   : > { %v3861_v37 = vrot.slane %v3781_v4, 1  ;;  %6369 = vmatmul.msk.f32.gmra.mxu2 %vm3879_vm8, %v3781_v4  ;;  %6384 = vmatmul.msk.f32.gmra.mxu3 %vm3879_vm8, %v3781_v4  ;;  %v4218_v3 = vrot.slane %v3781_v4, 2  ;;  %v4450_v55 = vrot.slane %v3781_v4, 3  ;;  %v4682_v47 = vrot.slane %v3781_v4, 4  ;;  %v6456_v4 = vld [vmem:[%s11147_s6 + $0x270] sm:$0xff] }
 0x591   : > { %4567 = vmatpush.msra.mxu3 %v6463_v27 }
 0x592   : > { %v3862_v34 = vsel %vm698_vm0, %v3859_v23, %v3861_v37  ;;  %v9665_v8 = vsel %vm1354_vm2, %v4216_v7, %v4218_v3  ;;  %v9668_v6 = vsel %vm1783_vm3, %v4448_v59, %v4450_v55  ;;  %v9671_v56 = vsel %vm2212_vm4, %v4680_v30, %v4682_v47  ;;  %v3698_v30 = vpop.f32.mrf.mxu2 }
 0x593   : > { %v3751_v48 = vpop.f32.mrf.mxu3  ;;  %6338 = vmatmul.msk.f32.gmra.mxu0 %vm3879_vm8, %v3862_v34  ;;  %6353 = vmatmul.msk.f32.gmra.mxu1 %vm3879_vm8, %v3862_v34  ;;  %v6413_v34 = vld [vmem:[%s11147_s6 + $0x208] sm:$0xf] }
 0x594   : > { %v3752_v11 = vadd.f32 %v3751_v48, %v3689_v41  ;;  %v6460_v41 = vld [vmem:[%s11147_s6 + $0x290] sm:$0xff]  ;;  %4568 = vmatpush.msra.mxu3 %v6461_v49  ;;  %6429 = vmatpush.msk.msrb.mxu1 %vm2212_vm4, %v6413_v34 }
 0x595   : > { %v3600_v57 = vpop.f32.mrf.mxu1  ;;  %4509 = vmatpush.msrb.mxu2 %v6460_v41  ;;  %v6410_v48 = vld [vmem:[%s11147_s6 + $0x1f0] sm:$0xff] }
 0x596   : > { %v3782_v2 = vmax.f32 %v3598_v21, %v3752_v11  ;;  %v3601_v24 = vadd.f32 %v3600_v57, %v3538_v25  ;;  %4569 = vmatpush.msra.mxu3 %v6459_v28  ;;  %v6412_v21 = vld [vmem:[%s11147_s6 + $0x200] sm:$0xf]  ;;  %v6411_v11 = vld [vmem:[%s11147_s6 + $0x1f8] sm:$0xff]  ;;  %v6455_v57 = vld [vmem:[%s11147_s6 + $0x268] sm:$0xff] }
 0x597   : > { %4510 = vmatpush.msrb.mxu2 %v6458_v13  ;;  %6414 = vmatpush.msk.msrb.mxu0 %vm2212_vm4, %v6412_v21  ;;  %v6406_v49 = vld [vmem:[%s11147_s6 + $0x1d0] sm:$0xff]  ;;  %v6449_v28 = vld [vmem:[%s11147_s6 + $0x238] sm:$0xff] }
 0x598   : > { %v3863_v42 = vrot.slane %v3782_v2, 1  ;;  %6370 = vmatmul.msk.f32.gmra.mxu2 %vm3879_vm8, %v3782_v2  ;;  %6385 = vmatmul.msk.f32.gmra.mxu3 %vm3879_vm8, %v3782_v2  ;;  %v4220_v38 = vrot.slane %v3782_v2, 2  ;;  %v4452_v33 = vrot.slane %v3782_v2, 3  ;;  %v4684_v14 = vrot.slane %v3782_v2, 4  ;;  %v6448_v13 = vld [vmem:[%s11147_s6 + $0x230] sm:$0xff] }
 0x599   : > { %4511 = vmatpush.msrb.mxu2 %v6456_v4  ;;  %4276 = vmatpush.msrb.mxu0 %v6410_v48  ;;  %v6446_v48 = vld [vmem:[%s11147_s6 + $0x220] sm:$0xff] }
 0x59a   : > { %v3864_v43 = vsel %vm698_vm0, %v3861_v37, %v3863_v42  ;;  %v9679_v53 = vsel %vm1354_vm2, %v4218_v3, %v4220_v38  ;;  %v9682_v29 = vsel %vm1783_vm3, %v4450_v55, %v4452_v33  ;;  %v9685_v31 = vsel %vm2212_vm4, %v4682_v47, %v4684_v14  ;;  %v6457_v37 = vld [vmem:[%s11147_s6 + $0x278] sm:$0xff]  ;;  %4335 = vmatpush.msrb.mxu1 %v6411_v11  ;;  %v3701_v27 = vpop.f32.mrf.mxu2  ;;  %v6447_v11 = vld [vmem:[%s11147_s6 + $0x228] sm:$0xff] }
 0x59b   : > { %v3754_v12 = vpop.f32.mrf.mxu3  ;;  %6339 = vmatmul.msk.f32.gmra.mxu0 %vm3879_vm8, %v3864_v43  ;;  %6354 = vmatmul.msk.f32.gmra.mxu1 %vm3879_vm8, %v3864_v43  ;;  %v6409_v43 = vld [vmem:[%s11147_s6 + $0x1e8] sm:$0xff] }
 0x59c   : > { %v3755_v61 = vadd.f32 %v3754_v12, %v3692_v36  ;;  %4570 = vmatpush.msra.mxu3 %v6457_v37  ;;  %4336 = vmatpush.msrb.mxu1 %v6409_v43  ;;  %v6445_v43 = vld [vmem:[%s11147_s6 + $0x218] sm:$0xff] }
 0x59d   : > { %v3603_v39 = vpop.f32.mrf.mxu1 }
 0x59e   : > { %v9703_v15 = vmax.f32 %v3601_v24, %v3755_v61  ;;  %v3604_v59 = vadd.f32 %v3603_v39, %v3541_v1  ;;  %v6454_v1 = vld [vmem:[%s11147_s6 + $0x260] sm:$0xff]  ;;  %4571 = vmatpush.msra.mxu3 %v6455_v57 }
 0x59f   : > { %v6408_v24 = vld [vmem:[%s11147_s6 + $0x1e0] sm:$0xff]  ;;  %4512 = vmatpush.msrb.mxu2 %v6454_v1 }
 0x5a0   : > { %v3865_v9 = vrot.slane %v9703_v15, 1  ;;  %6371 = vmatmul.msk.f32.gmra.mxu2 %vm3879_vm8, %v9703_v15  ;;  %6386 = vmatmul.msk.f32.gmra.mxu3 %vm3879_vm8, %v9703_v15  ;;  %v4222_v17 = vrot.slane %v9703_v15, 2  ;;  %v4454_v23 = vrot.slane %v9703_v15, 3  ;;  %v4686_v7 = vrot.slane %v9703_v15, 4  ;;  %v6450_v15 = vld [vmem:[%s11147_s6 + $0x240] sm:$0xff] }
 0x5a1   : > { %4277 = vmatpush.msrb.mxu0 %v6408_v24  ;;  %4513 = vmatpush.msrb.mxu2 %v6452_v5 }
 0x5a2   : > { %v3866_v25 = vsel %vm698_vm0, %v3863_v42, %v3865_v9  ;;  %v9727_v51 = vsel %vm1354_vm2, %v4220_v38, %v4222_v17  ;;  %v9730_v0 = vsel %vm1783_vm3, %v4452_v33, %v4454_v23  ;;  %v9733_v16 = vsel %vm2212_vm4, %v4684_v14, %v4686_v7  ;;  %4572 = vmatpush.msra.mxu3 %v6453_v26  ;;  %v3704_v5 = vpop.f32.mrf.mxu2 }
 0x5a3   : > { %v3757_v36 = vpop.f32.mrf.mxu3  ;;  %6340 = vmatmul.msk.f32.gmra.mxu0 %vm3879_vm8, %v3866_v25  ;;  %6355 = vmatmul.msk.f32.gmra.mxu1 %vm3879_vm8, %v3866_v25 }
 0x5a4   : > { %v3758_v3 = vadd.f32 %v3757_v36, %v3695_v32  ;;  %v3547_v32 = vpop.f32.mrf.mxu0  ;;  %4278 = vmatpush.msrb.mxu0 %v6406_v49  ;;  %4514 = vmatpush.msrb.mxu2 %v6450_v15 }
 0x5a5   : > { %v3606_v55 = vpop.f32.mrf.mxu1 }
 0x5a6   : > { %v9743_v47 = vmax.f32 %v3604_v59, %v3758_v3  ;;  %v3607_v14 = vadd.f32 %v3606_v55, %v3544_v52  ;;  %v6404_v59 = vld [vmem:[%s11147_s6 + $0x1c0] sm:$0xff]  ;;  %v6402_v55 = vld [vmem:[%s11147_s6 + $0x1b0] sm:$0xff]  ;;  %4515 = vmatpush.msrb.mxu2 %v6448_v13 }
 0x5a7   : > { %4279 = vmatpush.msrb.mxu0 %v6404_v59 }
 0x5a8   : > { %v3867_v2 = vrot.slane %v9743_v47, 1  ;;  %6372 = vmatmul.msk.f32.gmra.mxu2 %vm3879_vm8, %v9743_v47  ;;  %6387 = vmatmul.msk.f32.gmra.mxu3 %vm3879_vm8, %v9743_v47  ;;  %v4224_v42 = vrot.slane %v9743_v47, 2  ;;  %v4456_v38 = vrot.slane %v9743_v47, 3  ;;  %v4688_v33 = vrot.slane %v9743_v47, 4  ;;  %v6403_v47 = vld [vmem:[%s11147_s6 + $0x1b8] sm:$0xff] }
 0x5a9   : > { %4280 = vmatpush.msrb.mxu0 %v6402_v55  ;;  %4516 = vmatpush.msrb.mxu2 %v6446_v48 }
 0x5aa   : > { %v3868_v12 = vsel %vm698_vm0, %v3865_v9, %v3867_v2  ;;  %v9787_v61 = vsel %vm1354_vm2, %v4222_v17, %v4224_v42  ;;  %v9790_v39 = vsel %vm1783_vm3, %v4454_v23, %v4456_v38  ;;  %v9798_v52 = vsel %vm2212_vm4, %v4686_v7, %v4688_v33  ;;  %v6407_v9 = vld [vmem:[%s11147_s6 + $0x1d8] sm:$0xff]  ;;  %v6451_v17 = vld [vmem:[%s11147_s6 + $0x248] sm:$0xff] }
 0x5ab   : > { %v3760_v60 = vpop.f32.mrf.mxu3  ;;  %6341 = vmatmul.msk.f32.gmra.mxu0 %vm3879_vm8, %v3868_v12  ;;  %6356 = vmatmul.msk.f32.gmra.mxu1 %vm3879_vm8, %v3868_v12 }
 0x5ac   : > { %v3761_v41 = vadd.f32 %v3760_v60, %v3698_v30  ;;  %4337 = vmatpush.msrb.mxu1 %v6407_v9  ;;  %v6405_v30 = vld [vmem:[%s11147_s6 + $0x1c8] sm:$0xff]  ;;  %4573 = vmatpush.msra.mxu3 %v6451_v17  ;;  %v3550_v34 = vpop.f32.mrf.mxu0  ;;  %v6399_v60 = vld [vmem:[%s11147_s6 + $0x198] sm:$0xff]  ;;  %v6396_v17 = vld [vmem:[%s11147_s6 + $0x180] sm:$0xff] }
 0x5ad   : > { %v3609_v23 = vpop.f32.mrf.mxu1 }
 0x5ae   : > { %v9809_v7 = vmax.f32 %v3607_v14, %v3761_v41  ;;  %v3610_v3 = vadd.f32 %v3609_v23, %v3547_v32  ;;  %4338 = vmatpush.msrb.mxu1 %v6405_v30  ;;  %4574 = vmatpush.msra.mxu3 %v6449_v28  ;;  %v6401_v14 = vld [vmem:[%s11147_s6 + $0x1a8] sm:$0xff] }
 0x5af   : > { %v6397_v23 = vld [vmem:[%s11147_s6 + $0x188] sm:$0xff] }
 0x5b0   : > { %v3869_v25 = vrot.slane %v9809_v7, 1  ;;  %6373 = vmatmul.msk.f32.gmra.mxu2 %vm3879_vm8, %v9809_v7  ;;  %6388 = vmatmul.msk.f32.gmra.mxu3 %vm3879_vm8, %v9809_v7  ;;  %v4226_v36 = vrot.slane %v9809_v7, 2  ;;  %v4458_v4 = vrot.slane %v9809_v7, 3  ;;  %v4690_v37 = vrot.slane %v9809_v7, 4 }
 0x5b1   : > { %4339 = vmatpush.msrb.mxu1 %v6403_v47  ;;  %4575 = vmatpush.msra.mxu3 %v6447_v11  ;;  %v6393_v47 = vld [vmem:[%s11147_s6 + $0x168] sm:$0xff] }
 0x5b2   : > { %v3870_v21 = vsel %vm698_vm0, %v3867_v2, %v3869_v25  ;;  %v9845_v1 = vsel %vm1354_vm2, %v4224_v42, %v4226_v36  ;;  %v9848_v57 = vsel %vm1783_vm3, %v4456_v38, %v4458_v4  ;;  %v6400_v2 = vld [vmem:[%s11147_s6 + $0x1a0] sm:$0xff]  ;;  %v9859_v24 = vsel %vm2212_vm4, %v4688_v33, %v4690_v37  ;;  %v6444_v38 = vld [vmem:[%s11147_s6 + $0x210] sm:$0xff] }
 0x5b3   : > { %v3763_v32 = vpop.f32.mrf.mxu3  ;;  %6342 = vmatmul.msk.f32.gmra.mxu0 %vm3879_vm8, %v3870_v21  ;;  %6357 = vmatmul.msk.f32.gmra.mxu1 %vm3879_vm8, %v3870_v21  ;;  %v6398_v33 = vld [vmem:[%s11147_s6 + $0x190] sm:$0xff] }
 0x5b4   : > { %v3764_v42 = vadd.f32 %v3763_v32, %v3701_v27  ;;  %4281 = vmatpush.msrb.mxu0 %v6400_v2  ;;  %4340 = vmatpush.msrb.mxu1 %v6401_v14  ;;  %v3553_v55 = vpop.f32.mrf.mxu0 }
 0x5b5   : > { %v3612_v12 = vpop.f32.mrf.mxu1  ;;  %4517 = vmatpush.msrb.mxu2 %v6444_v38  ;;  %4576 = vmatpush.msra.mxu3 %v6445_v43 }
 0x5b6   : > { %v3786_v26 = vmax.f32 %v3610_v3, %v3764_v42  ;;  %v3613_v9 = vadd.f32 %v3612_v12, %v3550_v34  ;;  %4282 = vmatpush.msrb.mxu0 %v6398_v33  ;;  %4341 = vmatpush.msrb.mxu1 %v6399_v60  ;;  %v6394_v3 = vld [vmem:[%s11147_s6 + $0x170] sm:$0xff]  ;;  %v3707_v34 = vpop.f32.mrf.mxu2 }
 0x5b8   : > { %v3871_v27 = vrot.slane %v3786_v26, 1  ;;  %6374 = vmatmul.msk.f32.gmra.mxu2 %vm3879_vm8, %v3786_v26  ;;  %6389 = vmatmul.msk.f32.gmra.mxu3 %vm3879_vm8, %v3786_v26  ;;  %v4228_v15 = vrot.slane %v3786_v26, 2  ;;  %v4460_v41 = vrot.slane %v3786_v26, 3  ;;  %v4692_v49 = vrot.slane %v3786_v26, 4 }
 0x5b9   : > { %4283 = vmatpush.msrb.mxu0 %v6396_v17  ;;  %4342 = vmatpush.msrb.mxu1 %v6397_v23 }
 0x5ba   : > { %v3872_v7 = vsel %vm698_vm0, %v3869_v25, %v3871_v27  ;;  %v9883_v59 = vsel %vm1354_vm2, %v4226_v36, %v4228_v15  ;;  %v9886_v30 = vsel %vm1783_vm3, %v4458_v4, %v4460_v41  ;;  %v9889_v13 = vsel %vm2212_vm4, %v4690_v37, %v4692_v49  ;;  %v6395_v25 = vld [vmem:[%s11147_s6 + $0x178] sm:$0xff]  ;;  %v6392_v37 = vld [vmem:[%s11147_s6 + $0x160] sm:$0xff] }
 0x5bb   : > { %v3766_v28 = vpop.f32.mrf.mxu3  ;;  %6343 = vmatmul.msk.f32.gmra.mxu0 %vm3879_vm8, %v3872_v7  ;;  %6358 = vmatmul.msk.f32.gmra.mxu1 %vm3879_vm8, %v3872_v7 }
 0x5bc   : > { %v3767_v36 = vadd.f32 %v3766_v28, %v3704_v5  ;;  %4284 = vmatpush.msrb.mxu0 %v6394_v3  ;;  %4343 = vmatpush.msrb.mxu1 %v6395_v25  ;;  %v3556_v60 = vpop.f32.mrf.mxu0 }
 0x5bd   : > { %v3615_v4 = vpop.f32.mrf.mxu1 }
 0x5be   : > { %v3787_v21 = vmax.f32 %v3613_v9, %v3767_v36  ;;  %4285 = vmatpush.msrb.mxu0 %v6392_v37  ;;  %4344 = vmatpush.msrb.mxu1 %v6393_v47  ;;  %v3616_v14 = vadd.f32 %v3615_v4, %v3553_v55  ;;  %v3710_v28 = vpop.f32.mrf.mxu2 }
 0x5c0   : > { %v3873_v48 = vrot.slane %v3787_v21, 1  ;;  %v4230_v11 = vrot.slane %v3787_v21, 2  ;;  %v4462_v32 = vrot.slane %v3787_v21, 3  ;;  %v4694_v2 = vrot.slane %v3787_v21, 4  ;;  %6375 = vmatmul.msk.f32.gmra.mxu2 %vm3879_vm8, %v3787_v21  ;;  %6390 = vmatmul.msk.f32.gmra.mxu3 %vm3879_vm8, %v3787_v21 }
 0x5c2   : > { %v3874_v42 = vsel %vm698_vm0, %v3871_v27, %v3873_v48  ;;  %v9909_v38 = vsel %vm1354_vm2, %v4228_v15, %v4230_v11  ;;  %v9912_v43 = vsel %vm1783_vm3, %v4460_v41, %v4462_v32  ;;  %v9915_v12 = vsel %vm2212_vm4, %v4692_v49, %v4694_v2 }
 0x5c3   : > { %v3769_v5 = vpop.f32.mrf.mxu3  ;;  %6344 = vmatmul.msk.f32.gmra.mxu0 %vm3879_vm8, %v3874_v42  ;;  %6359 = vmatmul.msk.f32.gmra.mxu1 %vm3879_vm8, %v3874_v42  ;;  %v6512_v42 = vld [vmem:[%s11147_s6 + $0x340] sm:$0xff] }
 0x5c4   : > { %v3770_v26 = vadd.f32 %v3769_v5, %v3707_v34  ;;  %v6513_v5 = vld [vmem:[%s11147_s6 + $0x348] sm:$0xff] }
 0x5c5   : > { %v3618_v9 = vpop.f32.mrf.mxu1 }
 0x5c6   : > { %v3788_v33 = vmax.f32 %v3616_v14, %v3770_v26  ;;  %v3619_v7 = vadd.f32 %v3618_v9, %v3556_v60  ;;  %v6515_v14 = vld [vmem:[%s11147_s6 + $0x358] sm:$0xff]  ;;  %v6508_v9 = vld [vmem:[%s11147_s6 + $0x320] sm:$0xff] }
 0x5c7   : > { %v6511_v60 = vld [vmem:[%s11147_s6 + $0x338] sm:$0xff] }
 0x5c8   : > { %v3875_v17 = vrot.slane %v3788_v33, 1  ;;  %v4232_v27 = vrot.slane %v3788_v33, 2  ;;  %v4464_v23 = vrot.slane %v3788_v33, 3  ;;  %v4696_v15 = vrot.slane %v3788_v33, 4  ;;  %6376 = vmatmul.msk.f32.gmra.mxu2 %vm3879_vm8, %v3788_v33  ;;  %6391 = vmatmul.msk.f32.gmra.mxu3 %vm3879_vm8, %v3788_v33 }
 0x5ca   : > { %v3876_v41 = vsel %vm698_vm0, %v3873_v48, %v3875_v17  ;;  %v9923_v49 = vsel %vm1354_vm2, %v4230_v11, %v4232_v27  ;;  %v9926_v3 = vsel %vm1783_vm3, %v4462_v32, %v4464_v23  ;;  %v9929_v25 = vsel %vm2212_vm4, %v4694_v2, %v4696_v15 }
 0x5cb   : > { %v3772_v36 = vpop.f32.mrf.mxu3  ;;  %6345 = vmatmul.msk.f32.gmra.mxu0 %vm3879_vm8, %v3876_v41  ;;  %6360 = vmatmul.msk.f32.gmra.mxu1 %vm3879_vm8, %v3876_v41  ;;  %v6503_v41 = vld [vmem:[%s11147_s6 + $0x2f8] sm:$0xff] }
 0x5cc   : > { %v3773_v55 = vadd.f32 %v3772_v36, %v3710_v28  ;;  %v6505_v28 = vld [vmem:[%s11147_s6 + $0x308] sm:$0xff] }
 0x5ce   : > { %v3789_v4 = vmax.f32 %v3619_v7, %v3773_v55  ;;  %v6504_v7 = vld [vmem:[%s11147_s6 + $0x300] sm:$0xff] }
 0x5d0   : > { %v3877_v37 = vrot.slane %v3789_v4, 1  ;;  %v4234_v47 = vrot.slane %v3789_v4, 2  ;;  %v4466_v21 = vrot.slane %v3789_v4, 3  ;;  %v4698_v34 = vrot.slane %v3789_v4, 4  ;;  %6467 = vmatmul.msk.f32.vlgmr.msrb.gmra.mxu2 %vm3879_vm8, %v9598_v62  ;;  %6482 = vmatmul.msk.f32.vlgmr.msra.gmra.mxu3 %vm3879_vm8, %v9598_v62  ;;  %v6500_v4 = vld [vmem:[%s11147_s6 + $0x2e0] sm:$0xff] }
 0x5d2   : > { %v3878_v48 = vsel %vm698_vm0, %v3875_v17, %v3877_v37  ;;  %v9939_v11 = vsel %vm1354_vm2, %v4232_v27, %v4234_v47  ;;  %v9942_v32 = vsel %vm1783_vm3, %v4464_v23, %v4466_v21  ;;  %v9945_v2 = vsel %vm2212_vm4, %v4696_v15, %v4698_v34  ;;  %v6509_v17 = vld [vmem:[%s11147_s6 + $0x328] sm:$0xff]  ;;  %v6506_v23 = vld [vmem:[%s11147_s6 + $0x310] sm:$0xff]  ;;  %v6507_v15 = vld [vmem:[%s11147_s6 + $0x318] sm:$0xff] }
 0x5d3   : > { %6346 = vmatmul.msk.f32.gmra.mxu0 %vm3879_vm8, %v3878_v48  ;;  %6361 = vmatmul.msk.f32.gmra.mxu1 %vm3879_vm8, %v3878_v48  ;;  %v6498_v21 = vld [vmem:[%s11147_s6 + $0x2d0] sm:$0xff]  ;;  %v6499_v34 = vld [vmem:[%s11147_s6 + $0x2d8] sm:$0xff]  ;;  %v6496_v48 = vld [vmem:[%s11147_s6 + $0x2c0] sm:$0xff] }
 0x5d8   : > { %6468 = vmatmul.msk.f32.gmra.mxu2 %vm3879_vm8, %v9612_v63  ;;  %6483 = vmatmul.msk.f32.gmra.mxu3 %vm3879_vm8, %v9612_v63 }
 0x5db   : > { %6415 = vmatmul.msk.f32.vlgmr.msrb.gmra.mxu0 %vm3879_vm8, %v9595_v46  ;;  %6430 = vmatmul.msk.f32.vlgmr.msrb.gmra.mxu1 %vm3879_vm8, %v9595_v46 }
 0x5e0   : > { %6469 = vmatmul.msk.f32.gmra.mxu2 %vm3879_vm8, %v9626_v35  ;;  %6484 = vmatmul.msk.f32.gmra.mxu3 %vm3879_vm8, %v9626_v35 }
 0x5e3   : > { %6416 = vmatmul.msk.f32.gmra.mxu0 %vm3879_vm8, %v9609_v54  ;;  %6431 = vmatmul.msk.f32.gmra.mxu1 %vm3879_vm8, %v9609_v54  ;;  %v10065_v26 = vpop.f32.mrf.mxu2  ;;  %v10067_v33 = vpop.f32.mrf.mxu3 }
 0x5e8   : > { %v9965_v62 = vpop.f32.mrf.mxu0  ;;  %v9967_v63 = vpop.f32.mrf.mxu1  ;;  %6470 = vmatmul.msk.f32.gmra.mxu2 %vm3879_vm8, %v9640_v20  ;;  %6485 = vmatmul.msk.f32.gmra.mxu3 %vm3879_vm8, %v9640_v20 }
 0x5eb   : > { %6417 = vmatmul.msk.f32.gmra.mxu0 %vm3879_vm8, %v9623_v18  ;;  %6432 = vmatmul.msk.f32.gmra.mxu1 %vm3879_vm8, %v9623_v18  ;;  %v10115_v36 = vpop.f32.mrf.mxu2  ;;  %v10117_v55 = vpop.f32.mrf.mxu3 }
 0x5f0   : > { %v9977_v46 = vpop.f32.mrf.mxu0  ;;  %v9979_v35 = vpop.f32.mrf.mxu1  ;;  %6471 = vmatmul.msk.f32.gmra.mxu2 %vm3879_vm8, %v9654_v40  ;;  %6486 = vmatmul.msk.f32.gmra.mxu3 %vm3879_vm8, %v9654_v40 }
 0x5f3   : > { %6418 = vmatmul.msk.f32.gmra.mxu0 %vm3879_vm8, %v9637_v10  ;;  %6433 = vmatmul.msk.f32.gmra.mxu1 %vm3879_vm8, %v9637_v10 }
 0x5f8   : > { %v9989_v54 = vpop.f32.mrf.mxu0  ;;  %v9991_v20 = vpop.f32.mrf.mxu1  ;;  %6472 = vmatmul.msk.f32.gmra.mxu2 %vm3879_vm8, %v9668_v6  ;;  %6487 = vmatmul.msk.f32.gmra.mxu3 %vm3879_vm8, %v9668_v6 }
 0x5fb   : > { %6419 = vmatmul.msk.f32.gmra.mxu0 %vm3879_vm8, %v9651_v50  ;;  %6434 = vmatmul.msk.f32.gmra.mxu1 %vm3879_vm8, %v9651_v50 }
 0x600   : > { %v10001_v18 = vpop.f32.mrf.mxu0  ;;  %v10003_v40 = vpop.f32.mrf.mxu1  ;;  %6473 = vmatmul.msk.f32.gmra.mxu2 %vm3879_vm8, %v9682_v29  ;;  %6488 = vmatmul.msk.f32.gmra.mxu3 %vm3879_vm8, %v9682_v29 }
 0x603   : > { %6420 = vmatmul.msk.f32.gmra.mxu0 %vm3879_vm8, %v9665_v8  ;;  %6435 = vmatmul.msk.f32.gmra.mxu1 %vm3879_vm8, %v9665_v8  ;;  %v6516_v8 = vld [vmem:[%s11147_s6 + $0x360] sm:$0xf] }
 0x604   : > { %6518 = vmatpush.msk.msra.mxu0 %vm2212_vm4, %v6516_v8  ;;  %v6497_v8 = vld [vmem:[%s11147_s6 + $0x2c8] sm:$0xff] }
 0x608   : > { %v10013_v10 = vpop.f32.mrf.mxu0  ;;  %v10015_v6 = vpop.f32.mrf.mxu1  ;;  %6474 = vmatmul.msk.f32.gmra.mxu2 %vm3879_vm8, %v9730_v0  ;;  %6489 = vmatmul.msk.f32.gmra.mxu3 %vm3879_vm8, %v9730_v0 }
 0x60b   : > { %6421 = vmatmul.msk.f32.gmra.mxu0 %vm3879_vm8, %v9679_v53  ;;  %6436 = vmatmul.msk.f32.gmra.mxu1 %vm3879_vm8, %v9679_v53  ;;  %v6517_v53 = vld [vmem:[%s11147_s6 + $0x368] sm:$0xf] }
 0x60c   : > { %6533 = vmatpush.msk.msra.mxu1 %vm2212_vm4, %v6517_v53  ;;  %v10149_v53 = vpop.f32.mrf.mxu2 }
 0x60e   : > { %4799 = vmatpush.msra.mxu1 %v6515_v14 }
 0x610   : > { %v10025_v50 = vpop.f32.mrf.mxu0  ;;  %v10027_v29 = vpop.f32.mrf.mxu1  ;;  %6475 = vmatmul.msk.f32.gmra.mxu2 %vm3879_vm8, %v9790_v39  ;;  %6490 = vmatmul.msk.f32.gmra.mxu3 %vm3879_vm8, %v9790_v39 }
 0x611   : > { %4800 = vmatpush.msra.mxu1 %v6513_v5 }
 0x613   : > { %6422 = vmatmul.msk.f32.gmra.mxu0 %vm3879_vm8, %v9727_v51  ;;  %6437 = vmatmul.msk.f32.gmra.mxu1 %vm3879_vm8, %v9727_v51  ;;  %v6514_v51 = vld [vmem:[%s11147_s6 + $0x350] sm:$0xff] }
 0x614   : > { %4740 = vmatpush.msra.mxu0 %v6514_v51  ;;  %4801 = vmatpush.msra.mxu1 %v6511_v60  ;;  %v10169_v5 = vpop.f32.mrf.mxu2 }
 0x616   : > { %4741 = vmatpush.msra.mxu0 %v6512_v42  ;;  %4802 = vmatpush.msra.mxu1 %v6509_v17 }
 0x618   : > { %v10045_v0 = vpop.f32.mrf.mxu0  ;;  %v10047_v39 = vpop.f32.mrf.mxu1  ;;  %6476 = vmatmul.msk.f32.gmra.mxu2 %vm3879_vm8, %v9848_v57  ;;  %6491 = vmatmul.msk.f32.gmra.mxu3 %vm3879_vm8, %v9848_v57  ;;  %v6510_v57 = vld [vmem:[%s11147_s6 + $0x330] sm:$0xff] }
 0x619   : > { %4742 = vmatpush.msra.mxu0 %v6510_v57  ;;  %4803 = vmatpush.msra.mxu1 %v6507_v15 }
 0x61b   : > { %6423 = vmatmul.msk.f32.gmra.mxu0 %vm3879_vm8, %v9787_v61  ;;  %6438 = vmatmul.msk.f32.gmra.mxu1 %vm3879_vm8, %v9787_v61 }
 0x61c   : > { %4743 = vmatpush.msra.mxu0 %v6508_v9  ;;  %4804 = vmatpush.msra.mxu1 %v6505_v28  ;;  %v10189_v60 = vpop.f32.mrf.mxu2 }
 0x61e   : > { %4744 = vmatpush.msra.mxu0 %v6506_v23  ;;  %4805 = vmatpush.msra.mxu1 %v6503_v41 }
 0x620   : > { %v10085_v61 = vpop.f32.mrf.mxu0  ;;  %v10087_v27 = vpop.f32.mrf.mxu1  ;;  %6477 = vmatmul.msk.f32.gmra.mxu2 %vm3879_vm8, %v9886_v30  ;;  %6492 = vmatmul.msk.f32.gmra.mxu3 %vm3879_vm8, %v9886_v30  ;;  %v6502_v30 = vld [vmem:[%s11147_s6 + $0x2f0] sm:$0xff] }
 0x621   : > { %4745 = vmatpush.msra.mxu0 %v6504_v7 }
 0x623   : > { %6424 = vmatmul.msk.f32.gmra.mxu0 %vm3879_vm8, %v9845_v1  ;;  %6439 = vmatmul.msk.f32.gmra.mxu1 %vm3879_vm8, %v9845_v1  ;;  %v6501_v1 = vld [vmem:[%s11147_s6 + $0x2e8] sm:$0xff] }
 0x624   : > { %4746 = vmatpush.msra.mxu0 %v6502_v30  ;;  %4806 = vmatpush.msra.mxu1 %v6501_v1  ;;  %v10205_v15 = vpop.f32.mrf.mxu2 }
 0x626   : > { %4747 = vmatpush.msra.mxu0 %v6500_v4  ;;  %4807 = vmatpush.msra.mxu1 %v6499_v34 }
 0x628   : > { %v10125_v37 = vpop.f32.mrf.mxu0  ;;  %v10127_v47 = vpop.f32.mrf.mxu1  ;;  %6478 = vmatmul.msk.f32.gmra.mxu2 %vm3879_vm8, %v9912_v43  ;;  %6493 = vmatmul.msk.f32.gmra.mxu3 %vm3879_vm8, %v9912_v43 }
 0x629   : > { %11444 = vst [vmem:[#allocation23_spill] sm:$0xff] %v10125_v37  ;;  %4748 = vmatpush.msra.mxu0 %v6498_v21  ;;  %4808 = vmatpush.msra.mxu1 %v6497_v8  ;;  %v10151_v43 = vpop.f32.mrf.mxu3 }
 0x62a   : > { %11445 = vst [vmem:[#allocation24_spill] sm:$0xff] %v10127_v47 }
 0x62b   : > { %6425 = vmatmul.msk.f32.gmra.mxu0 %vm3879_vm8, %v9883_v59  ;;  %6440 = vmatmul.msk.f32.gmra.mxu1 %vm3879_vm8, %v9883_v59 }
 0x62c   : > { %4749 = vmatpush.msra.mxu0 %v6496_v48  ;;  %v10217_v30 = vpop.f32.mrf.mxu2 }
 0x630   : > { %v10153_v51 = vpop.f32.mrf.mxu0  ;;  %v10155_v14 = vpop.f32.mrf.mxu1  ;;  %6479 = vmatmul.msk.f32.gmra.mxu2 %vm3879_vm8, %v9926_v3  ;;  %6494 = vmatmul.msk.f32.gmra.mxu3 %vm3879_vm8, %v9926_v3 }
 0x631   : > { %11446 = vst [vmem:[#allocation25_spill] sm:$0xff] %v10153_v51  ;;  %v10171_v57 = vpop.f32.mrf.mxu3 }
 0x632   : > { %11447 = vst [vmem:[#allocation26_spill] sm:$0xff] %v10155_v14 }
 0x633   : > { %6426 = vmatmul.msk.f32.gmra.mxu0 %vm3879_vm8, %v9909_v38  ;;  %6441 = vmatmul.msk.f32.gmra.mxu1 %vm3879_vm8, %v9909_v38 }
 0x638   : > { %v10165_v59 = vpop.f32.mrf.mxu0  ;;  %v10167_v42 = vpop.f32.mrf.mxu1  ;;  %6480 = vmatmul.msk.f32.gmra.mxu2 %vm3879_vm8, %v9942_v32  ;;  %6495 = vmatmul.msk.f32.gmra.mxu3 %vm3879_vm8, %v9942_v32 }
 0x639   : > { %11448 = vst [vmem:[#allocation27_spill] sm:$0xff] %v10165_v59  ;;  %v10191_v9 = vpop.f32.mrf.mxu3 }
 0x63a   : > { %11449 = vst [vmem:[#allocation28_spill] sm:$0xff] %v10167_v42 }
 0x63b   : > { %6427 = vmatmul.msk.f32.gmra.mxu0 %vm3879_vm8, %v9923_v49  ;;  %6442 = vmatmul.msk.f32.gmra.mxu1 %vm3879_vm8, %v9923_v49 }
 0x640   : > { %v10181_v38 = vpop.f32.mrf.mxu0  ;;  %v10183_v3 = vpop.f32.mrf.mxu1 }
 0x641   : > { %11450 = vst [vmem:[#allocation29_spill] sm:$0xff] %v10181_v38 }
 0x642   : > { %11451 = vst [vmem:[#allocation30_spill] sm:$0xff] %v10183_v3 }
 0x643   : > { %6428 = vmatmul.msk.f32.gmra.mxu0 %vm3879_vm8, %v9939_v11  ;;  %6443 = vmatmul.msk.f32.gmra.mxu1 %vm3879_vm8, %v9939_v11  ;;  %v10207_v11 = vpop.f32.mrf.mxu3 }
 0x648   : > { %v10193_v32 = vpop.f32.mrf.mxu0  ;;  %v10195_v17 = vpop.f32.mrf.mxu1 }
 0x649   : > { %11452 = vst [vmem:[#allocation31_spill] sm:$0xff] %v10193_v32 }
 0x64a   : > { %11453 = vst [vmem:[#allocation32_spill] sm:$0xff] %v10195_v17 }
 0x64b   : > { %6519 = vmatmul.msk.f32.vlgmr.msra.gmra.mxu0 %vm3879_vm8, %v9601_v58  ;;  %6534 = vmatmul.msk.f32.vlgmr.msra.gmra.mxu1 %vm3879_vm8, %v9601_v58  ;;  %v10219_v58 = vpop.f32.mrf.mxu3 }
 0x650   : > { %v10201_v49 = vpop.f32.mrf.mxu0  ;;  %v10203_v23 = vpop.f32.mrf.mxu1 }
 0x651   : > { %11454 = vst [vmem:[#allocation33_spill] sm:$0xff] %v10201_v49 }
 0x652   : > { %11455 = vst [vmem:[#allocation34_spill] sm:$0xff] %v10203_v23 }
 0x653   : > { %6520 = vmatmul.msk.f32.gmra.mxu0 %vm3879_vm8, %v9615_v22  ;;  %6535 = vmatmul.msk.f32.gmra.mxu1 %vm3879_vm8, %v9615_v22  ;;  %v10233_v22 = vpop.f32.mrf.mxu2  ;;  %v10235_v1 = vpop.f32.mrf.mxu3 }
 0x658   : > { %v10213_v7 = vpop.f32.mrf.mxu0  ;;  %v10215_v28 = vpop.f32.mrf.mxu1 }
 0x65b   : > { %6521 = vmatmul.msk.f32.gmra.mxu0 %vm3879_vm8, %v9629_v44  ;;  %6536 = vmatmul.msk.f32.gmra.mxu1 %vm3879_vm8, %v9629_v44  ;;  %v10245_v44 = vpop.f32.mrf.mxu2  ;;  %v10247_v48 = vpop.f32.mrf.mxu3 }
 0x65c   : > { %11456 = vst [vmem:[#allocation35_spill] sm:$0xff] %v10245_v44 }
 0x65d   : > { %11457 = vst [vmem:[#allocation36_spill] sm:$0xff] %v10247_v48 }
 0x660   : > { %v10225_v41 = vpop.f32.mrf.mxu0  ;;  %v10227_v4 = vpop.f32.mrf.mxu1 }
 0x663   : > { %6522 = vmatmul.msk.f32.gmra.mxu0 %vm3879_vm8, %v9643_v45  ;;  %6537 = vmatmul.msk.f32.gmra.mxu1 %vm3879_vm8, %v9643_v45  ;;  %v10261_v17 = vpop.f32.mrf.mxu2 }
 0x664   : > { %11458 = vst [vmem:[#allocation37_spill] sm:$0xff] %v10261_v17 }
 0x668   : > { %v10237_v21 = vpop.f32.mrf.mxu0  ;;  %v10239_v34 = vpop.f32.mrf.mxu1 }
 0x66b   : > { %6523 = vmatmul.msk.f32.gmra.mxu0 %vm3879_vm8, %v9657_v19  ;;  %6538 = vmatmul.msk.f32.gmra.mxu1 %vm3879_vm8, %v9657_v19  ;;  %v10263_v19 = vpop.f32.mrf.mxu3  ;;  %v10273_v38 = vpop.f32.mrf.mxu2 }
 0x66c   : > { %11459 = vst [vmem:[#allocation38_spill] sm:$0xff] %v10263_v19 }
 0x66d   : > { %11460 = vst [vmem:[#allocation39_spill] sm:$0xff] %v10273_v38 }
 0x670   : > { %v10249_v8 = vpop.f32.mrf.mxu0  ;;  %v10251_v45 = vpop.f32.mrf.mxu1 }
 0x673   : > { %6524 = vmatmul.msk.f32.gmra.mxu0 %vm3879_vm8, %v9671_v56  ;;  %6539 = vmatmul.msk.f32.gmra.mxu1 %vm3879_vm8, %v9671_v56  ;;  %v10275_v56 = vpop.f32.mrf.mxu3 }
 0x674   : > { %11461 = vst [vmem:[#allocation40_spill] sm:$0xff] %v10275_v56 }
 0x678   : > { %v10257_v23 = vpop.f32.mrf.mxu0  ;;  %v10259_v49 = vpop.f32.mrf.mxu1 }
 0x67b   : > { %6525 = vmatmul.msk.f32.gmra.mxu0 %vm3879_vm8, %v9685_v31  ;;  %6540 = vmatmul.msk.f32.gmra.mxu1 %vm3879_vm8, %v9685_v31  ;;  %v10289_v31 = vpop.f32.mrf.mxu2  ;;  %v10291_v38 = vpop.f32.mrf.mxu3 }
 0x67c   : > { %11462 = vst [vmem:[#allocation66_spill] sm:$0xff] %v10289_v31 }
 0x67d   : > { %11463 = vst [vmem:[#allocation92_spill] sm:$0xff] %v10291_v38 }
 0x680   : > { %v10269_v32 = vpop.f32.mrf.mxu0  ;;  %v10271_v3 = vpop.f32.mrf.mxu1 }
 0x683   : > { %6526 = vmatmul.msk.f32.gmra.mxu0 %vm3879_vm8, %v9733_v16  ;;  %6541 = vmatmul.msk.f32.gmra.mxu1 %vm3879_vm8, %v9733_v16  ;;  %v10301_v16 = vpop.f32.mrf.mxu2  ;;  %v10303_v14 = vpop.f32.mrf.mxu3 }
 0x684   : > { %11465 = vst [vmem:[#allocation67_spill] sm:$0xff] %v10301_v16 }
 0x685   : > { %11466 = vst [vmem:[#allocation42_spill] sm:$0xff] %v10303_v14 }
 0x688   : > { %v10281_v42 = vpop.f32.mrf.mxu0  ;;  %v10283_v59 = vpop.f32.mrf.mxu1 }
 0x68b   : > { %6527 = vmatmul.msk.f32.gmra.mxu0 %vm3879_vm8, %v9798_v52  ;;  %6542 = vmatmul.msk.f32.gmra.mxu1 %vm3879_vm8, %v9798_v52  ;;  %v10317_v51 = vpop.f32.mrf.mxu2 }
 0x68c   : > { %11471 = vst [vmem:[#allocation69_spill] sm:$0xff] %v10317_v51 }
 0x690   : > { %v10293_v56 = vpop.f32.mrf.mxu0  ;;  %v10295_v19 = vpop.f32.mrf.mxu1 }
 0x691   : > { %11464 = vst [vmem:[#allocation41_spill] sm:$0xff] %v10295_v19 }
 0x693   : > { %6528 = vmatmul.msk.f32.gmra.mxu0 %vm3879_vm8, %v9859_v24  ;;  %6543 = vmatmul.msk.f32.gmra.mxu1 %vm3879_vm8, %v9859_v24  ;;  %v10319_v24 = vpop.f32.mrf.mxu3 }
 0x694   : > { %11472 = vst [vmem:[#allocation44_spill] sm:$0xff] %v10319_v24 }
 0x698   : > { %v10305_v17 = vpop.f32.mrf.mxu0  ;;  %v10307_v52 = vpop.f32.mrf.mxu1 }
 0x699   : > { %11467 = vst [vmem:[#allocation68_spill] sm:$0xff] %v10305_v17 }
 0x69a   : > { %11468 = vst [vmem:[#allocation95_spill] sm:$0xff] %v10307_v52  ;;  %v4519_v52 = vpop.f32.mrf.mxu2 }
 0x69b   : > { %6529 = vmatmul.msk.f32.gmra.mxu0 %vm3879_vm8, %v9889_v13  ;;  %6544 = vmatmul.msk.f32.gmra.mxu1 %vm3879_vm8, %v9889_v13  ;;  %v4578_v13 = vpop.f32.mrf.mxu3 }
 0x6a0   : > { %v10313_v38 = vpop.f32.mrf.mxu0  ;;  %v10315_v31 = vpop.f32.mrf.mxu1 }
 0x6a1   : > { %11469 = vst [vmem:[#allocation93_spill] sm:$0xff] %v10313_v38 }
 0x6a2   : > { %11470 = vst [vmem:[#allocation43_spill] sm:$0xff] %v10315_v31 }
 0x6a3   : > { %6530 = vmatmul.msk.f32.gmra.mxu0 %vm3879_vm8, %v9915_v12  ;;  %6545 = vmatmul.msk.f32.gmra.mxu1 %vm3879_vm8, %v9915_v12  ;;  %v4522_v12 = vpop.f32.mrf.mxu2 }
 0x6a8   : > { %v10325_v14 = vpop.f32.mrf.mxu0  ;;  %v10327_v16 = vpop.f32.mrf.mxu1 }
 0x6a9   : > { %11473 = vst [vmem:[#allocation70_spill] sm:$0xff] %v10325_v14 }
 0x6aa   : > { %11474 = vst [vmem:[#allocation97_spill] sm:$0xff] %v10327_v16  ;;  %v4581_v16 = vpop.f32.mrf.mxu3 }
 0x6ab   : > { %6531 = vmatmul.msk.f32.gmra.mxu0 %vm3879_vm8, %v9929_v25  ;;  %6546 = vmatmul.msk.f32.gmra.mxu1 %vm3879_vm8, %v9929_v25  ;;  %v4525_v38 = vpop.f32.mrf.mxu2 }
 0x6b0   : > { %v10333_v51 = vpop.f32.mrf.mxu0  ;;  %v10335_v24 = vpop.f32.mrf.mxu1 }
 0x6b1   : > { %11475 = vst [vmem:[#allocation94_spill] sm:$0xff] %v10333_v51  ;;  %v4143_v51 = vadd.f32 %v10067_v33, %v9967_v63  ;;  %v4146_v63 = vadd.f32 %v10117_v55, %v9979_v35 }
 0x6b2   : > { %11476 = vst [vmem:[#allocation45_spill] sm:$0xff] %v10335_v24  ;;  %v4584_v17 = vpop.f32.mrf.mxu3  ;;  %v4084_v24 = vadd.f32 %v10065_v26, %v9965_v62  ;;  %v4087_v62 = vadd.f32 %v10115_v36, %v9977_v46 }
 0x6b3   : > { %6532 = vmatmul.msk.f32.gmra.mxu0 %vm3879_vm8, %v9945_v2  ;;  %6547 = vmatmul.msk.f32.gmra.mxu1 %vm3879_vm8, %v9945_v2  ;;  %v4389_v47 = vadd.f32 %v10215_v28, %v4143_v51  ;;  %v4528_v26 = vpop.f32.mrf.mxu2 }
 0x6b4   : > { %v4388_v2 = vadd.f32 %v10213_v7, %v4084_v24  ;;  %v4390_v28 = vadd.f32 %v10225_v41, %v4087_v62  ;;  %v4090_v41 = vadd.f32 %v10149_v53, %v9989_v54 }
 0x6b5   : > { %v4621_v44 = vadd.f32 %v4578_v13, %v4389_v47  ;;  %v4391_v47 = vadd.f32 %v10227_v4, %v4146_v63  ;;  %v4149_v4 = vadd.f32 %v10151_v43, %v9991_v20 }
 0x6b6   : > { %v4622_v36 = vadd.f32 %v4522_v12, %v4390_v28 }
 0x6b7   : > { %v4623_v35 = vadd.f32 %v4581_v16, %v4391_v47  ;;  %v4392_v16 = vadd.f32 %v10237_v21, %v4090_v41  ;;  %v4393_v13 = vadd.f32 %v10239_v34, %v4149_v4  ;;  %v4093_v34 = vadd.f32 %v10169_v5, %v10001_v18 }
 0x6b8   : > { %v10341_v14 = vpop.f32.mrf.mxu0  ;;  %v10343_v31 = vpop.f32.mrf.mxu1  ;;  %v4155_v41 = vadd.f32 %v10191_v9, %v10015_v6 }
 0x6b9   : > { %11477 = vst [vmem:[#allocation71_spill] sm:$0xff] %v10341_v14  ;;  %v4620_v14 = vadd.f32 %v4519_v52, %v4388_v2  ;;  %v4624_v53 = vadd.f32 %v4525_v38, %v4392_v16  ;;  %v4625_v20 = vadd.f32 %v4584_v17, %v4393_v13  ;;  %v4394_v38 = vadd.f32 %v10249_v8, %v4093_v34 }
 0x6ba   : > { %11478 = vst [vmem:[#allocation46_spill] sm:$0xff] %v10343_v31  ;;  %v4880_v31 = vld [vmem:[%s11148_s7] sm:$0x3]  ;;  %v4587_v33 = vpop.f32.mrf.mxu3 }
 0x6bb   : > { %v10358_v37 = vperm.slane %v4880_v31, 0  ;;  %v4531_v12 = vpop.f32.mrf.mxu2  ;;  %v4626_v5 = vadd.f32 %v4528_v26, %v4394_v38 }
 0x6c0   : > { %v10345_v48 = vpop.f32.mrf.mxu0  ;;  %v10347_v25 = vpop.f32.mrf.mxu1 }
 0x6c1   : > { %11479 = vst [vmem:[#allocation72_spill] sm:$0xff] %v10345_v48  ;;  %v10360_v48 = vperm.slane %v4880_v31, 1 }
 0x6c2   : > { %11480 = vst [vmem:[#allocation96_spill] sm:$0xff] %v10347_v25 }
 0x6c8   : > { %v4751_v25 = vpop.f32.mrf.mxu0  ;;  %v4810_v19 = vpop.f32.mrf.mxu1 }
 0x6c9   : > { %v4852_v51 = vadd.f32 %v4751_v25, %v4620_v14  ;;  %v4853_v7 = vadd.f32 %v4810_v19, %v4621_v44  ;;  %v4590_v25 = vpop.f32.mrf.mxu3 }
 0x6cb   : > { %v10369_v52 = vadd.f32 %v10358_v37, %v4852_v51  ;;  %v10372_v31 = vadd.f32 %v10360_v48, %v4853_v7  ;;  %v4152_v51 = vadd.f32 %v10171_v57, %v10003_v40 }
 0x6cd   : > { %v4914_v24 = vmax.f32 %v10369_v52, 0.0  ;;  %v4915_v46 = vmax.f32 %v10372_v31, 0.0  ;;  %v4395_v17 = vadd.f32 %v10251_v45, %v4152_v51  ;;  %v4096_v45 = vadd.f32 %v10189_v60, %v10013_v10 }
 0x6cf   : > { %4972 = vrot.lane.b32.xlu2 %v4915_v46, %s6952_s26  ;;  %4970 = vrot.lane.b32.xlu1 %v4914_v24, %s6952_s26  ;;  %v4627_v40 = vadd.f32 %v4587_v33, %v4395_v17  ;;  %v4396_v26 = vadd.f32 %v10257_v23, %v4096_v45  ;;  %v4397_v33 = vadd.f32 %v10259_v49, %v4155_v41 }
 0x6d0   : > { %v4754_v55 = vpop.f32.mrf.mxu0  ;;  %v4813_v14 = vpop.f32.mrf.mxu1  ;;  %v4099_v23 = vadd.f32 %v10205_v15, %v10025_v50 }
 0x6d1   : > { %v4854_v44 = vadd.f32 %v4754_v55, %v4622_v36  ;;  %v4855_v19 = vadd.f32 %v4813_v14, %v4623_v35  ;;  %v4534_v35 = vpop.f32.mrf.mxu2  ;;  %v4593_v55 = vpop.f32.mrf.mxu3  ;;  %v4628_v10 = vadd.f32 %v4531_v12, %v4396_v26  ;;  %v4629_v60 = vadd.f32 %v4590_v25, %v4397_v33 }
 0x6d3   : > { %v10389_v2 = vadd.f32 %v10358_v37, %v4854_v44  ;;  %v10392_v62 = vadd.f32 %v10360_v48, %v4855_v19 }
 0x6d5   : > { %v4916_v63 = vmax.f32 %v10389_v2, 0.0  ;;  %v4917_v54 = vmax.f32 %v10392_v62, 0.0 }
 0x6d7   : > { %4976 = vrot.lane.b32.xlu1 %v4917_v54, %s6952_s26  ;;  %4974 = vrot.lane.b32.xlu0 %v4916_v63, %s6952_s26 }
 0x6d8   : > { %v4757_v43 = vpop.f32.mrf.mxu0  ;;  %v4816_v21 = vpop.f32.mrf.mxu1 }
 0x6d9   : > { %v4856_v7 = vadd.f32 %v4757_v43, %v4624_v53  ;;  %v4857_v28 = vadd.f32 %v4816_v21, %v4625_v20  ;;  %v4537_v20 = vpop.f32.mrf.mxu2  ;;  %v4596_v6 = vpop.f32.mrf.mxu3  ;;  %v4158_v43 = vadd.f32 %v10207_v11, %v10027_v29  ;;  %v4398_v21 = vadd.f32 %v10269_v32, %v4099_v23 }
 0x6da   : > { %v4102_v32 = vadd.f32 %v10217_v30, %v10045_v0  ;;  %v4161_v11 = vadd.f32 %v10219_v58, %v10047_v39  ;;  %v4105_v58 = vadd.f32 %v10233_v22, %v10085_v61 }
 0x6db   : > { %v10409_v47 = vadd.f32 %v10358_v37, %v4856_v7  ;;  %v10412_v36 = vadd.f32 %v10360_v48, %v4857_v28  ;;  %v4399_v34 = vadd.f32 %v10271_v3, %v4158_v43  ;;  %v4630_v50 = vadd.f32 %v4534_v35, %v4398_v21  ;;  %v11482_v43 = vld [vmem:[#allocation23_spill] sm:$0xff]  ;;  %v11484_v21 = vld [vmem:[#allocation24_spill] sm:$0xff] }
 0x6dc   : > { %v4402_v33 = vadd.f32 %v10293_v56, %v4105_v58 }
 0x6dd   : > { %v4918_v14 = vmax.f32 %v10409_v47, 0.0  ;;  %v4919_v18 = vmax.f32 %v10412_v36, 0.0  ;;  %v4631_v15 = vadd.f32 %v4593_v55, %v4399_v34  ;;  %v11485_v34 = vld [vmem:[#allocation36_spill] sm:$0xff] }
 0x6df   : > { %4980 = vrot.lane.b32.xlu0 %v4919_v18, %s6952_s26  ;;  %4978 = vrot.lane.b32.xlu2 %v4918_v14, %s6952_s26 }
 0x6e0   : > { %v4760_v57 = vpop.f32.mrf.mxu0  ;;  %v4819_v8 = vpop.f32.mrf.mxu1 }
 0x6e1   : > { %v4858_v4 = vadd.f32 %v4760_v57, %v4626_v5  ;;  %v4859_v44 = vadd.f32 %v4819_v8, %v4627_v40  ;;  %v4540_v17 = vpop.f32.mrf.mxu2  ;;  %v4599_v5 = vpop.f32.mrf.mxu3  ;;  %v4400_v40 = vadd.f32 %v10281_v42, %v4102_v32  ;;  %v4401_v57 = vadd.f32 %v10283_v59, %v4161_v11  ;;  %v11487_v11 = vld [vmem:[#allocation95_spill] sm:$0xff] }
 0x6e2   : > { %v4634_v22 = vadd.f32 %v4540_v17, %v4402_v33  ;;  %v11489_v33 = vld [vmem:[#allocation37_spill] sm:$0xff] }
 0x6e3   : > { %v10429_v19 = vadd.f32 %v10358_v37, %v4858_v4  ;;  %v10432_v16 = vadd.f32 %v10360_v48, %v4859_v44  ;;  %v4632_v30 = vadd.f32 %v4537_v20, %v4400_v40  ;;  %v4633_v39 = vadd.f32 %v4596_v6, %v4401_v57 }
 0x6e4   : > { %v4164_v4 = vadd.f32 %v10235_v1, %v10087_v27 }
 0x6e5   : > { %v4920_v13 = vmax.f32 %v10429_v19, 0.0  ;;  %v4921_v53 = vmax.f32 %v10432_v16, 0.0 }
 0x6e7   : > { %4984 = vrot.lane.b32.xlu2 %v4921_v53, %s6952_s26  ;;  %4982 = vrot.lane.b32.xlu1 %v4920_v13, %s6952_s26 }
 0x6e8   : > { %v4763_v9 = vpop.f32.mrf.mxu0  ;;  %v4822_v49 = vpop.f32.mrf.mxu1 }
 0x6e9   : > { %v4860_v12 = vadd.f32 %v4763_v9, %v4628_v10  ;;  %v4861_v25 = vadd.f32 %v4822_v49, %v4629_v60  ;;  %v11481_v10 = vld [vmem:[#allocation41_spill] sm:$0xff]  ;;  %v4543_v20 = vpop.f32.mrf.mxu2  ;;  %v4602_v6 = vpop.f32.mrf.mxu3 }
 0x6ea   : > { %v4403_v60 = vadd.f32 %v11481_v10, %v4164_v4 }
 0x6eb   : > { %v10449_v51 = vadd.f32 %v10358_v37, %v4860_v12  ;;  %v10452_v7 = vadd.f32 %v10360_v48, %v4861_v25  ;;  %v11483_v12 = vld [vmem:[#allocation35_spill] sm:$0xff] }
 0x6ec   : > { %v4635_v27 = vadd.f32 %v4599_v5, %v4403_v60  ;;  %v4108_v25 = vadd.f32 %v11483_v12, %v11482_v43  ;;  %v11490_v60 = vld [vmem:[#allocation26_spill] sm:$0xff]  ;;  %v11492_v43 = vld [vmem:[#allocation93_spill] sm:$0xff] }
 0x6ed   : > { %v4922_v28 = vmax.f32 %v10449_v51, 0.0  ;;  %v4923_v38 = vmax.f32 %v10452_v7, 0.0 }
 0x6ef   : > { %4988 = vrot.lane.b32.xlu1 %v4923_v38, %s6952_s26  ;;  %4986 = vrot.lane.b32.xlu0 %v4922_v28, %s6952_s26 }
 0x6f0   : > { %v4766_v29 = vpop.f32.mrf.mxu0  ;;  %v4825_v3 = vpop.f32.mrf.mxu1 }
 0x6f1   : > { %v4862_v35 = vadd.f32 %v4766_v29, %v4630_v50  ;;  %v4863_v55 = vadd.f32 %v4825_v3, %v4631_v15  ;;  %v4167_v50 = vadd.f32 %v11485_v34, %v11484_v21  ;;  %v11486_v3 = vld [vmem:[#allocation68_spill] sm:$0xff]  ;;  %v4605_v40 = vpop.f32.mrf.mxu3 }
 0x6f2   : > { %v4404_v32 = vadd.f32 %v11486_v3, %v4108_v25  ;;  %v11493_v25 = vld [vmem:[#allocation43_spill] sm:$0xff] }
 0x6f3   : > { %v10469_v8 = vadd.f32 %v10358_v37, %v4862_v35  ;;  %v10472_v45 = vadd.f32 %v10360_v48, %v4863_v55  ;;  %v4405_v17 = vadd.f32 %v11487_v11, %v4167_v50  ;;  %v4546_v55 = vpop.f32.mrf.mxu2  ;;  %v5108_v11 = vld [vmem:[#allocation7 + $0x58] sm:$0xff] }
 0x6f5   : > { %v4924_v41 = vmax.f32 %v10469_v8, 0.0  ;;  %v4925_v0 = vmax.f32 %v10472_v45, 0.0 }
 0x6f7   : > { %4992 = vrot.lane.b32.xlu0 %v4925_v0, %s6952_s26  ;;  %4990 = vrot.lane.b32.xlu2 %v4924_v41, %s6952_s26 }
 0x6f8   : > { %v4769_v59 = vpop.f32.mrf.mxu0  ;;  %v4828_v42 = vpop.f32.mrf.mxu1 }
 0x6f9   : > { %v4864_v44 = vadd.f32 %v4769_v59, %v4632_v30  ;;  %v4865_v26 = vadd.f32 %v4828_v42, %v4633_v39  ;;  %v5112_v39 = vld [vmem:[#allocation7 + $0x78] sm:$0xff]  ;;  %v4636_v59 = vadd.f32 %v4543_v20, %v4404_v32  ;;  %v4637_v42 = vadd.f32 %v4602_v6, %v4405_v17  ;;  %v5114_v6 = vld [vmem:[#allocation7 + $0x88] sm:$0xff] }
 0x6fa   : > { %5158 = vmatpush.msra.mxu2 %v5112_v39  ;;  %5231 = vmatpush.msrb.mxu3 %v5114_v6 }
 0x6fb   : > { %v10489_v9 = vadd.f32 %v10358_v37, %v4864_v44  ;;  %v10492_v49 = vadd.f32 %v10360_v48, %v4865_v26  ;;  %v5111_v44 = vld [vmem:[#allocation7 + $0x70] sm:$0xff] }
 0x6fc   : > { %v11488_v26 = vld [vmem:[#allocation25_spill] sm:$0xff]  ;;  %5159 = vmatpush.msra.mxu2 %v5111_v44 }
 0x6fd   : > { %v4926_v23 = vmax.f32 %v10489_v9, 0.0  ;;  %v4927_v61 = vmax.f32 %v10492_v49, 0.0  ;;  %v4111_v10 = vadd.f32 %v11489_v33, %v11488_v26  ;;  %v5107_v44 = vld [vmem:[#allocation7 + $0x50] sm:$0xff]  ;;  %v11494_v26 = vld [vmem:[#allocation27_spill] sm:$0xff] }
 0x6fe   : > { %v11495_v33 = vld [vmem:[#allocation39_spill] sm:$0xff] }
 0x6ff   : > { %4996 = vrot.lane.b32.xlu2 %v4927_v61, %s6952_s26  ;;  %4994 = vrot.lane.b32.xlu1 %v4926_v23, %s6952_s26  ;;  %v4406_v12 = vadd.f32 %v11492_v43, %v4111_v10  ;;  %v4114_v10 = vadd.f32 %v11495_v33, %v11494_v26  ;;  %v11500_v26 = vld [vmem:[#allocation29_spill] sm:$0xff]  ;;  %v11501_v33 = vld [vmem:[#allocation66_spill] sm:$0xff] }
 0x700   : > { %v4772_v1 = vpop.f32.mrf.mxu0  ;;  %v4831_v56 = vpop.f32.mrf.mxu1 }
 0x701   : > { %v4866_v15 = vadd.f32 %v4772_v1, %v4634_v22  ;;  %v4867_v29 = vadd.f32 %v4831_v56, %v4635_v27  ;;  %v11491_v22 = vld [vmem:[#allocation38_spill] sm:$0xff]  ;;  %v5110_v56 = vld [vmem:[#allocation7 + $0x68] sm:$0xff]  ;;  %v4638_v17 = vadd.f32 %v4546_v55, %v4406_v12 }
 0x702   : > { %v4170_v27 = vadd.f32 %v11491_v22, %v11490_v60  ;;  %5160 = vmatpush.msra.mxu2 %v5110_v56  ;;  %v11496_v60 = vld [vmem:[#allocation28_spill] sm:$0xff]  ;;  %v11499_v56 = vld [vmem:[#allocation97_spill] sm:$0xff] }
 0x703   : > { %v10509_v5 = vadd.f32 %v10358_v37, %v4866_v15  ;;  %v10512_v35 = vadd.f32 %v10360_v48, %v4867_v29  ;;  %v5113_v15 = vld [vmem:[#allocation7 + $0x80] sm:$0xff]  ;;  %v11497_v55 = vld [vmem:[#allocation40_spill] sm:$0xff] }
 0x704   : > { %v4407_v21 = vadd.f32 %v11493_v25, %v4170_v27  ;;  %5232 = vmatpush.msrb.mxu3 %v5113_v15  ;;  %v5109_v29 = vld [vmem:[#allocation7 + $0x60] sm:$0xff] }
 0x705   : > { %v4928_v57 = vmax.f32 %v10509_v5, 0.0  ;;  %v4929_v30 = vmax.f32 %v10512_v35, 0.0  ;;  %5161 = vmatpush.msra.mxu2 %v5109_v29 }
 0x706   : > { %v4639_v39 = vadd.f32 %v4605_v40, %v4407_v21  ;;  %v4173_v40 = vadd.f32 %v11497_v55, %v11496_v60  ;;  %v5105_v21 = vld [vmem:[#allocation7 + $0x40] sm:$0xff]  ;;  %v11502_v60 = vld [vmem:[#allocation30_spill] sm:$0xff]  ;;  %v11503_v55 = vld [vmem:[#allocation92_spill] sm:$0xff] }
 0x707   : > { %5000 = vrot.lane.b32.xlu1 %v4929_v30, %s6952_s26  ;;  %4998 = vrot.lane.b32.xlu0 %v4928_v57, %s6952_s26 }
 0x708   : > { %v4775_v58 = vpop.f32.mrf.mxu0  ;;  %v4834_v4 = vpop.f32.mrf.mxu1  ;;  %5162 = vmatpush.msra.mxu2 %v5108_v11  ;;  %v4409_v43 = vadd.f32 %v11499_v56, %v4173_v40  ;;  %v5104_v11 = vld [vmem:[#allocation7 + $0x38] sm:$0xff]  ;;  %v4176_v40 = vadd.f32 %v11503_v55, %v11502_v60  ;;  %v11505_v56 = vld [vmem:[#allocation45_spill] sm:$0xff]  ;;  %v11506_v55 = vld [vmem:[#allocation31_spill] sm:$0xff] }
 0x709   : > { %v4868_v1 = vadd.f32 %v4775_v58, %v4636_v59  ;;  %v4869_v20 = vadd.f32 %v4834_v4, %v4637_v42  ;;  %v4549_v59 = vpop.f32.mrf.mxu2  ;;  %v4608_v42 = vpop.f32.mrf.mxu3 }
 0x70a   : > { %5163 = vmatpush.msra.mxu2 %v5107_v44 }
 0x70b   : > { %v10529_v34 = vadd.f32 %v10358_v37, %v4868_v1  ;;  %v10532_v50 = vadd.f32 %v10360_v48, %v4869_v20  ;;  %v5106_v1 = vld [vmem:[#allocation7 + $0x48] sm:$0xff]  ;;  %v11498_v20 = vld [vmem:[#allocation70_spill] sm:$0xff] }
 0x70c   : > { %v4408_v6 = vadd.f32 %v11498_v20, %v4114_v10  ;;  %5164 = vmatpush.msra.mxu2 %v5106_v1  ;;  %v4117_v10 = vadd.f32 %v11501_v33, %v11500_v26  ;;  %v11504_v20 = vld [vmem:[#allocation94_spill] sm:$0xff]  ;;  %v5101_v26 = vld [vmem:[#allocation7 + $0x20] sm:$0xff] }
 0x70d   : > { %v4930_v3 = vmax.f32 %v10529_v34, 0.0  ;;  %v4931_v32 = vmax.f32 %v10532_v50, 0.0 }
 0x70e   : > { %5165 = vmatpush.msra.mxu2 %v5105_v21 }
 0x70f   : > { %5004 = vrot.lane.b32.xlu0 %v4931_v32, %s6952_s26  ;;  %5002 = vrot.lane.b32.xlu2 %v4930_v3, %s6952_s26 }
 0x710   : > { %v4778_v58 = vpop.f32.mrf.mxu0  ;;  %v4837_v4 = vpop.f32.mrf.mxu1  ;;  %5166 = vmatpush.msra.mxu2 %v5104_v11 }
 0x711   : > { %v4870_v22 = vadd.f32 %v4778_v58, %v4638_v17  ;;  %v4871_v27 = vadd.f32 %v4837_v4, %v4639_v39  ;;  %v4640_v17 = vadd.f32 %v4549_v59, %v4408_v6  ;;  %v4641_v39 = vadd.f32 %v4608_v42, %v4409_v43  ;;  %v5103_v58 = vld [vmem:[#allocation7 + $0x30] sm:$0xff]  ;;  %v4611_v1 = vpop.f32.mrf.mxu3 }
 0x712   : > { %5167 = vmatpush.msra.mxu2 %v5103_v58  ;;  %v4410_v6 = vadd.f32 %v11504_v20, %v4117_v10  ;;  %v4411_v43 = vadd.f32 %v11505_v56, %v4176_v40  ;;  %v11507_v40 = vld [vmem:[#allocation67_spill] sm:$0xff] }
 0x713   : > { %v10549_v12 = vadd.f32 %v10358_v37, %v4870_v22  ;;  %v10552_v25 = vadd.f32 %v10360_v48, %v4871_v27  ;;  %v5102_v22 = vld [vmem:[#allocation7 + $0x28] sm:$0xff]  ;;  %v4552_v27 = vpop.f32.mrf.mxu2  ;;  %v11510_v56 = vld [vmem:[#allocation71_spill] sm:$0xff] }
 0x714   : > { %5168 = vmatpush.msra.mxu2 %v5102_v22  ;;  %v4643_v58 = vadd.f32 %v4611_v1, %v4411_v43  ;;  %v11509_v22 = vld [vmem:[#allocation42_spill] sm:$0xff] }
 0x715   : > { %v11222_v15 = vmax.f32 %v10549_v12, 0.0  ;;  %v11223_v29 = vmax.f32 %v10552_v25, 0.0  ;;  %v11518_v5 = vmax.f32 %v10552_v25, 0.0 }
 0x716   : > { %5169 = vmatpush.msra.mxu2 %v5101_v26  ;;  %v11511_v26 = vld [vmem:[#allocation46_spill] sm:$0xff] }
 0x717   : > { %5008 = vrot.lane.b32.xlu2 %v11223_v29, %s6952_s26  ;;  %5006 = vrot.lane.b32.xlu1 %v11222_v15, %s6952_s26 }
 0x718   : > { %v4781_v4 = vpop.f32.mrf.mxu0  ;;  %v4840_v44 = vpop.f32.mrf.mxu1 }
 0x719   : > { %v4872_v59 = vadd.f32 %v4781_v4, %v4640_v17  ;;  %v4873_v42 = vadd.f32 %v4840_v44, %v4641_v39  ;;  %v5100_v39 = vld [vmem:[#allocation7 + $0x18] sm:$0xff]  ;;  %v4642_v4 = vadd.f32 %v4552_v27, %v4410_v6  ;;  %v5099_v44 = vld [vmem:[#allocation7 + $0x10] sm:$0xff]  ;;  %v5098_v6 = vld [vmem:[#allocation7 + $0x8] sm:$0xff] }
 0x71a   : > { %5170 = vmatpush.msra.mxu2 %v5100_v39  ;;  %v5097_v39 = vld [vmem:[#allocation7] sm:$0xff] }
 0x71b   : > { %v10569_v21 = vadd.f32 %v10358_v37, %v4872_v59  ;;  %v10572_v11 = vadd.f32 %v10360_v48, %v4873_v42  ;;  %v4120_v59 = vadd.f32 %v11507_v40, %v11506_v55  ;;  %v11508_v42 = vld [vmem:[#allocation32_spill] sm:$0xff]  ;;  %v4555_v29 = vpop.f32.mrf.mxu2  ;;  %v4614_v55 = vpop.f32.mrf.mxu3 }
 0x71c   : > { %v4179_v20 = vadd.f32 %v11509_v22, %v11508_v42  ;;  %5171 = vmatpush.msra.mxu2 %v5099_v44 }
 0x71d   : > { %v11221_v33 = vmax.f32 %v10569_v21, 0.0  ;;  %v11220_v17 = vmax.f32 %v10572_v11, 0.0  ;;  %v4412_v43 = vadd.f32 %v11510_v56, %v4120_v59  ;;  %v11520_v34 = vmax.f32 %v10572_v11, 0.0 }
 0x71e   : > { %5172 = vmatpush.msra.mxu2 %v5098_v6 }
 0x71f   : > { %5012 = vrot.lane.b32.xlu1 %v11220_v17, %s6952_s26  ;;  %5010 = vrot.lane.b32.xlu0 %v11221_v33, %s6952_s26  ;;  %v4413_v17 = vadd.f32 %v11511_v26, %v4179_v20  ;;  %v11514_v20 = vld [vmem:[#allocation34_spill] sm:$0xff] }
 0x720   : > { %v4784_v10 = vpop.f32.mrf.mxu0  ;;  %v4843_v60 = vpop.f32.mrf.mxu1  ;;  %5173 = vmatpush.msra.mxu2 %v5097_v39  ;;  %v11517_v39 = vld [vmem:[#allocation96_spill] sm:$0xff] }
 0x721   : > { %v4874_v27 = vadd.f32 %v4784_v10, %v4642_v4  ;;  %v4875_v1 = vadd.f32 %v4843_v60, %v4643_v58  ;;  %v4644_v58 = vadd.f32 %v4555_v29, %v4412_v43  ;;  %v4645_v44 = vadd.f32 %v4614_v55, %v4413_v17  ;;  %v11512_v10 = vld [vmem:[#allocation33_spill] sm:$0xff]  ;;  %v11516_v43 = vld [vmem:[#allocation72_spill] sm:$0xff] }
 0x722   : > { %v11513_v60 = vld [vmem:[#allocation69_spill] sm:$0xff] }
 0x723   : > { %v10589_v33 = vadd.f32 %v10358_v37, %v4874_v27  ;;  %v10592_v15 = vadd.f32 %v10360_v48, %v4875_v1  ;;  %v4123_v59 = vadd.f32 %v11513_v60, %v11512_v10  ;;  %v11515_v27 = vld [vmem:[#allocation44_spill] sm:$0xff]  ;;  %v4558_v60 = vpop.f32.mrf.mxu2 }
 0x724   : > { %v4182_v1 = vadd.f32 %v11515_v27, %v11514_v20 }
 0x725   : > { %v11224_v40 = vmax.f32 %v10589_v33, 0.0  ;;  %v4937_v4 = vmax.f32 %v10592_v15, 0.0  ;;  %v4414_v26 = vadd.f32 %v11516_v43, %v4123_v59 }
 0x726   : > { %v4415_v55 = vadd.f32 %v11517_v39, %v4182_v1 }
 0x727   : > { %5016 = vrot.lane.b32.xlu0 %v4937_v4, %s6952_s26  ;;  %5014 = vrot.lane.b32.xlu2 %v11224_v40, %s6952_s26  ;;  %v4646_v31 = vadd.f32 %v4558_v60, %v4414_v26 }
 0x728   : > { %v4787_v42 = vpop.f32.mrf.mxu0  ;;  %v4846_v22 = vpop.f32.mrf.mxu1 }
 0x729   : > { %v4876_v6 = vadd.f32 %v4787_v42, %v4644_v58  ;;  %v4877_v56 = vadd.f32 %v4846_v22, %v4645_v44  ;;  %v4973_v29 = vpop.permute.xlu2 %4972  ;;  %v4617_v42 = vpop.f32.mrf.mxu3 }
 0x72a   : > { %v5070_v17 = vmax.f32 %v4915_v46, %v4973_v29  ;;  %v4647_v46 = vadd.f32 %v4617_v42, %v4415_v55 }
 0x72b   : > { %v10611_v40 = vadd.f32 %v10358_v37, %v4876_v6  ;;  %v10614_v10 = vadd.f32 %v10360_v48, %v4877_v56 }
 0x72c   : > { %6548 = vmatmul.msk.f32.vlgmr.msrb.gmra.mxu3 %vm5115_vm9, %v5070_v17 }
 0x72d   : > { %v4938_v58 = vmax.f32 %v10611_v40, 0.0  ;;  %v4939_v44 = vmax.f32 %v10614_v10, 0.0 }
 0x72f   : > { %5020 = vrot.lane.b32.xlu2 %v4939_v44, %s6952_s26  ;;  %5018 = vrot.lane.b32.xlu1 %v4938_v58, %s6952_s26 }
 0x730   : > { %v4790_v59 = vpop.f32.mrf.mxu0  ;;  %v4849_v22 = vpop.f32.mrf.mxu1 }
 0x731   : > { %v4878_v20 = vadd.f32 %v4790_v59, %v4646_v31  ;;  %v4879_v27 = vadd.f32 %v4849_v22, %v4647_v46 }
 0x733   : > { %v10626_v1 = vadd.f32 %v10358_v37, %v4878_v20  ;;  %v10629_v6 = vadd.f32 %v10360_v48, %v4879_v27 }
 0x735   : > { %v4940_v56 = vmax.f32 %v10626_v1, 0.0  ;;  %v4941_v17 = vmax.f32 %v10629_v6, 0.0 }
 0x737   : > { %5024 = vrot.lane.b32.xlu1 %v4941_v17, %s6952_s26  ;;  %5022 = vrot.lane.b32.xlu0 %v4940_v56, %s6952_s26 }
 0x739   : > { %v4979_v31 = vpop.permute.xlu2 %4978 }
 0x741   : > { %v4971_v43 = vpop.permute.xlu1 %4970  ;;  %v4985_v62 = vpop.permute.xlu2 %4984 }
 0x742   : > { %v5027_v37 = vsel %vm5026_vm10, %v4971_v43, %v4973_v29  ;;  %v5076_v2 = vmax.f32 %v4921_v53, %v4985_v62 }
 0x743   : > { %v5069_v48 = vmax.f32 %v4914_v24, %v5027_v37 }
 0x745   : > { %5174 = vmatmul.f32.vlgmr.msra.gmra.mxu2 %v5069_v48 }
 0x749   : > { %v4977_v26 = vpop.permute.xlu1 %4976  ;;  %v4975_v39 = vpop.permute.xlu0 %4974 }
 0x74a   : > { %v5072_v55 = vmax.f32 %v4917_v54, %v4977_v26  ;;  %v5028_v60 = vsel %vm5026_vm10, %v4975_v39, %v4977_v26  ;;  %v11519_v26 = vmax.f32 %v10549_v12, 0.0 }
 0x74b   : > { %v5071_v42 = vmax.f32 %v4916_v63, %v5028_v60  ;;  %v11521_v60 = vmax.f32 %v10569_v21, 0.0 }
 0x74c   : > { %6549 = vmatmul.msk.f32.gmra.mxu3 %vm5115_vm9, %v5072_v55 }
 0x74d   : > { %5177 = vmatmul.f32.gmra.mxu2 %v5071_v42 }
 0x751   : > { %v4981_v46 = vpop.permute.xlu0 %4980  ;;  %v4991_v16 = vpop.permute.xlu2 %4990 }
 0x752   : > { %v5029_v29 = vsel %vm5026_vm10, %v4979_v31, %v4981_v46  ;;  %v5074_v52 = vmax.f32 %v4919_v18, %v4981_v46 }
 0x753   : > { %v5073_v24 = vmax.f32 %v4918_v14, %v5029_v29  ;;  %v11522_v29 = vmax.f32 %v10589_v33, 0.0 }
 0x754   : > { %6550 = vmatmul.msk.f32.gmra.mxu3 %vm5115_vm9, %v5074_v52 }
 0x755   : > { %5180 = vmatmul.f32.gmra.mxu2 %v5073_v24 }
 0x759   : > { %v4983_v54 = vpop.permute.xlu1 %4982  ;;  %v4997_v7 = vpop.permute.xlu2 %4996 }
 0x75a   : > { %v5030_v63 = vsel %vm5026_vm10, %v4983_v54, %v4985_v62  ;;  %v5082_v51 = vmax.f32 %v4927_v61, %v4997_v7 }
 0x75b   : > { %v5075_v59 = vmax.f32 %v4920_v13, %v5030_v63 }
 0x75c   : > { %6551 = vmatmul.msk.f32.gmra.mxu3 %vm5115_vm9, %v5076_v2 }
 0x75d   : > { %5183 = vmatmul.f32.gmra.mxu2 %v5075_v59 }
 0x761   : > { %v4989_v36 = vpop.permute.xlu1 %4988  ;;  %v4987_v18 = vpop.permute.xlu0 %4986 }
 0x762   : > { %v5078_v47 = vmax.f32 %v4923_v38, %v4989_v36  ;;  %v5031_v14 = vsel %vm5026_vm10, %v4987_v18, %v4989_v36 }
 0x763   : > { %v5077_v22 = vmax.f32 %v4922_v28, %v5031_v14 }
 0x764   : > { %6552 = vmatmul.msk.f32.gmra.mxu3 %vm5115_vm9, %v5078_v47 }
 0x765   : > { %5186 = vmatmul.f32.gmra.mxu2 %v5077_v22 }
 0x769   : > { %v4993_v53 = vpop.permute.xlu0 %4992  ;;  %v5003_v49 = vpop.permute.xlu2 %5002 }
 0x76a   : > { %v5032_v19 = vsel %vm5026_vm10, %v4991_v16, %v4993_v53  ;;  %v5080_v13 = vmax.f32 %v4925_v0, %v4993_v53 }
 0x76b   : > { %v5079_v20 = vmax.f32 %v4924_v41, %v5032_v19 }
 0x76c   : > { %6553 = vmatmul.msk.f32.gmra.mxu3 %vm5115_vm9, %v5080_v13 }
 0x76d   : > { %5189 = vmatmul.f32.gmra.mxu2 %v5079_v20 }
 0x771   : > { %v4995_v38 = vpop.permute.xlu1 %4994  ;;  %v5009_v35 = vpop.permute.xlu2 %5008 }
 0x772   : > { %v5033_v28 = vsel %vm5026_vm10, %v4995_v38, %v4997_v7 }
 0x773   : > { %v5081_v27 = vmax.f32 %v4926_v23, %v5033_v28 }
 0x774   : > { %6554 = vmatmul.msk.f32.gmra.mxu3 %vm5115_vm9, %v5082_v51 }
 0x775   : > { %5192 = vmatmul.f32.gmra.mxu2 %v5081_v27 }
 0x779   : > { %v5001_v45 = vpop.permute.xlu1 %5000  ;;  %v4999_v0 = vpop.permute.xlu0 %4998 }
 0x77a   : > { %v5084_v8 = vmax.f32 %v4929_v30, %v5001_v45  ;;  %v5034_v41 = vsel %vm5026_vm10, %v4999_v0, %v5001_v45 }
 0x77b   : > { %v5083_v43 = vmax.f32 %v4928_v57, %v5034_v41  ;;  %v5088_v57 = vmax.f32 %v11518_v5, %v5009_v35 }
 0x77c   : > { %6555 = vmatmul.msk.f32.gmra.mxu3 %vm5115_vm9, %v5084_v8 }
 0x77d   : > { %5195 = vmatmul.f32.gmra.mxu2 %v5083_v43 }
 0x781   : > { %v5005_v61 = vpop.permute.xlu0 %5004  ;;  %v5015_v25 = vpop.permute.xlu2 %5014 }
 0x782   : > { %v5035_v9 = vsel %vm5026_vm10, %v5003_v49, %v5005_v61  ;;  %v5086_v23 = vmax.f32 %v4931_v32, %v5005_v61 }
 0x783   : > { %v5085_v37 = vmax.f32 %v4930_v3, %v5035_v9 }
 0x784   : > { %6556 = vmatmul.msk.f32.gmra.mxu3 %vm5115_vm9, %v5086_v23 }
 0x785   : > { %5198 = vmatmul.f32.gmra.mxu2 %v5085_v37 }
 0x789   : > { %v5007_v30 = vpop.permute.xlu1 %5006  ;;  %v5021_v11 = vpop.permute.xlu2 %5020 }
 0x78a   : > { %v5036_v48 = vsel %vm5026_vm10, %v5007_v30, %v5009_v35  ;;  %v5094_v21 = vmax.f32 %v4939_v44, %v5021_v11 }
 0x78b   : > { %v5087_v39 = vmax.f32 %v11519_v26, %v5036_v48 }
 0x78c   : > { %6557 = vmatmul.msk.f32.gmra.mxu3 %vm5115_vm9, %v5088_v57 }
 0x78d   : > { %5201 = vmatmul.f32.gmra.mxu2 %v5087_v39 }
 0x791   : > { %v5013_v50 = vpop.permute.xlu1 %5012  ;;  %v5011_v32 = vpop.permute.xlu0 %5010 }
 0x792   : > { %v5090_v3 = vmax.f32 %v11520_v34, %v5013_v50  ;;  %v5037_v55 = vsel %vm5026_vm10, %v5011_v32, %v5013_v50  ;;  %v5276_v32 = vld [vmem:[#allocation2] sm:$0xff]  ;;  %v5300_v34 = vld [vmem:[#allocation5] sm:$0xff] }
 0x793   : > { %v5089_v42 = vmax.f32 %v11521_v60, %v5037_v55  ;;  %v5361_v55 = vld [vmem:[#allocation5 + $0x8] sm:$0xff]  ;;  %v5334_v60 = vld [vmem:[%s11152_s11 + $0x48] sm:$0xff] }
 0x794   : > { %6558 = vmatmul.msk.f32.gmra.mxu3 %vm5115_vm9, %v5090_v3  ;;  %v5336_v3 = vld [vmem:[#allocation2 + $0x8] sm:$0xff] }
 0x795   : > { %5204 = vmatmul.f32.gmra.mxu2 %v5089_v42  ;;  %v5333_v42 = vld [vmem:[%s11152_s11 + $0x40] sm:$0xff] }
 0x799   : > { %v5017_v31 = vpop.permute.xlu0 %5016 }
 0x79a   : > { %v5038_v12 = vsel %vm5026_vm10, %v5015_v25, %v5017_v31  ;;  %v5092_v46 = vmax.f32 %v4937_v4, %v5017_v31  ;;  %v5332_v25 = vld [vmem:[%s11152_s11 + $0x38] sm:$0xff]  ;;  %v5331_v31 = vld [vmem:[%s11152_s11 + $0x30] sm:$0xff] }
 0x79b   : > { %v5091_v52 = vmax.f32 %v11522_v29, %v5038_v12  ;;  %v5330_v12 = vld [vmem:[%s11152_s11 + $0x28] sm:$0xff]  ;;  %v5328_v29 = vld [vmem:[%s11152_s11 + $0x18] sm:$0xff] }
 0x79c   : > { %6559 = vmatmul.msk.f32.gmra.mxu3 %vm5115_vm9, %v5092_v46  ;;  %v5329_v46 = vld [vmem:[%s11152_s11 + $0x20] sm:$0xff] }
 0x79d   : > { %5207 = vmatmul.f32.gmra.mxu2 %v5091_v52  ;;  %v5327_v52 = vld [vmem:[%s11152_s11 + $0x10] sm:$0xff] }
 0x7a1   : > { %v5019_v24 = vpop.permute.xlu1 %5018 }
 0x7a2   : > { %v5039_v62 = vsel %vm5026_vm10, %v5019_v24, %v5021_v11  ;;  %v5326_v11 = vld [vmem:[%s11152_s11 + $0x8] sm:$0xff]  ;;  %v5325_v24 = vld [vmem:[%s11152_s11] sm:$0xff] }
 0x7a3   : > { %v5093_v54 = vmax.f32 %v4938_v58, %v5039_v62  ;;  %v6574_v62 = vld [vmem:[%s11152_s11 + $0x90] sm:$0xff] }
 0x7a4   : > { %6560 = vmatmul.msk.f32.gmra.mxu3 %vm5115_vm9, %v5094_v21  ;;  %v6575_v21 = vld [vmem:[%s11152_s11 + $0x98] sm:$0xff] }
 0x7a5   : > { %5210 = vmatmul.f32.gmra.mxu2 %v5093_v54  ;;  %v5470_v54 = vld [vmem:[#allocation5 + $0x10] sm:$0xff] }
 0x7a9   : > { %v5025_v15 = vpop.permute.xlu1 %5024  ;;  %v5023_v4 = vpop.permute.xlu0 %5022 }
 0x7aa   : > { %v5096_v33 = vmax.f32 %v4941_v17, %v5025_v15  ;;  %v5040_v2 = vsel %vm5026_vm10, %v5023_v4, %v5025_v15  ;;  %v5445_v15 = vld [vmem:[#allocation2 + $0x10] sm:$0xff]  ;;  %v6573_v4 = vld [vmem:[%s11152_s11 + $0x88] sm:$0xff] }
 0x7ab   : > { %v5095_v63 = vmax.f32 %v4940_v56, %v5040_v2  ;;  %v6571_v2 = vld [vmem:[%s11152_s11 + $0x78] sm:$0xff] }
 0x7ac   : > { %6561 = vmatmul.msk.f32.gmra.mxu3 %vm5115_vm9, %v5096_v33  ;;  %v6572_v33 = vld [vmem:[%s11152_s11 + $0x80] sm:$0xff] }
 0x7ad   : > { %5213 = vmatmul.f32.gmra.mxu2 %v5095_v63  ;;  %v6570_v63 = vld [vmem:[%s11152_s11 + $0x70] sm:$0xff] }
 0x7af   : > { %v5234_v10 = vpop.f32.mrf.mxu3 }
 0x7c8   : > { %v5175_v44 = vpop.f32.mrf.mxu2 }
 0x7c9   : > { %v10720_v40 = vadd.f32 %v5234_v10, %v5175_v44  ;;  %v6569_v10 = vld [vmem:[%s11152_s11 + $0x68] sm:$0xff]  ;;  %v6568_v44 = vld [vmem:[%s11152_s11 + $0x60] sm:$0xff] }
 0x7cf   : > { %v5237_v58 = vpop.f32.mrf.mxu3 }
 0x7d0   : > { %v5178_v59 = vpop.f32.mrf.mxu2 }
 0x7d1   : > { %v10722_v36 = vadd.f32 %v5237_v58, %v5178_v59  ;;  %v6567_v58 = vld [vmem:[%s11152_s11 + $0x58] sm:$0xff]  ;;  %v6566_v59 = vld [vmem:[%s11152_s11 + $0x50] sm:$0xff] }
 0x7d7   : > { %v5240_v18 = vpop.f32.mrf.mxu3 }
 0x7d8   : > { %v5181_v47 = vpop.f32.mrf.mxu2 }
 0x7d9   : > { %v10724_v6 = vadd.f32 %v5240_v18, %v5181_v47  ;;  %v6589_v18 = vld [vmem:[%s11152_s11 + $0xe8] sm:$0xff]  ;;  %v6588_v47 = vld [vmem:[%s11152_s11 + $0xe0] sm:$0xff] }
 0x7df   : > { %v5243_v17 = vpop.f32.mrf.mxu3 }
 0x7e0   : > { %v5184_v14 = vpop.f32.mrf.mxu2 }
 0x7e1   : > { %v10726_v22 = vadd.f32 %v5243_v17, %v5184_v14  ;;  %v6587_v17 = vld [vmem:[%s11152_s11 + $0xd8] sm:$0xff]  ;;  %v6586_v14 = vld [vmem:[%s11152_s11 + $0xd0] sm:$0xff] }
 0x7e7   : > { %v5246_v1 = vpop.f32.mrf.mxu3 }
 0x7e8   : > { %v5187_v56 = vpop.f32.mrf.mxu2 }
 0x7e9   : > { %v10728_v16 = vadd.f32 %v5246_v1, %v5187_v56  ;;  %v6585_v1 = vld [vmem:[%s11152_s11 + $0xc8] sm:$0xff]  ;;  %v6584_v56 = vld [vmem:[%s11152_s11 + $0xc0] sm:$0xff] }
 0x7ef   : > { %v5249_v53 = vpop.f32.mrf.mxu3 }
 0x7f0   : > { %v5190_v19 = vpop.f32.mrf.mxu2 }
 0x7f1   : > { %v10730_v13 = vadd.f32 %v5249_v53, %v5190_v19  ;;  %v6583_v53 = vld [vmem:[%s11152_s11 + $0xb8] sm:$0xff]  ;;  %v6582_v19 = vld [vmem:[%s11152_s11 + $0xb0] sm:$0xff] }
 0x7f7   : > { %v5252_v20 = vpop.f32.mrf.mxu3 }
 0x7f8   : > { %v5193_v7 = vpop.f32.mrf.mxu2 }
 0x7f9   : > { %v10732_v38 = vadd.f32 %v5252_v20, %v5193_v7  ;;  %v6581_v20 = vld [vmem:[%s11152_s11 + $0xa8] sm:$0xff]  ;;  %v6580_v7 = vld [vmem:[%s11152_s11 + $0xa0] sm:$0xff] }
 0x7ff   : > { %v5255_v51 = vpop.f32.mrf.mxu3 }
 0x800   : > { %v5196_v28 = vpop.f32.mrf.mxu2 }
 0x801   : > { %v10766_v50 = vadd.f32 %v5255_v51, %v5196_v28  ;;  %v5556_v51 = vld [vmem:[#allocation5 + $0x18] sm:$0xff] }
 0x807   : > { %v5258_v27 = vpop.f32.mrf.mxu3 }
 0x808   : > { %v5199_v45 = vpop.f32.mrf.mxu2 }
 0x809   : > { %v10760_v39 = vadd.f32 %v5258_v27, %v5199_v45 }
 0x80f   : > { %v5261_v0 = vpop.f32.mrf.mxu3 }
 0x810   : > { %v5202_v8 = vpop.f32.mrf.mxu2 }
 0x811   : > { %v10754_v26 = vadd.f32 %v5261_v0, %v5202_v8 }
 0x817   : > { %v5264_v41 = vpop.f32.mrf.mxu3 }
 0x818   : > { %v5205_v43 = vpop.f32.mrf.mxu2 }
 0x819   : > { %v10748_v48 = vadd.f32 %v5264_v41, %v5205_v43  ;;  %v5531_v43 = vld [vmem:[#allocation2 + $0x18] sm:$0xff] }
 0x81f   : > { %v5267_v49 = vpop.f32.mrf.mxu3 }
 0x820   : > { %v5208_v61 = vpop.f32.mrf.mxu2 }
 0x821   : > { %v10742_v57 = vadd.f32 %v5267_v49, %v5208_v61  ;;  %v6602_v49 = vld [vmem:[%s11152_s11 + $0x138] sm:$0xff]  ;;  %v6601_v61 = vld [vmem:[%s11152_s11 + $0x130] sm:$0xff] }
 0x827   : > { %v5270_v9 = vpop.f32.mrf.mxu3 }
 0x828   : > { %v5211_v23 = vpop.f32.mrf.mxu2 }
 0x829   : > { %v10736_v5 = vadd.f32 %v5270_v9, %v5211_v23  ;;  %v6600_v9 = vld [vmem:[%s11152_s11 + $0x128] sm:$0xff]  ;;  %v6599_v23 = vld [vmem:[%s11152_s11 + $0x120] sm:$0xff] }
 0x82f   : > { %v5273_v37 = vpop.f32.mrf.mxu3 }
 0x830   : > { %v5214_v35 = vpop.f32.mrf.mxu2 }
 0x831   : > { %v10734_v30 = vadd.f32 %v5273_v37, %v5214_v35  ;;  %v6598_v37 = vld [vmem:[%s11152_s11 + $0x118] sm:$0xff]  ;;  %v6597_v35 = vld [vmem:[%s11152_s11 + $0x110] sm:$0xff] }
 0x833   : > { %5282 = vmatpush.msrb.mxu0 %v10734_v30  ;;  %5306 = vmatpush.msrb.mxu1 %v10734_v30 }
 0x834   : > { %5342 = vmatpush.msrb.mxu2 %v10734_v30  ;;  %5367 = vmatpush.msra.mxu3 %v10734_v30 }
 0x835   : > { %5283 = vmatpush.msrb.mxu0 %v10736_v5  ;;  %5307 = vmatpush.msrb.mxu1 %v10736_v5 }
 0x836   : > { %5343 = vmatpush.msrb.mxu2 %v10736_v5  ;;  %5368 = vmatpush.msra.mxu3 %v10736_v5 }
 0x837   : > { %5284 = vmatpush.msrb.mxu0 %v10742_v57  ;;  %5308 = vmatpush.msrb.mxu1 %v10742_v57 }
 0x838   : > { %5344 = vmatpush.msrb.mxu2 %v10742_v57  ;;  %5369 = vmatpush.msra.mxu3 %v10742_v57 }
 0x839   : > { %5285 = vmatpush.msrb.mxu0 %v10748_v48  ;;  %5309 = vmatpush.msrb.mxu1 %v10748_v48 }
 0x83a   : > { %5345 = vmatpush.msrb.mxu2 %v10748_v48  ;;  %5370 = vmatpush.msra.mxu3 %v10748_v48 }
 0x83b   : > { %5286 = vmatpush.msrb.mxu0 %v10754_v26  ;;  %5310 = vmatpush.msrb.mxu1 %v10754_v26 }
 0x83c   : > { %5346 = vmatpush.msrb.mxu2 %v10754_v26  ;;  %5371 = vmatpush.msra.mxu3 %v10754_v26 }
 0x83d   : > { %5287 = vmatpush.msrb.mxu0 %v10760_v39  ;;  %5311 = vmatpush.msrb.mxu1 %v10760_v39 }
 0x83e   : > { %5347 = vmatpush.msrb.mxu2 %v10760_v39  ;;  %5372 = vmatpush.msra.mxu3 %v10760_v39 }
 0x83f   : > { %5288 = vmatpush.msrb.mxu0 %v10766_v50  ;;  %5312 = vmatpush.msrb.mxu1 %v10766_v50 }
 0x840   : > { %5348 = vmatpush.msrb.mxu2 %v10766_v50  ;;  %5373 = vmatpush.msra.mxu3 %v10766_v50 }
 0x841   : > { %5289 = vmatpush.msrb.mxu0 %v10732_v38  ;;  %5313 = vmatpush.msrb.mxu1 %v10732_v38 }
 0x842   : > { %5349 = vmatpush.msrb.mxu2 %v10732_v38  ;;  %5374 = vmatpush.msra.mxu3 %v10732_v38 }
 0x843   : > { %5290 = vmatpush.msrb.mxu0 %v10730_v13  ;;  %5314 = vmatpush.msrb.mxu1 %v10730_v13 }
 0x844   : > { %5350 = vmatpush.msrb.mxu2 %v10730_v13  ;;  %5375 = vmatpush.msra.mxu3 %v10730_v13 }
 0x845   : > { %5291 = vmatpush.msrb.mxu0 %v10728_v16  ;;  %5315 = vmatpush.msrb.mxu1 %v10728_v16 }
 0x846   : > { %5351 = vmatpush.msrb.mxu2 %v10728_v16  ;;  %5376 = vmatpush.msra.mxu3 %v10728_v16 }
 0x847   : > { %5292 = vmatpush.msrb.mxu0 %v10726_v22  ;;  %5316 = vmatpush.msrb.mxu1 %v10726_v22 }
 0x848   : > { %5352 = vmatpush.msrb.mxu2 %v10726_v22  ;;  %5377 = vmatpush.msra.mxu3 %v10726_v22 }
 0x849   : > { %5293 = vmatpush.msrb.mxu0 %v10724_v6  ;;  %5317 = vmatpush.msrb.mxu1 %v10724_v6 }
 0x84a   : > { %5353 = vmatpush.msrb.mxu2 %v10724_v6  ;;  %5378 = vmatpush.msra.mxu3 %v10724_v6 }
 0x84b   : > { %5294 = vmatpush.msrb.mxu0 %v10722_v36  ;;  %5318 = vmatpush.msrb.mxu1 %v10722_v36 }
 0x84c   : > { %5354 = vmatpush.msrb.mxu2 %v10722_v36  ;;  %5379 = vmatpush.msra.mxu3 %v10722_v36 }
 0x84d   : > { %5295 = vmatpush.msrb.mxu0 %v10720_v40  ;;  %5319 = vmatpush.msrb.mxu1 %v10720_v40 }
 0x84e   : > { %5355 = vmatpush.msrb.mxu2 %v10720_v40  ;;  %5380 = vmatpush.msra.mxu3 %v10720_v40 }
 0x84f   : > { %6562 = vmatmul.msk.f32.vlgmr.msrb.gmra.mxu0 %vm5026_vm10, %v5276_v32  ;;  %6563 = vmatmul.msk.f32.vlgmr.msrb.gmra.mxu1 %vm5026_vm10, %v5300_v34  ;;  %v6611_v32 = vld [vmem:[%s11152_s11 + $0x168] sm:$0xff] }
 0x850   : > { %6564 = vmatmul.msk.f32.vlgmr.msrb.gmra.mxu2 %vm5026_vm10, %v5336_v3  ;;  %6565 = vmatmul.msk.f32.vlgmr.msra.gmra.mxu3 %vm5026_vm10, %v5361_v55  ;;  %v6610_v3 = vld [vmem:[%s11152_s11 + $0x160] sm:$0xff]  ;;  %v6609_v55 = vld [vmem:[%s11152_s11 + $0x158] sm:$0xff] }
 0x851   : > { %5430 = vmatpush.msra.mxu1 %v5334_v60  ;;  %5451 = vmatpush.msra.mxu2 %v10734_v30 }
 0x852   : > { %5476 = vmatpush.msrb.mxu3 %v10734_v30  ;;  %5407 = vmatpush.msra.mxu0 %v6575_v21  ;;  %v5719_v21 = vld [vmem:[%s11154_s13 + $0x58] sm:$0xff] }
 0x853   : > { %5431 = vmatpush.msra.mxu1 %v5333_v42  ;;  %5452 = vmatpush.msra.mxu2 %v10736_v5 }
 0x854   : > { %5477 = vmatpush.msrb.mxu3 %v10736_v5  ;;  %5408 = vmatpush.msra.mxu0 %v6574_v62  ;;  %v5718_v62 = vld [vmem:[%s11154_s13 + $0x50] sm:$0xff] }
 0x855   : > { %5432 = vmatpush.msra.mxu1 %v5332_v25  ;;  %5453 = vmatpush.msra.mxu2 %v10742_v57 }
 0x856   : > { %5478 = vmatpush.msrb.mxu3 %v10742_v57  ;;  %5409 = vmatpush.msra.mxu0 %v6573_v4 }
 0x857   : > { %5433 = vmatpush.msra.mxu1 %v5331_v31  ;;  %5454 = vmatpush.msra.mxu2 %v10748_v48 }
 0x858   : > { %5479 = vmatpush.msrb.mxu3 %v10748_v48  ;;  %5410 = vmatpush.msra.mxu0 %v6572_v33 }
 0x859   : > { %5434 = vmatpush.msra.mxu1 %v5330_v12  ;;  %5455 = vmatpush.msra.mxu2 %v10754_v26  ;;  %v6608_v12 = vld [vmem:[%s11152_s11 + $0x150] sm:$0xff] }
 0x85a   : > { %5480 = vmatpush.msrb.mxu3 %v10754_v26  ;;  %5411 = vmatpush.msra.mxu0 %v6571_v2 }
 0x85b   : > { %5435 = vmatpush.msra.mxu1 %v5329_v46  ;;  %5456 = vmatpush.msra.mxu2 %v10760_v39  ;;  %v6607_v46 = vld [vmem:[%s11152_s11 + $0x148] sm:$0xff] }
 0x85c   : > { %5481 = vmatpush.msrb.mxu3 %v10760_v39  ;;  %5412 = vmatpush.msra.mxu0 %v6570_v63 }
 0x85d   : > { %5436 = vmatpush.msra.mxu1 %v5328_v29  ;;  %5457 = vmatpush.msra.mxu2 %v10766_v50  ;;  %v6606_v29 = vld [vmem:[%s11152_s11 + $0x140] sm:$0xff] }
 0x85e   : > { %5482 = vmatpush.msrb.mxu3 %v10766_v50  ;;  %5413 = vmatpush.msra.mxu0 %v6569_v10 }
 0x85f   : > { %5437 = vmatpush.msra.mxu1 %v5327_v52  ;;  %5458 = vmatpush.msra.mxu2 %v10732_v38  ;;  %v5722_v52 = vld [vmem:[%s11154_s13 + $0x70] sm:$0xff] }
 0x860   : > { %5483 = vmatpush.msrb.mxu3 %v10732_v38  ;;  %5414 = vmatpush.msra.mxu0 %v6568_v44  ;;  %v5715_v44 = vld [vmem:[%s11154_s13 + $0x38] sm:$0xff] }
 0x861   : > { %5438 = vmatpush.msra.mxu1 %v5326_v11  ;;  %5459 = vmatpush.msra.mxu2 %v10730_v13  ;;  %v5721_v11 = vld [vmem:[%s11154_s13 + $0x68] sm:$0xff] }
 0x862   : > { %5484 = vmatpush.msrb.mxu3 %v10730_v13  ;;  %5415 = vmatpush.msra.mxu0 %v6567_v58  ;;  %v5714_v58 = vld [vmem:[%s11154_s13 + $0x30] sm:$0xff] }
 0x863   : > { %5439 = vmatpush.msra.mxu1 %v5325_v24  ;;  %5460 = vmatpush.msra.mxu2 %v10728_v16  ;;  %v5720_v24 = vld [vmem:[%s11154_s13 + $0x60] sm:$0xff] }
 0x864   : > { %5485 = vmatpush.msrb.mxu3 %v10728_v16  ;;  %5416 = vmatpush.msra.mxu0 %v6566_v59  ;;  %v5713_v59 = vld [vmem:[%s11154_s13 + $0x28] sm:$0xff] }
 0x865   : > { %5537 = vmatpush.msrb.mxu1 %v10734_v30  ;;  %5461 = vmatpush.msra.mxu2 %v10726_v22 }
 0x866   : > { %5486 = vmatpush.msrb.mxu3 %v10726_v22  ;;  %5515 = vmatpush.msrb.mxu0 %v6589_v18  ;;  %v5712_v18 = vld [vmem:[%s11154_s13 + $0x20] sm:$0xff] }
 0x867   : > { %5538 = vmatpush.msrb.mxu1 %v10736_v5  ;;  %5462 = vmatpush.msra.mxu2 %v10724_v6 }
 0x868   : > { %5487 = vmatpush.msrb.mxu3 %v10724_v6  ;;  %5516 = vmatpush.msrb.mxu0 %v6588_v47  ;;  %v5711_v47 = vld [vmem:[%s11154_s13 + $0x18] sm:$0xff] }
 0x869   : > { %5539 = vmatpush.msrb.mxu1 %v10742_v57  ;;  %5463 = vmatpush.msra.mxu2 %v10722_v36 }
 0x86a   : > { %5488 = vmatpush.msrb.mxu3 %v10722_v36  ;;  %5517 = vmatpush.msrb.mxu0 %v6587_v17  ;;  %v5710_v17 = vld [vmem:[%s11154_s13 + $0x10] sm:$0xff] }
 0x86b   : > { %5540 = vmatpush.msrb.mxu1 %v10748_v48  ;;  %5464 = vmatpush.msra.mxu2 %v10720_v40 }
 0x86c   : > { %5489 = vmatpush.msrb.mxu3 %v10720_v40  ;;  %6578 = vmatmul.msk.f32.vlgmr.msra.gmra.mxu2 %vm5026_vm10, %v5445_v15  ;;  %v5716_v15 = vld [vmem:[%s11154_s13 + $0x40] sm:$0xff] }
 0x86d   : > { %5541 = vmatpush.msrb.mxu1 %v10754_v26  ;;  %5562 = vmatpush.msrb.mxu2 %v10734_v30 }
 0x86e   : > { %6579 = vmatmul.msk.f32.vlgmr.msrb.gmra.mxu3 %vm5026_vm10, %v5470_v54  ;;  %5518 = vmatpush.msrb.mxu0 %v6586_v14  ;;  %v5717_v54 = vld [vmem:[%s11154_s13 + $0x48] sm:$0xff] }
 0x86f   : > { %5542 = vmatpush.msrb.mxu1 %v10760_v39  ;;  %5563 = vmatpush.msrb.mxu2 %v10736_v5  ;;  %v5709_v14 = vld [vmem:[%s11154_s13 + $0x8] sm:$0xff] }
 0x870   : > { %5519 = vmatpush.msrb.mxu0 %v6585_v1  ;;  %5601 = vmatpush.msra.mxu3 %v6602_v49  ;;  %v5708_v1 = vld [vmem:[%s11154_s13] sm:$0xff] }
 0x871   : > { %5543 = vmatpush.msrb.mxu1 %v10766_v50  ;;  %5564 = vmatpush.msrb.mxu2 %v10742_v57 }
 0x872   : > { %5520 = vmatpush.msrb.mxu0 %v6584_v56  ;;  %5602 = vmatpush.msra.mxu3 %v6601_v61  ;;  %v5762_v56 = vld [vmem:[#allocation8 + $0x50] sm:$0xf] }
 0x873   : > { %5544 = vmatpush.msrb.mxu1 %v10732_v38  ;;  %5565 = vmatpush.msrb.mxu2 %v10748_v48 }
 0x874   : > { %5521 = vmatpush.msrb.mxu0 %v6583_v53  ;;  %5603 = vmatpush.msra.mxu3 %v6600_v9  ;;  %v5761_v53 = vld [vmem:[#allocation8 + $0x48] sm:$0xff]  ;;  %v5754_v9 = vld [vmem:[#allocation8 + $0x10] sm:$0xff] }
 0x875   : > { %5545 = vmatpush.msrb.mxu1 %v10730_v13  ;;  %5566 = vmatpush.msrb.mxu2 %v10754_v26 }
 0x876   : > { %5522 = vmatpush.msrb.mxu0 %v6582_v19  ;;  %5604 = vmatpush.msra.mxu3 %v6599_v23  ;;  %v5760_v19 = vld [vmem:[#allocation8 + $0x40] sm:$0xff]  ;;  %v5753_v23 = vld [vmem:[#allocation8 + $0x8] sm:$0xff] }
 0x877   : > { %5546 = vmatpush.msrb.mxu1 %v10728_v16  ;;  %5567 = vmatpush.msrb.mxu2 %v10760_v39 }
 0x878   : > { %5523 = vmatpush.msrb.mxu0 %v6581_v20  ;;  %5605 = vmatpush.msra.mxu3 %v6598_v37  ;;  %v5759_v20 = vld [vmem:[#allocation8 + $0x38] sm:$0xff]  ;;  %v5752_v37 = vld [vmem:[#allocation8] sm:$0xff] }
 0x879   : > { %5547 = vmatpush.msrb.mxu1 %v10726_v22  ;;  %5568 = vmatpush.msrb.mxu2 %v10766_v50 }
 0x87a   : > { %5524 = vmatpush.msrb.mxu0 %v6580_v7  ;;  %5606 = vmatpush.msra.mxu3 %v6597_v35  ;;  %v5758_v7 = vld [vmem:[#allocation8 + $0x30] sm:$0xff]  ;;  %v6714_v35 = vld [vmem:[%s11155_s14] ss:$0 sm:$0xff] }
 0x87b   : > { %5548 = vmatpush.msrb.mxu1 %v10724_v6  ;;  %5569 = vmatpush.msrb.mxu2 %v10732_v38 }
 0x87d   : > { %5549 = vmatpush.msrb.mxu1 %v10722_v36  ;;  %5570 = vmatpush.msrb.mxu2 %v10730_v13 }
 0x87f   : > { %5550 = vmatpush.msrb.mxu1 %v10720_v40  ;;  %5571 = vmatpush.msrb.mxu2 %v10728_v16 }
 0x881   : > { %5572 = vmatpush.msrb.mxu2 %v10726_v22 }
 0x883   : > { %5573 = vmatpush.msrb.mxu2 %v10724_v6 }
 0x885   : > { %5574 = vmatpush.msrb.mxu2 %v10722_v36 }
 0x887   : > { %5575 = vmatpush.msrb.mxu2 %v10720_v40 }
 0x888   : > { %6592 = vmatmul.msk.f32.vlgmr.msrb.gmra.mxu2 %vm5026_vm10, %v5556_v51  ;;  %v5757_v51 = vld [vmem:[#allocation8 + $0x28] sm:$0xff] }
 0x889   : > { %5732 = vmatpush.msra.mxu2 %v5722_v52 }
 0x88b   : > { %5733 = vmatpush.msra.mxu2 %v5721_v11 }
 0x88d   : > { %5734 = vmatpush.msra.mxu2 %v5720_v24 }
 0x88f   : > { %5735 = vmatpush.msra.mxu2 %v5719_v21 }
 0x891   : > { %5736 = vmatpush.msra.mxu2 %v5718_v62 }
 0x893   : > { %5737 = vmatpush.msra.mxu2 %v5717_v54 }
 0x895   : > { %5738 = vmatpush.msra.mxu2 %v5716_v15 }
 0x897   : > { %5739 = vmatpush.msra.mxu2 %v5715_v44 }
 0x899   : > { %5740 = vmatpush.msra.mxu2 %v5714_v58 }
 0x89b   : > { %5741 = vmatpush.msra.mxu2 %v5713_v59 }
 0x89d   : > { %5742 = vmatpush.msra.mxu2 %v5712_v18 }
 0x89f   : > { %5743 = vmatpush.msra.mxu2 %v5711_v47 }
 0x8a1   : > { %5744 = vmatpush.msra.mxu2 %v5710_v17 }
 0x8a3   : > { %5745 = vmatpush.msra.mxu2 %v5709_v14 }
 0x8a5   : > { %5746 = vmatpush.msra.mxu2 %v5708_v1 }
 0x8cc   : > { %v5297_v28 = vpop.f32.mrf.mxu0  ;;  %v5321_v27 = vpop.f32.mrf.mxu1 }
 0x8cd   : > { %v5324_v45 = vmax.f32 %v5297_v28, %v5321_v27  ;;  %v5756_v28 = vld [vmem:[#allocation8 + $0x20] sm:$0xff]  ;;  %v5755_v27 = vld [vmem:[#allocation8 + $0x18] sm:$0xff] }
 0x8cf   : > { %6577 = vmatmul.msk.f32.vlgmr.msra.gmra.mxu1 %vm5397_vm11, %v5324_v45 }
 0x8d0   : > { %5648 = vmatpush.msra.mxu1 %v10734_v30 }
 0x8d2   : > { %5649 = vmatpush.msra.mxu1 %v10736_v5 }
 0x8d3   : > { %v5357_v0 = vpop.f32.mrf.mxu2  ;;  %v5382_v8 = vpop.f32.mrf.mxu3 }
 0x8d4   : > { %v5385_v41 = vmax.f32 %v5357_v0, %v5382_v8  ;;  %5650 = vmatpush.msra.mxu1 %v10742_v57  ;;  %v6713_v8 = vld [vmem:[%s11153_s12] ss:$0 sm:$0xff] }
 0x8d6   : > { %6576 = vmatmul.msk.f32.vlgmr.msra.gmra.mxu0 %vm5397_vm11, %v5385_v41  ;;  %5651 = vmatpush.msra.mxu1 %v10748_v48 }
 0x8d7   : > { %5623 = vmatpush.msra.mxu0 %v10734_v30  ;;  %6591 = vmatmul.msk.f32.vlgmr.msrb.gmra.mxu1 %vm5026_vm10, %v5531_v43  ;;  %v6596_v30 = vld [vmem:[%s11152_s11 + $0x108] sm:$0xff] }
 0x8d8   : > { %5652 = vmatpush.msra.mxu1 %v10754_v26  ;;  %5607 = vmatpush.msra.mxu3 %v6596_v30 }
 0x8d9   : > { %5624 = vmatpush.msra.mxu0 %v10736_v5  ;;  %v5642_v5 = vld [vmem:[#allocation5 + $0x20] sm:$0xff] }
 0x8da   : > { %5653 = vmatpush.msra.mxu1 %v10760_v39 }
 0x8db   : > { %5625 = vmatpush.msra.mxu0 %v10742_v57 }
 0x8dc   : > { %5654 = vmatpush.msra.mxu1 %v10766_v50 }
 0x8dd   : > { %5626 = vmatpush.msra.mxu0 %v10748_v48 }
 0x8de   : > { %5655 = vmatpush.msra.mxu1 %v10732_v38 }
 0x8df   : > { %5627 = vmatpush.msra.mxu0 %v10754_v26  ;;  %v5617_v26 = vld [vmem:[#allocation2 + $0x20] sm:$0xff] }
 0x8e0   : > { %5656 = vmatpush.msra.mxu1 %v10730_v13 }
 0x8e1   : > { %5628 = vmatpush.msra.mxu0 %v10760_v39  ;;  %v6614_v39 = vld [vmem:[%s11152_s11 + $0x180] sm:$0xff] }
 0x8e2   : > { %5657 = vmatpush.msra.mxu1 %v10728_v16 }
 0x8e3   : > { %5629 = vmatpush.msra.mxu0 %v10766_v50 }
 0x8e4   : > { %5658 = vmatpush.msra.mxu1 %v10726_v22 }
 0x8e5   : > { %5630 = vmatpush.msra.mxu0 %v10732_v38  ;;  %v6595_v38 = vld [vmem:[%s11152_s11 + $0x100] sm:$0xff] }
 0x8e6   : > { %5659 = vmatpush.msra.mxu1 %v10724_v6  ;;  %5608 = vmatpush.msra.mxu3 %v6595_v38 }
 0x8e7   : > { %5631 = vmatpush.msra.mxu0 %v10730_v13  ;;  %v6594_v13 = vld [vmem:[%s11152_s11 + $0xf8] sm:$0xff] }
 0x8e8   : > { %5660 = vmatpush.msra.mxu1 %v10722_v36  ;;  %5609 = vmatpush.msra.mxu3 %v6594_v13  ;;  %v6715_v13 = vld [vmem:[%s11525_s27] ss:$0 sm:$0xff] }
 0x8e9   : > { %5632 = vmatpush.msra.mxu0 %v10728_v16  ;;  %v6593_v16 = vld [vmem:[%s11152_s11 + $0xf0] sm:$0xff] }
 0x8ea   : > { %5661 = vmatpush.msra.mxu1 %v10720_v40  ;;  %5610 = vmatpush.msra.mxu3 %v6593_v16 }
 0x8eb   : > { %5633 = vmatpush.msra.mxu0 %v10726_v22  ;;  %6605 = vmatmul.msk.f32.vlgmr.msra.gmra.mxu1 %vm5026_vm10, %v5642_v5 }
 0x8ed   : > { %5634 = vmatpush.msra.mxu0 %v10724_v6  ;;  %v6615_v6 = vld [vmem:[%s11152_s11 + $0x188] sm:$0xff] }
 0x8ee   : > { %5687 = vmatpush.msrb.mxu3 %v6615_v6 }
 0x8ef   : > { %5635 = vmatpush.msra.mxu0 %v10722_v36  ;;  %v5466_v22 = vpop.f32.mrf.mxu2  ;;  %v6612_v36 = vld [vmem:[%s11152_s11 + $0x170] sm:$0xff] }
 0x8f0   : > { %5688 = vmatpush.msrb.mxu3 %v6614_v39 }
 0x8f1   : > { %v5491_v57 = vpop.f32.mrf.mxu3  ;;  %5636 = vmatpush.msra.mxu0 %v10720_v40  ;;  %v6613_v40 = vld [vmem:[%s11152_s11 + $0x178] sm:$0xff] }
 0x8f2   : > { %v5494_v48 = vmax.f32 %v5466_v22, %v5491_v57  ;;  %5689 = vmatpush.msrb.mxu3 %v6613_v40 }
 0x8f4   : > { %6590 = vmatmul.msk.f32.vlgmr.msrb.gmra.mxu0 %vm5397_vm11, %v5494_v48  ;;  %5690 = vmatpush.msrb.mxu3 %v6612_v36 }
 0x8f5   : > { %6618 = vmatpush.msk.msrb.mxu0 %vm2212_vm4, %v5762_v56 }
 0x8f6   : > { %5691 = vmatpush.msrb.mxu3 %v6611_v32 }
 0x8f7   : > { %5779 = vmatpush.msrb.mxu0 %v5761_v53 }
 0x8f8   : > { %5692 = vmatpush.msrb.mxu3 %v6610_v3 }
 0x8f9   : > { %5780 = vmatpush.msrb.mxu0 %v5760_v19 }
 0x8fa   : > { %5693 = vmatpush.msrb.mxu3 %v6609_v55 }
 0x8fb   : > { %5781 = vmatpush.msrb.mxu0 %v5759_v20 }
 0x8fc   : > { %6604 = vmatmul.msk.f32.vlgmr.msra.gmra.mxu0 %vm5026_vm10, %v5617_v26  ;;  %5694 = vmatpush.msrb.mxu3 %v6608_v12 }
 0x8fd   : > { %5782 = vmatpush.msrb.mxu0 %v5758_v7 }
 0x8fe   : > { %5695 = vmatpush.msrb.mxu3 %v6607_v46 }
 0x8ff   : > { %5783 = vmatpush.msrb.mxu0 %v5757_v51 }
 0x900   : > { %5696 = vmatpush.msrb.mxu3 %v6606_v29 }
 0x901   : > { %5784 = vmatpush.msrb.mxu0 %v5756_v28 }
 0x903   : > { %5785 = vmatpush.msrb.mxu0 %v5755_v27 }
 0x905   : > { %5786 = vmatpush.msrb.mxu0 %v5754_v9 }
 0x907   : > { %5787 = vmatpush.msrb.mxu0 %v5753_v23 }
 0x909   : > { %5788 = vmatpush.msrb.mxu0 %v5752_v37 }
 0x90b   : > { %v5577_v34 = vpop.f32.mrf.mxu2 }
 0x94c   : > { %v5441_v50 = vpop.f32.mrf.mxu1 }
 0x953   : > { %v5418_v60 = vpop.f32.mrf.mxu0 }
 0x954   : > { %v5442_v42 = vadd.f32 %v5441_v50, %v5418_v60  ;;  %v5552_v25 = vpop.f32.mrf.mxu1 }
 0x955   : > { %v5580_v31 = vmax.f32 %v5552_v25, %v5577_v34 }
 0x957   : > { %6603 = vmatmul.msk.f32.vlgmr.msra.gmra.mxu3 %vm5397_vm11, %v5580_v31 }
 0x968   : > { %v5663_v2 = vpop.f32.mrf.mxu1 }
 0x971   : > { %v5526_v4 = vpop.f32.mrf.mxu0 }
 0x972   : > { %v5529_v33 = vadd.f32 %v5526_v4, %v5442_v42 }
 0x979   : > { %v5638_v63 = vpop.f32.mrf.mxu0 }
 0x97a   : > { %v5666_v10 = vmax.f32 %v5638_v63, %v5663_v2 }
 0x97c   : > { %6616 = vmatmul.msk.f32.vlgmr.msrb.gmra.mxu3 %vm5397_vm11, %v5666_v10 }
 0x9da   : > { %v5612_v45 = vpop.f32.mrf.mxu3 }
 0x9db   : > { %v5615_v0 = vadd.f32 %v5612_v45, %v5529_v33 }
 0x9ff   : > { %v5698_v41 = vpop.f32.mrf.mxu3 }
 0xa00   : > { %v5701_v43 = vadd.f32 %v5698_v41, %v5615_v0 }
 0xa02   : > { %v5706_v49 = vadd.f32 %v6713_v8, %v5701_v43 }
 0xa04   : > { %v5707_v61 = vmax.f32 %v5706_v49, 0.0 }
 0xa06   : > { %6617 = vmatmul.msk.f32.vlgmr.msra.gmra.mxu2 %vm5727_vm12, %v5707_v61 }
 0xa89   : > { %v5748_v30 = vpop.f32.mrf.mxu2 }
 0xa8a   : > { %v5749_v5 = vadd.f32 %v6714_v35, %v5748_v30 }
 0xa8c   : > { %v5751_v38 = vmax.f32 %v5749_v5, 0.0 }
 0xa8e   : > { %6619 = vmatmul.msk.f32.vlgmr.msrb.gmra.mxu0 %vm3879_vm8, %v5751_v38 }
 0xb0b   : > { %v5790_v16 = vpop.f32.mrf.mxu0 }
 0xb0c   : > { %v5791_v57 = vadd.f32 %v6715_v13, %v5790_v16 }
 0xb0e   : > { %5793 = vst [vmem:[%s609_s1] sm:$0xff] %v5791_v57 }
 0xb0f   : > { %6895 = shalt.err (!%p6892_p8)
}
 0xb10   : > { %6644 = dma.vmem_to_hbm [thread:$0]  (%p7081_p5), %s5808_s21, 128, %s5810_s29, %s5795_s22  }
 0xb11 PF: > { %s11526_s23 = sld [smem:[#allocation17_spill]] }
 0xb12   : > { %s11527_s8 = sld [smem:[#allocation15_spill]] }
 0xb17   : > { %p6671_p9 = scmp.ge.s32.totalorder %s11526_s23, 2 }
 0xb18   : > { %s5821_s27 = sand.u32 1, %s11527_s8  }
 0xb19   : > { %p6660_p10 = pnand %p6671_p9, %p7085_p6  ;;  %s5822_s1 = scalar_lea.sflag [#allocation4], %s5821_s27 }
 0xb1b   : > { %p6661_p11 = pneg %p6660_p10 }
 0xb1d   : > { %6925 = dma.done.wait (%p6661_p11), %s5822_s1, 128  }
 0xb1e   : > { %6927 = vsyncadd (%p6661_p11), %s5822_s1, 4294967168  ;;  %s11529_s27 = sld [smem:[#allocation18_spill]]  ;;  %s11532_s24 = smov %s6934_s25 }
 0xb1f   : > { %s11530_s16 = sld [smem:[#allocation16_spill]] }
 0xb20   : > { %s11531_s26 = sld [smem:[#allocation19_spill]] }
 0xb24   : > { %p30_p12 = scmp.ge.s32.totalorder %s11529_s27, 4  }
 0xb25   : > { %s11533_s25 = smov %s11530_s16 }
 0xb26   :  { %32 = sbr.rel (!%p30_p12) target bundleno = 13 (0xd), region = 160 }
 0xb2b   :  { %5828 = vsyncpa [#allocation3], 1 }
 0xb2c   :  { %5830 = vsyncpa [#allocation3 + $0x1], 1 }
 0xb2d   :  { %5831 = vsyncpa [#allocation6], 1 }
 0xb2e   :  { %5832 = vsyncpa [#allocation9], 1 }
 0xb2f   :  { %5833 = vsyncpa [#allocation4], 1 }
 0xb30   :  { %5835 = vsyncpa [#allocation4 + $0x1], 1 }

</bundles_post_ra>
